<compile_context>
chip_gen: v5e
topology: v5e:2x2
jax: 0.10.0
libtpu: 0.0.40
codegen_flags: <defaults>
</compile_context>

<pallas_src>
import functools
import math

import jax
import jax.numpy as jnp
import numpy as np
from jax.experimental import pallas as pl
from jax.experimental.pallas import tpu as pltpu

LN_EPS = 1e-5


def _layernorm(x, gamma, beta):
    mu = jnp.mean(x, axis=-1, keepdims=True)
    xc = x - mu
    var = jnp.mean(xc * xc, axis=-1, keepdims=True)
    return xc * jax.lax.rsqrt(var + LN_EPS) * gamma + beta


def _erf(x):
    # Abramowitz & Stegun 7.1.26, |err| <= 1.5e-7.  Uses only mul/add/div/exp/select,
    # so it lowers on the VPU/EUP without relying on an erf lowering rule.
    p = 0.3275911
    a1, a2, a3, a4, a5 = (0.254829592, -0.284496736, 1.421413741,
                          -1.453152027, 1.061405429)
    ax = jnp.abs(x)
    t = 1.0 / (1.0 + p * ax)
    poly = ((((a5 * t + a4) * t + a3) * t + a2) * t + a1) * t
    y = 1.0 - poly * jnp.exp(-ax * ax)
    return jnp.where(x < 0.0, -y, y)


def _gelu_exact(x):
    # PyTorch nn.GELU() default (erf form), not the tanh approximation.
    return 0.5 * x * (1.0 + _erf(x * 0.7071067811865476))


# ---------------------------------------------------------------------------
# Branch 1: x * res_scale_1 + WMSA(LN1(x))         (type = 'W', no shift/mask)
# Grid = (B, H // window): each step processes one contiguous p-row strip.
# ---------------------------------------------------------------------------
def _wmsa_strip_kernel(x_ref, g_ref, b_ref, wqkv_ref, bqkv_ref, bias_ref,
                       wproj_ref, bproj_ref, s_ref, o_ref,
                       *, win, n_heads, head_dim):
    p = win
    W = x_ref.shape[2]
    C = x_ref.shape[3]
    nw = W // p                      # windows inside this strip
    p2 = p * p
    Tw = p * W                       # tokens inside this strip
    scale = 1.0 / math.sqrt(head_dim)

    x = x_ref[0].reshape(Tw, C).astype(jnp.float32)           # row-major tokens
    xn = _layernorm(x, g_ref[...], b_ref[...])

    # Row-major -> window-major regroup, entirely in VMEM (static sublane slices;
    # no HBM transpose pass).  Row (w2*p2 + p1*p + pj) <- token (p1, w2*p + pj).
    xw = jnp.concatenate(
        [xn[p1 * W + w2 * p: p1 * W + w2 * p + p, :]
         for w2 in range(nw) for p1 in range(p)], axis=0)      # (Tw, C)

    qkv = jnp.dot(xw, wqkv_ref[...],
                  preferred_element_type=jnp.float32) + bqkv_ref[...]   # (Tw, 3C)

    # Stack all (head, window) pairs on ONE batch axis -> a single pair of batched
    # einsums instead of a per-head loop.  Batch index = h*nw + w.
    def head_batch(base):
        return jnp.concatenate(
            [qkv[:, base + h * head_dim: base + (h + 1) * head_dim]
             .reshape(nw, p2, head_dim) for h in range(n_heads)], axis=0)

    q = head_batch(0)                # (n_heads*nw, p2, d)
    k = head_batch(C)
    v = head_batch(2 * C)

    sim = jnp.einsum('bpd,bqd->bpq', q, k,
                     preferred_element_type=jnp.float32) * scale
    sim = sim + bias_ref[...]                                   # relative position bias
    m = jnp.max(sim, axis=-1, keepdims=True)
    e = jnp.exp(sim - m)
    probs = e * pl.reciprocal(jnp.sum(e, axis=-1, keepdims=True), approx=True)
    attn = jnp.einsum('bpq,bqd->bpd', probs, v,
                      preferred_element_type=jnp.float32)       # (n_heads*nw, p2, d)

    # Heads back onto the lane axis, then ONE K=C output-projection matmul
    # (replaces the previous sum of n_heads K=8 matmuls).
    attn = jnp.concatenate([attn[h * nw:(h + 1) * nw] for h in range(n_heads)],
                           axis=-1)                             # (nw, p2, C)
    out = jnp.dot(attn.reshape(Tw, C), wproj_ref[...],
                  preferred_element_type=jnp.float32) + bproj_ref[...]

    # Window-major -> row-major (inverse regroup, in VMEM).
    out = jnp.concatenate(
        [out[w2 * p2 + p1 * p: w2 * p2 + p1 * p + p, :]
         for p1 in range(p) for w2 in range(nw)], axis=0)       # (Tw, C)

    # TODO(synk): type='SW' (cyclic shift + attention mask) not implemented; 'W' only.
    y = x * s_ref[...] + out
    o_ref[0] = y.reshape(p, W, C).astype(o_ref.dtype)


def wmsa_branch(x, params, window_size, head_dim):
    """x: (B, H, W, C) -> x*res_scale_1 + WMSA(LN1(x)), same shape."""
    B, H, W, C = x.shape
    p = window_size
    n_heads = C // head_dim
    nw = W // p
    p2 = p * p

    # relative-position bias table -> (n_heads, p2, p2), repeated per in-strip window
    # so the kernel adds it with the (h*nw + w) batch layout directly.
    coords = np.array([[i, j] for i in range(p) for j in range(p)])
    rel = coords[:, None, :] - coords[None, :, :] + p - 1
    bias = params['rel_pos'][:, rel[:, :, 0], rel[:, :, 1]].astype(jnp.float32)
    bias = jnp.repeat(bias, nw, axis=0)                         # (n_heads*nw, p2, p2)

    row = lambda a: a.reshape(1, -1)
    kernel = functools.partial(_wmsa_strip_kernel, win=p, n_heads=n_heads,
                               head_dim=head_dim)

    return pl.pallas_call(
        kernel,
        out_shape=jax.ShapeDtypeStruct((B, H, W, C), x.dtype),
        grid=(B, H // p),
        in_specs=[
            pl.BlockSpec((1, p, W, C), lambda b, s: (b, s, 0, 0)),
            pl.BlockSpec((1, C), lambda b, s: (0, 0)),
            pl.BlockSpec((1, C), lambda b, s: (0, 0)),
            pl.BlockSpec((C, 3 * C), lambda b, s: (0, 0)),
            pl.BlockSpec((1, 3 * C), lambda b, s: (0, 0)),
            pl.BlockSpec((n_heads * nw, p2, p2), lambda b, s: (0, 0, 0)),
            pl.BlockSpec((C, C), lambda b, s: (0, 0)),
            pl.BlockSpec((1, C), lambda b, s: (0, 0)),
            pl.BlockSpec((1, C), lambda b, s: (0, 0)),
        ],
        out_specs=pl.BlockSpec((1, p, W, C), lambda b, s: (b, s, 0, 0)),
        compiler_params=pltpu.CompilerParams(
            dimension_semantics=("parallel", "parallel")),
    )(x, row(params['ln1_g']), row(params['ln1_b']),
      params['w_qkv'], row(params['b_qkv']), bias,
      params['w_proj'], row(params['b_proj']), row(params['res_scale_1']))


# ---------------------------------------------------------------------------
# Branch 2: x * res_scale_2 + ConvolutionalGLU(LN2(x))
# Grid = (B,): the depthwise 3x3 needs whole rows (halo), so one image per step.
# ---------------------------------------------------------------------------
def _convglu_kernel(x_ref, g_ref, b_ref, w1c_ref, b1c_ref, w1g_ref, b1g_ref,
                    wdw_ref, bdw_ref, w2_ref, b2_ref, s_ref, o_ref, pad_ref,
                    *, width, pad_top):
    T = x_ref.shape[1]                  # H*W tokens, row-major (i*W + j)
    C2 = wdw_ref.shape[1]               # hidden channels (2*C)
    P = pad_top                         # sublane-aligned halo rows on each side

    x = x_ref[0].astype(jnp.float32)                                    # (T, C)
    xn = _layernorm(x, g_ref[...], b_ref[...])

    # fc1 pre-split into conv / gate halves -> no offset-C2 lane extraction.
    xg = jnp.dot(xn, w1c_ref[...],
                 preferred_element_type=jnp.float32) + b1c_ref[...]     # (T, C2)
    gate = jnp.dot(xn, w1g_ref[...],
                   preferred_element_type=jnp.float32) + b1g_ref[...]   # (T, C2)

    # Zero only the small halo rows (never the whole buffer); done every step so the
    # kernel is correct when the parallel batch axis is split across TensorCores.
    pad_ref[:P, :] = jnp.zeros((P, C2), jnp.float32)
    pad_ref[P + T:, :] = jnp.zeros((pad_ref.shape[0] - P - T, C2), jnp.float32)
    pad_ref[P:P + T, :] = xg            # P % 8 == 0 -> aligned bulk store

    # Depthwise 3x3 "SAME" conv on the (H, W) grid in the flattened token layout:
    # tap (di, dj) = static sublane shift by di*W + dj of the zero-padded copy plus a
    # column mask for the horizontal wrap (masks hoisted out of the tap loops).
    col = jax.lax.broadcasted_iota(jnp.int32, (T, 1), 0) % width
    left_edge = col == 0
    right_edge = col == width - 1
    wdw = wdw_ref[...]                                                  # (9, C2)

    acc = jnp.zeros((T, C2), jnp.float32)
    for di in (-1, 0, 1):
        part = None                                  # partial accumulators -> ILP
        for dj in (-1, 0, 1):
            start = P + di * width + dj              # static; +-W taps stay 8-aligned
            tap = pad_ref[start:start + T, :]
            if dj == -1:
                tap = jnp.where(left_edge, 0.0, tap)
            elif dj == 1:
                tap = jnp.where(right_edge, 0.0, tap)
            term = wdw[(di + 1) * 3 + (dj + 1)] * tap
            part = term if part is None else part + term
        acc = acc + part
    acc = acc + bdw_ref[...]

    gated = _gelu_exact(acc) * gate                                     # (T, C2)
    out = jnp.dot(gated, w2_ref[...],
                  preferred_element_type=jnp.float32) + b2_ref[...]     # (T, C)

    o_ref[0] = (x * s_ref[...] + out).astype(o_ref.dtype)


def convglu_branch(x, params):
    """x: (B, H, W, C) -> x*res_scale_2 + ConvGLU(LN2(x)), same shape."""
    B, H, W, C = x.shape
    T = H * W
    C2 = params['w_dw'].shape[-1]        # hidden = 2*C
    P = ((W + 1 + 7) // 8) * 8           # halo rows, rounded up to a sublane multiple
    pad_rows = T + 2 * P

    xt = x.reshape(B, T, C)              # free reshape of NHWC row-major layout
    row = lambda a: a.reshape(1, -1)

    w1c, w1g = params['w_fc1'][:, :C2], params['w_fc1'][:, C2:]
    b1c, b1g = params['b_fc1'][:C2], params['b_fc1'][C2:]

    kernel = functools.partial(_convglu_kernel, width=W, pad_top=P)

    yt = pl.pallas_call(
        kernel,
        out_shape=jax.ShapeDtypeStruct((B, T, C), x.dtype),
        grid=(B,),
        in_specs=[
            pl.BlockSpec((1, T, C), lambda b: (b, 0, 0)),
            pl.BlockSpec((1, C), lambda b: (0, 0)),
            pl.BlockSpec((1, C), lambda b: (0, 0)),
            pl.BlockSpec((C, C2), lambda b: (0, 0)),
            pl.BlockSpec((1, C2), lambda b: (0, 0)),
            pl.BlockSpec((C, C2), lambda b: (0, 0)),
            pl.BlockSpec((1, C2), lambda b: (0, 0)),
            pl.BlockSpec((9, C2), lambda b: (0, 0)),
            pl.BlockSpec((1, C2), lambda b: (0, 0)),
            pl.BlockSpec((C2, C), lambda b: (0, 0)),
            pl.BlockSpec((1, C), lambda b: (0, 0)),
            pl.BlockSpec((1, C), lambda b: (0, 0)),
        ],
        out_specs=pl.BlockSpec((1, T, C), lambda b: (b, 0, 0)),
        scratch_shapes=[pltpu.VMEM((pad_rows, C2), jnp.float32)],
        compiler_params=pltpu.CompilerParams(dimension_semantics=("parallel",)),
    )(xt, row(params['ln2_g']), row(params['ln2_b']),
      w1c, row(b1c), w1g, row(b1g),
      params['w_dw'].reshape(9, C2), row(params['b_dw']),
      params['w_fc2'], row(params['b_fc2']), row(params['res_scale_2']))

    return yt.reshape(B, H, W, C)


def res_scale_convolution_gate_block(x, params, window_size, head_dim):
    # drop_path = 0.0 -> Identity (inference path).
    x = wmsa_branch(x, params, window_size, head_dim)
    x = convglu_branch(x, params)
    return x


# ---------------------------------------------------------------------------
# Pure-JAX reference (mirrors the PyTorch forward, type='W', drop_path=0)
# ---------------------------------------------------------------------------
def reference_forward(x, params, window_size, head_dim):
    B, H, W, C = x.shape
    p = window_size
    n_heads = C // head_dim
    n_win = (H // p) * (W // p)
    p2 = p * p
    C2 = params['w_dw'].shape[-1]
    hp = 'highest'

    def ln(z, g, b):
        mu = jnp.mean(z, -1, keepdims=True)
        zc = z - mu
        var = jnp.mean(zc * zc, -1, keepdims=True)
        return zc * jax.lax.rsqrt(var + LN_EPS) * g + b

    # ---- branch 1: W-MSA ----
    xn = ln(x, params['ln1_g'], params['ln1_b'])
    xw = xn.reshape(B, H // p, p, W // p, p, C).transpose(0, 1, 3, 2, 4, 5)
    xw = xw.reshape(B, n_win, p2, C)
    qkv = jnp.einsum('bwpc,cd->bwpd', xw, params['w_qkv'], precision=hp) + params['b_qkv']
    q = qkv[..., :C].reshape(B, n_win, p2, n_heads, head_dim)
    k = qkv[..., C:2 * C].reshape(B, n_win, p2, n_heads, head_dim)
    v = qkv[..., 2 * C:].reshape(B, n_win, p2, n_heads, head_dim)
    coords = np.array([[i, j] for i in range(p) for j in range(p)])
    rel = coords[:, None, :] - coords[None, :, :] + p - 1
    bias = params['rel_pos'][:, rel[:, :, 0], rel[:, :, 1]]             # (h, p2, p2)
    sim = jnp.einsum('bwphd,bwqhd->bhwpq', q, k, precision=hp) / math.sqrt(head_dim)
    sim = sim + bias[None, :, None, :, :]
    probs = jax.nn.softmax(sim, axis=-1)
    out = jnp.einsum('bhwpq,bwqhd->bwphd', probs, v, precision=hp).reshape(B, n_win, p2, C)
    out = jnp.einsum('bwpc,cd->bwpd', out, params['w_proj'], precision=hp) + params['b_proj']
    out = out.reshape(B, H // p, W // p, p, p, C).transpose(0, 1, 3, 2, 4, 5).reshape(B, H, W, C)
    x = x * params['res_scale_1'] + out

    # ---- branch 2: ConvolutionalGLU ----
    xn = ln(x, params['ln2_g'], params['ln2_b'])
    h1 = jnp.einsum('bhwc,cd->bhwd', xn, params['w_fc1'], precision=hp) + params['b_fc1']
    xg, gate = h1[..., :C2], h1[..., C2:]
    w_hwio = params['w_dw'][:, :, None, :]                              # (3, 3, 1, C2)
    dw = jax.lax.conv_general_dilated(
        xg, w_hwio, (1, 1), 'SAME',
        dimension_numbers=('NHWC', 'HWIO', 'NHWC'),
        feature_group_count=C2, precision=hp) + params['b_dw']
    gated = jax.nn.gelu(dw, approximate=False) * gate                   # exact erf GELU
    out = jnp.einsum('bhwc,cd->bhwd', gated, params['w_fc2'], precision=hp) + params['b_fc2']
    return x * params['res_scale_2'] + out


if __name__ == "__main__":
    B, H, W = 2, 16, 16
    C = 32                    # input_dim
    head_dim = 8              # -> 4 heads
    window_size = 4
    C2 = 2 * C                # ConvolutionalGLU hidden = (4*C) // 2

    key = jax.random.PRNGKey(0)
    ks = jax.random.split(key, 18)

    def lin_init(kw, kb, fan_in, w_shape, b_shape):
        bound = 1.0 / math.sqrt(fan_in)
        w = jax.random.uniform(kw, w_shape, jnp.float32, -bound, bound)
        b = jax.random.uniform(kb, b_shape, jnp.float32, -bound, bound)
        return w, b

    w_qkv, b_qkv = lin_init(ks[0], ks[1], C, (C, 3 * C), (3 * C,))
    w_proj, b_proj = lin_init(ks[2], ks[3], C, (C, C), (C,))
    w_fc1, b_fc1 = lin_init(ks[4], ks[5], C, (C, 2 * C2), (2 * C2,))
    w_fc2, b_fc2 = lin_init(ks[6], ks[7], C2, (C2, C), (C,))
    w_dw = jax.random.uniform(ks[8], (3, 3, C2), jnp.float32, -1.0 / 3, 1.0 / 3)
    b_dw = jax.random.uniform(ks[9], (C2,), jnp.float32, -1.0 / 3, 1.0 / 3)
    rel_pos = 0.02 * jax.random.normal(
        ks[10], (C // head_dim, 2 * window_size - 1, 2 * window_size - 1), jnp.float32)

    params = dict(
        ln1_g=1.0 + 0.1 * jax.random.normal(ks[11], (C,), jnp.float32),
        ln1_b=0.05 * jax.random.normal(ks[12], (C,), jnp.float32),
        ln2_g=1.0 + 0.1 * jax.random.normal(ks[13], (C,), jnp.float32),
        ln2_b=0.05 * jax.random.normal(ks[14], (C,), jnp.float32),
        w_qkv=w_qkv, b_qkv=b_qkv, rel_pos=rel_pos,
        w_proj=w_proj, b_proj=b_proj,
        w_fc1=w_fc1, b_fc1=b_fc1, w_dw=w_dw, b_dw=b_dw,
        w_fc2=w_fc2, b_fc2=b_fc2,
        res_scale_1=1.0 + 0.1 * jax.random.normal(ks[15], (C,), jnp.float32),
        res_scale_2=1.0 + 0.1 * jax.random.normal(ks[16], (C,), jnp.float32),
    )

    x = jax.random.normal(ks[17], (B, H, W, C), jnp.float32)

    fwd = jax.jit(res_scale_convolution_gate_block, static_argnums=(2, 3))
    out = fwd(x, params, window_size, head_dim)
    out = jax.block_until_ready(out)

    ref = reference_forward(x, params, window_size, head_dim)
    ref = jax.block_until_ready(ref)

    # Tolerance covers MXU f32 multi-pass rounding and the approximate (EUP vrcp)
    # softmax reciprocal vs. the highest-precision XLA reference; GELU now matches
    # exactly (erf form), so structural/layout errors would be O(1).
    np.testing.assert_allclose(np.asarray(out), np.asarray(ref), atol=5e-3, rtol=5e-3)
    print("KERNEL_OK")
</pallas_src>

<mosaic_0001>
module attributes {stable_mosaic.version = 11 : i64} {
  func.func @_wmsa_strip_kernel(%arg0: i32, %arg1: i32, %arg2: memref<1x4x16x32xf32, #tpu.memory_space<vmem>>, %arg3: memref<1x32xf32, #tpu.memory_space<vmem>>, %arg4: memref<1x32xf32, #tpu.memory_space<vmem>>, %arg5: memref<32x96xf32, #tpu.memory_space<vmem>>, %arg6: memref<1x96xf32, #tpu.memory_space<vmem>>, %arg7: memref<16x16x16xf32, #tpu.memory_space<vmem>>, %arg8: memref<32x32xf32, #tpu.memory_space<vmem>>, %arg9: memref<1x32xf32, #tpu.memory_space<vmem>>, %arg10: memref<1x32xf32, #tpu.memory_space<vmem>>, %arg11: memref<1x4x16x32xf32, #tpu.memory_space<vmem>>) attributes {dimension_semantics = [#tpu.dimension_semantics<parallel>, #tpu.dimension_semantics<parallel>], iteration_bounds = array<i64: 2, 4>, scalar_prefetch = 0 : i64, scratch_operands = 0 : i64, tpu.core_type = #tpu.core_type<tc>, window_params = [{transform_indices = @transform_0, window_bounds = array<i64: 1, 4, 16, 32>}, {pipeline_mode = #tpu.pipeline_mode<synchronous>, transform_indices = @transform_1, window_bounds = array<i64: 1, 32>}, {pipeline_mode = #tpu.pipeline_mode<synchronous>, transform_indices = @transform_2, window_bounds = array<i64: 1, 32>}, {pipeline_mode = #tpu.pipeline_mode<synchronous>, transform_indices = @transform_3, window_bounds = array<i64: 32, 96>}, {pipeline_mode = #tpu.pipeline_mode<synchronous>, transform_indices = @transform_4, window_bounds = array<i64: 1, 96>}, {pipeline_mode = #tpu.pipeline_mode<synchronous>, transform_indices = @transform_5, window_bounds = array<i64: 16, 16, 16>}, {pipeline_mode = #tpu.pipeline_mode<synchronous>, transform_indices = @transform_6, window_bounds = array<i64: 32, 32>}, {pipeline_mode = #tpu.pipeline_mode<synchronous>, transform_indices = @transform_7, window_bounds = array<i64: 1, 32>}, {pipeline_mode = #tpu.pipeline_mode<synchronous>, transform_indices = @transform_8, window_bounds = array<i64: 1, 32>}, {transform_indices = @transform_9, window_bounds = array<i64: 1, 4, 16, 32>}]} {
    %c0 = arith.constant 0 : index
    %c0_0 = arith.constant 0 : index
    %c0_1 = arith.constant 0 : index
    %c0_2 = arith.constant 0 : index
    %0 = vector.load %arg2[%c0, %c0_0, %c0_1, %c0_2] : memref<1x4x16x32xf32, #tpu.memory_space<vmem>>, vector<1x4x16x32xf32>
    %1 = vector.shape_cast %0 : vector<1x4x16x32xf32> to vector<4x16x32xf32>
    %2 = vector.shape_cast %1 : vector<4x16x32xf32> to vector<64x32xf32>
    %c0_3 = arith.constant 0 : index
    %c0_4 = arith.constant 0 : index
    %3 = vector.load %arg3[%c0_3, %c0_4] : memref<1x32xf32, #tpu.memory_space<vmem>>, vector<1x32xf32>
    %c0_5 = arith.constant 0 : index
    %c0_6 = arith.constant 0 : index
    %4 = vector.load %arg4[%c0_5, %c0_6] : memref<1x32xf32, #tpu.memory_space<vmem>>, vector<1x32xf32>
    %cst = arith.constant dense<0.000000e+00> : vector<64xf32>
    %5 = vector.multi_reduction <add>, %2, %cst [1] : vector<64x32xf32> to vector<64xf32>
    %6 = vector.shape_cast %5 : vector<64xf32> to vector<64x1xf32>
    %cst_7 = arith.constant 3.200000e+01 : f32
    %7 = vector.broadcast %cst_7 : f32 to vector<64x1xf32>
    %8 = arith.divf %6, %7 : vector<64x1xf32>
    %9 = vector.broadcast %8 : vector<64x1xf32> to vector<64x32xf32>
    %10 = arith.subf %2, %9 : vector<64x32xf32>
    %11 = arith.mulf %10, %10 : vector<64x32xf32>
    %cst_8 = arith.constant dense<0.000000e+00> : vector<64xf32>
    %12 = vector.multi_reduction <add>, %11, %cst_8 [1] : vector<64x32xf32> to vector<64xf32>
    %13 = vector.shape_cast %12 : vector<64xf32> to vector<64x1xf32>
    %cst_9 = arith.constant 3.200000e+01 : f32
    %14 = vector.broadcast %cst_9 : f32 to vector<64x1xf32>
    %15 = arith.divf %13, %14 : vector<64x1xf32>
    %cst_10 = arith.constant 9.99999974E-6 : f32
    %16 = vector.broadcast %cst_10 : f32 to vector<64x1xf32>
    %17 = arith.addf %15, %16 : vector<64x1xf32>
    %18 = math.rsqrt %17 : vector<64x1xf32>
    %19 = vector.broadcast %18 : vector<64x1xf32> to vector<64x32xf32>
    %20 = arith.mulf %10, %19 : vector<64x32xf32>
    %21 = vector.broadcast %3 : vector<1x32xf32> to vector<64x32xf32>
    %22 = arith.mulf %20, %21 : vector<64x32xf32>
    %23 = vector.broadcast %4 : vector<1x32xf32> to vector<64x32xf32>
    %24 = arith.addf %22, %23 : vector<64x32xf32>
    %25 = vector.extract_strided_slice %24 {offsets = [0, 0], sizes = [4, 32], strides = [1, 1]} : vector<64x32xf32> to vector<4x32xf32>
    %26 = vector.extract_strided_slice %24 {offsets = [16, 0], sizes = [4, 32], strides = [1, 1]} : vector<64x32xf32> to vector<4x32xf32>
    %27 = vector.extract_strided_slice %24 {offsets = [32, 0], sizes = [4, 32], strides = [1, 1]} : vector<64x32xf32> to vector<4x32xf32>
    %28 = vector.extract_strided_slice %24 {offsets = [48, 0], sizes = [4, 32], strides = [1, 1]} : vector<64x32xf32> to vector<4x32xf32>
    %29 = vector.extract_strided_slice %24 {offsets = [4, 0], sizes = [4, 32], strides = [1, 1]} : vector<64x32xf32> to vector<4x32xf32>
    %30 = vector.extract_strided_slice %24 {offsets = [20, 0], sizes = [4, 32], strides = [1, 1]} : vector<64x32xf32> to vector<4x32xf32>
    %31 = vector.extract_strided_slice %24 {offsets = [36, 0], sizes = [4, 32], strides = [1, 1]} : vector<64x32xf32> to vector<4x32xf32>
    %32 = vector.extract_strided_slice %24 {offsets = [52, 0], sizes = [4, 32], strides = [1, 1]} : vector<64x32xf32> to vector<4x32xf32>
    %33 = vector.extract_strided_slice %24 {offsets = [8, 0], sizes = [4, 32], strides = [1, 1]} : vector<64x32xf32> to vector<4x32xf32>
    %34 = vector.extract_strided_slice %24 {offsets = [24, 0], sizes = [4, 32], strides = [1, 1]} : vector<64x32xf32> to vector<4x32xf32>
    %35 = vector.extract_strided_slice %24 {offsets = [40, 0], sizes = [4, 32], strides = [1, 1]} : vector<64x32xf32> to vector<4x32xf32>
    %36 = vector.extract_strided_slice %24 {offsets = [56, 0], sizes = [4, 32], strides = [1, 1]} : vector<64x32xf32> to vector<4x32xf32>
    %37 = vector.extract_strided_slice %24 {offsets = [12, 0], sizes = [4, 32], strides = [1, 1]} : vector<64x32xf32> to vector<4x32xf32>
    %38 = vector.extract_strided_slice %24 {offsets = [28, 0], sizes = [4, 32], strides = [1, 1]} : vector<64x32xf32> to vector<4x32xf32>
    %39 = vector.extract_strided_slice %24 {offsets = [44, 0], sizes = [4, 32], strides = [1, 1]} : vector<64x32xf32> to vector<4x32xf32>
    %40 = vector.extract_strided_slice %24 {offsets = [60, 0], sizes = [4, 32], strides = [1, 1]} : vector<64x32xf32> to vector<4x32xf32>
    %41 = tpu.concatenate %25, %26, %27, %28, %29, %30, %31, %32, %33, %34, %35, %36, %37, %38, %39, %40 in 0 : vector<4x32xf32>, vector<4x32xf32>, vector<4x32xf32>, vector<4x32xf32>, vector<4x32xf32>, vector<4x32xf32>, vector<4x32xf32>, vector<4x32xf32>, vector<4x32xf32>, vector<4x32xf32>, vector<4x32xf32>, vector<4x32xf32>, vector<4x32xf32>, vector<4x32xf32>, vector<4x32xf32>, vector<4x32xf32> -> vector<64x32xf32>
    %c0_11 = arith.constant 0 : index
    %c0_12 = arith.constant 0 : index
    %42 = vector.load %arg5[%c0_11, %c0_12] : memref<32x96xf32, #tpu.memory_space<vmem>>, vector<32x96xf32>
    %cst_13 = arith.constant dense<0.000000e+00> : vector<64x96xf32>
    %43 = tpu.matmul %41, %42, %cst_13 {dimension_numbers = #tpu.dot_dimension_numbers<[1], [0], [0], [1], [0, 0, 1, 1], [], []>} : vector<64x32xf32>, vector<32x96xf32>, vector<64x96xf32> -> vector<64x96xf32>
    %c0_14 = arith.constant 0 : index
    %c0_15 = arith.constant 0 : index
    %44 = vector.load %arg6[%c0_14, %c0_15] : memref<1x96xf32, #tpu.memory_space<vmem>>, vector<1x96xf32>
    %45 = vector.broadcast %44 : vector<1x96xf32> to vector<64x96xf32>
    %46 = arith.addf %43, %45 : vector<64x96xf32>
    %47 = vector.extract_strided_slice %46 {offsets = [0, 0], sizes = [64, 8], strides = [1, 1]} : vector<64x96xf32> to vector<64x8xf32>
    %48 = vector.shape_cast %47 : vector<64x8xf32> to vector<4x16x8xf32>
    %49 = vector.extract_strided_slice %46 {offsets = [0, 8], sizes = [64, 8], strides = [1, 1]} : vector<64x96xf32> to vector<64x8xf32>
    %50 = vector.shape_cast %49 : vector<64x8xf32> to vector<4x16x8xf32>
    %51 = vector.extract_strided_slice %46 {offsets = [0, 16], sizes = [64, 8], strides = [1, 1]} : vector<64x96xf32> to vector<64x8xf32>
    %52 = vector.shape_cast %51 : vector<64x8xf32> to vector<4x16x8xf32>
    %53 = vector.extract_strided_slice %46 {offsets = [0, 24], sizes = [64, 8], strides = [1, 1]} : vector<64x96xf32> to vector<64x8xf32>
    %54 = vector.shape_cast %53 : vector<64x8xf32> to vector<4x16x8xf32>
    %55 = tpu.concatenate %48, %50, %52, %54 in 0 : vector<4x16x8xf32>, vector<4x16x8xf32>, vector<4x16x8xf32>, vector<4x16x8xf32> -> vector<16x16x8xf32>
    %56 = vector.extract_strided_slice %46 {offsets = [0, 32], sizes = [64, 8], strides = [1, 1]} : vector<64x96xf32> to vector<64x8xf32>
    %57 = vector.shape_cast %56 : vector<64x8xf32> to vector<4x16x8xf32>
    %58 = vector.extract_strided_slice %46 {offsets = [0, 40], sizes = [64, 8], strides = [1, 1]} : vector<64x96xf32> to vector<64x8xf32>
    %59 = vector.shape_cast %58 : vector<64x8xf32> to vector<4x16x8xf32>
    %60 = vector.extract_strided_slice %46 {offsets = [0, 48], sizes = [64, 8], strides = [1, 1]} : vector<64x96xf32> to vector<64x8xf32>
    %61 = vector.shape_cast %60 : vector<64x8xf32> to vector<4x16x8xf32>
    %62 = vector.extract_strided_slice %46 {offsets = [0, 56], sizes = [64, 8], strides = [1, 1]} : vector<64x96xf32> to vector<64x8xf32>
    %63 = vector.shape_cast %62 : vector<64x8xf32> to vector<4x16x8xf32>
    %64 = tpu.concatenate %57, %59, %61, %63 in 0 : vector<4x16x8xf32>, vector<4x16x8xf32>, vector<4x16x8xf32>, vector<4x16x8xf32> -> vector<16x16x8xf32>
    %65 = vector.extract_strided_slice %46 {offsets = [0, 64], sizes = [64, 8], strides = [1, 1]} : vector<64x96xf32> to vector<64x8xf32>
    %66 = vector.shape_cast %65 : vector<64x8xf32> to vector<4x16x8xf32>
    %67 = vector.extract_strided_slice %46 {offsets = [0, 72], sizes = [64, 8], strides = [1, 1]} : vector<64x96xf32> to vector<64x8xf32>
    %68 = vector.shape_cast %67 : vector<64x8xf32> to vector<4x16x8xf32>
    %69 = vector.extract_strided_slice %46 {offsets = [0, 80], sizes = [64, 8], strides = [1, 1]} : vector<64x96xf32> to vector<64x8xf32>
    %70 = vector.shape_cast %69 : vector<64x8xf32> to vector<4x16x8xf32>
    %71 = vector.extract_strided_slice %46 {offsets = [0, 88], sizes = [64, 8], strides = [1, 1]} : vector<64x96xf32> to vector<64x8xf32>
    %72 = vector.shape_cast %71 : vector<64x8xf32> to vector<4x16x8xf32>
    %73 = tpu.concatenate %66, %68, %70, %72 in 0 : vector<4x16x8xf32>, vector<4x16x8xf32>, vector<4x16x8xf32>, vector<4x16x8xf32> -> vector<16x16x8xf32>
    "tpu.trace_start"() <{level = 10 : i32, message = "bpd,bqd->bpq"}> : () -> ()
    %cst_16 = arith.constant dense<0.000000e+00> : vector<16x16x16xf32>
    %74 = tpu.matmul %55, %64, %cst_16 {dimension_numbers = #tpu.dot_dimension_numbers<[2], [2], [1], [1], [0, 0, 0, 1, 1, 1], [0], [0]>} : vector<16x16x8xf32>, vector<16x16x8xf32>, vector<16x16x16xf32> -> vector<16x16x16xf32>
    "tpu.trace_stop"() : () -> ()
    %cst_17 = arith.constant 0.353553385 : f32
    %75 = vector.broadcast %cst_17 : f32 to vector<16x16x16xf32>
    %76 = arith.mulf %74, %75 : vector<16x16x16xf32>
    %c0_18 = arith.constant 0 : index
    %c0_19 = arith.constant 0 : index
    %c0_20 = arith.constant 0 : index
    %77 = vector.load %arg7[%c0_18, %c0_19, %c0_20] : memref<16x16x16xf32, #tpu.memory_space<vmem>>, vector<16x16x16xf32>
    %78 = arith.addf %76, %77 : vector<16x16x16xf32>
    %cst_21 = arith.constant dense<0xFF800000> : vector<16x16xf32>
    %79 = vector.multi_reduction <maximumf>, %78, %cst_21 [2] : vector<16x16x16xf32> to vector<16x16xf32>
    %80 = vector.shape_cast %79 : vector<16x16xf32> to vector<16x16x1xf32>
    %81 = vector.broadcast %80 : vector<16x16x1xf32> to vector<16x16x16xf32>
    %82 = arith.subf %78, %81 : vector<16x16x16xf32>
    %83 = math.exp %82 : vector<16x16x16xf32>
    %cst_22 = arith.constant dense<0.000000e+00> : vector<16x16xf32>
    %84 = vector.multi_reduction <add>, %83, %cst_22 [2] : vector<16x16x16xf32> to vector<16x16xf32>
    %85 = vector.shape_cast %84 : vector<16x16xf32> to vector<16x16x1xf32>
    %86 = tpu.reciprocal %85 {approx = true} : vector<16x16x1xf32> -> vector<16x16x1xf32>
    %87 = vector.broadcast %86 : vector<16x16x1xf32> to vector<16x16x16xf32>
    %88 = arith.mulf %83, %87 : vector<16x16x16xf32>
    "tpu.trace_start"() <{level = 10 : i32, message = "bpq,bqd->bpd"}> : () -> ()
    %cst_23 = arith.constant dense<0.000000e+00> : vector<16x16x8xf32>
    %89 = tpu.matmul %88, %73, %cst_23 {dimension_numbers = #tpu.dot_dimension_numbers<[2], [1], [1], [2], [0, 0, 0, 1, 1, 2], [0], [0]>} : vector<16x16x16xf32>, vector<16x16x8xf32>, vector<16x16x8xf32> -> vector<16x16x8xf32>
    "tpu.trace_stop"() : () -> ()
    %90 = vector.extract_strided_slice %89 {offsets = [0, 0, 0], sizes = [4, 16, 8], strides = [1, 1, 1]} : vector<16x16x8xf32> to vector<4x16x8xf32>
    %91 = vector.extract_strided_slice %89 {offsets = [4, 0, 0], sizes = [4, 16, 8], strides = [1, 1, 1]} : vector<16x16x8xf32> to vector<4x16x8xf32>
    %92 = vector.extract_strided_slice %89 {offsets = [8, 0, 0], sizes = [4, 16, 8], strides = [1, 1, 1]} : vector<16x16x8xf32> to vector<4x16x8xf32>
    %93 = vector.extract_strided_slice %89 {offsets = [12, 0, 0], sizes = [4, 16, 8], strides = [1, 1, 1]} : vector<16x16x8xf32> to vector<4x16x8xf32>
    %94 = tpu.concatenate %90, %91, %92, %93 in 2 : vector<4x16x8xf32>, vector<4x16x8xf32>, vector<4x16x8xf32>, vector<4x16x8xf32> -> vector<4x16x32xf32>
    %95 = vector.shape_cast %94 : vector<4x16x32xf32> to vector<64x32xf32>
    %c0_24 = arith.constant 0 : index
    %c0_25 = arith.constant 0 : index
    %96 = vector.load %arg8[%c0_24, %c0_25] : memref<32x32xf32, #tpu.memory_space<vmem>>, vector<32x32xf32>
    %cst_26 = arith.constant dense<0.000000e+00> : vector<64x32xf32>
    %97 = tpu.matmul %95, %96, %cst_26 {dimension_numbers = #tpu.dot_dimension_numbers<[1], [0], [0], [1], [0, 0, 1, 1], [], []>} : vector<64x32xf32>, vector<32x32xf32>, vector<64x32xf32> -> vector<64x32xf32>
    %c0_27 = arith.constant 0 : index
    %c0_28 = arith.constant 0 : index
    %98 = vector.load %arg9[%c0_27, %c0_28] : memref<1x32xf32, #tpu.memory_space<vmem>>, vector<1x32xf32>
    %99 = vector.broadcast %98 : vector<1x32xf32> to vector<64x32xf32>
    %100 = arith.addf %97, %99 : vector<64x32xf32>
    %101 = vector.extract_strided_slice %100 {offsets = [0, 0], sizes = [4, 32], strides = [1, 1]} : vector<64x32xf32> to vector<4x32xf32>
    %102 = vector.extract_strided_slice %100 {offsets = [16, 0], sizes = [4, 32], strides = [1, 1]} : vector<64x32xf32> to vector<4x32xf32>
    %103 = vector.extract_strided_slice %100 {offsets = [32, 0], sizes = [4, 32], strides = [1, 1]} : vector<64x32xf32> to vector<4x32xf32>
    %104 = vector.extract_strided_slice %100 {offsets = [48, 0], sizes = [4, 32], strides = [1, 1]} : vector<64x32xf32> to vector<4x32xf32>
    %105 = vector.extract_strided_slice %100 {offsets = [4, 0], sizes = [4, 32], strides = [1, 1]} : vector<64x32xf32> to vector<4x32xf32>
    %106 = vector.extract_strided_slice %100 {offsets = [20, 0], sizes = [4, 32], strides = [1, 1]} : vector<64x32xf32> to vector<4x32xf32>
    %107 = vector.extract_strided_slice %100 {offsets = [36, 0], sizes = [4, 32], strides = [1, 1]} : vector<64x32xf32> to vector<4x32xf32>
    %108 = vector.extract_strided_slice %100 {offsets = [52, 0], sizes = [4, 32], strides = [1, 1]} : vector<64x32xf32> to vector<4x32xf32>
    %109 = vector.extract_strided_slice %100 {offsets = [8, 0], sizes = [4, 32], strides = [1, 1]} : vector<64x32xf32> to vector<4x32xf32>
    %110 = vector.extract_strided_slice %100 {offsets = [24, 0], sizes = [4, 32], strides = [1, 1]} : vector<64x32xf32> to vector<4x32xf32>
    %111 = vector.extract_strided_slice %100 {offsets = [40, 0], sizes = [4, 32], strides = [1, 1]} : vector<64x32xf32> to vector<4x32xf32>
    %112 = vector.extract_strided_slice %100 {offsets = [56, 0], sizes = [4, 32], strides = [1, 1]} : vector<64x32xf32> to vector<4x32xf32>
    %113 = vector.extract_strided_slice %100 {offsets = [12, 0], sizes = [4, 32], strides = [1, 1]} : vector<64x32xf32> to vector<4x32xf32>
    %114 = vector.extract_strided_slice %100 {offsets = [28, 0], sizes = [4, 32], strides = [1, 1]} : vector<64x32xf32> to vector<4x32xf32>
    %115 = vector.extract_strided_slice %100 {offsets = [44, 0], sizes = [4, 32], strides = [1, 1]} : vector<64x32xf32> to vector<4x32xf32>
    %116 = vector.extract_strided_slice %100 {offsets = [60, 0], sizes = [4, 32], strides = [1, 1]} : vector<64x32xf32> to vector<4x32xf32>
    %117 = tpu.concatenate %101, %102, %103, %104, %105, %106, %107, %108, %109, %110, %111, %112, %113, %114, %115, %116 in 0 : vector<4x32xf32>, vector<4x32xf32>, vector<4x32xf32>, vector<4x32xf32>, vector<4x32xf32>, vector<4x32xf32>, vector<4x32xf32>, vector<4x32xf32>, vector<4x32xf32>, vector<4x32xf32>, vector<4x32xf32>, vector<4x32xf32>, vector<4x32xf32>, vector<4x32xf32>, vector<4x32xf32>, vector<4x32xf32> -> vector<64x32xf32>
    %c0_29 = arith.constant 0 : index
    %c0_30 = arith.constant 0 : index
    %118 = vector.load %arg10[%c0_29, %c0_30] : memref<1x32xf32, #tpu.memory_space<vmem>>, vector<1x32xf32>
    %119 = vector.broadcast %118 : vector<1x32xf32> to vector<64x32xf32>
    %120 = arith.mulf %2, %119 : vector<64x32xf32>
    %121 = arith.addf %120, %117 : vector<64x32xf32>
    %122 = vector.shape_cast %121 : vector<64x32xf32> to vector<4x16x32xf32>
    %c0_31 = arith.constant 0 : index
    %c0_32 = arith.constant 0 : index
    %c0_33 = arith.constant 0 : index
    %c0_34 = arith.constant 0 : index
    %123 = vector.load %arg11[%c0_31, %c0_32, %c0_33, %c0_34] : memref<1x4x16x32xf32, #tpu.memory_space<vmem>>, vector<1x4x16x32xf32>
    %124 = vector.shape_cast %123 : vector<1x4x16x32xf32> to vector<4x16x32xf32>
    %125 = vector.shape_cast %122 : vector<4x16x32xf32> to vector<1x4x16x32xf32>
    tpu.vector_store %arg11[%c0_31, %c0_32, %c0_33, %c0_34], %125 {strides = array<i32>} : memref<1x4x16x32xf32, #tpu.memory_space<vmem>>, vector<1x4x16x32xf32>,
    return
  }
  func.func @transform_0(%arg0: i32, %arg1: i32) -> (i32, i32, i32, i32) {
    %c0_i32 = arith.constant 0 : i32
    %c0_i32_0 = arith.constant 0 : i32
    %c0_i32_1 = arith.constant 0 : i32
    return %arg0, %arg1, %c0_i32, %c0_i32_0 : i32, i32, i32, i32
  }
  func.func @transform_1(%arg0: i32, %arg1: i32) -> (i32, i32) {
    %c0_i32 = arith.constant 0 : i32
    %c0_i32_0 = arith.constant 0 : i32
    %c0_i32_1 = arith.constant 0 : i32
    return %c0_i32, %c0_i32_0 : i32, i32
  }
  func.func @transform_2(%arg0: i32, %arg1: i32) -> (i32, i32) {
    %c0_i32 = arith.constant 0 : i32
    %c0_i32_0 = arith.constant 0 : i32
    %c0_i32_1 = arith.constant 0 : i32
    return %c0_i32, %c0_i32_0 : i32, i32
  }
  func.func @transform_3(%arg0: i32, %arg1: i32) -> (i32, i32) {
    %c0_i32 = arith.constant 0 : i32
    %c0_i32_0 = arith.constant 0 : i32
    %c0_i32_1 = arith.constant 0 : i32
    return %c0_i32, %c0_i32_0 : i32, i32
  }
  func.func @transform_4(%arg0: i32, %arg1: i32) -> (i32, i32) {
    %c0_i32 = arith.constant 0 : i32
    %c0_i32_0 = arith.constant 0 : i32
    %c0_i32_1 = arith.constant 0 : i32
    return %c0_i32, %c0_i32_0 : i32, i32
  }
  func.func @transform_5(%arg0: i32, %arg1: i32) -> (i32, i32, i32) {
    %c0_i32 = arith.constant 0 : i32
    %c0_i32_0 = arith.constant 0 : i32
    %c0_i32_1 = arith.constant 0 : i32
    %c0_i32_2 = arith.constant 0 : i32
    return %c0_i32, %c0_i32_0, %c0_i32_1 : i32, i32, i32
  }
  func.func @transform_6(%arg0: i32, %arg1: i32) -> (i32, i32) {
    %c0_i32 = arith.constant 0 : i32
    %c0_i32_0 = arith.constant 0 : i32
    %c0_i32_1 = arith.constant 0 : i32
    return %c0_i32, %c0_i32_0 : i32, i32
  }
  func.func @transform_7(%arg0: i32, %arg1: i32) -> (i32, i32) {
    %c0_i32 = arith.constant 0 : i32
    %c0_i32_0 = arith.constant 0 : i32
    %c0_i32_1 = arith.constant 0 : i32
    return %c0_i32, %c0_i32_0 : i32, i32
  }
  func.func @transform_8(%arg0: i32, %arg1: i32) -> (i32, i32) {
    %c0_i32 = arith.constant 0 : i32
    %c0_i32_0 = arith.constant 0 : i32
    %c0_i32_1 = arith.constant 0 : i32
    return %c0_i32, %c0_i32_0 : i32, i32
  }
  func.func @transform_9(%arg0: i32, %arg1: i32) -> (i32, i32, i32, i32) {
    %c0_i32 = arith.constant 0 : i32
    %c0_i32_0 = arith.constant 0 : i32
    %c0_i32_1 = arith.constant 0 : i32
    return %arg0, %arg1, %c0_i32, %c0_i32_0 : i32, i32, i32, i32
  }
}

module attributes {stable_mosaic.version = 11 : i64} {
  func.func @_convglu_kernel(%arg0: i32, %arg1: memref<1x256x32xf32, #tpu.memory_space<vmem>>, %arg2: memref<1x32xf32, #tpu.memory_space<vmem>>, %arg3: memref<1x32xf32, #tpu.memory_space<vmem>>, %arg4: memref<32x64xf32, #tpu.memory_space<vmem>>, %arg5: memref<1x64xf32, #tpu.memory_space<vmem>>, %arg6: memref<32x64xf32, #tpu.memory_space<vmem>>, %arg7: memref<1x64xf32, #tpu.memory_space<vmem>>, %arg8: memref<9x64xf32, #tpu.memory_space<vmem>>, %arg9: memref<1x64xf32, #tpu.memory_space<vmem>>, %arg10: memref<64x32xf32, #tpu.memory_space<vmem>>, %arg11: memref<1x32xf32, #tpu.memory_space<vmem>>, %arg12: memref<1x32xf32, #tpu.memory_space<vmem>>, %arg13: memref<1x256x32xf32, #tpu.memory_space<vmem>>, %arg14: memref<304x64xf32, #tpu.memory_space<vmem>>) attributes {dimension_semantics = [#tpu.dimension_semantics<parallel>], iteration_bounds = array<i64: 2>, scalar_prefetch = 0 : i64, scratch_operands = 1 : i64, tpu.core_type = #tpu.core_type<tc>, window_params = [{transform_indices = @transform_0, window_bounds = array<i64: 1, 256, 32>}, {pipeline_mode = #tpu.pipeline_mode<synchronous>, transform_indices = @transform_1, window_bounds = array<i64: 1, 32>}, {pipeline_mode = #tpu.pipeline_mode<synchronous>, transform_indices = @transform_2, window_bounds = array<i64: 1, 32>}, {pipeline_mode = #tpu.pipeline_mode<synchronous>, transform_indices = @transform_3, window_bounds = array<i64: 32, 64>}, {pipeline_mode = #tpu.pipeline_mode<synchronous>, transform_indices = @transform_4, window_bounds = array<i64: 1, 64>}, {pipeline_mode = #tpu.pipeline_mode<synchronous>, transform_indices = @transform_5, window_bounds = array<i64: 32, 64>}, {pipeline_mode = #tpu.pipeline_mode<synchronous>, transform_indices = @transform_6, window_bounds = array<i64: 1, 64>}, {pipeline_mode = #tpu.pipeline_mode<synchronous>, transform_indices = @transform_7, window_bounds = array<i64: 9, 64>}, {pipeline_mode = #tpu.pipeline_mode<synchronous>, transform_indices = @transform_8, window_bounds = array<i64: 1, 64>}, {pipeline_mode = #tpu.pipeline_mode<synchronous>, transform_indices = @transform_9, window_bounds = array<i64: 64, 32>}, {pipeline_mode = #tpu.pipeline_mode<synchronous>, transform_indices = @transform_10, window_bounds = array<i64: 1, 32>}, {pipeline_mode = #tpu.pipeline_mode<synchronous>, transform_indices = @transform_11, window_bounds = array<i64: 1, 32>}, {transform_indices = @transform_12, window_bounds = array<i64: 1, 256, 32>}]} {
    %c0 = arith.constant 0 : index
    %c0_0 = arith.constant 0 : index
    %c0_1 = arith.constant 0 : index
    %0 = vector.load %arg1[%c0, %c0_0, %c0_1] : memref<1x256x32xf32, #tpu.memory_space<vmem>>, vector<1x256x32xf32>
    %1 = vector.shape_cast %0 : vector<1x256x32xf32> to vector<256x32xf32>
    %c0_2 = arith.constant 0 : index
    %c0_3 = arith.constant 0 : index
    %2 = vector.load %arg2[%c0_2, %c0_3] : memref<1x32xf32, #tpu.memory_space<vmem>>, vector<1x32xf32>
    %c0_4 = arith.constant 0 : index
    %c0_5 = arith.constant 0 : index
    %3 = vector.load %arg3[%c0_4, %c0_5] : memref<1x32xf32, #tpu.memory_space<vmem>>, vector<1x32xf32>
    %cst = arith.constant dense<0.000000e+00> : vector<256xf32>
    %4 = vector.multi_reduction <add>, %1, %cst [1] : vector<256x32xf32> to vector<256xf32>
    %5 = vector.shape_cast %4 : vector<256xf32> to vector<256x1xf32>
    %cst_6 = arith.constant 3.200000e+01 : f32
    %6 = vector.broadcast %cst_6 : f32 to vector<256x1xf32>
    %7 = arith.divf %5, %6 : vector<256x1xf32>
    %8 = vector.broadcast %7 : vector<256x1xf32> to vector<256x32xf32>
    %9 = arith.subf %1, %8 : vector<256x32xf32>
    %10 = arith.mulf %9, %9 : vector<256x32xf32>
    %cst_7 = arith.constant dense<0.000000e+00> : vector<256xf32>
    %11 = vector.multi_reduction <add>, %10, %cst_7 [1] : vector<256x32xf32> to vector<256xf32>
    %12 = vector.shape_cast %11 : vector<256xf32> to vector<256x1xf32>
    %cst_8 = arith.constant 3.200000e+01 : f32
    %13 = vector.broadcast %cst_8 : f32 to vector<256x1xf32>
    %14 = arith.divf %12, %13 : vector<256x1xf32>
    %cst_9 = arith.constant 9.99999974E-6 : f32
    %15 = vector.broadcast %cst_9 : f32 to vector<256x1xf32>
    %16 = arith.addf %14, %15 : vector<256x1xf32>
    %17 = math.rsqrt %16 : vector<256x1xf32>
    %18 = vector.broadcast %17 : vector<256x1xf32> to vector<256x32xf32>
    %19 = arith.mulf %9, %18 : vector<256x32xf32>
    %20 = vector.broadcast %2 : vector<1x32xf32> to vector<256x32xf32>
    %21 = arith.mulf %19, %20 : vector<256x32xf32>
    %22 = vector.broadcast %3 : vector<1x32xf32> to vector<256x32xf32>
    %23 = arith.addf %21, %22 : vector<256x32xf32>
    %c0_10 = arith.constant 0 : index
    %c0_11 = arith.constant 0 : index
    %24 = vector.load %arg4[%c0_10, %c0_11] : memref<32x64xf32, #tpu.memory_space<vmem>>, vector<32x64xf32>
    %cst_12 = arith.constant dense<0.000000e+00> : vector<256x64xf32>
    %25 = tpu.matmul %23, %24, %cst_12 {dimension_numbers = #tpu.dot_dimension_numbers<[1], [0], [0], [1], [0, 0, 1, 1], [], []>} : vector<256x32xf32>, vector<32x64xf32>, vector<256x64xf32> -> vector<256x64xf32>
    %c0_13 = arith.constant 0 : index
    %c0_14 = arith.constant 0 : index
    %26 = vector.load %arg5[%c0_13, %c0_14] : memref<1x64xf32, #tpu.memory_space<vmem>>, vector<1x64xf32>
    %27 = vector.broadcast %26 : vector<1x64xf32> to vector<256x64xf32>
    %28 = arith.addf %25, %27 : vector<256x64xf32>
    %c0_15 = arith.constant 0 : index
    %c0_16 = arith.constant 0 : index
    %29 = vector.load %arg6[%c0_15, %c0_16] : memref<32x64xf32, #tpu.memory_space<vmem>>, vector<32x64xf32>
    %cst_17 = arith.constant dense<0.000000e+00> : vector<256x64xf32>
    %30 = tpu.matmul %23, %29, %cst_17 {dimension_numbers = #tpu.dot_dimension_numbers<[1], [0], [0], [1], [0, 0, 1, 1], [], []>} : vector<256x32xf32>, vector<32x64xf32>, vector<256x64xf32> -> vector<256x64xf32>
    %c0_18 = arith.constant 0 : index
    %c0_19 = arith.constant 0 : index
    %31 = vector.load %arg7[%c0_18, %c0_19] : memref<1x64xf32, #tpu.memory_space<vmem>>, vector<1x64xf32>
    %32 = vector.broadcast %31 : vector<1x64xf32> to vector<256x64xf32>
    %33 = arith.addf %30, %32 : vector<256x64xf32>
    %cst_20 = arith.constant 0.000000e+00 : f32
    %34 = vector.broadcast %cst_20 : f32 to vector<24x64xf32>
    %c0_21 = arith.constant 0 : index
    %c0_22 = arith.constant 0 : index
    %35 = vector.load %arg14[%c0_21, %c0_22] : memref<304x64xf32, #tpu.memory_space<vmem>>, vector<24x64xf32>
    tpu.vector_store %arg14[%c0_21, %c0_22], %34 {strides = array<i32>} : memref<304x64xf32, #tpu.memory_space<vmem>>, vector<24x64xf32>,
    %cst_23 = arith.constant 0.000000e+00 : f32
    %36 = vector.broadcast %cst_23 : f32 to vector<24x64xf32>
    %c280 = arith.constant 280 : index
    %c0_24 = arith.constant 0 : index
    %37 = vector.load %arg14[%c280, %c0_24] : memref<304x64xf32, #tpu.memory_space<vmem>>, vector<24x64xf32>
    tpu.vector_store %arg14[%c280, %c0_24], %36 {strides = array<i32>} : memref<304x64xf32, #tpu.memory_space<vmem>>, vector<24x64xf32>,
    %c24 = arith.constant 24 : index
    %c0_25 = arith.constant 0 : index
    %38 = vector.load %arg14[%c24, %c0_25] : memref<304x64xf32, #tpu.memory_space<vmem>>, vector<256x64xf32>
    tpu.vector_store %arg14[%c24, %c0_25], %28 {strides = array<i32>} : memref<304x64xf32, #tpu.memory_space<vmem>>, vector<256x64xf32>,
    %39 = tpu.iota {dimensions = array<i32: 0>} : vector<256x1xi32>
    %c16_i32 = arith.constant 16 : i32
    %c0_i32 = arith.constant 0 : i32
    %40 = arith.cmpi eq, %c16_i32, %c0_i32 : i32
    %c1_i32 = arith.constant 1 : i32
    %41 = arith.select %40, %c1_i32, %c16_i32 : i32
    %42 = vector.broadcast %41 : i32 to vector<256x1xi32>
    %43 = arith.remsi %39, %42 : vector<256x1xi32>
    %c0_i32_26 = arith.constant 0 : i32
    %44 = vector.broadcast %c0_i32_26 : i32 to vector<256x1xi32>
    %45 = arith.cmpi ne, %43, %44 : vector<256x1xi32>
    %c0_i32_27 = arith.constant 0 : i32
    %46 = vector.broadcast %c0_i32_27 : i32 to vector<256x1xi32>
    %47 = arith.cmpi slt, %43, %46 : vector<256x1xi32>
    %c0_i32_28 = arith.constant 0 : i32
    %48 = arith.cmpi slt, %41, %c0_i32_28 : i32
    %49 = vector.broadcast %48 : i1 to vector<256x1xi1>
    %50 = vector.broadcast %49 : vector<256x1xi1> to vector<256x1xi1>
    %51 = arith.xori %47, %50 : vector<256x1xi1>
    %52 = arith.andi %51, %45 : vector<256x1xi1>
    %53 = vector.broadcast %41 : i32 to vector<256x1xi32>
    %54 = arith.addi %43, %53 : vector<256x1xi32>
    %55 = arith.select %52, %54, %43 : vector<256x1xi1>, vector<256x1xi32>
    %c0_i32_29 = arith.constant 0 : i32
    %56 = vector.broadcast %c0_i32_29 : i32 to vector<256x1xi32>
    %57 = arith.cmpi eq, %55, %56 : vector<256x1xi32>
    %c15_i32 = arith.constant 15 : i32
    %58 = vector.broadcast %c15_i32 : i32 to vector<256x1xi32>
    %59 = arith.cmpi eq, %55, %58 : vector<256x1xi32>
    %c0_30 = arith.constant 0 : index
    %c0_31 = arith.constant 0 : index
    %60 = vector.load %arg8[%c0_30, %c0_31] : memref<9x64xf32, #tpu.memory_space<vmem>>, vector<9x64xf32>
    %cst_32 = arith.constant 0.000000e+00 : f32
    %61 = vector.broadcast %cst_32 : f32 to vector<256x64xf32>
    %c7 = arith.constant 7 : index
    %c0_33 = arith.constant 0 : index
    %62 = vector.load %arg14[%c7, %c0_33] : memref<304x64xf32, #tpu.memory_space<vmem>>, vector<256x64xf32>
    %cst_34 = arith.constant 0.000000e+00 : f32
    %63 = vector.shape_cast %57 : vector<256x1xi1> to vector<256x1xi1>
    %64 = vector.broadcast %63 : vector<256x1xi1> to vector<256x64xi1>
    %65 = vector.broadcast %cst_34 : f32 to vector<256x64xf32>
    %66 = arith.select %64, %65, %62 : vector<256x64xi1>, vector<256x64xf32>
    %67 = vector.extract_strided_slice %60 {offsets = [0, 0], sizes = [1, 64], strides = [1, 1]} : vector<9x64xf32> to vector<1x64xf32>
    %68 = vector.shape_cast %67 : vector<1x64xf32> to vector<64xf32>
    %69 = vector.shape_cast %68 : vector<64xf32> to vector<1x64xf32>
    %70 = vector.broadcast %69 : vector<1x64xf32> to vector<256x64xf32>
    %71 = arith.mulf %70, %66 : vector<256x64xf32>
    %c8 = arith.constant 8 : index
    %c0_35 = arith.constant 0 : index
    %72 = vector.load %arg14[%c8, %c0_35] : memref<304x64xf32, #tpu.memory_space<vmem>>, vector<256x64xf32>
    %73 = vector.extract_strided_slice %60 {offsets = [1, 0], sizes = [1, 64], strides = [1, 1]} : vector<9x64xf32> to vector<1x64xf32>
    %74 = vector.shape_cast %73 : vector<1x64xf32> to vector<64xf32>
    %75 = vector.shape_cast %74 : vector<64xf32> to vector<1x64xf32>
    %76 = vector.broadcast %75 : vector<1x64xf32> to vector<256x64xf32>
    %77 = arith.mulf %76, %72 : vector<256x64xf32>
    %78 = arith.addf %71, %77 : vector<256x64xf32>
    %c9 = arith.constant 9 : index
    %c0_36 = arith.constant 0 : index
    %79 = vector.load %arg14[%c9, %c0_36] : memref<304x64xf32, #tpu.memory_space<vmem>>, vector<256x64xf32>
    %cst_37 = arith.constant 0.000000e+00 : f32
    %80 = vector.shape_cast %59 : vector<256x1xi1> to vector<256x1xi1>
    %81 = vector.broadcast %80 : vector<256x1xi1> to vector<256x64xi1>
    %82 = vector.broadcast %cst_37 : f32 to vector<256x64xf32>
    %83 = arith.select %81, %82, %79 : vector<256x64xi1>, vector<256x64xf32>
    %84 = vector.extract_strided_slice %60 {offsets = [2, 0], sizes = [1, 64], strides = [1, 1]} : vector<9x64xf32> to vector<1x64xf32>
    %85 = vector.shape_cast %84 : vector<1x64xf32> to vector<64xf32>
    %86 = vector.shape_cast %85 : vector<64xf32> to vector<1x64xf32>
    %87 = vector.broadcast %86 : vector<1x64xf32> to vector<256x64xf32>
    %88 = arith.mulf %87, %83 : vector<256x64xf32>
    %89 = arith.addf %78, %88 : vector<256x64xf32>
    %90 = arith.addf %61, %89 : vector<256x64xf32>
    %c23 = arith.constant 23 : index
    %c0_38 = arith.constant 0 : index
    %91 = vector.load %arg14[%c23, %c0_38] : memref<304x64xf32, #tpu.memory_space<vmem>>, vector<256x64xf32>
    %cst_39 = arith.constant 0.000000e+00 : f32
    %92 = vector.shape_cast %57 : vector<256x1xi1> to vector<256x1xi1>
    %93 = vector.broadcast %92 : vector<256x1xi1> to vector<256x64xi1>
    %94 = vector.broadcast %cst_39 : f32 to vector<256x64xf32>
    %95 = arith.select %93, %94, %91 : vector<256x64xi1>, vector<256x64xf32>
    %96 = vector.extract_strided_slice %60 {offsets = [3, 0], sizes = [1, 64], strides = [1, 1]} : vector<9x64xf32> to vector<1x64xf32>
    %97 = vector.shape_cast %96 : vector<1x64xf32> to vector<64xf32>
    %98 = vector.shape_cast %97 : vector<64xf32> to vector<1x64xf32>
    %99 = vector.broadcast %98 : vector<1x64xf32> to vector<256x64xf32>
    %100 = arith.mulf %99, %95 : vector<256x64xf32>
    %c24_40 = arith.constant 24 : index
    %c0_41 = arith.constant 0 : index
    %101 = vector.load %arg14[%c24_40, %c0_41] : memref<304x64xf32, #tpu.memory_space<vmem>>, vector<256x64xf32>
    %102 = vector.extract_strided_slice %60 {offsets = [4, 0], sizes = [1, 64], strides = [1, 1]} : vector<9x64xf32> to vector<1x64xf32>
    %103 = vector.shape_cast %102 : vector<1x64xf32> to vector<64xf32>
    %104 = vector.shape_cast %103 : vector<64xf32> to vector<1x64xf32>
    %105 = vector.broadcast %104 : vector<1x64xf32> to vector<256x64xf32>
    %106 = arith.mulf %105, %101 : vector<256x64xf32>
    %107 = arith.addf %100, %106 : vector<256x64xf32>
    %c25 = arith.constant 25 : index
    %c0_42 = arith.constant 0 : index
    %108 = vector.load %arg14[%c25, %c0_42] : memref<304x64xf32, #tpu.memory_space<vmem>>, vector<256x64xf32>
    %cst_43 = arith.constant 0.000000e+00 : f32
    %109 = vector.shape_cast %59 : vector<256x1xi1> to vector<256x1xi1>
    %110 = vector.broadcast %109 : vector<256x1xi1> to vector<256x64xi1>
    %111 = vector.broadcast %cst_43 : f32 to vector<256x64xf32>
    %112 = arith.select %110, %111, %108 : vector<256x64xi1>, vector<256x64xf32>
    %113 = vector.extract_strided_slice %60 {offsets = [5, 0], sizes = [1, 64], strides = [1, 1]} : vector<9x64xf32> to vector<1x64xf32>
    %114 = vector.shape_cast %113 : vector<1x64xf32> to vector<64xf32>
    %115 = vector.shape_cast %114 : vector<64xf32> to vector<1x64xf32>
    %116 = vector.broadcast %115 : vector<1x64xf32> to vector<256x64xf32>
    %117 = arith.mulf %116, %112 : vector<256x64xf32>
    %118 = arith.addf %107, %117 : vector<256x64xf32>
    %119 = arith.addf %90, %118 : vector<256x64xf32>
    %c39 = arith.constant 39 : index
    %c0_44 = arith.constant 0 : index
    %120 = vector.load %arg14[%c39, %c0_44] : memref<304x64xf32, #tpu.memory_space<vmem>>, vector<256x64xf32>
    %cst_45 = arith.constant 0.000000e+00 : f32
    %121 = vector.shape_cast %57 : vector<256x1xi1> to vector<256x1xi1>
    %122 = vector.broadcast %121 : vector<256x1xi1> to vector<256x64xi1>
    %123 = vector.broadcast %cst_45 : f32 to vector<256x64xf32>
    %124 = arith.select %122, %123, %120 : vector<256x64xi1>, vector<256x64xf32>
    %125 = vector.extract_strided_slice %60 {offsets = [6, 0], sizes = [1, 64], strides = [1, 1]} : vector<9x64xf32> to vector<1x64xf32>
    %126 = vector.shape_cast %125 : vector<1x64xf32> to vector<64xf32>
    %127 = vector.shape_cast %126 : vector<64xf32> to vector<1x64xf32>
    %128 = vector.broadcast %127 : vector<1x64xf32> to vector<256x64xf32>
    %129 = arith.mulf %128, %124 : vector<256x64xf32>
    %c40 = arith.constant 40 : index
    %c0_46 = arith.constant 0 : index
    %130 = vector.load %arg14[%c40, %c0_46] : memref<304x64xf32, #tpu.memory_space<vmem>>, vector<256x64xf32>
    %131 = vector.extract_strided_slice %60 {offsets = [7, 0], sizes = [1, 64], strides = [1, 1]} : vector<9x64xf32> to vector<1x64xf32>
    %132 = vector.shape_cast %131 : vector<1x64xf32> to vector<64xf32>
    %133 = vector.shape_cast %132 : vector<64xf32> to vector<1x64xf32>
    %134 = vector.broadcast %133 : vector<1x64xf32> to vector<256x64xf32>
    %135 = arith.mulf %134, %130 : vector<256x64xf32>
    %136 = arith.addf %129, %135 : vector<256x64xf32>
    %c41 = arith.constant 41 : index
    %c0_47 = arith.constant 0 : index
    %137 = vector.load %arg14[%c41, %c0_47] : memref<304x64xf32, #tpu.memory_space<vmem>>, vector<256x64xf32>
    %cst_48 = arith.constant 0.000000e+00 : f32
    %138 = vector.shape_cast %59 : vector<256x1xi1> to vector<256x1xi1>
    %139 = vector.broadcast %138 : vector<256x1xi1> to vector<256x64xi1>
    %140 = vector.broadcast %cst_48 : f32 to vector<256x64xf32>
    %141 = arith.select %139, %140, %137 : vector<256x64xi1>, vector<256x64xf32>
    %142 = vector.extract_strided_slice %60 {offsets = [8, 0], sizes = [1, 64], strides = [1, 1]} : vector<9x64xf32> to vector<1x64xf32>
    %143 = vector.shape_cast %142 : vector<1x64xf32> to vector<64xf32>
    %144 = vector.shape_cast %143 : vector<64xf32> to vector<1x64xf32>
    %145 = vector.broadcast %144 : vector<1x64xf32> to vector<256x64xf32>
    %146 = arith.mulf %145, %141 : vector<256x64xf32>
    %147 = arith.addf %136, %146 : vector<256x64xf32>
    %148 = arith.addf %119, %147 : vector<256x64xf32>
    %c0_49 = arith.constant 0 : index
    %c0_50 = arith.constant 0 : index
    %149 = vector.load %arg9[%c0_49, %c0_50] : memref<1x64xf32, #tpu.memory_space<vmem>>, vector<1x64xf32>
    %150 = vector.broadcast %149 : vector<1x64xf32> to vector<256x64xf32>
    %151 = arith.addf %148, %150 : vector<256x64xf32>
    %cst_51 = arith.constant 5.000000e-01 : f32
    %152 = vector.broadcast %cst_51 : f32 to vector<256x64xf32>
    %153 = arith.mulf %152, %151 : vector<256x64xf32>
    %cst_52 = arith.constant 0.707106769 : f32
    %154 = vector.broadcast %cst_52 : f32 to vector<256x64xf32>
    %155 = arith.mulf %151, %154 : vector<256x64xf32>
    %156 = math.absf %155 : vector<256x64xf32>
    %cst_53 = arith.constant 0.327591091 : f32
    %157 = vector.broadcast %cst_53 : f32 to vector<256x64xf32>
    %158 = arith.mulf %157, %156 : vector<256x64xf32>
    %cst_54 = arith.constant 1.000000e+00 : f32
    %159 = vector.broadcast %cst_54 : f32 to vector<256x64xf32>
    %160 = arith.addf %159, %158 : vector<256x64xf32>
    %cst_55 = arith.constant 1.000000e+00 : f32
    %161 = vector.broadcast %cst_55 : f32 to vector<256x64xf32>
    %162 = arith.divf %161, %160 : vector<256x64xf32>
    %cst_56 = arith.constant 1.06140542 : f32
    %163 = vector.broadcast %cst_56 : f32 to vector<256x64xf32>
    %164 = arith.mulf %163, %162 : vector<256x64xf32>
    %cst_57 = arith.constant -1.45315206 : f32
    %165 = vector.broadcast %cst_57 : f32 to vector<256x64xf32>
    %166 = arith.addf %164, %165 : vector<256x64xf32>
    %167 = arith.mulf %166, %162 : vector<256x64xf32>
    %cst_58 = arith.constant 1.42141378 : f32
    %168 = vector.broadcast %cst_58 : f32 to vector<256x64xf32>
    %169 = arith.addf %167, %168 : vector<256x64xf32>
    %170 = arith.mulf %169, %162 : vector<256x64xf32>
    %cst_59 = arith.constant -0.284496725 : f32
    %171 = vector.broadcast %cst_59 : f32 to vector<256x64xf32>
    %172 = arith.addf %170, %171 : vector<256x64xf32>
    %173 = arith.mulf %172, %162 : vector<256x64xf32>
    %cst_60 = arith.constant 0.254829586 : f32
    %174 = vector.broadcast %cst_60 : f32 to vector<256x64xf32>
    %175 = arith.addf %173, %174 : vector<256x64xf32>
    %176 = arith.mulf %175, %162 : vector<256x64xf32>
    %cst_61 = arith.constant 0.000000e+00 : f32
    %177 = vector.broadcast %cst_61 : f32 to vector<256x64xf32>
    %178 = arith.subf %177, %156 : vector<256x64xf32>
    %179 = arith.mulf %178, %156 : vector<256x64xf32>
    %180 = math.exp %179 : vector<256x64xf32>
    %181 = arith.mulf %176, %180 : vector<256x64xf32>
    %cst_62 = arith.constant 1.000000e+00 : f32
    %182 = vector.broadcast %cst_62 : f32 to vector<256x64xf32>
    %183 = arith.subf %182, %181 : vector<256x64xf32>
    %cst_63 = arith.constant 0.000000e+00 : f32
    %184 = vector.broadcast %cst_63 : f32 to vector<256x64xf32>
    %185 = arith.cmpf olt, %155, %184 : vector<256x64xf32>
    %cst_64 = arith.constant 0.000000e+00 : f32
    %186 = vector.broadcast %cst_64 : f32 to vector<256x64xf32>
    %187 = arith.subf %186, %183 : vector<256x64xf32>
    %188 = arith.select %185, %187, %183 : vector<256x64xi1>, vector<256x64xf32>
    %cst_65 = arith.constant 1.000000e+00 : f32
    %189 = vector.broadcast %cst_65 : f32 to vector<256x64xf32>
    %190 = arith.addf %189, %188 : vector<256x64xf32>
    %191 = arith.mulf %153, %190 : vector<256x64xf32>
    %192 = arith.mulf %191, %33 : vector<256x64xf32>
    %c0_66 = arith.constant 0 : index
    %c0_67 = arith.constant 0 : index
    %193 = vector.load %arg10[%c0_66, %c0_67] : memref<64x32xf32, #tpu.memory_space<vmem>>, vector<64x32xf32>
    %cst_68 = arith.constant dense<0.000000e+00> : vector<256x32xf32>
    %194 = tpu.matmul %192, %193, %cst_68 {dimension_numbers = #tpu.dot_dimension_numbers<[1], [0], [0], [1], [0, 0, 1, 1], [], []>} : vector<256x64xf32>, vector<64x32xf32>, vector<256x32xf32> -> vector<256x32xf32>
    %c0_69 = arith.constant 0 : index
    %c0_70 = arith.constant 0 : index
    %195 = vector.load %arg11[%c0_69, %c0_70] : memref<1x32xf32, #tpu.memory_space<vmem>>, vector<1x32xf32>
    %196 = vector.broadcast %195 : vector<1x32xf32> to vector<256x32xf32>
    %197 = arith.addf %194, %196 : vector<256x32xf32>
    %c0_71 = arith.constant 0 : index
    %c0_72 = arith.constant 0 : index
    %198 = vector.load %arg12[%c0_71, %c0_72] : memref<1x32xf32, #tpu.memory_space<vmem>>, vector<1x32xf32>
    %199 = vector.broadcast %198 : vector<1x32xf32> to vector<256x32xf32>
    %200 = arith.mulf %1, %199 : vector<256x32xf32>
    %201 = arith.addf %200, %197 : vector<256x32xf32>
    %c0_73 = arith.constant 0 : index
    %c0_74 = arith.constant 0 : index
    %c0_75 = arith.constant 0 : index
    %202 = vector.load %arg13[%c0_73, %c0_74, %c0_75] : memref<1x256x32xf32, #tpu.memory_space<vmem>>, vector<1x256x32xf32>
    %203 = vector.shape_cast %202 : vector<1x256x32xf32> to vector<256x32xf32>
    %204 = vector.shape_cast %201 : vector<256x32xf32> to vector<1x256x32xf32>
    tpu.vector_store %arg13[%c0_73, %c0_74, %c0_75], %204 {strides = array<i32>} : memref<1x256x32xf32, #tpu.memory_space<vmem>>, vector<1x256x32xf32>,
    return
  }
  func.func @transform_0(%arg0: i32) -> (i32, i32, i32) {
    %c0_i32 = arith.constant 0 : i32
    %c0_i32_0 = arith.constant 0 : i32
    %c0_i32_1 = arith.constant 0 : i32
    return %arg0, %c0_i32, %c0_i32_0 : i32, i32, i32
  }
  func.func @transform_1(%arg0: i32) -> (i32, i32) {
    %c0_i32 = arith.constant 0 : i32
    %c0_i32_0 = arith.constant 0 : i32
    %c0_i32_1 = arith.constant 0 : i32
    return %c0_i32, %c0_i32_0 : i32, i32
  }
  func.func @transform_2(%arg0: i32) -> (i32, i32) {
    %c0_i32 = arith.constant 0 : i32
    %c0_i32_0 = arith.constant 0 : i32
    %c0_i32_1 = arith.constant 0 : i32
    return %c0_i32, %c0_i32_0 : i32, i32
  }
  func.func @transform_3(%arg0: i32) -> (i32, i32) {
    %c0_i32 = arith.constant 0 : i32
    %c0_i32_0 = arith.constant 0 : i32
    %c0_i32_1 = arith.constant 0 : i32
    return %c0_i32, %c0_i32_0 : i32, i32
  }
  func.func @transform_4(%arg0: i32) -> (i32, i32) {
    %c0_i32 = arith.constant 0 : i32
    %c0_i32_0 = arith.constant 0 : i32
    %c0_i32_1 = arith.constant 0 : i32
    return %c0_i32, %c0_i32_0 : i32, i32
  }
  func.func @transform_5(%arg0: i32) -> (i32, i32) {
    %c0_i32 = arith.constant 0 : i32
    %c0_i32_0 = arith.constant 0 : i32
    %c0_i32_1 = arith.constant 0 : i32
    return %c0_i32, %c0_i32_0 : i32, i32
  }
  func.func @transform_6(%arg0: i32) -> (i32, i32) {
    %c0_i32 = arith.constant 0 : i32
    %c0_i32_0 = arith.constant 0 : i32
    %c0_i32_1 = arith.constant 0 : i32
    return %c0_i32, %c0_i32_0 : i32, i32
  }
  func.func @transform_7(%arg0: i32) -> (i32, i32) {
    %c0_i32 = arith.constant 0 : i32
    %c0_i32_0 = arith.constant 0 : i32
    %c0_i32_1 = arith.constant 0 : i32
    return %c0_i32, %c0_i32_0 : i32, i32
  }
  func.func @transform_8(%arg0: i32) -> (i32, i32) {
    %c0_i32 = arith.constant 0 : i32
    %c0_i32_0 = arith.constant 0 : i32
    %c0_i32_1 = arith.constant 0 : i32
    return %c0_i32, %c0_i32_0 : i32, i32
  }
  func.func @transform_9(%arg0: i32) -> (i32, i32) {
    %c0_i32 = arith.constant 0 : i32
    %c0_i32_0 = arith.constant 0 : i32
    %c0_i32_1 = arith.constant 0 : i32
    return %c0_i32, %c0_i32_0 : i32, i32
  }
  func.func @transform_10(%arg0: i32) -> (i32, i32) {
    %c0_i32 = arith.constant 0 : i32
    %c0_i32_0 = arith.constant 0 : i32
    %c0_i32_1 = arith.constant 0 : i32
    return %c0_i32, %c0_i32_0 : i32, i32
  }
  func.func @transform_11(%arg0: i32) -> (i32, i32) {
    %c0_i32 = arith.constant 0 : i32
    %c0_i32_0 = arith.constant 0 : i32
    %c0_i32_1 = arith.constant 0 : i32
    return %c0_i32, %c0_i32_0 : i32, i32
  }
  func.func @transform_12(%arg0: i32) -> (i32, i32, i32) {
    %c0_i32 = arith.constant 0 : i32
    %c0_i32_0 = arith.constant 0 : i32
    %c0_i32_1 = arith.constant 0 : i32
    return %arg0, %c0_i32, %c0_i32_0 : i32, i32, i32
  }
}

</mosaic_0001>

<bundles_post_ra>
// kernel: res_scale_convolution_gate_block.2
= control target key start
LH: loop header
LB: loop body
LE: loop exit
PB: predicated region body
PF: predicated region fallthrough
CT: control target
= control target key end

     0   :  { %s3204_s30 = smov 0   ;;  %s3206_s10 = smov 0   ;;  %s4441_s0 = inlined_call_operand.vmem [shape: f32[2,16,16,32], index: 0, kind: input, shape index: {}]   ;;  %s4442_s1 = inlined_call_operand.vmem [shape: f32[1,32], index: 1, kind: input, shape index: {}]   ;;  %s4443_s2 = inlined_call_operand.vmem [shape: f32[1,32], index: 2, kind: input, shape index: {}]   ;;  %s4444_s3 = inlined_call_operand.vmem [shape: f32[32,96], index: 3, kind: input, shape index: {}]   ;;  %s4445_s4 = inlined_call_operand.vmem [shape: f32[1,96], index: 4, kind: input, shape index: {}]   ;;  %s4446_s5 = inlined_call_operand.vmem [shape: f32[16,16,16], index: 5, kind: input, shape index: {}]   ;;  %s4447_s6 = inlined_call_operand.vmem [shape: f32[32,32], index: 6, kind: input, shape index: {}]   ;;  %s4448_s7 = inlined_call_operand.vmem [shape: f32[1,32], index: 7, kind: input, shape index: {}]   ;;  %s4449_s8 = inlined_call_operand.vmem [shape: f32[1,32], index: 8, kind: input, shape index: {}]   ;;  %s4450_s9 = inlined_call_operand.vmem [shape: f32[2,16,16,32], index: 9, kind: output, shape index: {}]  }
   0x1   :  { %s3208_s11 = smov 0   ;;  %s3210_s12 = smov 0  }
   0x2   :  { %s3212_s13 = smov 0  }
   0x3 LB: > { %s28_s14 = sadd.s32 1, %s3135_s11  ;;  %s31_s15 = sadd.s32 1, %s3139_s12  ;;  %s3143_s13 = sphi %s3212_s13, %s19_s13   ;;  %s3139_s12 = sphi %s3210_s12, %s4462_s12   ;;  %s3135_s11 = sphi %s3208_s11, %s4461_s11   ;;  %s3131_s10 = sphi %s3206_s10, %s4460_s10   ;;  %s3127_s30 = sphi %s3204_s30, %s4459_s30  }
   0x4   : > { %p29_p0 = scmp.ge.s32.totalorder %s28_s14, 4  ;;  %p2682_p1 = scmp.ge.s32.totalorder %s3143_s13, 1 }
   0x5   : > { %p309_p2 = scmp.lt.s32.totalorder %s3143_s13, 9 }
   0x6   : > { %s4464_s14 = smov (%p29_p0, %s28_s14), 0  ;;  %s4466_s15 = smov (!%p29_p0, %s31_s15), %s3139_s12 }
   0x7   : > { %p310_p3 = pnand %p2682_p1, %p309_p2  ;;  %p33_p4 = scmp.ge.s32.totalorder %s4466_s15, 2 }
   0x8   : > { %s2683_s16 = sshll.u32 (!%p310_p3), %s3127_s30, 2  ;;  %p356_p5 = scmp.lt.s32.totalorder (!%p310_p3), %s3131_s10, 1 }
   0x9   : > { %s4468_s15 = smov (%p33_p4, %s4466_s15), 0  ;;  %313 = sbr.rel (%p310_p3) target bundleno = 1671 (0x687), region = 56 }
   0xa   : > { %p358_p6 = scmp.lt.s32.totalorder (!%p310_p3), %s2683_s16, 15  ;;  %s3146_s25 = smov (!%p310_p3), 120  }
   0xb   : > { %s3147_s26 = smov (!%p310_p3), 104   ;;  %s3148_s27 = smov (!%p310_p3), 96  }
   0xc   : > { %s3149_s28 = smov (!%p310_p3), 112   ;;  %s3150_s29 = smov (!%p310_p3), 64  }
   0xd   : > { %s3153_s21 = smov (!%p310_p3), 24  }
   0xe   : > { %s4470_s10 = smov (!%p356_p5, %s3131_s10), 1  ;;  %s4472_s16 = smov (!%p358_p6, %s2683_s16), 15  ;;  %vm387_vm0 = vcmask 261120   ;;  %v3145_v16 = vmov 32.0  }
   0xf   : > { %s2685_s17 = sshll.u32 %s4470_s10, 5  ;;  %s2684_s18 = sshll.u32 %s4472_s16, 1  ;;  %2951 = vrcp.f32 %v3145_v16 }
  0x10   : > { %s3234_s19 = sadd.s32 %s2685_s17, %s2684_s18  ;;  %s3152_s18 = smov 16  }
  0x11   : > { %s2686_s20 = sshll.u32 %s3234_s19, 3 }
  0x12   : > { %s3242_s23 = scalar_lea.vmem %s4441_s0, %s2686_s20  ;;  %s4394_s24 = scalar_lea.vmem %s4450_s9, %s2686_s20 }
  0x13   : > { %v381_v0 = vld [vmem:[%s3242_s23 + $0x20] sm:$0xff]  ;;  %v380_v1 = vld [vmem:[%s3242_s23 + $0x18] sm:$0xff]  ;;  %v383_v6 = vld [vmem:[%s3242_s23 + $0x30] sm:$0xff] }
  0x14   : > { %v377_v2 = vld [vmem:[%s3242_s23] sm:$0xff]  ;;  %v400_v3 = vsel %vm387_vm0, %v381_v0, 0.0  ;;  %v397_v4 = vsel %vm387_vm0, %v380_v1, 0.0  ;;  %v378_v7 = vld [vmem:[%s3242_s23 + $0x8] sm:$0xff]  ;;  %v379_v8 = vld [vmem:[%s3242_s23 + $0x10] sm:$0xff]  ;;  %v406_v9 = vsel %vm387_vm0, %v383_v6, 0.0 }
  0x15   : > { %401 = vadd.xlane.f32.xlu1 %v400_v3  ;;  %398 = vadd.xlane.f32.xlu2 %v397_v4  ;;  %v388_v5 = vsel %vm387_vm0, %v377_v2, 0.0  ;;  %v391_v10 = vsel %vm387_vm0, %v378_v7, 0.0  ;;  %v394_v11 = vsel %vm387_vm0, %v379_v8, 0.0  ;;  %v382_v12 = vld [vmem:[%s3242_s23 + $0x28] sm:$0xff]  ;;  %v384_v13 = vld [vmem:[%s3242_s23 + $0x38] sm:$0xff]  ;;  %v2952_v17 = vpop.eup %2951 }
  0x16   : > { %389 = vadd.xlane.f32.xlu0 %v388_v5  ;;  %v403_v14 = vsel %vm387_vm0, %v382_v12, 0.0  ;;  %v409_v15 = vsel %vm387_vm0, %v384_v13, 0.0  ;;  %v413_v18 = vmul.f32 32.0, %v2952_v17  ;;  %vm417_vm1 = vweird.f32 %v2952_v17  ;;  %v629_v3 = vld [vmem:[%s4444_s3 + $0x18] sm:$0xff] }
  0x17   : > { %2805 = vmatpush.msra.mxu1 %v629_v3  ;;  %670 = vmatpush.msra.mxu0 %v629_v3 }
  0x18   : > { %v414_v19 = vsub.f32 1.0, %v413_v18  ;;  %2807 = vmatpush.msra.mxu3 %v629_v3  ;;  %2806 = vmatpush.msra.mxu2 %v629_v3 }
  0x1a   : > { %v415_v20 = vmul.f32 %v2952_v17, %v414_v19 }
  0x1c   : > { %v416_v21 = vadd.f32 %v2952_v17, %v415_v20 }
  0x1d   : > { %407 = vadd.xlane.f32.xlu1 %v406_v9  ;;  %392 = vadd.xlane.f32.xlu2 %v391_v10  ;;  %v626_v9 = vld [vmem:[%s4444_s3] sm:$0xff] }
  0x1e   : > { %395 = vadd.xlane.f32.xlu0 %v394_v11  ;;  %v3260_v22 = vsel %vm417_vm1, %v2952_v17, %v416_v21 }
  0x25   : > { %404 = vadd.xlane.f32.xlu1 %v403_v14 }
  0x26   : > { %410 = vadd.xlane.f32.xlu0 %v409_v15 }
  0x88   : > { %v402_v23 = vpop.xlane.xlu1 %401  ;;  %v399_v24 = vpop.xlane.xlu2 %398 }
  0x89   : > { %v423_v25 = vmul.f32 %v3260_v22, %v402_v23  ;;  %v390_v26 = vpop.xlane.xlu0 %389  ;;  %v422_v42 = vmul.f32 %v3260_v22, %v399_v24 }
  0x8a   : > { %v419_v27 = vmul.f32 %v3260_v22, %v390_v26 }
  0x8b   : > { %v3264_v28 = vsub.f32 %v381_v0, %v423_v25  ;;  %v3292_v49 = vsub.f32 %v380_v1, %v422_v42 }
  0x8c   : > { %v3266_v29 = vsub.f32 %v377_v2, %v419_v27 }
  0x8d   : > { %v439_v30 = vmul.f32 %v3264_v28, %v3264_v28  ;;  %v438_v56 = vmul.f32 %v3292_v49, %v3292_v49 }
  0x8e   : > { %v435_v31 = vmul.f32 %v3266_v29, %v3266_v29 }
  0x8f   : > { %v455_v32 = vsel %vm387_vm0, %v439_v30, 0.0  ;;  %v452_v59 = vsel %vm387_vm0, %v438_v56, 0.0 }
  0x90   : > { %456 = vadd.xlane.f32.xlu1 %v455_v32  ;;  %v408_v33 = vpop.xlane.xlu1 %407  ;;  %v393_v34 = vpop.xlane.xlu2 %392  ;;  %v443_v35 = vsel %vm387_vm0, %v435_v31, 0.0 }
  0x91   : > { %v425_v36 = vmul.f32 %v3260_v22, %v408_v33  ;;  %v420_v37 = vmul.f32 %v3260_v22, %v393_v34  ;;  %444 = vadd.xlane.f32.xlu2 %v443_v35  ;;  %v396_v38 = vpop.xlane.xlu0 %395 }
  0x92   : > { %v421_v39 = vmul.f32 %v3260_v22, %v396_v38 }
  0x93   : > { %v3277_v40 = vsub.f32 %v383_v6, %v425_v36  ;;  %v3279_v41 = vsub.f32 %v378_v7, %v420_v37  ;;  %v628_v6 = vld [vmem:[%s4444_s3 + $0x10] sm:$0xff]  ;;  %v627_v7 = vld [vmem:[%s4444_s3 + $0x8] sm:$0xff] }
  0x94   : > { %v3282_v43 = vsub.f32 %v379_v8, %v421_v39  ;;  %2808 = vmatpush.msra.mxu1 %v628_v6  ;;  %671 = vmatpush.msra.mxu0 %v628_v6 }
  0x95   : > { %v436_v44 = vmul.f32 %v3279_v41, %v3279_v41  ;;  %v441_v45 = vmul.f32 %v3277_v40, %v3277_v40  ;;  %2810 = vmatpush.msra.mxu3 %v628_v6  ;;  %2809 = vmatpush.msra.mxu2 %v628_v6 }
  0x96   : > { %v437_v46 = vmul.f32 %v3282_v43, %v3282_v43  ;;  %2811 = vmatpush.msra.mxu1 %v627_v7  ;;  %672 = vmatpush.msra.mxu0 %v627_v7 }
  0x97   : > { %v446_v47 = vsel %vm387_vm0, %v436_v44, 0.0  ;;  %v461_v48 = vsel %vm387_vm0, %v441_v45, 0.0  ;;  %2813 = vmatpush.msra.mxu3 %v627_v7  ;;  %2812 = vmatpush.msra.mxu2 %v627_v7  ;;  %v3389_v7 = vld [vmem:[%s4443_s2] ss:$0 sm:$0xff] }
  0x98   : > { %447 = vadd.xlane.f32.xlu1 %v446_v47  ;;  %v449_v50 = vsel %vm387_vm0, %v437_v46, 0.0  ;;  %v405_v51 = vpop.xlane.xlu1 %404  ;;  %2814 = vmatpush.msra.mxu1 %v626_v9 }
  0x99   : > { %462 = vadd.xlane.f32.xlu2 %v461_v48  ;;  %450 = vadd.xlane.f32.xlu0 %v449_v50  ;;  %v411_v52 = vpop.xlane.xlu0 %410  ;;  %v424_v54 = vmul.f32 %v3260_v22, %v405_v51 }
  0x9a   : > { %v426_v53 = vmul.f32 %v3260_v22, %v411_v52  ;;  %673 = vmatpush.msra.mxu0 %v626_v9  ;;  %2816 = vmatpush.msra.mxu3 %v626_v9 }
  0x9b   : > { %v3301_v57 = vsub.f32 %v382_v12, %v424_v54  ;;  %2815 = vmatpush.msra.mxu2 %v626_v9 }
  0x9c   : > { %v3297_v55 = vsub.f32 %v384_v13, %v426_v53 }
  0x9d   : > { %v440_v61 = vmul.f32 %v3301_v57, %v3301_v57 }
  0x9e   : > { %v442_v58 = vmul.f32 %v3297_v55, %v3297_v55 }
  0x9f   : > { %v458_v62 = vsel %vm387_vm0, %v440_v61, 0.0 }
  0xa0   : > { %v464_v60 = vsel %vm387_vm0, %v442_v58, 0.0  ;;  %v3361_v58 = vld [vmem:[%s4442_s1] ss:$0 sm:$0xff] }
  0xa1   : > { %453 = vadd.xlane.f32.xlu0 %v452_v59  ;;  %465 = vadd.xlane.f32.xlu2 %v464_v60 }
  0xa9   : > { %459 = vadd.xlane.f32.xlu0 %v458_v62 }
 0x103   : > { %v457_v63 = vpop.xlane.xlu1 %456 }
 0x104   : > { %v471_v0 = vmul.f32 %v457_v63, %v3260_v22  ;;  %v445_v1 = vpop.xlane.xlu2 %444 }
 0x105   : > { %v467_v2 = vmul.f32 %v445_v1, %v3260_v22 }
 0x106   : > { %v3315_v4 = vadd.f32 1e-05, %v471_v0 }
 0x107   : > { %v475_v5 = vadd.f32 1e-05, %v467_v2 }
 0x108   : > { %2953 = vrsqrt.f32 %v3315_v4  ;;  %vm529_vm5 = vweird.f32 %v3315_v4 }
 0x109   : > { %2955 = vrsqrt.f32 %v475_v5  ;;  %vm489_vm3 = vweird.f32 %v475_v5 }
 0x10b   : > { %v448_v8 = vpop.xlane.xlu1 %447 }
 0x10c   : > { %v468_v10 = vmul.f32 %v448_v8, %v3260_v22  ;;  %v463_v11 = vpop.xlane.xlu2 %462  ;;  %v451_v12 = vpop.xlane.xlu0 %450 }
 0x10d   : > { %v473_v13 = vmul.f32 %v463_v11, %v3260_v22  ;;  %v469_v14 = vmul.f32 %v451_v12, %v3260_v22 }
 0x10e   : > { %v3330_v15 = vpop.eup %2953  ;;  %v3332_v16 = vadd.f32 1e-05, %v468_v10 }
 0x10f   : > { %v2956_v17 = vpop.eup %2955  ;;  %v524_v18 = vmul.f32 %v3330_v15, %v3315_v4  ;;  %v481_v19 = vadd.f32 1e-05, %v473_v13  ;;  %v3336_v20 = vadd.f32 1e-05, %v469_v14  ;;  %vm530_vm6 = vweird.f32 %v3330_v15 }
 0x110   : > { %v484_v21 = vmul.f32 %v2956_v17, %v475_v5  ;;  %2957 = vrsqrt.f32 %v3332_v16  ;;  %vm490_vm2 = vweird.f32 %v2956_v17  ;;  %vm499_vm9 = vweird.f32 %v3332_v16  ;;  %vm3381_vm13 = vmor %vm529_vm5, %vm530_vm6 }
 0x111   : > { %v525_v23 = vmul.f32 %v3330_v15, %v524_v18  ;;  %2959 = vrsqrt.f32 %v481_v19  ;;  %vm491_vm4 = vmor %vm489_vm3, %vm490_vm2  ;;  %vm549_vm7 = vweird.f32 %v481_v19  ;;  %vm509_vm15 = vweird.f32 %v3336_v20 }
 0x112   : > { %v485_v24 = vmul.f32 %v2956_v17, %v484_v21  ;;  %2961 = vrsqrt.f32 %v3336_v20  ;;  %vm617_vm3 = vcmask 1043456  }
 0x113   : > { %v526_v30 = vmul.f32 0.5, %v525_v23 }
 0x114   : > { %v486_v25 = vmul.f32 0.5, %v485_v24  ;;  %v466_v26 = vpop.xlane.xlu2 %465  ;;  %v454_v27 = vpop.xlane.xlu0 %453 }
 0x115   : > { %v474_v31 = vmul.f32 %v466_v26, %v3260_v22  ;;  %v470_v32 = vmul.f32 %v454_v27, %v3260_v22  ;;  %v527_v45 = vsub.f32 1.5, %v526_v30 }
 0x116   : > { %v3343_v33 = vpop.eup %2957  ;;  %v487_v34 = vsub.f32 1.5, %v486_v25 }
 0x117   : > { %v2960_v35 = vpop.eup %2959  ;;  %v494_v36 = vmul.f32 %v3343_v33, %v3332_v16  ;;  %v3347_v37 = vadd.f32 1e-05, %v474_v31  ;;  %v3349_v44 = vadd.f32 1e-05, %v470_v32  ;;  %v528_v59 = vmul.f32 %v3330_v15, %v527_v45 }
 0x118   : > { %v2962_v38 = vpop.eup %2961  ;;  %v488_v39 = vmul.f32 %v2956_v17, %v487_v34  ;;  %v544_v42 = vmul.f32 %v2960_v35, %v481_v19  ;;  %vm550_vm8 = vweird.f32 %v2960_v35  ;;  %vm500_vm10 = vweird.f32 %v3343_v33 }
 0x119   : > { %v495_v46 = vmul.f32 %v3343_v33, %v494_v36  ;;  %v504_v47 = vmul.f32 %v2962_v38, %v3336_v20  ;;  %2963 = vrsqrt.f32 %v3347_v37  ;;  %vm3369_vm11 = vmor %vm549_vm7, %vm550_vm8  ;;  %vm510_vm12 = vweird.f32 %v2962_v38 }
 0x11a   : > { %v492_v48 = vsel %vm491_vm4, %v2956_v17, %v488_v39  ;;  %v545_v50 = vmul.f32 %v2960_v35, %v544_v42  ;;  %2965 = vrsqrt.f32 %v3349_v44  ;;  %v532_v8 = vsel %vm3381_vm13, %v3330_v15, %v528_v59  ;;  %vm3394_vm14 = vmor %vm499_vm9, %vm500_vm10 }
 0x11b   : > { %v496_v51 = vmul.f32 0.5, %v495_v46  ;;  %v505_v52 = vmul.f32 %v2962_v38, %v504_v47  ;;  %v563_v53 = vmul.f32 %v492_v48, %v3266_v29  ;;  %vm511_vm1 = vmor %vm509_vm15, %vm510_vm12  ;;  %v567_v17 = vmul.f32 %v532_v8, %v3264_v28 }
 0x11c   : > { %v546_v54 = vmul.f32 0.5, %v545_v50  ;;  %v460_v56 = vpop.xlane.xlu0 %459  ;;  %vm559_vm2 = vweird.f32 %v3347_v37  ;;  %vm519_vm7 = vweird.f32 %v3349_v44  ;;  %vm759_vm12 = vcmask 64512  }
 0x11d   : > { %v497_v60 = vsub.f32 1.5, %v496_v51  ;;  %v506_v61 = vmul.f32 0.5, %v505_v52  ;;  %v472_v62 = vmul.f32 %v460_v56, %v3260_v22  ;;  %v574_v6 = vmul.f32 %v3361_v58, %v563_v53 }
 0x11e   : > { %v547_v29 = vsub.f32 1.5, %v546_v54  ;;  %vm1412_vm13 = vcmask 130048  }
 0x11f   : > { %v498_v63 = vmul.f32 %v3343_v33, %v497_v60  ;;  %v507_v1 = vsub.f32 1.5, %v506_v61  ;;  %v3373_v2 = vadd.f32 1e-05, %v472_v62  ;;  %v3375_v3 = vpop.eup %2963  ;;  %v585_v19 = vadd.f32 %v3389_v7, %v574_v6 }
 0x120   : > { %v548_v5 = vmul.f32 %v2960_v35, %v547_v29  ;;  %v554_v10 = vmul.f32 %v3375_v3, %v3347_v37  ;;  %v2966_v11 = vpop.eup %2965  ;;  %vm560_vm4 = vweird.f32 %v3375_v3 }
 0x121   : > { %v508_v4 = vmul.f32 %v2962_v38, %v507_v1  ;;  %2967 = vrsqrt.f32 %v3373_v2  ;;  %v502_v13 = vsel %vm3394_vm14, %v3343_v33, %v498_v63  ;;  %v514_v16 = vmul.f32 %v2966_v11, %v3349_v44  ;;  %vm3424_vm6 = vmor %vm559_vm2, %vm560_vm4 }
 0x122   : > { %v552_v12 = vsel %vm3369_vm11, %v2960_v35, %v548_v5  ;;  %v555_v15 = vmul.f32 %v3375_v3, %v554_v10  ;;  %v564_v24 = vmul.f32 %v502_v13, %v3279_v41  ;;  %v600_v31 = vrot.slane %v585_v19, 4 }
 0x123   : > { %v512_v14 = vsel %vm511_vm1, %v2962_v38, %v508_v4  ;;  %v569_v20 = vmul.f32 %v552_v12, %v3277_v40  ;;  %v515_v23 = vmul.f32 %v2966_v11, %v514_v16  ;;  %v578_v40 = vmul.f32 %v3361_v58, %v567_v17 }
 0x124   : > { %v565_v18 = vmul.f32 %v512_v14, %v3282_v43  ;;  %v556_v21 = vmul.f32 0.5, %v555_v15  ;;  %vm520_vm5 = vweird.f32 %v2966_v11  ;;  %v575_v38 = vmul.f32 %v3361_v58, %v564_v24 }
 0x125   : > { %v516_v27 = vmul.f32 0.5, %v515_v23  ;;  %v580_v28 = vmul.f32 %v3361_v58, %v569_v20  ;;  %vm521_vm8 = vmor %vm519_vm7, %vm520_vm5  ;;  %vm539_vm9 = vweird.f32 %v3373_v2  ;;  %v589_v46 = vadd.f32 %v3389_v7, %v578_v40 }
 0x126   : > { %v576_v25 = vmul.f32 %v3361_v58, %v565_v18  ;;  %v557_v26 = vsub.f32 1.5, %v556_v21  ;;  %v586_v51 = vadd.f32 %v3389_v7, %v575_v38  ;;  %vm2437_vm14 = vcmask 195584  }
 0x127   : > { %v2968_v43 = vpop.eup %2967  ;;  %v517_v41 = vsub.f32 1.5, %v516_v27  ;;  %v591_v45 = vadd.f32 %v3389_v7, %v580_v28  ;;  %v603_v56 = vrot.slane %v589_v46, 4 }
 0x128   : > { %v587_v30 = vadd.f32 %v3389_v7, %v576_v25  ;;  %v558_v32 = vmul.f32 %v3375_v3, %v557_v26  ;;  %v534_v33 = vmul.f32 %v2968_v43, %v3373_v2  ;;  %vm540_vm10 = vweird.f32 %v2968_v43 }
 0x129   : > { %v518_v39 = vmul.f32 %v2966_v11, %v517_v41  ;;  %v597_v53 = vrot.slane %v591_v45, 4  ;;  %vm541_vm11 = vmor %vm539_vm9, %vm540_vm10  ;;  %v621_v61 = vsel %vm617_vm3, %v603_v56, %v591_v45  ;;  %v612_v29 = vrot.slane %v586_v51, 4 }
 0x12a   : > { %v620_v35 = vsel %vm617_vm3, %v600_v31, %v587_v30  ;;  %v594_v36 = vrot.slane %v587_v30, 4  ;;  %v535_v42 = vmul.f32 %v2968_v43, %v534_v33  ;;  %v562_v47 = vsel %vm3424_vm6, %v3375_v3, %v558_v32 }
 0x12b   : > { %2693 = vmatmul.msk.f32.vlgmr.msra.gmra.mxu1 %vm387_vm0, %v620_v35  ;;  %v522_v48 = vsel %vm521_vm8, %v2966_v11, %v518_v39  ;;  %v570_v54 = vmul.f32 %v562_v47, %v3297_v55 }
 0x12c   : > { %v618_v37 = vsel %vm617_vm3, %v585_v19, %v594_v36  ;;  %v536_v50 = vmul.f32 0.5, %v535_v42  ;;  %v566_v44 = vmul.f32 %v522_v48, %v3292_v49  ;;  %v619_v49 = vsel %vm617_vm3, %v589_v46, %v597_v53 }
 0x12d   : > { %2691 = vmatmul.msk.f32.vlgmr.msra.gmra.mxu0 %vm387_vm0, %v618_v37  ;;  %v581_v2 = vmul.f32 %v3361_v58, %v570_v54 }
 0x12e   : > { %v537_v52 = vsub.f32 1.5, %v536_v50  ;;  %v577_v59 = vmul.f32 %v3361_v58, %v566_v44 }
 0x12f   : > { %v592_v6 = vadd.f32 %v3389_v7, %v581_v2 }
 0x130   : > { %v538_v60 = vmul.f32 %v2968_v43, %v537_v52  ;;  %v588_v62 = vadd.f32 %v3389_v7, %v577_v59 }
 0x131   : > { %v609_v9 = vrot.slane %v592_v6, 4 }
 0x132   : > { %v542_v63 = vsel %vm541_vm11, %v2968_v43, %v538_v60  ;;  %v624_v0 = vsel %vm617_vm3, %v612_v29, %v588_v62  ;;  %v606_v1 = vrot.slane %v588_v62, 4 }
 0x133   : > { %2694 = vmatmul.msk.f32.gmra.mxu1 %vm387_vm0, %v621_v61  ;;  %v568_v55 = vmul.f32 %v542_v63, %v3301_v57  ;;  %2697 = vmatmul.msk.f32.vlgmr.msra.gmra.mxu3 %vm387_vm0, %v624_v0 }
 0x134   : > { %v622_v3 = vsel %vm617_vm3, %v586_v51, %v606_v1 }
 0x135   : > { %2692 = vmatmul.msk.f32.gmra.mxu0 %vm387_vm0, %v619_v49  ;;  %v579_v22 = vmul.f32 %v3361_v58, %v568_v55  ;;  %2695 = vmatmul.msk.f32.vlgmr.msra.gmra.mxu2 %vm387_vm0, %v622_v3  ;;  %v2949_v58 = vld [vmem:[%s4445_s4] ss:$0 sm:$0xff] }
 0x137   : > { %v590_v5 = vadd.f32 %v3389_v7, %v579_v22 }
 0x139   : > { %v615_v8 = vrot.slane %v590_v5, 4  ;;  %v623_v4 = vsel %vm617_vm3, %v590_v5, %v609_v9 }
 0x13b   : > { %v625_v57 = vsel %vm617_vm3, %v615_v8, %v592_v6 }
 0x13c   : > { %2698 = vmatmul.msk.f32.gmra.mxu3 %vm387_vm0, %v625_v57 }
 0x13d   : > { %2696 = vmatmul.msk.f32.gmra.mxu2 %vm387_vm0, %v623_v4 }
 0x1a8   : > { %v681_v10 = vpop.f32.mrf.mxu1 }
 0x1a9   : > { %v3465_v11 = vadd.f32 %v2949_v58, %v681_v10 }
 0x1aa   : > { %v675_v12 = vpop.f32.mrf.mxu0 }
 0x1ab   : > { %v3467_v13 = vadd.f32 %v2949_v58, %v675_v12  ;;  %711 = vrot.lane.b32.xlu2 %v3465_v11, %s3146_s25 }
 0x1ad   : > { %739 = vrot.lane.b32.xlu1 %v3467_v13, %s3147_s26  ;;  %707 = vrot.lane.b32.xlu0 %v3467_v13, %s3146_s25 }
 0x1b0   : > { %v684_v17 = vpop.f32.mrf.mxu1 }
 0x1b1   : > { %v3497_v19 = vadd.f32 %v2949_v58, %v684_v17 }
 0x1b2   : > { %v678_v7 = vpop.f32.mrf.mxu0 }
 0x1b3   : > { %755 = vrot.lane.b32.xlu2 %v3467_v13, %s3148_s27  ;;  %v3481_v15 = vadd.f32 %v2949_v58, %v678_v7 }
 0x1b5   : > { %743 = vrot.lane.b32.xlu1 %v3465_v11, %s3147_s26  ;;  %723 = vrot.lane.b32.xlu0 %v3467_v13, %s3149_s28  ;;  %v2866_v7 = vpack.i.bf16 %v3467_v13, %v3481_v15 }
 0x1b6   : > { %v693_v18 = vpop.f32.mrf.mxu3 }
 0x1b7   : > { %v3499_v20 = vadd.f32 %v2949_v58, %v693_v18 }
 0x1b8   : > { %v687_v14 = vpop.f32.mrf.mxu2 }
 0x1b9   : > { %v3483_v16 = vadd.f32 %v2949_v58, %v687_v14 }
 0x1bb   : > { %715 = vrot.lane.b32.xlu2 %v3483_v16, %s3146_s25 }
 0x1bd   : > { %709 = vrot.lane.b32.xlu1 %v3481_v15, %s3146_s25  ;;  %791 = vrot.lane.b32.xlu0 %v3465_v11, %s3148_s27 }
 0x1bf   : > { %v696_v24 = vpop.f32.mrf.mxu3 }
 0x1c0   : > { %v690_v21 = vpop.f32.mrf.mxu2  ;;  %v3527_v25 = vadd.f32 %v2949_v58, %v696_v24 }
 0x1c1   : > { %v3519_v23 = vadd.f32 %v2949_v58, %v690_v21 }
 0x1c3   : > { %826 = vrot.lane.b32.xlu2 %v3483_v16, %s3148_s27  ;;  %v2881_v18 = vpack.i.bf16 %v3483_v16, %v3519_v23 }
 0x1c5   : > { %725 = vrot.lane.b32.xlu1 %v3481_v15, %s3149_s28  ;;  %727 = vrot.lane.b32.xlu0 %v3465_v11, %s3149_s28 }
 0x1cb   : > { %861 = vrot.lane.b32.xlu2 %v3499_v20, %s3148_s27 }
 0x1cd   : > { %793 = vrot.lane.b32.xlu1 %v3497_v19, %s3148_s27  ;;  %719 = vrot.lane.b32.xlu0 %v3499_v20, %s3146_s25 }
 0x1d3   : > { %747 = vrot.lane.b32.xlu2 %v3483_v16, %s3147_s26 }
 0x1d5   : > { %757 = vrot.lane.b32.xlu1 %v3481_v15, %s3148_s27  ;;  %731 = vrot.lane.b32.xlu0 %v3483_v16, %s3149_s28 }
 0x1db   : > { %713 = vrot.lane.b32.xlu2 %v3497_v19, %s3146_s25 }
 0x1dd   : > { %729 = vrot.lane.b32.xlu1 %v3497_v19, %s3149_s28  ;;  %735 = vrot.lane.b32.xlu0 %v3499_v20, %s3149_s28 }
 0x1e3   : > { %717 = vrot.lane.b32.xlu2 %v3519_v23, %s3146_s25 }
 0x1e5   : > { %745 = vrot.lane.b32.xlu1 %v3497_v19, %s3147_s26  ;;  %741 = vrot.lane.b32.xlu0 %v3481_v15, %s3147_s26 }
 0x1eb   : > { %733 = vrot.lane.b32.xlu2 %v3519_v23, %s3149_s28 }
 0x1ed   : > { %721 = vrot.lane.b32.xlu1 %v3527_v25, %s3146_s25  ;;  %828 = vrot.lane.b32.xlu0 %v3519_v23, %s3148_s27 }
 0x1f3   : > { %737 = vrot.lane.b32.xlu2 %v3527_v25, %s3149_s28 }
 0x1f5   : > { %863 = vrot.lane.b32.xlu1 %v3527_v25, %s3148_s27  ;;  %749 = vrot.lane.b32.xlu0 %v3519_v23, %s3147_s26 }
 0x1fd   : > { %753 = vrot.lane.b32.xlu1 %v3527_v25, %s3147_s26 }
 0x205   : > { %v3543_v26 = vpop.permute.xlu2 %711 }
 0x206   : > { %931 = vrot.lane.b32.xlu2 %v3543_v26, %s3148_s27 }
 0x20d   : > { %v756_v27 = vpop.permute.xlu2 %755 }
 0x215   : > { %v3547_v28 = vpop.permute.xlu2 %715 }
 0x216   : > { %966 = vrot.lane.b32.xlu1 %v3547_v28, %s3148_s27  ;;  %v2896_v60 = vpack.i.bf16 %v3547_v28, %v3499_v20 }
 0x21d   : > { %v827_v43 = vpop.permute.xlu2 %826 }
 0x21f   : > { %v3551_v30 = vpop.permute.xlu1 %739  ;;  %v3553_v31 = vpop.permute.xlu0 %707 }
 0x220   : > { %896 = vrot.lane.b32.xlu0 %v3553_v31, %s3148_s27  ;;  %v2876_v56 = vpack.i.bf16 %v3553_v31, %v3465_v11 }
 0x225   : > { %v862_v40 = vpop.permute.xlu2 %861 }
 0x227   : > { %v3557_v32 = vpop.permute.xlu1 %743  ;;  %v3559_v41 = vpop.permute.xlu0 %723 }
 0x228   : > { %1036 = vrot.lane.b32.xlu2 %v3559_v41, %s3148_s27  ;;  %v2891_v59 = vpack.i.bf16 %v3559_v41, %v3543_v26 }
 0x22d   : > { %v3563_v33 = vpop.permute.xlu2 %747 }
 0x22f   : > { %v3565_v34 = vpop.permute.xlu1 %709  ;;  %v792_v35 = vpop.permute.xlu0 %791 }
 0x230   : > { %v2871_v62 = vpack.i.bf16 %v3565_v34, %v3497_v19 }
 0x235   : > { %v3567_v36 = vpop.permute.xlu2 %713 }
 0x236   : > { %933 = vrot.lane.b32.xlu1 %v3567_v36, %s3148_s27 }
 0x237   : > { %v3569_v38 = vpop.permute.xlu1 %725  ;;  %v3573_v39 = vpop.permute.xlu0 %727 }
 0x238   : > { %1071 = vrot.lane.b32.xlu0 %v3573_v39, %s3148_s27  ;;  %v2886_v63 = vpack.i.bf16 %v3569_v38, %v3567_v36 }
 0x23d   : > { %v3597_v47 = vpop.permute.xlu2 %717 }
 0x23e   : > { %751 = vrot.lane.b32.xlu1 %v3499_v20, %s3147_s26  ;;  %v2916_v5 = vpack.i.bf16 %v3597_v47, %v3527_v25 }
 0x23f   : > { %v794_v42 = vpop.permute.xlu1 %793  ;;  %v3579_v45 = vpop.permute.xlu0 %719 }
 0x240   : > { %2703 = vmatpush.xpose.msk.msrb.mxu2 %vm759_vm12, %v794_v42  ;;  %1038 = vrot.lane.b32.xlu0 %v3569_v38, %s3148_s27 }
 0x241   : > { %1001 = vrot.lane.b32.xlu2 %v3579_v45, %s3148_s27 }
 0x244   : > { %2704 = vmatpush.xpose.msk.msrb.mxu2 %vm759_vm12, %v792_v35 }
 0x245   : > { %v3651_v61 = vpop.permute.xlu2 %733 }
 0x246   : > { %1176 = vrot.lane.b32.xlu1 %v3551_v30, %s3148_s27 }
 0x247   : > { %v758_v37 = vpop.permute.xlu1 %757  ;;  %2705 = vmatmul.msk.f32.vlgmr.msrb.gmra.mxu2 %vm759_vm12, %v3465_v11  ;;  %v3591_v46 = vpop.permute.xlu0 %731 }
 0x248   : > { %2699 = vmatpush.xpose.msk.msrb.mxu1 %vm759_vm12, %v758_v37  ;;  %v2911_v3 = vpack.i.bf16 %v3591_v46, %v3579_v45 }
 0x249   : > { %898 = vrot.lane.b32.xlu2 %v3565_v34, %s3148_s27 }
 0x24c   : > { %2700 = vmatpush.xpose.msk.msrb.mxu1 %vm759_vm12, %v756_v27 }
 0x24d   : > { %v3661_v29 = vpop.permute.xlu2 %737 }
 0x24e   : > { %968 = vrot.lane.b32.xlu1 %v3597_v47, %s3148_s27 }
 0x24f   : > { %v3599_v48 = vpop.permute.xlu1 %729  ;;  %2701 = vmatmul.msk.f32.vlgmr.msrb.gmra.mxu1 %vm759_vm12, %v3467_v13  ;;  %2706 = vmatmul.msk.f32.gmra.mxu2 %vm759_vm12, %v3497_v19  ;;  %v3607_v50 = vpop.permute.xlu0 %735 }
 0x250   : > { %1073 = vrot.lane.b32.xlu0 %v3599_v48, %s3148_s27 }
 0x256   : > { %1141 = vrot.lane.b32.xlu1 %v3607_v50, %s3148_s27 }
 0x257   : > { %v3611_v44 = vpop.permute.xlu1 %745  ;;  %2702 = vmatmul.msk.f32.gmra.mxu1 %vm759_vm12, %v3481_v15  ;;  %v3617_v51 = vpop.permute.xlu0 %741 }
 0x258   : > { %1178 = vrot.lane.b32.xlu2 %v3617_v51, %s3148_s27  ;;  %v2901_v1 = vpack.i.bf16 %v3617_v51, %v3599_v48 }
 0x25f   : > { %v3621_v52 = vpop.permute.xlu1 %721  ;;  %v829_v53 = vpop.permute.xlu0 %828 }
 0x260   : > { %1003 = vrot.lane.b32.xlu0 %v3621_v52, %s3148_s27  ;;  %1213 = vrot.lane.b32.xlu2 %v3611_v44, %s3148_s27  ;;  %v932_v0 = vpop.permute.xlu2 %931  ;;  %v2921_v57 = vpack.i.bf16 %v3651_v61, %v3621_v52 }
 0x261   : > { %2707 = vmatpush.xpose.msk.msrb.mxu3 %vm759_vm12, %v829_v53 }
 0x265   : > { %2708 = vmatpush.xpose.msk.msrb.mxu3 %vm759_vm12, %v827_v43 }
 0x267   : > { %v864_v54 = vpop.permute.xlu1 %863  ;;  %v3665_v49 = vpop.permute.xlu0 %749 }
 0x268   : > { %2709 = vmatmul.msk.f32.vlgmr.msrb.gmra.mxu3 %vm759_vm12, %v3483_v16  ;;  %2711 = vmatpush.xpose.msk.msra.mxu1 %vm759_vm12, %v864_v54 }
 0x269   : > { %1106 = vrot.lane.b32.xlu0 %v3591_v46, %s3148_s27  ;;  %2877 = vrot.lane.b32.xlu2 %v2876_v56, %s3150_s29 }
 0x26c   : > { %2712 = vmatpush.xpose.msk.msra.mxu1 %vm759_vm12, %v862_v40  ;;  %v1349_v40 = vld [vmem:[%s4446_s5 + $0x8] sm:$0xff] }
 0x26f   : > { %2713 = vmatmul.msk.f32.vlgmr.msra.gmra.mxu1 %vm759_vm12, %v3499_v20  ;;  %v3672_v55 = vpop.permute.xlu1 %753 }
 0x270   : > { %2710 = vmatmul.msk.f32.gmra.mxu3 %vm759_vm12, %v3519_v23  ;;  %v1348_v23 = vld [vmem:[%s4446_s5] sm:$0xff] }
 0x271   : > { %1211 = vrot.lane.b32.xlu0 %v3557_v32, %s3148_s27  ;;  %2892 = vrot.lane.b32.xlu2 %v2891_v59, %s3150_s29 }
 0x277   : > { %2714 = vmatmul.msk.f32.gmra.mxu1 %vm759_vm12, %v3527_v25 }
 0x279   : > { %1246 = vrot.lane.b32.xlu0 %v3563_v33, %s3148_s27  ;;  %2897 = vrot.lane.b32.xlu2 %v2896_v60, %s3150_s29 }
 0x281   : > { %2872 = vrot.lane.b32.xlu0 %v2871_v62, %s3150_s29  ;;  %1108 = vrot.lane.b32.xlu2 %v3651_v61, %s3148_s27 }
 0x282   : > { %v1037_v2 = vpop.permute.xlu2 %1036 }
 0x288   : > { %v967_v6 = vpop.permute.xlu1 %966 }
 0x289   : > { %2887 = vrot.lane.b32.xlu0 %v2886_v63, %s3150_s29  ;;  %1248 = vrot.lane.b32.xlu2 %v3665_v49, %s3148_s27 }
 0x291   : > { %2902 = vrot.lane.b32.xlu0 %v2901_v1, %s3150_s29  ;;  %1283 = vrot.lane.b32.xlu2 %v3672_v55, %s3148_s27 }
 0x292   : > { %v897_v8 = vpop.permute.xlu0 %896 }
 0x299   : > { %2912 = vrot.lane.b32.xlu0 %v2911_v3, %s3150_s29  ;;  %v1355_v3 = vld [vmem:[%s4446_s5 + $0x38] sm:$0xff] }
 0x29b   : > { %v3680_v22 = vpop.permute.xlu2 %1001 }
 0x2a1   : > { %2917 = vrot.lane.b32.xlu0 %v2916_v5, %s3150_s29 }
 0x2a3   : > { %v899_v9 = vpop.permute.xlu2 %898 }
 0x2a4   : > { %2715 = vmatpush.xpose.msk.msra.mxu2 %vm759_vm12, %v899_v9 }
 0x2a8   : > { %2716 = vmatpush.xpose.msk.msra.mxu2 %vm759_vm12, %v897_v8  ;;  %v934_v4 = vpop.permute.xlu1 %933  ;;  %v1350_v8 = vld [vmem:[%s4446_s5 + $0x10] sm:$0xff] }
 0x2a9   : > { %2922 = vrot.lane.b32.xlu0 %v2921_v57, %s3150_s29  ;;  %2719 = vmatpush.xpose.msk.msra.mxu3 %vm759_vm12, %v934_v4 }
 0x2aa   : > { %v1072_v58 = vpop.permute.xlu0 %1071 }
 0x2ab   : > { %2717 = vmatmul.msk.f32.vlgmr.msra.gmra.mxu2 %vm759_vm12, %v3553_v31 }
 0x2ad   : > { %2720 = vmatpush.xpose.msk.msra.mxu3 %vm759_vm12, %v932_v0 }
 0x2b0   : > { %v3694_v10 = vpop.permute.xlu1 %751  ;;  %2721 = vmatmul.msk.f32.vlgmr.msra.gmra.mxu3 %vm759_vm12, %v3543_v26  ;;  %v2906_v26 = vpack.i.bf16 %v3551_v30, %v3573_v39 }
 0x2b1   : > { %1281 = vrot.lane.b32.xlu1 %v3694_v10, %s3148_s27 }
 0x2b2   : > { %v1179_v11 = vpop.permute.xlu2 %1178  ;;  %v1039_v12 = vpop.permute.xlu0 %1038 }
 0x2b3   : > { %2718 = vmatmul.msk.f32.gmra.mxu2 %vm759_vm12, %v3565_v34  ;;  %2731 = vmatpush.xpose.msk.msrb.mxu3 %vm759_vm12, %v1039_v12  ;;  %v1353_v12 = vld [vmem:[%s4446_s5 + $0x28] sm:$0xff] }
 0x2b4   : > { %2747 = vmatpush.xpose.msk.msrb.mxu0 %vm759_vm12, %v1179_v11 }
 0x2b7   : > { %2732 = vmatpush.xpose.msk.msrb.mxu3 %vm759_vm12, %v1037_v2 }
 0x2b8   : > { %v1177_v14 = vpop.permute.xlu1 %1176  ;;  %2722 = vmatmul.msk.f32.gmra.mxu3 %vm759_vm12, %v3567_v36 }
 0x2b9   : > { %2867 = vrot.lane.b32.xlu1 %v2866_v7, %s3150_s29  ;;  %2748 = vmatpush.xpose.msk.msrb.mxu0 %vm759_vm12, %v1177_v14 }
 0x2ba   : > { %v1214_v17 = vpop.permute.xlu2 %1213 }
 0x2bc   : > { %2749 = vmatmul.msk.f32.vlgmr.msrb.gmra.mxu0 %vm759_vm12, %v3551_v30 }
 0x2c0   : > { %v969_v19 = vpop.permute.xlu1 %968  ;;  %2733 = vmatmul.msk.f32.vlgmr.msrb.gmra.mxu3 %vm759_vm12, %v3559_v41 }
 0x2c1   : > { %2723 = vmatpush.xpose.msk.msrb.mxu1 %vm759_vm12, %v969_v19  ;;  %2882 = vrot.lane.b32.xlu1 %v2881_v18, %s3150_s29 }
 0x2c2   : > { %v1074_v15 = vpop.permute.xlu0 %1073 }
 0x2c3   : > { %v3719_v13 = vpop.permute.xlu2 %2877 }
 0x2c4   : > { %2750 = vmatmul.msk.f32.gmra.mxu0 %vm759_vm12, %v3617_v51  ;;  %v2879_v9 = vunpack.i.l.bf16 %v3719_v13 }
 0x2c5   : > { %2724 = vmatpush.xpose.msk.msrb.mxu1 %vm759_vm12, %v967_v6 }
 0x2c8   : > { %2725 = vmatmul.msk.f32.vlgmr.msrb.gmra.mxu1 %vm759_vm12, %v3547_v28  ;;  %2734 = vmatmul.msk.f32.gmra.mxu3 %vm759_vm12, %v3569_v38  ;;  %v1351_v38 = vld [vmem:[%s4446_s5 + $0x18] sm:$0xff] }
 0x2c9   : > { %2735 = vmatpush.xpose.msk.msra.mxu1 %vm759_vm12, %v1074_v15  ;;  %1143 = vrot.lane.b32.xlu1 %v3661_v29, %s3148_s27 }
 0x2ca   : > { %v820_v20 = vpop.f32.mrf.mxu2 }
 0x2cb   : > { %v3731_v16 = vpop.permute.xlu2 %2892  ;;  %v1318_v63 = vmul.f32 0.35355338, %v820_v20  ;;  %v1142_v20 = vpop.permute.xlu1 %1141 }
 0x2cc   : > { %v785_v21 = vpop.f32.mrf.mxu1  ;;  %v2894_v19 = vunpack.i.l.bf16 %v3731_v16 }
 0x2cd   : > { %2736 = vmatpush.xpose.msk.msra.mxu1 %vm759_vm12, %v1072_v58  ;;  %v1316_v24 = vmul.f32 0.35355338, %v785_v21  ;;  %v3810_v58 = vadd.f32 %v1350_v8, %v1318_v63 }
 0x2cf   : > { %v3738_v25 = vadd.f32 %v1348_v23, %v1316_v24  ;;  %v1419_v14 = vsel %vm1412_vm13, %v3810_v58, -inf }
 0x2d0   : > { %2726 = vmatmul.msk.f32.gmra.mxu1 %vm759_vm12, %v3597_v47 }
 0x2d1   : > { %2751 = vmatpush.xpose.msk.msrb.mxu1 %vm759_vm12, %v1214_v17  ;;  %v1413_v27 = vsel %vm1412_vm13, %v3738_v25, -inf  ;;  %2907 = vrot.lane.b32.xlu1 %v2906_v26, %s3150_s29 }
 0x2d2   : > { %v1004_v28 = vpop.permute.xlu0 %1003  ;;  %v823_v41 = vpop.f32.mrf.mxu2 }
 0x2d3   : > { %1414 = vmax.xlane.f32.xlu0 %v1413_v27  ;;  %v3747_v43 = vpop.permute.xlu2 %2897  ;;  %2727 = vmatpush.xpose.msk.msrb.mxu2 %vm759_vm12, %v1004_v28  ;;  %v1319_v35 = vmul.f32 0.35355338, %v823_v41 }
 0x2d4   : > { %v788_v31 = vpop.f32.mrf.mxu1 }
 0x2d5   : > { %v1317_v30 = vmul.f32 0.35355338, %v788_v31  ;;  %v3767_v47 = vadd.f32 %v1351_v38, %v1319_v35 }
 0x2d7   : > { %v3753_v34 = vadd.f32 %v1349_v40, %v1317_v30  ;;  %2728 = vmatpush.xpose.msk.msrb.mxu2 %vm759_vm12, %v3680_v22  ;;  %v1422_v51 = vsel %vm1412_vm13, %v3767_v47, -inf  ;;  %v2880_v40 = vunpack.i.h.bf16 %v3719_v13 }
 0x2d8   : > { %2737 = vmatmul.msk.f32.vlgmr.msra.gmra.mxu1 %vm759_vm12, %v3573_v39 }
 0x2d9   : > { %v1416_v36 = vsel %vm1412_vm13, %v3753_v34, -inf }
 0x2da   : > { %1417 = vmax.xlane.f32.xlu2 %v1416_v36  ;;  %2729 = vmatmul.msk.f32.vlgmr.msrb.gmra.mxu2 %vm759_vm12, %v3579_v45  ;;  %v1358_v36 = vld [vmem:[%s4446_s5 + $0x50] sm:$0xff] }
 0x2db   : > { %v1109_v42 = vpop.permute.xlu2 %1108  ;;  %v1107_v37 = vpop.permute.xlu0 %1106 }
 0x2dc   : > { %2739 = vmatpush.xpose.msk.msra.mxu2 %vm759_vm12, %v1109_v42 }
 0x2e0   : > { %2740 = vmatpush.xpose.msk.msra.mxu2 %vm759_vm12, %v1107_v37  ;;  %2738 = vmatmul.msk.f32.gmra.mxu1 %vm759_vm12, %v3599_v48  ;;  %v1352_v48 = vld [vmem:[%s4446_s5 + $0x20] sm:$0xff] }
 0x2e2   : > { %1423 = vmax.xlane.f32.xlu2 %v1422_v51  ;;  %2730 = vmatmul.msk.f32.gmra.mxu2 %vm759_vm12, %v3621_v52 }
 0x2e3   : > { %v1249_v39 = vpop.permute.xlu2 %1248  ;;  %v1212_v53 = vpop.permute.xlu0 %1211 }
 0x2e4   : > { %2752 = vmatpush.xpose.msk.msrb.mxu1 %vm759_vm12, %v1212_v53  ;;  %2755 = vmatpush.xpose.msk.msrb.mxu2 %vm759_vm12, %v1249_v39  ;;  %v2900_v53 = vunpack.i.h.bf16 %v3747_v43 }
 0x2e8   : > { %2753 = vmatmul.msk.f32.vlgmr.msrb.gmra.mxu1 %vm759_vm12, %v3557_v32 }
 0x2ea   : > { %2741 = vmatmul.msk.f32.vlgmr.msra.gmra.mxu2 %vm759_vm12, %v3591_v46  ;;  %v1354_v46 = vld [vmem:[%s4446_s5 + $0x30] sm:$0xff] }
 0x2eb   : > { %v855_v45 = vpop.f32.mrf.mxu3  ;;  %v1247_v56 = vpop.permute.xlu0 %1246 }
 0x2ec   : > { %v1320_v54 = vmul.f32 0.35355338, %v855_v45  ;;  %v890_v59 = vpop.f32.mrf.mxu1  ;;  %2756 = vmatpush.xpose.msk.msrb.mxu2 %vm759_vm12, %v1247_v56 }
 0x2ed   : > { %v1322_v60 = vmul.f32 0.35355338, %v890_v59 }
 0x2ee   : > { %v3786_v52 = vadd.f32 %v1352_v48, %v1320_v54  ;;  %v1372_v54 = vld [vmem:[%s4446_s5 + $0xc0] sm:$0xff] }
 0x2ef   : > { %v3797_v2 = vadd.f32 %v1354_v46, %v1322_v60 }
 0x2f0   : > { %v1425_v62 = vsel %vm1412_vm13, %v3786_v52, -inf  ;;  %2754 = vmatmul.msk.f32.gmra.mxu1 %vm759_vm12, %v3611_v44 }
 0x2f1   : > { %1426 = vmax.xlane.f32.xlu0 %v1425_v62  ;;  %v1431_v4 = vsel %vm1412_vm13, %v3797_v2, -inf }
 0x2f2   : > { %2742 = vmatmul.msk.f32.gmra.mxu2 %vm759_vm12, %v3651_v61 }
 0x2f3   : > { %v2873_v0 = vpop.permute.xlu0 %2872  ;;  %v858_v22 = vpop.f32.mrf.mxu3 }
 0x2f4   : > { %v893_v1 = vpop.f32.mrf.mxu1  ;;  %v2874_v5 = vunpack.i.l.bf16 %v2873_v0  ;;  %v1321_v57 = vmul.f32 0.35355338, %v858_v22  ;;  %v2875_v31 = vunpack.i.h.bf16 %v2873_v0  ;;  %v1356_v0 = vld [vmem:[%s4446_s5 + $0x40] sm:$0xff]  ;;  %v1373_v22 = vld [vmem:[%s4446_s5 + $0xc8] sm:$0xff] }
 0x2f5   : > { %v1323_v6 = vmul.f32 0.35355338, %v893_v1  ;;  %v1284_v1 = vpop.permute.xlu2 %1283 }
 0x2f6   : > { %1826 = vmatpush.msra.mxu1 %v2874_v5  ;;  %v3823_v17 = vadd.f32 %v1353_v12, %v1321_v57 }
 0x2f7   : > { %v3806_v61 = vadd.f32 %v1355_v3, %v1323_v6 }
 0x2f8   : > { %1827 = vmatpush.msra.mxu1 %v2879_v9  ;;  %v1428_v15 = vsel %vm1412_vm13, %v3823_v17, -inf }
 0x2f9   : > { %1432 = vmax.xlane.f32.xlu0 %v1431_v4  ;;  %v1434_v11 = vsel %vm1412_vm13, %v3806_v61, -inf }
 0x2fa   : > { %1435 = vmax.xlane.f32.xlu2 %v1434_v11  ;;  %2757 = vmatmul.msk.f32.vlgmr.msrb.gmra.mxu2 %vm759_vm12, %v3563_v33  ;;  %v2899_v11 = vunpack.i.l.bf16 %v3747_v43 }
 0x2fb   : > { %v3819_v7 = vpop.permute.xlu0 %2887  ;;  %1420 = vmax.xlane.f32.xlu1 %v1419_v14 }
 0x2fc   : > { %v2889_v18 = vunpack.i.l.bf16 %v3819_v7 }
 0x2fe   : > { %1966 = vmatpush.msrb.mxu1 %v2889_v18  ;;  %v1360_v18 = vld [vmem:[%s4446_s5 + $0x60] sm:$0xff] }
 0x300   : > { %1967 = vmatpush.msrb.mxu1 %v2894_v19 }
 0x301   : > { %1429 = vmax.xlane.f32.xlu0 %v1428_v15 }
 0x302   : > { %2758 = vmatmul.msk.f32.gmra.mxu2 %vm759_vm12, %v3665_v49 }
 0x303   : > { %v3831_v21 = vpop.permute.xlu0 %2902 }
 0x30b   : > { %v3833_v24 = vpop.permute.xlu0 %2912 }
 0x313   : > { %v2918_v30 = vpop.permute.xlu0 %2917 }
 0x314   : > { %v2920_v39 = vunpack.i.h.bf16 %v2918_v30  ;;  %v2919_v9 = vunpack.i.l.bf16 %v2918_v30 }
 0x31b   : > { %v3847_v60 = vpop.permute.xlu0 %2922 }
 0x323   : > { %v1282_v23 = vpop.permute.xlu1 %1281 }
 0x32b   : > { %v2868_v26 = vpop.permute.xlu1 %2867 }
 0x32c   : > { %v2869_v27 = vunpack.i.l.bf16 %v2868_v26  ;;  %v2870_v28 = vunpack.i.h.bf16 %v2868_v26 }
 0x32e   : > { %1791 = vmatpush.msra.mxu0 %v2869_v27  ;;  %v925_v45 = vpop.f32.mrf.mxu2 }
 0x32f   : > { %v1324_v46 = vmul.f32 0.35355338, %v925_v45 }
 0x330   : > { %1792 = vmatpush.msra.mxu0 %v2870_v28 }
 0x331   : > { %v3862_v6 = vadd.f32 %v1356_v0, %v1324_v46 }
 0x332   : > { %1931 = vmatpush.msrb.mxu0 %v2875_v31 }
 0x333   : > { %v2883_v41 = vpop.permute.xlu1 %2882  ;;  %v960_v35 = vpop.f32.mrf.mxu3  ;;  %v1437_v26 = vsel %vm1412_vm13, %v3862_v6, -inf }
 0x334   : > { %1932 = vmatpush.msrb.mxu0 %v2880_v40  ;;  %v2884_v38 = vunpack.i.l.bf16 %v2883_v41  ;;  %v1326_v42 = vmul.f32 0.35355338, %v960_v35  ;;  %v2885_v37 = vunpack.i.h.bf16 %v2883_v41  ;;  %v1359_v41 = vld [vmem:[%s4446_s5 + $0x58] sm:$0xff] }
 0x336   : > { %1861 = vmatpush.msra.mxu2 %v2884_v38  ;;  %v3839_v51 = vadd.f32 %v1358_v36, %v1326_v42  ;;  %v928_v8 = vpop.f32.mrf.mxu2 }
 0x337   : > { %v1325_v19 = vmul.f32 0.35355338, %v928_v8 }
 0x338   : > { %1862 = vmatpush.msra.mxu2 %v2885_v37  ;;  %v1443_v13 = vsel %vm1412_vm13, %v3839_v51, -inf }
 0x339   : > { %v1205_v48 = vpop.f32.mrf.mxu0  ;;  %1444 = vmax.xlane.f32.xlu2 %v1443_v13 }
 0x33a   : > { %2001 = vmatpush.msrb.mxu2 %v2920_v39  ;;  %v1340_v56 = vmul.f32 0.35355338, %v1205_v48  ;;  %v1361_v39 = vld [vmem:[%s4446_s5 + $0x68] sm:$0xff] }
 0x33b   : > { %v1144_v59 = vpop.permute.xlu1 %1143  ;;  %v963_v27 = vpop.f32.mrf.mxu3 }
 0x33c   : > { %2002 = vmatpush.msrb.mxu2 %v2900_v53  ;;  %2743 = vmatpush.xpose.msk.msra.mxu3 %vm759_vm12, %v1144_v59  ;;  %v3850_v62 = vadd.f32 %v1372_v54, %v1340_v56  ;;  %v1327_v28 = vmul.f32 0.35355338, %v963_v27  ;;  %v2924_v53 = vunpack.i.l.bf16 %v3847_v60  ;;  %v2914_v59 = vunpack.i.l.bf16 %v3833_v24 }
 0x33e   : > { %v1485_v63 = vsel %vm1412_vm13, %v3850_v62, -inf  ;;  %v3896_v42 = vadd.f32 %v1359_v41, %v1327_v28  ;;  %v1365_v41 = vld [vmem:[%s4446_s5 + $0x88] sm:$0xff] }
 0x33f   : > { %1486 = vmax.xlane.f32.xlu0 %v1485_v63 }
 0x340   : > { %2744 = vmatpush.xpose.msk.msra.mxu3 %vm759_vm12, %v1142_v20  ;;  %v1446_v45 = vsel %vm1412_vm13, %v3896_v42, -inf }
 0x341   : > { %v1208_v3 = vpop.f32.mrf.mxu0 }
 0x342   : > { %v1341_v5 = vmul.f32 0.35355338, %v1208_v3 }
 0x343   : > { %2745 = vmatmul.msk.f32.vlgmr.msra.gmra.mxu3 %vm759_vm12, %v3607_v50  ;;  %v1065_v54 = vpop.f32.mrf.mxu3 }
 0x344   : > { %2759 = vmatpush.xpose.msk.msrb.mxu3 %vm759_vm12, %v1284_v1  ;;  %v3866_v4 = vadd.f32 %v1373_v22, %v1341_v5  ;;  %v1332_v0 = vmul.f32 0.35355338, %v1065_v54  ;;  %v1364_v22 = vld [vmem:[%s4446_s5 + $0x80] sm:$0xff] }
 0x345   : > { %v995_v12 = vpop.f32.mrf.mxu1 }
 0x346   : > { %v1415_v57 = vpop.xlane.xlu0 %1414  ;;  %v1328_v15 = vmul.f32 0.35355338, %v995_v12  ;;  %v1488_v20 = vsel %vm1412_vm13, %v3866_v4, -inf  ;;  %v3919_v5 = vadd.f32 %v1364_v22, %v1332_v0  ;;  %v1374_v22 = vld [vmem:[%s4446_s5 + $0xd0] sm:$0xff] }
 0x347   : > { %v1509_v14 = vsub.f32 %v3738_v25, %v1415_v57  ;;  %1489 = vmax.xlane.f32.xlu1 %v1488_v20  ;;  %1438 = vmax.xlane.f32.xlu0 %v1437_v26  ;;  %v1357_v25 = vld [vmem:[%s4446_s5 + $0x48] sm:$0xff] }
 0x348   : > { %2760 = vmatpush.xpose.msk.msrb.mxu3 %vm759_vm12, %v1282_v23  ;;  %v3881_v23 = vadd.f32 %v1360_v18, %v1328_v15  ;;  %v3885_v40 = vadd.f32 %v1357_v25, %v1325_v19  ;;  %v1366_v18 = vld [vmem:[%s4446_s5 + $0x90] sm:$0xff]  ;;  %v1367_v19 = vld [vmem:[%s4446_s5 + $0x98] sm:$0xff] }
 0x349   : > { %v1541_v43 = vmul.f32 1.442695, %v1509_v14 }
 0x34a   : > { %v1449_v31 = vsel %vm1412_vm13, %v3881_v23, -inf  ;;  %v1440_v38 = vsel %vm1412_vm13, %v3885_v40, -inf }
 0x34b   : > { %2969 = vpow2.f32 %v1541_v43  ;;  %1450 = vmax.xlane.f32.xlu2 %v1449_v31  ;;  %2746 = vmatmul.msk.f32.gmra.mxu3 %vm759_vm12, %v3661_v29  ;;  %v1068_v20 = vpop.f32.mrf.mxu3  ;;  %v3943_v43 = vpop.permute.xlu1 %2907 }
 0x34c   : > { %1896 = vmatpush.msra.mxu3 %v2919_v9  ;;  %v1333_v25 = vmul.f32 0.35355338, %v1068_v20 }
 0x34d   : > { %v3889_v30 = vpop.xlane.xlu2 %1417  ;;  %v998_v35 = vpop.f32.mrf.mxu1 }
 0x34e   : > { %1897 = vmatpush.msra.mxu3 %v2899_v11  ;;  %v1329_v36 = vmul.f32 0.35355338, %v998_v35  ;;  %v1461_v11 = vsel %vm1412_vm13, %v3919_v5, -inf }
 0x34f   : > { %1441 = vmax.xlane.f32.xlu1 %v1440_v38 }
 0x350   : > { %v3908_v48 = vadd.f32 %v1361_v39, %v1329_v36  ;;  %v3952_v36 = vadd.f32 %v1365_v41, %v1333_v25 }
 0x351   : > { %v3898_v37 = vpop.eup %2969 }
 0x352   : > { %v1605_v13 = vsel %vm1412_vm13, %v3898_v37, 0.0  ;;  %v1452_v3 = vsel %vm1412_vm13, %v3908_v48, -inf }
 0x353   : > { %1606 = vadd.xlane.f32.xlu0 %v1605_v13  ;;  %1447 = vmax.xlane.f32.xlu2 %v1446_v45 }
 0x354   : > { %2761 = vmatmul.msk.f32.vlgmr.msrb.gmra.mxu3 %vm759_vm12, %v3694_v10 }
 0x355   : > { %v1424_v56 = vpop.xlane.xlu2 %1423  ;;  %2036 = vmatpush.msrb.mxu3 %v2924_v53  ;;  %v1100_v63 = vpop.f32.mrf.mxu1  ;;  %v1368_v53 = vld [vmem:[%s4446_s5 + $0xa0] sm:$0xff] }
 0x356   : > { %v1512_v46 = vsub.f32 %v3767_v47, %v1424_v56  ;;  %v1334_v57 = vmul.f32 0.35355338, %v1100_v63 }
 0x357   : > { %2037 = vmatpush.msrb.mxu3 %v2914_v59  ;;  %1453 = vmax.xlane.f32.xlu1 %v1452_v3  ;;  %v1464_v59 = vsel %vm1412_vm13, %v3952_v36, -inf }
 0x358   : > { %v1547_v1 = vmul.f32 1.442695, %v1512_v46  ;;  %v3937_v15 = vadd.f32 %v1366_v18, %v1334_v57 }
 0x35a   : > { %2971 = vpow2.f32 %v1547_v1  ;;  %v1467_v28 = vsel %vm1412_vm13, %v3937_v15, -inf }
 0x35c   : > { %2762 = vmatmul.msk.f32.gmra.mxu3 %vm759_vm12, %v3672_v55 }
 0x35d   : > { %v3923_v8 = vpop.f32.mrf.mxu2  ;;  %v1103_v47 = vpop.f32.mrf.mxu1 }
 0x35e   : > { %v1335_v12 = vmul.f32 0.35355338, %v1103_v47 }
 0x35f   : > { %1462 = vmax.xlane.f32.xlu1 %v1461_v11 }
 0x360   : > { %v3925_v9 = vpop.eup %2971  ;;  %v3939_v26 = vadd.f32 %v1367_v19, %v1335_v12 }
 0x361   : > { %v1614_v14 = vsel %vm1412_vm13, %v3925_v9, 0.0 }
 0x362   : > { %1615 = vadd.xlane.f32.xlu2 %v1614_v14  ;;  %v1470_v31 = vsel %vm1412_vm13, %v3939_v26, -inf }
 0x364   : > { %v1427_v41 = vpop.xlane.xlu0 %1426 }
 0x365   : > { %v3941_v27 = vpop.f32.mrf.mxu2  ;;  %v1240_v35 = vpop.f32.mrf.mxu1 }
 0x366   : > { %v1342_v0 = vmul.f32 0.35355338, %v1240_v35 }
 0x367   : > { %1468 = vmax.xlane.f32.xlu1 %v1467_v28  ;;  %v1369_v28 = vld [vmem:[%s4446_s5 + $0xa8] sm:$0xff] }
 0x368   : > { %v3970_v11 = vadd.f32 %v1374_v22, %v1342_v0 }
 0x36a   : > { %1471 = vmax.xlane.f32.xlu2 %v1470_v31  ;;  %v1491_v20 = vsel %vm1412_vm13, %v3970_v11, -inf }
 0x36d   : > { %v1436_v38 = vpop.xlane.xlu2 %1435  ;;  %v1135_v13 = vpop.f32.mrf.mxu2 }
 0x36e   : > { %v1516_v39 = vsub.f32 %v3806_v61, %v1436_v38  ;;  %v1336_v45 = vmul.f32 0.35355338, %v1135_v13  ;;  %v1421_v56 = vpop.xlane.xlu1 %1420  ;;  %v1510_v61 = vsub.f32 %v3753_v34, %v3889_v30  ;;  %v1243_v47 = vpop.f32.mrf.mxu1  ;;  %v1375_v30 = vld [vmem:[%s4446_s5 + $0xd8] sm:$0xff] }
 0x36f   : > { %v1511_v46 = vsub.f32 %v3810_v58, %v1421_v56  ;;  %1465 = vmax.xlane.f32.xlu1 %v1464_v59  ;;  %v1343_v14 = vmul.f32 0.35355338, %v1243_v47  ;;  %v1330_v56 = vmul.f32 0.35355338, %v3923_v8 }
 0x370   : > { %v1555_v54 = vmul.f32 1.442695, %v1516_v39  ;;  %v3961_v63 = vadd.f32 %v1368_v53, %v1336_v45  ;;  %v1543_v57 = vmul.f32 1.442695, %v1510_v61  ;;  %v1513_v53 = vsub.f32 %v3786_v52, %v1427_v41  ;;  %v1362_v61 = vld [vmem:[%s4446_s5 + $0x70] sm:$0xff] }
 0x371   : > { %v1545_v1 = vmul.f32 1.442695, %v1511_v46  ;;  %v3988_v31 = vadd.f32 %v1375_v30, %v1343_v14  ;;  %v1376_v46 = vld [vmem:[%s4446_s5 + $0xe0] sm:$0xff] }
 0x372   : > { %2973 = vpow2.f32 %v1555_v54  ;;  %v1473_v3 = vsel %vm1412_vm13, %v3961_v63, -inf  ;;  %v1549_v52 = vmul.f32 1.442695, %v1513_v53 }
 0x373   : > { %1474 = vmax.xlane.f32.xlu2 %v1473_v3  ;;  %2975 = vpow2.f32 %v1545_v1  ;;  %v1494_v13 = vsel %vm1412_vm13, %v3988_v31, -inf  ;;  %v1433_v1 = vpop.xlane.xlu0 %1432  ;;  %v4010_v3 = vadd.f32 %v1362_v61, %v1330_v56 }
 0x374   : > { %2977 = vpow2.f32 %v1543_v57  ;;  %v1515_v8 = vsub.f32 %v3797_v2, %v1433_v1 }
 0x375   : > { %v1138_v58 = vpop.f32.mrf.mxu2  ;;  %2979 = vpow2.f32 %v1549_v52  ;;  %v1455_v47 = vsel %vm1412_vm13, %v4010_v3, -inf }
 0x376   : > { %v1337_v19 = vmul.f32 0.35355338, %v1138_v58  ;;  %v1553_v58 = vmul.f32 1.442695, %v1515_v8 }
 0x378   : > { %v3972_v12 = vpop.eup %2973  ;;  %v3990_v35 = vadd.f32 %v1369_v28, %v1337_v19  ;;  %2981 = vpow2.f32 %v1553_v58  ;;  %v1331_v19 = vmul.f32 0.35355338, %v3941_v27  ;;  %v1370_v58 = vld [vmem:[%s4446_s5 + $0xb0] sm:$0xff] }
 0x379   : > { %v1626_v34 = vsel %vm1412_vm13, %v3972_v12, 0.0  ;;  %v3979_v18 = vpop.eup %2975 }
 0x37a   : > { %1627 = vadd.xlane.f32.xlu1 %v1626_v34  ;;  %v1611_v25 = vsel %vm1412_vm13, %v3979_v18, 0.0  ;;  %v3992_v39 = vpop.eup %2977  ;;  %v1476_v54 = vsel %vm1412_vm13, %v3990_v35, -inf }
 0x37b   : > { %1492 = vmax.xlane.f32.xlu2 %v1491_v20  ;;  %1612 = vadd.xlane.f32.xlu0 %v1611_v25  ;;  %v1608_v59 = vsel %vm1412_vm13, %v3992_v39, 0.0  ;;  %v4017_v57 = vpop.eup %2979  ;;  %v1430_v34 = vpop.xlane.xlu0 %1429  ;;  %v1363_v25 = vld [vmem:[%s4446_s5 + $0x78] sm:$0xff] }
 0x37c   : > { %v1617_v14 = vsel %vm1412_vm13, %v4017_v57, 0.0  ;;  %v1514_v2 = vsub.f32 %v3823_v17, %v1430_v34  ;;  %v4030_v41 = vadd.f32 %v1363_v25, %v1331_v19 }
 0x37d   : > { %v1275_v38 = vpop.f32.mrf.mxu2 }
 0x37e   : > { %v1344_v45 = vmul.f32 0.35355338, %v1275_v38  ;;  %v4021_v30 = vpop.eup %2981  ;;  %v1551_v28 = vmul.f32 1.442695, %v1514_v2  ;;  %v1458_v38 = vsel %vm1412_vm13, %v4030_v41, -inf }
 0x37f   : > { %v1623_v20 = vsel %vm1412_vm13, %v4021_v30, 0.0 }
 0x380   : > { %v4008_v0 = vadd.f32 %v1376_v46, %v1344_v45  ;;  %2983 = vpow2.f32 %v1551_v28 }
 0x382   : > { %1495 = vmax.xlane.f32.xlu1 %v1494_v13  ;;  %v1497_v22 = vsel %vm1412_vm13, %v4008_v0, -inf }
 0x383   : > { %1477 = vmax.xlane.f32.xlu2 %v1476_v54  ;;  %1609 = vadd.xlane.f32.xlu0 %v1608_v59 }
 0x386   : > { %v4034_v13 = vpop.eup %2983 }
 0x387   : > { %v1620_v17 = vsel %vm1412_vm13, %v4034_v13, 0.0 }
 0x38b   : > { %1498 = vmax.xlane.f32.xlu2 %v1497_v22  ;;  %1456 = vmax.xlane.f32.xlu0 %v1455_v47 }
 0x393   : > { %1618 = vadd.xlane.f32.xlu0 %v1617_v14 }
 0x39b   : > { %1624 = vadd.xlane.f32.xlu0 %v1623_v20 }
 0x3a3   : > { %1459 = vmax.xlane.f32.xlu0 %v1458_v38  ;;  %v2890_v38 = vunpack.i.h.bf16 %v3819_v7 }
 0x3ab   : > { %1621 = vadd.xlane.f32.xlu0 %v1620_v17 }
 0x3ac   : > { %v1445_v53 = vpop.xlane.xlu2 %1444 }
 0x3ad   : > { %v1519_v59 = vsub.f32 %v3839_v51, %v1445_v53 }
 0x3af   : > { %v1561_v52 = vmul.f32 1.442695, %v1519_v59 }
 0x3b2   : > { %v4038_v27 = vpop.xlane.xlu0 %1486 }
 0x3ba   : > { %v1439_v45 = vpop.xlane.xlu0 %1438  ;;  %v1490_v46 = vpop.xlane.xlu1 %1489 }
 0x3bb   : > { %v1517_v54 = vsub.f32 %v3862_v6, %v1439_v45  ;;  %v1371_v45 = vld [vmem:[%s4446_s5 + $0xb8] sm:$0xff] }
 0x3bd   : > { %v1557_v56 = vmul.f32 1.442695, %v1517_v54  ;;  %v2895_v54 = vunpack.i.h.bf16 %v3731_v16  ;;  %v1377_v16 = vld [vmem:[%s4446_s5 + $0xe8] sm:$0xff] }
 0x3be   : > { %v1451_v61 = vpop.xlane.xlu2 %1450 }
 0x3bf   : > { %2985 = vpow2.f32 %v1557_v56  ;;  %v1521_v22 = vsub.f32 %v3881_v23, %v1451_v61 }
 0x3c1   : > { %v1565_v34 = vmul.f32 1.442695, %v1521_v22 }
 0x3c2   : > { %v1442_v19 = vpop.xlane.xlu1 %1441 }
 0x3c3   : > { %v1518_v17 = vsub.f32 %v3885_v40, %v1442_v19  ;;  %v1534_v40 = vsub.f32 %v3866_v4, %v1490_v46  ;;  %v1378_v4 = vld [vmem:[%s4446_s5 + $0xf0] sm:$0xff]  ;;  %v1533_v19 = vsub.f32 %v3850_v62, %v4038_v27 }
 0x3c5   : > { %v4042_v8 = vpop.eup %2985  ;;  %v1559_v61 = vmul.f32 1.442695, %v1518_v17 }
 0x3c6   : > { %v1607_v1 = vpop.xlane.xlu0 %1606  ;;  %v1170_v47 = vpop.f32.mrf.mxu3  ;;  %v1629_v51 = vsel %vm1412_vm13, %v4042_v8, 0.0 }
 0x3c7   : > { %2987 = vrcp.f32 %v1607_v1  ;;  %v1338_v6 = vmul.f32 0.35355338, %v1170_v47  ;;  %1630 = vadd.xlane.f32.xlu2 %v1629_v51  ;;  %v1448_v20 = vpop.xlane.xlu2 %1447 }
 0x3c8   : > { %2989 = vpow2.f32 %v1561_v52 }
 0x3c9   : > { %v4050_v14 = vadd.f32 %v1370_v58, %v1338_v6  ;;  %2991 = vpow2.f32 %v1565_v34  ;;  %v1591_v58 = vmul.f32 1.442695, %v1534_v40  ;;  %v1520_v40 = vsub.f32 %v3896_v42, %v1448_v20 }
 0x3ca   : > { %2993 = vpow2.f32 %v1559_v61 }
 0x3cb   : > { %v1479_v25 = vsel %vm1412_vm13, %v4050_v14, -inf  ;;  %2995 = vpow2.f32 %v1591_v58 }
 0x3cc   : > { %1480 = vmax.xlane.f32.xlu0 %v1479_v25 }
 0x3cd   : > { %v2988_v2 = vpop.eup %2987 }
 0x3ce   : > { %v4054_v23 = vpop.eup %2989  ;;  %v1733_v28 = vmul.f32 %v2988_v2, %v3898_v37  ;;  %v1173_v53 = vpop.f32.mrf.mxu3 }
 0x3cf   : > { %v1339_v56 = vmul.f32 0.35355338, %v1173_v53  ;;  %v1635_v59 = vsel %vm1412_vm13, %v4054_v23, 0.0  ;;  %v1278_v37 = vpop.f32.mrf.mxu2  ;;  %v4071_v47 = vpop.eup %2991  ;;  %v1589_v53 = vmul.f32 1.442695, %v1533_v19 }
 0x3d0   : > { %2763 = vmatmul.msk.f32.vlgmr.msra.gmra.mxu0 %vm1412_vm13, %v1733_v28  ;;  %1636 = vadd.xlane.f32.xlu2 %v1635_v59  ;;  %v1345_v52 = vmul.f32 0.35355338, %v1278_v37  ;;  %v1641_v51 = vsel %vm1412_vm13, %v4071_v47, 0.0  ;;  %v4093_v17 = vpop.eup %2993  ;;  %v1454_v59 = vpop.xlane.xlu1 %1453 }
 0x3d1   : > { %2071 = vmatpush.msra.mxu0 %v2890_v38  ;;  %v4066_v7 = vadd.f32 %v1371_v45, %v1339_v56  ;;  %v1632_v27 = vsel %vm1412_vm13, %v4093_v17, 0.0  ;;  %v4100_v56 = vpop.eup %2995  ;;  %2997 = vpow2.f32 %v1589_v53 }
 0x3d2   : > { %v4081_v34 = vadd.f32 %v1377_v16, %v1345_v52  ;;  %v1680_v52 = vsel %vm1412_vm13, %v4100_v56, 0.0  ;;  %v1563_v16 = vmul.f32 1.442695, %v1520_v40  ;;  %v2904_v40 = vunpack.i.l.bf16 %v3831_v21 }
 0x3d3   : > { %2072 = vmatpush.msra.mxu0 %v2895_v54  ;;  %v1482_v1 = vsel %vm1412_vm13, %v4066_v7, -inf  ;;  %v1379_v54 = vld [vmem:[%s4446_s5 + $0xf8] sm:$0xff] }
 0x3d4   : > { %1483 = vmax.xlane.f32.xlu1 %v1482_v1  ;;  %v1500_v25 = vsel %vm1412_vm13, %v4081_v34, -inf  ;;  %2999 = vpow2.f32 %v1563_v16 }
 0x3d5   : > { %v1616_v22 = vpop.xlane.xlu2 %1615 }
 0x3d7   : > { %v1310_v6 = vpop.f32.mrf.mxu3  ;;  %v4111_v58 = vpop.eup %2997 }
 0x3d8   : > { %v1346_v46 = vmul.f32 0.35355338, %v1310_v6  ;;  %1642 = vadd.xlane.f32.xlu2 %v1641_v51  ;;  %v1522_v6 = vsub.f32 %v3908_v48, %v1454_v59  ;;  %v1677_v42 = vsel %vm1412_vm13, %v4111_v58, 0.0 }
 0x3da   : > { %v4083_v2 = vadd.f32 %v1378_v4, %v1346_v46  ;;  %v1463_v4 = vpop.xlane.xlu1 %1462  ;;  %v1567_v20 = vmul.f32 1.442695, %v1522_v6 }
 0x3db   : > { %v1525_v53 = vsub.f32 %v3919_v5, %v1463_v4  ;;  %v2909_v5 = vunpack.i.l.bf16 %v3943_v43 }
 0x3dc   : > { %v1503_v28 = vsel %vm1412_vm13, %v4083_v2, -inf  ;;  %1501 = vmax.xlane.f32.xlu1 %v1500_v25  ;;  %v4117_v25 = vpop.eup %2999 }
 0x3dd   : > { %v4091_v38 = vpop.xlane.xlu2 %1471  ;;  %1504 = vmax.xlane.f32.xlu0 %v1503_v28  ;;  %v1638_v48 = vsel %vm1412_vm13, %v4117_v25, 0.0 }
 0x3df   : > { %v1313_v45 = vpop.f32.mrf.mxu3 }
 0x3e0   : > { %v1347_v62 = vmul.f32 0.35355338, %v1313_v45  ;;  %1633 = vadd.xlane.f32.xlu2 %v1632_v27 }
 0x3e2   : > { %v4102_v37 = vadd.f32 %v1379_v54, %v1347_v62  ;;  %v1469_v45 = vpop.xlane.xlu1 %1468  ;;  %v1573_v62 = vmul.f32 1.442695, %v1525_v53 }
 0x3e4   : > { %v1506_v61 = vsel %vm1412_vm13, %v4102_v37, -inf }
 0x3e5   : > { %1507 = vmax.xlane.f32.xlu1 %v1506_v61  ;;  %1681 = vadd.xlane.f32.xlu0 %v1680_v52 }
 0x3e6   : > { %v4109_v1 = vpop.xlane.xlu2 %1474 }
 0x3ed   : > { %1678 = vadd.xlane.f32.xlu1 %v1677_v42  ;;  %v1466_v42 = vpop.xlane.xlu1 %1465 }
 0x3ee   : > { %v1493_v46 = vpop.xlane.xlu2 %1492  ;;  %v1613_v19 = vpop.xlane.xlu0 %1612 }
 0x3ef   : > { %v1535_v51 = vsub.f32 %v3970_v11, %v1493_v46  ;;  %3001 = vrcp.f32 %v1613_v19 }
 0x3f0   : > { %3003 = vpow2.f32 %v1567_v20 }
 0x3f1   : > { %v1593_v28 = vmul.f32 1.442695, %v1535_v51 }
 0x3f3   : > { %3005 = vpow2.f32 %v1593_v28 }
 0x3f4   : > { %3007 = vrcp.f32 %v1616_v22  ;;  %v1527_v22 = vsub.f32 %v3937_v15, %v1469_v45  ;;  %v1526_v15 = vsub.f32 %v3952_v36, %v1466_v42  ;;  %v1529_v36 = vsub.f32 %v3961_v63, %v4109_v1 }
 0x3f5   : > { %1639 = vadd.xlane.f32.xlu1 %v1638_v48  ;;  %v3002_v54 = vpop.eup %3001  ;;  %v1528_v48 = vsub.f32 %v3939_v26, %v4091_v38  ;;  %v2915_v63 = vunpack.i.h.bf16 %v3833_v24  ;;  %v1628_v1 = vpop.xlane.xlu1 %1627 }
 0x3f6   : > { %v1735_v27 = vmul.f32 %v3002_v54, %v3979_v18  ;;  %v1610_v11 = vpop.xlane.xlu0 %1609  ;;  %v4123_v59 = vpop.eup %3003  ;;  %v1577_v4 = vmul.f32 1.442695, %v1527_v22  ;;  %v2925_v22 = vunpack.i.h.bf16 %v3847_v60 }
 0x3f7   : > { %3009 = vrcp.f32 %v1610_v11  ;;  %v1644_v16 = vsel %vm1412_vm13, %v4123_v59, 0.0  ;;  %v1581_v11 = vmul.f32 1.442695, %v1529_v36 }
 0x3f8   : > { %2765 = vmatmul.msk.f32.vlgmr.msra.gmra.mxu1 %vm1412_vm13, %v1735_v27  ;;  %3011 = vpow2.f32 %v1573_v62 }
 0x3f9   : > { %v4126_v61 = vpop.eup %3005  ;;  %2106 = vmatpush.msra.mxu1 %v2904_v40  ;;  %3013 = vpow2.f32 %v1577_v4 }
 0x3fa   : > { %v1683_v52 = vsel %vm1412_vm13, %v4126_v61, 0.0  ;;  %v3008_v18 = vpop.eup %3007 }
 0x3fb   : > { %1684 = vadd.xlane.f32.xlu0 %v1683_v52  ;;  %2107 = vmatpush.msra.mxu1 %v2909_v5  ;;  %v1736_v51 = vmul.f32 %v3008_v18, %v3925_v9  ;;  %v1575_v9 = vmul.f32 1.442695, %v1526_v15 }
 0x3fd   : > { %1645 = vadd.xlane.f32.xlu1 %v1644_v16  ;;  %v3010_v6 = vpop.eup %3009  ;;  %v1496_v36 = vpop.xlane.xlu1 %1495 }
 0x3fe   : > { %v1457_v20 = vpop.xlane.xlu0 %1456  ;;  %v1734_v46 = vmul.f32 %v3010_v6, %v3992_v39  ;;  %v4138_v28 = vpop.eup %3011 }
 0x3ff   : > { %v1523_v19 = vsub.f32 %v4010_v3, %v1457_v20  ;;  %v1653_v39 = vsel %vm1412_vm13, %v4138_v28, 0.0  ;;  %v1579_v3 = vmul.f32 1.442695, %v1528_v48  ;;  %v4147_v54 = vpop.eup %3013 }
 0x400   : > { %2764 = vmatmul.msk.f32.gmra.mxu0 %vm1412_vm13, %v1734_v46  ;;  %2766 = vmatmul.msk.f32.gmra.mxu1 %vm1412_vm13, %v1736_v51  ;;  %v1659_v38 = vsel %vm1412_vm13, %v4147_v54, 0.0 }
 0x401   : > { %v1569_v53 = vmul.f32 1.442695, %v1523_v19 }
 0x403   : > { %3015 = vpow2.f32 %v1569_v53 }
 0x405   : > { %1654 = vadd.xlane.f32.xlu1 %v1653_v39  ;;  %v1478_v39 = vpop.xlane.xlu2 %1477 }
 0x406   : > { %v1619_v45 = vpop.xlane.xlu0 %1618 }
 0x407   : > { %3017 = vrcp.f32 %v1619_v45 }
 0x408   : > { %3019 = vpow2.f32 %v1575_v9  ;;  %v2926_v9 = vpack.i.bf16 %v3557_v32, %v3611_v44  ;;  %v2905_v44 = vunpack.i.h.bf16 %v3831_v21 }
 0x409   : > { %v4149_v62 = vpop.eup %3015  ;;  %3021 = vpow2.f32 %v1579_v3 }
 0x40a   : > { %v1647_v26 = vsel %vm1412_vm13, %v4149_v62, 0.0 }
 0x40b   : > { %1648 = vadd.xlane.f32.xlu2 %v1647_v26 }
 0x40d   : > { %1660 = vadd.xlane.f32.xlu1 %v1659_v38  ;;  %v3018_v27 = vpop.eup %3017  ;;  %v4186_v3 = vpop.xlane.xlu2 %1498 }
 0x40e   : > { %v1737_v40 = vmul.f32 %v3018_v27, %v4017_v57  ;;  %v1625_v5 = vpop.xlane.xlu0 %1624  ;;  %v4158_v52 = vpop.eup %3019 }
 0x40f   : > { %3023 = vrcp.f32 %v1625_v5  ;;  %v4161_v18 = vpop.eup %3021  ;;  %v1656_v16 = vsel %vm1412_vm13, %v4158_v52, 0.0 }
 0x410   : > { %2767 = vmatmul.msk.f32.vlgmr.msra.gmra.mxu2 %vm1412_vm13, %v1737_v40  ;;  %3025 = vpow2.f32 %v1581_v11  ;;  %v1662_v57 = vsel %vm1412_vm13, %v4161_v18, 0.0 }
 0x411   : > { %2141 = vmatpush.msra.mxu2 %v2925_v22  ;;  %3027 = vrcp.f32 %v1628_v1  ;;  %v1530_v1 = vsub.f32 %v3990_v35, %v1478_v39 }
 0x413   : > { %2142 = vmatpush.msra.mxu2 %v2915_v63  ;;  %1657 = vadd.xlane.f32.xlu2 %v1656_v16 }
 0x415   : > { %1663 = vadd.xlane.f32.xlu1 %v1662_v57  ;;  %v3024_v60 = vpop.eup %3023 }
 0x416   : > { %v1739_v6 = vmul.f32 %v3024_v60, %v4021_v30  ;;  %v1460_v4 = vpop.xlane.xlu0 %1459  ;;  %v4171_v24 = vpop.eup %3025 }
 0x417   : > { %v1524_v42 = vsub.f32 %v4030_v41, %v1460_v4  ;;  %v3028_v46 = vpop.eup %3027  ;;  %v1665_v51 = vsel %vm1412_vm13, %v4171_v24, 0.0 }
 0x418   : > { %2769 = vmatmul.msk.f32.vlgmr.msra.gmra.mxu3 %vm1412_vm13, %v1739_v6  ;;  %v1740_v15 = vmul.f32 %v3028_v46, %v3972_v12  ;;  %v2931_v12 = vpack.i.bf16 %v3665_v49, %v3661_v29  ;;  %v2910_v29 = vunpack.i.h.bf16 %v3943_v43 }
 0x419   : > { %v1571_v20 = vmul.f32 1.442695, %v1524_v42  ;;  %v1583_v42 = vmul.f32 1.442695, %v1530_v1 }
 0x41b   : > { %3029 = vpow2.f32 %v1571_v20  ;;  %v1536_v20 = vsub.f32 %v3988_v31, %v1496_v36 }
 0x41d   : > { %1666 = vadd.xlane.f32.xlu1 %v1665_v51 }
 0x41e   : > { %v1622_v19 = vpop.xlane.xlu0 %1621 }
 0x41f   : > { %3031 = vrcp.f32 %v1622_v19  ;;  %v1595_v19 = vmul.f32 1.442695, %v1536_v20 }
 0x420   : > { %2770 = vmatmul.msk.f32.gmra.mxu3 %vm1412_vm13, %v1740_v15 }
 0x421   : > { %v4178_v30 = vpop.eup %3029 }
 0x422   : > { %v1650_v41 = vsel %vm1412_vm13, %v4178_v30, 0.0 }
 0x423   : > { %1651 = vadd.xlane.f32.xlu2 %v1650_v41 }
 0x425   : > { %v3032_v53 = vpop.eup %3031 }
 0x426   : > { %v1738_v48 = vmul.f32 %v3032_v53, %v4034_v13 }
 0x428   : > { %2768 = vmatmul.msk.f32.gmra.mxu2 %vm1412_vm13, %v1738_v48 }
 0x436   : > { %2927 = vrot.lane.b32.xlu1 %v2926_v9, %s3150_s29 }
 0x43a   : > { %v1631_v45 = vpop.xlane.xlu2 %1630 }
 0x43b   : > { %2932 = vrot.lane.b32.xlu2 %v2931_v12, %s3150_s29  ;;  %3033 = vrcp.f32 %v1631_v45 }
 0x43f   : > { %v1481_v26 = vpop.xlane.xlu0 %1480 }
 0x440   : > { %v1531_v13 = vsub.f32 %v4050_v14, %v1481_v26 }
 0x441   : > { %v3034_v38 = vpop.eup %3033 }
 0x442   : > { %v1585_v27 = vmul.f32 1.442695, %v1531_v13  ;;  %v1741_v11 = vmul.f32 %v3034_v38, %v4042_v8 }
 0x443   : > { %v1637_v32 = vpop.xlane.xlu2 %1636 }
 0x444   : > { %3035 = vpow2.f32 %v1585_v27  ;;  %2771 = vmatmul.msk.f32.vlgmr.msrb.gmra.mxu0 %vm1412_vm13, %v1741_v11 }
 0x445   : > { %3037 = vrcp.f32 %v1637_v32  ;;  %2211 = vmatpush.msrb.mxu0 %v2905_v44 }
 0x447   : > { %v1484_v49 = vpop.xlane.xlu1 %1483  ;;  %2212 = vmatpush.msrb.mxu0 %v2910_v29 }
 0x448   : > { %v1532_v21 = vsub.f32 %v4066_v7, %v1484_v49 }
 0x44a   : > { %v4197_v40 = vpop.eup %3035  ;;  %v1587_v43 = vmul.f32 1.442695, %v1532_v21 }
 0x44b   : > { %v3038_v5 = vpop.eup %3037  ;;  %v1643_v14 = vpop.xlane.xlu2 %1642  ;;  %v1671_v22 = vsel %vm1412_vm13, %v4197_v40, 0.0 }
 0x44c   : > { %v1743_v8 = vmul.f32 %v3038_v5, %v4054_v23  ;;  %1672 = vadd.xlane.f32.xlu0 %v1671_v22  ;;  %3039 = vrcp.f32 %v1643_v14 }
 0x44d   : > { %3041 = vpow2.f32 %v1587_v43 }
 0x44e   : > { %2773 = vmatmul.msk.f32.vlgmr.msrb.gmra.mxu1 %vm1412_vm13, %v1743_v8 }
 0x44f   : > { %v1502_v63 = vpop.xlane.xlu1 %1501 }
 0x450   : > { %v1505_v16 = vpop.xlane.xlu0 %1504 }
 0x451   : > { %v1539_v4 = vsub.f32 %v4083_v2, %v1505_v16  ;;  %v2936_v2 = vpack.i.bf16 %v3563_v33, %v3607_v50  ;;  %v2941_v50 = vpack.i.bf16 %v3694_v10, %v3672_v55 }
 0x452   : > { %v3040_v57 = vpop.eup %3039 }
 0x453   : > { %v1634_v60 = vpop.xlane.xlu2 %1633  ;;  %v1745_v6 = vmul.f32 %v3040_v57, %v4071_v47  ;;  %v1601_v7 = vmul.f32 1.442695, %v1539_v4  ;;  %v4209_v46 = vpop.eup %3041 }
 0x454   : > { %3043 = vrcp.f32 %v1634_v60  ;;  %v1674_v15 = vsel %vm1412_vm13, %v4209_v46, 0.0 }
 0x455   : > { %2775 = vmatmul.msk.f32.vlgmr.msrb.gmra.mxu2 %vm1412_vm13, %v1745_v6  ;;  %3045 = vpow2.f32 %v1583_v42 }
 0x456   : > { %3047 = vpow2.f32 %v1601_v7 }
 0x457   : > { %3049 = vpow2.f32 %v1595_v19 }
 0x458   : > { %v1508_v23 = vpop.xlane.xlu1 %1507 }
 0x459   : > { %v1540_v51 = vsub.f32 %v4102_v37, %v1508_v23 }
 0x45a   : > { %v3044_v35 = vpop.eup %3043 }
 0x45b   : > { %v1742_v47 = vmul.f32 %v3044_v35, %v4093_v17  ;;  %v4218_v41 = vpop.eup %3045  ;;  %v1603_v53 = vmul.f32 1.442695, %v1540_v51  ;;  %v1537_v17 = vsub.f32 %v4008_v0, %v4186_v3  ;;  %v1538_v0 = vsub.f32 %v4081_v34, %v1502_v63 }
 0x45c   : > { %v4223_v37 = vpop.eup %3047  ;;  %v1668_v33 = vsel %vm1412_vm13, %v4218_v41, 0.0 }
 0x45d   : > { %2772 = vmatmul.msk.f32.gmra.mxu0 %vm1412_vm13, %v1742_v47  ;;  %3051 = vpow2.f32 %v1603_v53  ;;  %v1597_v48 = vmul.f32 1.442695, %v1537_v17  ;;  %v1695_v39 = vsel %vm1412_vm13, %v4223_v37, 0.0  ;;  %v4231_v12 = vpop.eup %3049  ;;  %v1599_v10 = vmul.f32 1.442695, %v1538_v0 }
 0x45e   : > { %v1686_v45 = vsel %vm1412_vm13, %v4231_v12, 0.0 }
 0x460   : > { %1675 = vadd.xlane.f32.xlu1 %v1674_v15  ;;  %v1679_v31 = vpop.xlane.xlu1 %1678  ;;  %2937 = vrot.lane.b32.xlu0 %v2936_v2, %s3150_s29 }
 0x463   : > { %v4235_v3 = vpop.eup %3051 }
 0x464   : > { %1669 = vadd.xlane.f32.xlu2 %v1668_v33  ;;  %v1698_v36 = vsel %vm1412_vm13, %v4235_v3, 0.0 }
 0x468   : > { %v1640_v9 = vpop.xlane.xlu1 %1639  ;;  %1696 = vadd.xlane.f32.xlu1 %v1695_v39  ;;  %2942 = vrot.lane.b32.xlu0 %v2941_v50, %s3150_s29  ;;  %s3151_s29 = smov 8  }
 0x469   : > { %3053 = vrcp.f32 %v1640_v9 }
 0x46a   : > { %3055 = vpow2.f32 %v1597_v48 }
 0x46c   : > { %1687 = vadd.xlane.f32.xlu2 %v1686_v45 }
 0x46f   : > { %v3054_v55 = vpop.eup %3053 }
 0x470   : > { %v1646_v26 = vpop.xlane.xlu1 %1645  ;;  %1699 = vadd.xlane.f32.xlu1 %v1698_v36  ;;  %v1744_v13 = vmul.f32 %v3054_v55, %v4117_v25  ;;  %v4242_v38 = vpop.eup %3055 }
 0x471   : > { %3057 = vrcp.f32 %v1646_v26  ;;  %v1689_v34 = vsel %vm1412_vm13, %v4242_v38, 0.0 }
 0x472   : > { %2774 = vmatmul.msk.f32.gmra.mxu1 %vm1412_vm13, %v1744_v13  ;;  %3059 = vpow2.f32 %v1599_v10 }
 0x474   : > { %1690 = vadd.xlane.f32.xlu2 %v1689_v34 }
 0x477   : > { %v3058_v27 = vpop.eup %3057 }
 0x478   : > { %v1655_v11 = vpop.xlane.xlu1 %1654  ;;  %v1746_v32 = vmul.f32 %v3058_v27, %v4123_v59  ;;  %v4248_v44 = vpop.eup %3059 }
 0x479   : > { %3061 = vrcp.f32 %v1655_v11  ;;  %v1692_v25 = vsel %vm1412_vm13, %v4248_v44, 0.0 }
 0x47a   : > { %2776 = vmatmul.msk.f32.gmra.mxu2 %vm1412_vm13, %v1746_v32 }
 0x47c   : > { %1693 = vadd.xlane.f32.xlu2 %v1692_v25 }
 0x47e   : > { %v1649_v49 = vpop.xlane.xlu2 %1648 }
 0x47f   : > { %v3062_v29 = vpop.eup %3061  ;;  %3063 = vrcp.f32 %v1649_v49 }
 0x480   : > { %v1749_v5 = vmul.f32 %v3062_v29, %v4138_v28  ;;  %v1661_v14 = vpop.xlane.xlu1 %1660 }
 0x481   : > { %3065 = vrcp.f32 %v1661_v14 }
 0x482   : > { %2779 = vmatmul.msk.f32.vlgmr.msra.gmra.mxu0 %vm1412_vm13, %v1749_v5 }
 0x485   : > { %v3064_v22 = vpop.eup %3063 }
 0x486   : > { %v1747_v8 = vmul.f32 %v3064_v22, %v4149_v62  ;;  %v1658_v21 = vpop.xlane.xlu2 %1657 }
 0x487   : > { %v3066_v59 = vpop.eup %3065  ;;  %3067 = vrcp.f32 %v1658_v21 }
 0x488   : > { %v1751_v63 = vmul.f32 %v3066_v59, %v4147_v54  ;;  %v1664_v43 = vpop.xlane.xlu1 %1663  ;;  %2777 = vmatmul.msk.f32.vlgmr.msrb.gmra.mxu3 %vm1412_vm13, %v1747_v8  ;;  %v1682_v54 = vpop.xlane.xlu0 %1681 }
 0x489   : > { %3069 = vrcp.f32 %v1664_v43 }
 0x48a   : > { %2781 = vmatmul.msk.f32.vlgmr.msra.gmra.mxu1 %vm1412_vm13, %v1751_v63  ;;  %3071 = vrcp.f32 %v1679_v31 }
 0x48d   : > { %v3068_v28 = vpop.eup %3067 }
 0x48e   : > { %v1750_v16 = vmul.f32 %v3068_v28, %v4158_v52 }
 0x48f   : > { %v3070_v1 = vpop.eup %3069 }
 0x490   : > { %v1667_v57 = vpop.xlane.xlu1 %1666  ;;  %v1752_v60 = vmul.f32 %v3070_v1, %v4161_v18  ;;  %2780 = vmatmul.msk.f32.gmra.mxu0 %vm1412_vm13, %v1750_v16  ;;  %v3072_v62 = vpop.eup %3071 }
 0x491   : > { %3073 = vrcp.f32 %v1667_v57  ;;  %v1757_v4 = vmul.f32 %v3072_v62, %v4111_v58  ;;  %v1685_v51 = vpop.xlane.xlu0 %1684 }
 0x492   : > { %2782 = vmatmul.msk.f32.gmra.mxu1 %vm1412_vm13, %v1752_v60  ;;  %3075 = vrcp.f32 %v1682_v54 }
 0x496   : > { %v1652_v42 = vpop.xlane.xlu2 %1651 }
 0x497   : > { %v3074_v6 = vpop.eup %3073  ;;  %3077 = vrcp.f32 %v1652_v42 }
 0x498   : > { %v1753_v23 = vmul.f32 %v3074_v6, %v4171_v24  ;;  %2787 = vmatmul.msk.f32.vlgmr.msrb.gmra.mxu0 %vm1412_vm13, %v1757_v4  ;;  %v3076_v52 = vpop.eup %3075  ;;  %3079 = vrcp.f32 %v1685_v51 }
 0x499   : > { %v1758_v35 = vmul.f32 %v3076_v52, %v4100_v56  ;;  %v4273_v56 = vpop.f32.mrf.mxu0 }
 0x49a   : > { %2783 = vmatmul.msk.f32.vlgmr.msra.gmra.mxu2 %vm1412_vm13, %v1753_v23 }
 0x49d   : > { %v3078_v18 = vpop.eup %3077 }
 0x49e   : > { %v2933_v7 = vpop.permute.xlu2 %2932  ;;  %v1748_v20 = vmul.f32 %v3078_v18, %v4178_v30  ;;  %v3080_v24 = vpop.eup %3079 }
 0x49f   : > { %v2935_v47 = vunpack.i.h.bf16 %v2933_v7  ;;  %v2934_v2 = vunpack.i.l.bf16 %v2933_v7  ;;  %v1759_v31 = vmul.f32 %v3080_v24, %v4126_v61 }
 0x4a0   : > { %2778 = vmatmul.msk.f32.gmra.mxu3 %vm1412_vm13, %v1748_v20  ;;  %2788 = vmatmul.msk.f32.gmra.mxu0 %vm1412_vm13, %v1758_v35  ;;  %v2449_v20 = vld [vmem:[%s4447_s6 + $0x18] sm:$0xff]  ;;  %v2448_v35 = vld [vmem:[%s4447_s6 + $0x10] sm:$0xff] }
 0x4a1   : > { %2176 = vmatpush.msra.mxu3 %v2934_v2  ;;  %2281 = vmatpush.msrb.mxu2 %v2935_v47  ;;  %v4275_v30 = vpop.f32.mrf.mxu0  ;;  %v2447_v47 = vld [vmem:[%s4447_s6 + $0x8] sm:$0xff] }
 0x4a2   : > { %2490 = vmatpush.msra.mxu0 %v2449_v20  ;;  %v2946_v20 = vld [vmem:[%s4449_s8] ss:$0 sm:$0xff] }
 0x4a4   : > { %2491 = vmatpush.msra.mxu0 %v2448_v35 }
 0x4a6   : > { %2492 = vmatpush.msra.mxu0 %v2447_v47 }
 0x4a8   : > { %v2928_v58 = vpop.permute.xlu1 %2927 }
 0x4a9   : > { %v2929_v19 = vunpack.i.l.bf16 %v2928_v58  ;;  %v2930_v15 = vunpack.i.h.bf16 %v2928_v58  ;;  %v2446_v58 = vld [vmem:[%s4447_s6] sm:$0xff] }
 0x4aa   : > { %2493 = vmatpush.msra.mxu0 %v2446_v58 }
 0x4ab   : > { %2246 = vmatpush.msrb.mxu1 %v2929_v19 }
 0x4ad   : > { %2247 = vmatpush.msrb.mxu1 %v2930_v15 }
 0x4ae   : > { %2789 = vmatmul.msk.f32.vlgmr.msrb.gmra.mxu1 %vm1412_vm13, %v1759_v31 }
 0x4bf   : > { %v1673_v17 = vpop.xlane.xlu0 %1672 }
 0x4c0   : > { %3081 = vrcp.f32 %v1673_v17 }
 0x4c1   : > { %v1934_v53 = vpop.f32.mrf.mxu0 }
 0x4c2   : > { %2333 = vrot.lane.b32.xlu0 %v1934_v53, %s3151_s29 }
 0x4c6   : > { %v3082_v33 = vpop.eup %3081 }
 0x4c7   : > { %v1755_v61 = vmul.f32 %v3082_v33, %v4197_v40 }
 0x4d2   : > { %v2938_v48 = vpop.permute.xlu0 %2937 }
 0x4d3   : > { %v1676_v50 = vpop.xlane.xlu1 %1675  ;;  %v2940_v39 = vunpack.i.h.bf16 %v2938_v48  ;;  %v2939_v9 = vunpack.i.l.bf16 %v2938_v48 }
 0x4d4   : > { %3083 = vrcp.f32 %v1676_v50 }
 0x4d5   : > { %2177 = vmatpush.msra.mxu3 %v2939_v9  ;;  %2282 = vmatpush.msrb.mxu2 %v2940_v39 }
 0x4d6   : > { %2785 = vmatmul.msk.f32.vlgmr.msra.gmra.mxu3 %vm1412_vm13, %v1755_v61 }
 0x4d7   : > { %v1670_v0 = vpop.xlane.xlu2 %1669 }
 0x4d8   : > { %3085 = vrcp.f32 %v1670_v0 }
 0x4da   : > { %v3084_v45 = vpop.eup %3083  ;;  %v2943_v10 = vpop.permute.xlu0 %2942 }
 0x4db   : > { %v1697_v55 = vpop.xlane.xlu1 %1696  ;;  %v2944_v36 = vunpack.i.l.bf16 %v2943_v10  ;;  %v1937_v26 = vpop.f32.mrf.mxu0  ;;  %v1756_v13 = vmul.f32 %v3084_v45, %v4209_v46  ;;  %v2945_v34 = vunpack.i.h.bf16 %v2943_v10 }
 0x4dc   : > { %3087 = vrcp.f32 %v1697_v55  ;;  %2335 = vrot.lane.b32.xlu0 %v1937_v26, %s3151_s29 }
 0x4dd   : > { %2316 = vmatpush.msrb.mxu3 %v2944_v36 }
 0x4de   : > { %v3086_v27 = vpop.eup %3085  ;;  %2786 = vmatmul.msk.f32.gmra.mxu3 %vm1412_vm13, %v1756_v13 }
 0x4df   : > { %v1688_v40 = vpop.xlane.xlu2 %1687  ;;  %2317 = vmatpush.msrb.mxu3 %v2945_v34  ;;  %v1754_v11 = vmul.f32 %v3086_v27, %v4218_v41 }
 0x4e0   : > { %3089 = vrcp.f32 %v1688_v40 }
 0x4e1   : > { %2784 = vmatmul.msk.f32.gmra.mxu2 %vm1412_vm13, %v1754_v11 }
 0x4e2   : > { %v3088_v32 = vpop.eup %3087 }
 0x4e3   : > { %v1700_v25 = vpop.xlane.xlu1 %1699  ;;  %v1763_v29 = vmul.f32 %v3088_v32, %v4223_v37  ;;  %v4293_v37 = vpop.f32.mrf.mxu1 }
 0x4e4   : > { %3091 = vrcp.f32 %v1700_v25 }
 0x4e6   : > { %v3090_v46 = vpop.eup %3089  ;;  %2793 = vmatmul.msk.f32.vlgmr.msrb.gmra.mxu3 %vm1412_vm13, %v1763_v29 }
 0x4e7   : > { %v1691_v49 = vpop.xlane.xlu2 %1690  ;;  %v1760_v5 = vmul.f32 %v3090_v46, %v4231_v12 }
 0x4e8   : > { %3093 = vrcp.f32 %v1691_v49 }
 0x4e9   : > { %2790 = vmatmul.msk.f32.gmra.mxu1 %vm1412_vm13, %v1760_v5 }
 0x4ea   : > { %v3092_v14 = vpop.eup %3091 }
 0x4eb   : > { %v1764_v41 = vmul.f32 %v3092_v14, %v4235_v3  ;;  %v4297_v63 = vpop.f32.mrf.mxu1  ;;  %v4300_v3 = vpop.f32.mrf.mxu2 }
 0x4ee   : > { %v3094_v22 = vpop.eup %3093  ;;  %2794 = vmatmul.msk.f32.gmra.mxu3 %vm1412_vm13, %v1764_v41 }
 0x4ef   : > { %v1761_v59 = vmul.f32 %v3094_v22, %v4242_v38  ;;  %v1694_v8 = vpop.xlane.xlu2 %1693 }
 0x4f0   : > { %3095 = vrcp.f32 %v1694_v8 }
 0x4f1   : > { %2791 = vmatmul.msk.f32.vlgmr.msrb.gmra.mxu2 %vm1412_vm13, %v1761_v59 }
 0x4f3   : > { %v1969_v38 = vpop.f32.mrf.mxu1  ;;  %v4303_v1 = vpop.f32.mrf.mxu2 }
 0x4f6   : > { %v3096_v21 = vpop.eup %3095 }
 0x4f7   : > { %v1762_v12 = vmul.f32 %v3096_v21, %v4248_v44  ;;  %v4307_v44 = vpop.f32.mrf.mxu3 }
 0x4f9   : > { %2792 = vmatmul.msk.f32.gmra.mxu2 %vm1412_vm13, %v1762_v12 }
 0x4fb   : > { %v1972_v16 = vpop.f32.mrf.mxu1  ;;  %v2004_v60 = vpop.f32.mrf.mxu2 }
 0x4ff   : > { %v2074_v43 = vpop.f32.mrf.mxu0  ;;  %v4311_v6 = vpop.f32.mrf.mxu3 }
 0x500   : > { %2365 = vrot.lane.b32.xlu2 %v2074_v43, %s3152_s18 }
 0x503   : > { %v2007_v4 = vpop.f32.mrf.mxu2 }
 0x507   : > { %v2109_v54 = vpop.f32.mrf.mxu1 }
 0x508   : > { %2337 = vrot.lane.b32.xlu2 %v1969_v38, %s3151_s29 }
 0x50b   : > { %v2039_v23 = vpop.f32.mrf.mxu3 }
 0x50d   : > { %v2077_v28 = vpop.f32.mrf.mxu0 }
 0x50e   : > { %2367 = vrot.lane.b32.xlu0 %v2077_v28, %s3152_s18 }
 0x50f   : > { %v2112_v42 = vpop.f32.mrf.mxu1 }
 0x510   : > { %2339 = vrot.lane.b32.xlu2 %v1972_v16, %s3151_s29 }
 0x515   : > { %v2214_v57 = vpop.f32.mrf.mxu0 }
 0x516   : > { %2397 = vrot.lane.b32.xlu1 %v2214_v57, %s3153_s21 }
 0x518   : > { %2341 = vrot.lane.b32.xlu2 %v2004_v60, %s3151_s29 }
 0x51d   : > { %v2217_v62 = vpop.f32.mrf.mxu0  ;;  %v2144_v18 = vpop.f32.mrf.mxu2 }
 0x51e   : > { %2399 = vrot.lane.b32.xlu0 %v2217_v62, %s3153_s21  ;;  %2369 = vrot.lane.b32.xlu1 %v2109_v54, %s3152_s18 }
 0x520   : > { %2343 = vrot.lane.b32.xlu2 %v2007_v4, %s3151_s29 }
 0x523   : > { %v2042_v7 = vpop.f32.mrf.mxu3 }
 0x526   : > { %2371 = vrot.lane.b32.xlu1 %v2112_v42, %s3152_s18 }
 0x528   : > { %2345 = vrot.lane.b32.xlu2 %v2039_v23, %s3151_s29 }
 0x52b   : > { %v2249_v52 = vpop.f32.mrf.mxu1 }
 0x52c   : > { %2401 = vrot.lane.b32.xlu0 %v2249_v52, %s3153_s21 }
 0x52e   : > { %2373 = vrot.lane.b32.xlu1 %v2144_v18, %s3152_s18 }
 0x530   : > { %2347 = vrot.lane.b32.xlu2 %v2042_v7, %s3151_s29  ;;  %v2950_v7 = vld [vmem:[%s4448_s7] ss:$0 sm:$0xff] }
 0x534   : > { %v2334_v31 = vpop.permute.xlu0 %2333 }
 0x535   : > { %v2421_v48 = vsel %vm759_vm12, %v4273_v56, %v2334_v31 }
 0x54e   : > { %v2336_v17 = vpop.permute.xlu0 %2335 }
 0x54f   : > { %v2422_v55 = vsel %vm759_vm12, %v4275_v30, %v2336_v17 }
 0x559   : > { %v2179_v24 = vpop.f32.mrf.mxu3 }
 0x55a   : > { %v2366_v50 = vpop.permute.xlu2 %2365 }
 0x55b   : > { %v2429_v39 = vsel %vm1412_vm13, %v2421_v48, %v2366_v50  ;;  %v3099_v48 = vld [vmem:[%s3242_s23 + $0x30] sm:$0xff] }
 0x561   : > { %v2182_v19 = vpop.f32.mrf.mxu3 }
 0x562   : > { %v2338_v56 = vpop.permute.xlu2 %2337 }
 0x563   : > { %v2423_v34 = vsel %vm759_vm12, %v4293_v37, %v2338_v56 }
 0x564   : > { %v2147_v51 = vpop.f32.mrf.mxu2 }
 0x565   : > { %2375 = vrot.lane.b32.xlu1 %v2147_v51, %s3152_s18 }
 0x566   : > { %v2252_v2 = vpop.f32.mrf.mxu1 }
 0x567   : > { %2403 = vrot.lane.b32.xlu0 %v2252_v2, %s3153_s21 }
 0x569   : > { %v2319_v33 = vpop.f32.mrf.mxu3 }
 0x56a   : > { %v2340_v30 = vpop.permute.xlu2 %2339 }
 0x56b   : > { %v2424_v25 = vsel %vm759_vm12, %v4297_v63, %v2340_v30 }
 0x56d   : > { %2377 = vrot.lane.b32.xlu1 %v2179_v24, %s3152_s18  ;;  %v3098_v24 = vld [vmem:[%s3242_s23] sm:$0xff] }
 0x571   : > { %v2322_v45 = vpop.f32.mrf.mxu3 }
 0x572   : > { %v2342_v5 = vpop.permute.xlu2 %2341 }
 0x573   : > { %v2425_v41 = vsel %vm759_vm12, %v4300_v3, %v2342_v5 }
 0x574   : > { %v2284_v15 = vpop.f32.mrf.mxu2 }
 0x575   : > { %2379 = vrot.lane.b32.xlu1 %v2182_v19, %s3152_s18  ;;  %2405 = vrot.lane.b32.xlu0 %v2284_v15, %s3153_s21  ;;  %v2555_v19 = vmul.f32 %v3098_v24, %v2946_v20 }
 0x57a   : > { %v2344_v22 = vpop.permute.xlu2 %2343 }
 0x57b   : > { %v2426_v12 = vsel %vm759_vm12, %v4303_v1, %v2344_v22 }
 0x57c   : > { %v2287_v53 = vpop.f32.mrf.mxu2 }
 0x57d   : > { %2407 = vrot.lane.b32.xlu0 %v2287_v53, %s3153_s21 }
 0x580   : > { %v2368_v9 = vpop.permute.xlu0 %2367 }
 0x581   : > { %v2430_v10 = vsel %vm1412_vm13, %v2422_v55, %v2368_v9 }
 0x582   : > { %v2346_v28 = vpop.permute.xlu2 %2345 }
 0x583   : > { %v2427_v16 = vsel %vm759_vm12, %v4307_v44, %v2346_v28 }
 0x585   : > { %2409 = vrot.lane.b32.xlu0 %v2319_v33, %s3153_s21 }
 0x588   : > { %v2398_v61 = vpop.permute.xlu1 %2397 }
 0x589   : > { %v2438_v0 = vsel %vm2437_vm14, %v2429_v39, %v2398_v61  ;;  %v2561_v39 = vmul.f32 %v3099_v48, %v2946_v20 }
 0x58a   : > { %2795 = vmatmul.msk.f32.vlgmr.msra.gmra.mxu0 %vm387_vm0, %v2438_v0  ;;  %v2348_v1 = vpop.permute.xlu2 %2347 }
 0x58b   : > { %v2428_v4 = vsel %vm759_vm12, %v4311_v6, %v2348_v1  ;;  %v3097_v6 = vld [vmem:[%s3242_s23 + $0x10] sm:$0xff] }
 0x58c   : > { %v2557_v51 = vmul.f32 %v3097_v6, %v2946_v20 }
 0x58d   : > { %2411 = vrot.lane.b32.xlu0 %v2322_v45, %s3153_s21  ;;  %v3100_v45 = vld [vmem:[%s3242_s23 + $0x20] sm:$0xff] }
 0x58e   : > { %v2559_v55 = vmul.f32 %v3100_v45, %v2946_v20 }
 0x590   : > { %v2400_v36 = vpop.permute.xlu0 %2399  ;;  %v2370_v13 = vpop.permute.xlu1 %2369 }
 0x591   : > { %v2439_v26 = vsel %vm2437_vm14, %v2430_v10, %v2400_v36  ;;  %v2431_v27 = vsel %vm1412_vm13, %v2423_v34, %v2370_v13 }
 0x592   : > { %2796 = vmatmul.msk.f32.gmra.mxu0 %vm387_vm0, %v2439_v26 }
 0x598   : > { %v2372_v32 = vpop.permute.xlu1 %2371 }
 0x599   : > { %v2432_v29 = vsel %vm1412_vm13, %v2424_v25, %v2372_v32 }
 0x59e   : > { %v2402_v40 = vpop.permute.xlu0 %2401 }
 0x59f   : > { %v2440_v11 = vsel %vm2437_vm14, %v2431_v27, %v2402_v40 }
 0x5a0   : > { %2797 = vmatmul.msk.f32.gmra.mxu0 %vm387_vm0, %v2440_v11  ;;  %v2374_v14 = vpop.permute.xlu1 %2373  ;;  %v3101_v11 = vld [vmem:[%s3242_s23 + $0x18] sm:$0xff] }
 0x5a1   : > { %v2433_v59 = vsel %vm1412_vm13, %v2425_v41, %v2374_v14  ;;  %v2558_v30 = vmul.f32 %v3101_v11, %v2946_v20 }
 0x5d7   : > { %v2376_v37 = vpop.permute.xlu1 %2375 }
 0x5d8   : > { %v2434_v63 = vsel %vm1412_vm13, %v2426_v12, %v2376_v37  ;;  %v3103_v37 = vld [vmem:[%s3242_s23 + $0x38] sm:$0xff] }
 0x5d9   : > { %v2404_v46 = vpop.permute.xlu0 %2403 }
 0x5da   : > { %v2441_v49 = vsel %vm2437_vm14, %v2432_v29, %v2404_v46  ;;  %v3102_v46 = vld [vmem:[%s3242_s23 + $0x8] sm:$0xff] }
 0x5db   : > { %2798 = vmatmul.msk.f32.gmra.mxu0 %vm387_vm0, %v2441_v49  ;;  %v2556_v49 = vmul.f32 %v3102_v46, %v2946_v20 }
 0x5df   : > { %v2378_v3 = vpop.permute.xlu1 %2377 }
 0x5e0   : > { %v2435_v57 = vsel %vm1412_vm13, %v2427_v16, %v2378_v3 }
 0x5e7   : > { %v2406_v8 = vpop.permute.xlu0 %2405  ;;  %v2380_v62 = vpop.permute.xlu1 %2379 }
 0x5e8   : > { %v2442_v21 = vsel %vm2437_vm14, %v2433_v59, %v2406_v8  ;;  %v2436_v42 = vsel %vm1412_vm13, %v2428_v4, %v2380_v62 }
 0x5e9   : > { %2799 = vmatmul.msk.f32.gmra.mxu0 %vm387_vm0, %v2442_v21  ;;  %v2562_v21 = vmul.f32 %v3103_v37, %v2946_v20 }
 0x5ef   : > { %v2408_v43 = vpop.permute.xlu0 %2407 }
 0x5f0   : > { %v2443_v38 = vsel %vm2437_vm14, %v2434_v63, %v2408_v43 }
 0x5f1   : > { %2800 = vmatmul.msk.f32.gmra.mxu0 %vm387_vm0, %v2443_v38  ;;  %v3104_v38 = vld [vmem:[%s3242_s23 + $0x28] sm:$0xff] }
 0x5f2   : > { %v2560_v28 = vmul.f32 %v3104_v38, %v2946_v20 }
 0x5f7   : > { %v2410_v60 = vpop.permute.xlu0 %2409 }
 0x5f8   : > { %v2444_v54 = vsel %vm2437_vm14, %v2435_v57, %v2410_v60 }
 0x5f9   : > { %2801 = vmatmul.msk.f32.gmra.mxu0 %vm387_vm0, %v2444_v54 }
 0x5ff   : > { %v2412_v23 = vpop.permute.xlu0 %2411 }
 0x600   : > { %v2445_v44 = vsel %vm2437_vm14, %v2436_v42, %v2412_v23 }
 0x601   : > { %2802 = vmatmul.msk.f32.gmra.mxu0 %vm387_vm0, %v2445_v44 }
 0x607   : > { %v2495_v52 = vpop.f32.mrf.mxu0 }
 0x608   : > { %v2496_v35 = vadd.f32 %v2950_v7, %v2495_v52 }
 0x60a   : > { %v2526_v2 = vrot.slane %v2496_v35, 4 }
 0x60f   : > { %v2498_v18 = vpop.f32.mrf.mxu0 }
 0x610   : > { %v2499_v50 = vadd.f32 %v2950_v7, %v2498_v18 }
 0x612   : > { %v2538_v61 = vrot.slane %v2499_v50, 4 }
 0x61d   : > { %v2501_v47 = vpop.f32.mrf.mxu0 }
 0x61e   : > { %v2502_v58 = vadd.f32 %v2950_v7, %v2501_v47 }
 0x620   : > { %v2520_v15 = vrot.slane %v2502_v58, 4  ;;  %v2545_v31 = vsel %vm617_vm3, %v2526_v2, %v2502_v58 }
 0x621   : > { %v2565_v53 = vadd.f32 %v2557_v51, %v2545_v31 }
 0x622   : > { %v2543_v17 = vsel %vm617_vm3, %v2496_v35, %v2520_v15 }
 0x623   : > { %v2563_v33 = vadd.f32 %v2555_v19, %v2543_v17  ;;  %2573 = vst.msk [vmem:[%s4394_s24 + $0x10] sm:$0xff] %vm387_vm0, %v2565_v53 }
 0x625   : > { %2571 = vst.msk [vmem:[%s4394_s24] sm:$0xff] %vm387_vm0, %v2563_v33 }
 0x658   : > { %v2504_v9 = vpop.f32.mrf.mxu0 }
 0x659   : > { %v2505_v0 = vadd.f32 %v2950_v7, %v2504_v9 }
 0x65b   : > { %v2532_v10 = vrot.slane %v2505_v0, 4  ;;  %v2549_v36 = vsel %vm617_vm3, %v2538_v61, %v2505_v0 }
 0x65c   : > { %v2569_v26 = vadd.f32 %v2561_v39, %v2549_v36 }
 0x65d   : > { %v2547_v56 = vsel %vm617_vm3, %v2499_v50, %v2532_v10 }
 0x65e   : > { %v2567_v13 = vadd.f32 %v2559_v55, %v2547_v56  ;;  %2577 = vst.msk [vmem:[%s4394_s24 + $0x30] sm:$0xff] %vm387_vm0, %v2569_v26 }
 0x660   : > { %2575 = vst.msk [vmem:[%s4394_s24 + $0x20] sm:$0xff] %vm387_vm0, %v2567_v13 }
 0x666   : > { %v2507_v34 = vpop.f32.mrf.mxu0 }
 0x667   : > { %v2508_v40 = vadd.f32 %v2950_v7, %v2507_v34 }
 0x669   : > { %v2529_v25 = vrot.slane %v2508_v40, 4 }
 0x66e   : > { %v2510_v27 = vpop.f32.mrf.mxu0 }
 0x66f   : > { %v2511_v22 = vadd.f32 %v2950_v7, %v2510_v27 }
 0x671   : > { %v2541_v63 = vrot.slane %v2511_v22, 4 }
 0x676   : > { %v2513_v32 = vpop.f32.mrf.mxu0 }
 0x677   : > { %v2514_v29 = vadd.f32 %v2950_v7, %v2513_v32 }
 0x679   : > { %v2523_v5 = vrot.slane %v2514_v29, 4  ;;  %v2546_v14 = vsel %vm617_vm3, %v2529_v25, %v2514_v29 }
 0x67a   : > { %v2566_v41 = vadd.f32 %v2558_v30, %v2546_v14 }
 0x67b   : > { %v2544_v59 = vsel %vm617_vm3, %v2508_v40, %v2523_v5 }
 0x67c   : > { %v2564_v8 = vadd.f32 %v2556_v49, %v2544_v59  ;;  %2574 = vst.msk [vmem:[%s4394_s24 + $0x18] sm:$0xff] %vm387_vm0, %v2566_v41 }
 0x67e   : > { %2572 = vst.msk [vmem:[%s4394_s24 + $0x8] sm:$0xff] %vm387_vm0, %v2564_v8  ;;  %v2516_v12 = vpop.f32.mrf.mxu0 }
 0x67f   : > { %v2517_v43 = vadd.f32 %v2950_v7, %v2516_v12 }
 0x681   : > { %v2535_v3 = vrot.slane %v2517_v43, 4  ;;  %v2550_v16 = vsel %vm617_vm3, %v2541_v63, %v2517_v43 }
 0x682   : > { %v2570_v57 = vadd.f32 %v2562_v21, %v2550_v16 }
 0x683   : > { %v2548_v60 = vsel %vm617_vm3, %v2511_v22, %v2535_v3 }
 0x684   : > { %v2568_v54 = vadd.f32 %v2560_v28, %v2548_v60  ;;  %2578 = vst.msk [vmem:[%s4394_s24 + $0x38] sm:$0xff] %vm387_vm0, %v2570_v57 }
 0x686   : > { %2576 = vst.msk [vmem:[%s4394_s24 + $0x28] sm:$0xff] %vm387_vm0, %v2568_v54 }
 0x687 PF: > { %s19_s13 = sadd.s32 1, %s3143_s13   ;;  %s4459_s30 = smov %s3135_s11 }
 0x688   : > { %p16_p7 = scmp.ge.s32.totalorder %s19_s13, 10   ;;  %s4460_s10 = smov %s3139_s12 }
 0x689   : > { %s4461_s11 = smov %s4464_s14  ;;  %s4462_s12 = smov %s4468_s15 }
 0x68a   :  { %18 = sbr.rel (!%p16_p7) target bundleno = 3 (0x3), region = 86 }

// kernel: res_scale_convolution_gate_block.3
= control target key start
LH: loop header
LB: loop body
LE: loop exit
PB: predicated region body
PF: predicated region fallthrough
CT: control target
= control target key end

     0   :  { %s9387_s0 = inlined_call_operand.vmem [shape: f32[2,256,32], index: 0, kind: input, shape index: {}]   ;;  %s9388_s1 = inlined_call_operand.vmem [shape: f32[1,32], index: 1, kind: input, shape index: {}]   ;;  %s9389_s2 = inlined_call_operand.vmem [shape: f32[1,32], index: 2, kind: input, shape index: {}]   ;;  %s9390_s3 = inlined_call_operand.vmem [shape: f32[32,64], index: 3, kind: input, shape index: {}]   ;;  %s9391_s4 = inlined_call_operand.vmem [shape: f32[1,64], index: 4, kind: input, shape index: {}]   ;;  %s9392_s5 = inlined_call_operand.vmem [shape: f32[32,64], index: 5, kind: input, shape index: {}]   ;;  %s9393_s6 = inlined_call_operand.vmem [shape: f32[1,64], index: 6, kind: input, shape index: {}]   ;;  %s9394_s7 = inlined_call_operand.vmem [shape: f32[9,64], index: 7, kind: input, shape index: {}]   ;;  %s9395_s8 = inlined_call_operand.vmem [shape: f32[1,64], index: 8, kind: input, shape index: {}]   ;;  %s9396_s9 = inlined_call_operand.vmem [shape: f32[64,32], index: 9, kind: input, shape index: {}]   ;;  %s9397_s10 = inlined_call_operand.vmem [shape: f32[1,32], index: 10, kind: input, shape index: {}]   ;;  %s9398_s11 = inlined_call_operand.vmem [shape: f32[1,32], index: 11, kind: input, shape index: {}]   ;;  %s9399_s12 = inlined_call_operand.hbm [shape: f32[2,256,32], index: 12, kind: output, shape index: {}]  }
   0x1   :  { %9433 = sst [smem:[#allocation24_spill]] %s9387_s0 }
   0x2   :  { %9434 = sst [smem:[#allocation25_spill]] %s9388_s1 }
   0x3   :  { %17 = vsyncpa [#allocation4], 0 }
   0x4   :  { %19 = vsyncpa [#allocation4 + $0x1], 0  ;;  %s5453_s21 = smov 0   ;;  %s5455_s22 = smov 0  }
   0x5   :  { %s5457_s23 = smov 0   ;;  %s5459_s24 = smov 0  }
   0x6 LB: > { %s5474_s25 = sadd.s32 4294967295, %s5382_s24   ;;  %s4848_s26 = sadd.s32 4294967294, %s5382_s24   ;;  %s5382_s24 = sphi %s5459_s24, %s9646_s24   ;;  %s5378_s23 = sphi %s5457_s23, %s9645_s23   ;;  %s5374_s22 = sphi %s5455_s22, %s9644_s22   ;;  %s5370_s21 = sphi %s5453_s21, %s9643_s21  }
   0x7   : > { %s5478_s27 = sadd.s32 1, %s5382_s24   ;;  %s289_s28 = sadd.s32 1, %s5378_s23 }
   0x8   : > { %s286_s29 = ssub.s32 %s5382_s24, %s5478_s27  ;;  %p299_p0 = scmp.ne.s32.totalorder %s5378_s23, %s5374_s22 }
   0x9   : > { %p287_p1 = scmp.eq.s32.totalorder %s286_s29, 0  ;;  %p300_p2 = scmp.eq.s32.totalorder %s5474_s25, 1 }
   0xa   : > { %p305_p3 = scmp.ne.s32.totalorder %s5374_s22, %s5370_s21  ;;  %p306_p4 = scmp.eq.s32.totalorder %s4848_s26, 1 }
   0xb   : > { %s5489_s30 = scalar_select %p287_p1, %s5378_s23, %s289_s28  }
   0xc   : > { %p5491_p5 = por %p300_p2, %p299_p0  ;;  %p5495_p6 = por %p306_p4, %p305_p3 }
   0xd   : > { %p4851_p7 = scmp.ge.s32.totalorder %s5382_s24, 1  ;;  %p365_p8 = scmp.lt.s32.totalorder %s5382_s24, 3 }
   0xf   : > { %p366_p9 = pnand %p4851_p7, %p365_p8 }
  0x11   : > { %369 = sbr.rel (%p366_p9) target bundleno = 1312 (0x520), region = 68 }
  0x16   : > { %p407_p10 = scmp.lt.s32.totalorder %s5474_s25, 1  ;;  %vm446_vm0 = vcmask 261120   ;;  %s9437_s0 = sld [smem:[#allocation24_spill]]  ;;  %v5384_v14 = vmov 32.0  }
  0x17   : > { %5025 = vrcp.f32 %v5384_v14  ;;  %s9438_s1 = sld [smem:[#allocation25_spill]]  ;;  %s404_s17 = sand.u32 1, %s5374_s22  }
  0x18   : > { %s408_s15 = scalar_select %p407_p10, %s5474_s25, 1 }
  0x19   : > { %s4852_s26 = sshll.u32 %s404_s17, 8  ;;  %s4957_s29 = sshll.u32 %s5474_s25, 8 }
  0x1a   : > { %s4956_s16 = sshll.u32 %s408_s15, 8  ;;  %s7270_s28 = scalar_lea.vmem [#allocation3], %s4852_s26 }
  0x1b   : > { %s4782_s18 = scalar_lea.hbm %s9399_s12, %s4957_s29  ;;  %s4783_s20 = sshll.u32 %s7270_s28, 4  ;;  %s4784_s20 = int_to_ptr.vmem [resolvable:$true] %s4783_s20 }
  0x1c   : > { %s5506_s19 = scalar_lea.vmem %s9437_s0, %s4956_s16  ;;  %s4785_s26 = sshll.u32 %s4782_s18, 4  ;;  %s4786_s26 = int_to_ptr.hbm [resolvable:$true] %s4785_s26 }
  0x1d   : > { %v414_v0 = vld [vmem:[%s5506_s19 + $0x10] sm:$0xff]  ;;  %v412_v1 = vld [vmem:[%s5506_s19] sm:$0xff]  ;;  %v413_v6 = vld [vmem:[%s5506_s19 + $0x8] sm:$0xff]  ;;  %v5026_v15 = vpop.eup %5025  ;;  %s4771_s25 = scalar_lea.sflag [#allocation4], %s404_s17  ;;  %s5334_s15 = sshra.s32 %s4786_s26, 4  ;;  %s5335_s15 = int_to_ptr.hbm [resolvable:$true] %s5334_s15 }
  0x1e   : > { %v5511_v2 = vld [vmem:[%s5506_s19 + $0x20] sm:$0xff]  ;;  %v453_v3 = vsel %vm446_vm0, %v414_v0, 0.0  ;;  %v447_v4 = vsel %vm446_vm0, %v412_v1, 0.0  ;;  %v415_v7 = vld [vmem:[%s5506_s19 + $0x18] sm:$0xff]  ;;  %v417_v8 = vld [vmem:[%s5506_s19 + $0x28] sm:$0xff]  ;;  %v450_v9 = vsel %vm446_vm0, %v413_v6, 0.0  ;;  %vm548_vm1 = vweird.f32 %v5026_v15  ;;  %p5341_p0 = scmp.lt.s32.totalorder %s5335_s15, %s9399_s12 }
  0x1f   : > { %454 = vadd.xlane.f32.xlu1 %v453_v3  ;;  %448 = vadd.xlane.f32.xlu0 %v447_v4  ;;  %v459_v5 = vsel %vm446_vm0, %v5511_v2, 0.0  ;;  %v456_v10 = vsel %vm446_vm0, %v415_v7, 0.0  ;;  %v462_v11 = vsel %vm446_vm0, %v417_v8, 0.0  ;;  %v418_v12 = vld [vmem:[%s5506_s19 + $0x30] sm:$0xff]  ;;  %v544_v16 = vmul.f32 32.0, %v5026_v15  ;;  %v5541_v36 = vld [vmem:[%s5506_s19 + $0x48] sm:$0xff] }
  0x20   : > { %460 = vadd.xlane.f32.xlu2 %v459_v5  ;;  %v465_v13 = vsel %vm446_vm0, %v418_v12, 0.0  ;;  %v5546_v39 = vld [vmem:[%s5506_s19 + $0x38] sm:$0xff]  ;;  %v474_v41 = vsel %vm446_vm0, %v5541_v36, 0.0  ;;  %v5567_v50 = vld [vmem:[%s5506_s19 + $0x40] sm:$0xff]  ;;  %v5581_v58 = vld [vmem:[%s5506_s19 + $0x50] sm:$0xff]  ;;  %s5336_s29 = scalar_lea.hbm %s5335_s15, 256 }
  0x21   : > { %v545_v17 = vsub.f32 1.0, %v544_v16  ;;  %v468_v44 = vsel %vm446_vm0, %v5546_v39, 0.0  ;;  %v471_v54 = vsel %vm446_vm0, %v5567_v50, 0.0  ;;  %v5578_v57 = vld [vmem:[%s5506_s19 + $0x60] sm:$0xff]  ;;  %v477_v62 = vsel %vm446_vm0, %v5581_v58, 0.0  ;;  %v5601_v4 = vld [vmem:[%s5506_s19 + $0x68] sm:$0xff]  ;;  %p5337_p11 = scmp.ne.s32.totalorder %s5335_s15, %s5336_s29 }
  0x22   : > { %v483_v60 = vsel %vm446_vm0, %v5578_v57, 0.0  ;;  %v486_v5 = vsel %vm446_vm0, %v5601_v4, 0.0  ;;  %s5340_s18 = scalar_lea.hbm %s9399_s12, 512 }
  0x23   : > { %v546_v18 = vmul.f32 %v5026_v15, %v545_v17  ;;  %p5338_p12 = pnand %p5337_p11, %p5491_p5  ;;  %p5342_p1 = scmp.lt.s32.totalorder %s5340_s18, %s5336_s29 }
  0x25   : > { %v547_v19 = vadd.f32 %v5026_v15, %v546_v18  ;;  %p5339_p13 = pneg %p5338_p12  ;;  %p5343_p2 = por %p5342_p1, %p5341_p0 }
  0x27   : > { %451 = vadd.xlane.f32.xlu0 %v450_v9  ;;  %457 = vadd.xlane.f32.xlu1 %v456_v10  ;;  %v5525_v20 = vsel %vm548_vm1, %v5026_v15, %v547_v19  ;;  %v1447_v9 = vld [vmem:[%s9392_s5 + $0x10] sm:$0xff]  ;;  %v1229_v10 = vld [vmem:[%s9390_s3 + $0x8] sm:$0xff]  ;;  %p5344_p3 = pnand %p5343_p2, %p5339_p13 }
  0x28   : > { %463 = vadd.xlane.f32.xlu2 %v462_v11  ;;  %v1446_v11 = vld [vmem:[%s9392_s5 + $0x8] sm:$0xff] }
  0x2f   : > { %466 = vadd.xlane.f32.xlu1 %v465_v13  ;;  %v1445_v13 = vld [vmem:[%s9392_s5] sm:$0xff] }
  0x92   : > { %v455_v21 = vpop.xlane.xlu1 %454  ;;  %v449_v22 = vpop.xlane.xlu0 %448 }
  0x93   : > { %v552_v23 = vmul.f32 %v5525_v20, %v455_v21  ;;  %v550_v24 = vmul.f32 %v5525_v20, %v449_v22  ;;  %v461_v25 = vpop.xlane.xlu2 %460 }
  0x94   : > { %v554_v49 = vmul.f32 %v5525_v20, %v461_v25 }
  0x95   : > { %v5529_v26 = vsub.f32 %v414_v0, %v552_v23  ;;  %v5531_v27 = vsub.f32 %v412_v1, %v550_v24  ;;  %v5595_v1 = vld [vmem:[%s5506_s19 + $0x58] sm:$0xff] }
  0x96   : > { %v5572_v53 = vsub.f32 %v5511_v2, %v554_v49  ;;  %v480_v3 = vsel %vm446_vm0, %v5595_v1, 0.0 }
  0x97   : > { %v616_v28 = vmul.f32 %v5529_v26, %v5529_v26  ;;  %v614_v29 = vmul.f32 %v5531_v27, %v5531_v27 }
  0x98   : > { %v618_v59 = vmul.f32 %v5572_v53, %v5572_v53 }
  0x99   : > { %v652_v30 = vsel %vm446_vm0, %v616_v28, 0.0  ;;  %v646_v31 = vsel %vm446_vm0, %v614_v29, 0.0 }
  0x9a   : > { %653 = vadd.xlane.f32.xlu1 %v652_v30  ;;  %647 = vadd.xlane.f32.xlu0 %v646_v31  ;;  %v452_v32 = vpop.xlane.xlu0 %451  ;;  %v458_v33 = vpop.xlane.xlu1 %457  ;;  %v658_v63 = vsel %vm446_vm0, %v618_v59, 0.0 }
  0x9b   : > { %v551_v34 = vmul.f32 %v5525_v20, %v452_v32  ;;  %v464_v35 = vpop.xlane.xlu2 %463  ;;  %v553_v37 = vmul.f32 %v5525_v20, %v458_v33 }
  0x9c   : > { %v555_v38 = vmul.f32 %v5525_v20, %v464_v35 }
  0x9d   : > { %v5548_v40 = vsub.f32 %v413_v6, %v551_v34  ;;  %v5554_v43 = vsub.f32 %v415_v7, %v553_v37  ;;  %v1231_v6 = vld [vmem:[%s9390_s3 + $0x18] sm:$0xff] }
  0x9e   : > { %v5552_v42 = vsub.f32 %v417_v8, %v555_v38  ;;  %v1448_v7 = vld [vmem:[%s9392_s5 + $0x18] sm:$0xff]  ;;  %1344 = vmatpush.msra.mxu0 %v1231_v6  ;;  %v1230_v8 = vld [vmem:[%s9390_s3 + $0x10] sm:$0xff]  ;;  %4958 = vmatpush.msra.mxu3 %v1231_v6  ;;  %v5680_v6 = vld [vmem:[%s9438_s1] ss:$0 sm:$0xff] }
  0x9f   : > { %v615_v45 = vmul.f32 %v5548_v40, %v5548_v40  ;;  %v617_v48 = vmul.f32 %v5554_v43, %v5554_v43  ;;  %1465 = vmatpush.msra.mxu1 %v1448_v7 }
  0xa0   : > { %v619_v47 = vmul.f32 %v5552_v42, %v5552_v42  ;;  %1345 = vmatpush.msra.mxu0 %v1230_v8  ;;  %4959 = vmatpush.msra.mxu3 %v1230_v8 }
  0xa1   : > { %v649_v46 = vsel %vm446_vm0, %v615_v45, 0.0  ;;  %v655_v52 = vsel %vm446_vm0, %v617_v48, 0.0  ;;  %1466 = vmatpush.msra.mxu1 %v1447_v9 }
  0xa2   : > { %475 = vadd.xlane.f32.xlu1 %v474_v41  ;;  %469 = vadd.xlane.f32.xlu0 %v468_v44  ;;  %v661_v51 = vsel %vm446_vm0, %v619_v47, 0.0  ;;  %v467_v55 = vpop.xlane.xlu1 %466 }
  0xa3   : > { %650 = vadd.xlane.f32.xlu2 %v649_v46  ;;  %v556_v56 = vmul.f32 %v5525_v20, %v467_v55  ;;  %1346 = vmatpush.msra.mxu0 %v1229_v10 }
  0xa4   : > { %1467 = vmatpush.msra.mxu1 %v1446_v11  ;;  %4960 = vmatpush.msra.mxu3 %v1229_v10 }
  0xa5   : > { %v5587_v61 = vsub.f32 %v418_v12, %v556_v56  ;;  %v1228_v12 = vld [vmem:[%s9390_s3] sm:$0xff] }
  0xa6   : > { %1347 = vmatpush.msra.mxu0 %v1228_v12  ;;  %1468 = vmatpush.msra.mxu1 %v1445_v13 }
  0xa7   : > { %v620_v0 = vmul.f32 %v5587_v61, %v5587_v61  ;;  %4961 = vmatpush.msra.mxu3 %v1228_v12 }
  0xa9   : > { %v664_v2 = vsel %vm446_vm0, %v620_v0, 0.0  ;;  %4962 = vmatpush.msrb.mxu3 %v1448_v7 }
  0xaa   : > { %662 = vadd.xlane.f32.xlu1 %v661_v51  ;;  %656 = vadd.xlane.f32.xlu0 %v655_v52  ;;  %v5659_v51 = vld [vmem:[%s5506_s19 + $0x80] sm:$0xff] }
  0xab   : > { %472 = vadd.xlane.f32.xlu2 %v471_v54  ;;  %4963 = vmatpush.msrb.mxu3 %v1447_v9  ;;  %v5663_v54 = vld [vmem:[%s5506_s19 + $0x70] sm:$0xff]  ;;  %v495_v0 = vsel %vm446_vm0, %v5659_v51, 0.0 }
  0xad   : > { %4964 = vmatpush.msrb.mxu3 %v1446_v11 }
  0xaf   : > { %4965 = vmatpush.msrb.mxu3 %v1445_v13 }
  0xb2   : > { %484 = vadd.xlane.f32.xlu1 %v483_v60  ;;  %478 = vadd.xlane.f32.xlu0 %v477_v62 }
  0xb3   : > { %659 = vadd.xlane.f32.xlu2 %v658_v63 }
  0xba   : > { %665 = vadd.xlane.f32.xlu0 %v664_v2 }
  0xbb   : > { %481 = vadd.xlane.f32.xlu2 %v480_v3 }
  0xc2   : > { %487 = vadd.xlane.f32.xlu0 %v486_v5  ;;  %v489_v5 = vsel %vm446_vm0, %v5663_v54, 0.0 }
 0x10d   : > { %v654_v14 = vpop.xlane.xlu1 %653  ;;  %v648_v15 = vpop.xlane.xlu0 %647 }
 0x10e   : > { %v744_v16 = vmul.f32 %v654_v14, %v5525_v20  ;;  %v742_v17 = vmul.f32 %v648_v15, %v5525_v20  ;;  %v5692_v14 = vld [vmem:[%s9389_s2] ss:$0 sm:$0xff] }
 0x110   : > { %v5631_v18 = vadd.f32 1e-05, %v744_v16  ;;  %v774_v19 = vadd.f32 1e-05, %v742_v17 }
 0x112   : > { %5027 = vrsqrt.f32 %v5631_v18  ;;  %vm812_vm3 = vweird.f32 %v774_v19  ;;  %vm832_vm5 = vweird.f32 %v5631_v18 }
 0x113   : > { %5029 = vrsqrt.f32 %v774_v19 }
 0x115   : > { %v476_v21 = vpop.xlane.xlu1 %475  ;;  %v470_v22 = vpop.xlane.xlu0 %469 }
 0x116   : > { %v559_v23 = vmul.f32 %v5525_v20, %v476_v21  ;;  %v651_v24 = vpop.xlane.xlu2 %650  ;;  %v557_v25 = vmul.f32 %v5525_v20, %v470_v22 }
 0x117   : > { %v743_v28 = vmul.f32 %v651_v24, %v5525_v20 }
 0x118   : > { %v5637_v29 = vpop.eup %5027  ;;  %v5640_v30 = vsub.f32 %v5541_v36, %v559_v23  ;;  %v5643_v31 = vsub.f32 %v5546_v39, %v557_v25 }
 0x119   : > { %v5030_v32 = vpop.eup %5029  ;;  %v827_v33 = vmul.f32 %v5637_v29, %v5631_v18  ;;  %v5647_v34 = vadd.f32 1e-05, %v743_v28  ;;  %vm833_vm6 = vweird.f32 %v5637_v29 }
 0x11a   : > { %v807_v35 = vmul.f32 %v5030_v32, %v774_v19  ;;  %v623_v37 = vmul.f32 %v5640_v30, %v5640_v30  ;;  %v621_v38 = vmul.f32 %v5643_v31, %v5643_v31  ;;  %vm813_vm2 = vweird.f32 %v5030_v32  ;;  %vm5720_vm9 = vmor %vm832_vm5, %vm833_vm6 }
 0x11b   : > { %5031 = vrsqrt.f32 %v5647_v34  ;;  %v828_v44 = vmul.f32 %v5637_v29, %v827_v33  ;;  %vm814_vm4 = vmor %vm812_vm3, %vm813_vm2  ;;  %vm822_vm7 = vweird.f32 %v5647_v34 }
 0x11c   : > { %v808_v36 = vmul.f32 %v5030_v32, %v807_v35  ;;  %v673_v39 = vsel %vm446_vm0, %v623_v37, 0.0  ;;  %v667_v41 = vsel %vm446_vm0, %v621_v38, 0.0  ;;  %v5713_v35 = vld [vmem:[%s5506_s19 + $0x78] sm:$0xff] }
 0x11d   : > { %v663_v45 = vpop.xlane.xlu1 %662  ;;  %674 = vadd.xlane.f32.xlu0 %v673_v39  ;;  %668 = vadd.xlane.f32.xlu2 %v667_v41  ;;  %v657_v46 = vpop.xlane.xlu0 %656  ;;  %v829_v62 = vmul.f32 0.5, %v828_v44 }
 0x11e   : > { %v809_v47 = vmul.f32 0.5, %v808_v36  ;;  %v473_v48 = vpop.xlane.xlu2 %472  ;;  %v745_v49 = vmul.f32 %v657_v46, %v5525_v20  ;;  %v747_v56 = vmul.f32 %v663_v45, %v5525_v20  ;;  %v492_v45 = vsel %vm446_vm0, %v5713_v35, 0.0 }
 0x11f   : > { %v558_v52 = vmul.f32 %v5525_v20, %v473_v48  ;;  %v830_v10 = vsub.f32 1.5, %v829_v62 }
 0x120   : > { %v810_v55 = vsub.f32 1.5, %v809_v47  ;;  %v5666_v59 = vadd.f32 1e-05, %v745_v49  ;;  %v5682_v8 = vadd.f32 1e-05, %v747_v56 }
 0x121   : > { %v5032_v60 = vpop.eup %5031  ;;  %v5669_v63 = vsub.f32 %v5567_v50, %v558_v52  ;;  %v831_v37 = vmul.f32 %v5637_v29, %v830_v10 }
 0x122   : > { %v811_v2 = vmul.f32 %v5030_v32, %v810_v55  ;;  %v817_v3 = vmul.f32 %v5032_v60, %v5647_v34  ;;  %5033 = vrsqrt.f32 %v5666_v59  ;;  %vm823_vm8 = vweird.f32 %v5032_v60 }
 0x123   : > { %v622_v9 = vmul.f32 %v5669_v63, %v5669_v63  ;;  %5035 = vrsqrt.f32 %v5682_v8  ;;  %vm824_vm10 = vmor %vm822_vm7, %vm823_vm8  ;;  %v835_v49 = vsel %vm5720_vm9, %v5637_v29, %v831_v37  ;;  %vm842_vm11 = vweird.f32 %v5666_v59  ;;  %v5758_v29 = vld [vmem:[%s5506_s19 + $0x88] sm:$0xff] }
 0x124   : > { %v815_v50 = vsel %vm814_vm4, %v5030_v32, %v811_v2  ;;  %v818_v7 = vmul.f32 %v5032_v60, %v817_v3  ;;  %vm862_vm2 = vweird.f32 %v5682_v8  ;;  %vm1566_vm8 = vcmask 523264  }
 0x125   : > { %v485_v11 = vpop.xlane.xlu1 %484  ;;  %496 = vadd.xlane.f32.xlu0 %v495_v0  ;;  %490 = vadd.xlane.f32.xlu2 %v489_v5  ;;  %v479_v12 = vpop.xlane.xlu0 %478  ;;  %v1126_v13 = vmul.f32 %v815_v50, %v5531_v27  ;;  %v670_v17 = vsel %vm446_vm0, %v622_v9, 0.0  ;;  %v5751_v0 = vld [vmem:[%s5506_s19 + $0x98] sm:$0xff]  ;;  %v1128_v9 = vmul.f32 %v835_v49, %v5529_v26 }
 0x126   : > { %v819_v15 = vmul.f32 0.5, %v818_v7  ;;  %v562_v16 = vmul.f32 %v5525_v20, %v485_v11  ;;  %v660_v19 = vpop.xlane.xlu2 %659  ;;  %v560_v21 = vmul.f32 %v5525_v20, %v479_v12  ;;  %671 = vadd.xlane.f32.xlu1 %v670_v17  ;;  %v504_v11 = vsel %vm446_vm0, %v5751_v0, 0.0 }
 0x127   : > { %v746_v27 = vmul.f32 %v660_v19, %v5525_v20  ;;  %v1161_v22 = vmul.f32 %v5680_v6, %v1126_v13  ;;  %v1163_v17 = vmul.f32 %v5680_v6, %v1128_v9  ;;  %v5385_v12 = vmov 0.0  }
 0x128   : > { %v820_v23 = vsub.f32 1.5, %v819_v15  ;;  %v5702_v24 = vsub.f32 %v5578_v57, %v562_v16  ;;  %v5705_v25 = vsub.f32 %v5581_v58, %v560_v21  ;;  %v5707_v28 = vpop.eup %5033  ;;  %1567 = vst.msk [vmem:[#allocation2] sm:$0xff] %vm1566_vm8, %v5385_v12 }
 0x129   : > { %v5709_v32 = vadd.f32 1e-05, %v746_v27  ;;  %v1196_v33 = vadd.f32 %v5692_v14, %v1161_v22  ;;  %v837_v38 = vmul.f32 %v5707_v28, %v5666_v59  ;;  %v5742_v48 = vpop.eup %5035  ;;  %vm843_vm12 = vweird.f32 %v5707_v28  ;;  %1568 = vst.msk [vmem:[#allocation2 + $0x8] sm:$0xff] %vm1566_vm8, %v5385_v12 }
 0x12a   : > { %v821_v58 = vmul.f32 %v5032_v60, %v820_v23  ;;  %v626_v36 = vmul.f32 %v5702_v24, %v5702_v24  ;;  %v624_v18 = vmul.f32 %v5705_v25, %v5705_v25  ;;  %v857_v5 = vmul.f32 %v5742_v48, %v5682_v8  ;;  %vm5772_vm13 = vmor %vm842_vm11, %vm843_vm12  ;;  %1569 = vst.msk [vmem:[#allocation2 + $0x10] sm:$0xff] %vm1566_vm8, %v5385_v12 }
 0x12b   : > { %5037 = vrsqrt.f32 %v5709_v32  ;;  %4855 = vmatmul.msk.f32.vlgmr.msra.gmra.mxu0 %vm446_vm0, %v1196_v33  ;;  %4887 = vmatmul.msk.f32.vlgmr.msra.gmra.mxu1 %vm446_vm0, %v1196_v33  ;;  %v838_v41 = vmul.f32 %v5707_v28, %v837_v38  ;;  %vm852_vm14 = vweird.f32 %v5709_v32  ;;  %v1198_v57 = vadd.f32 %v5692_v14, %v1163_v17  ;;  %v5796_v38 = vld [vmem:[%s5506_s19 + $0x90] sm:$0xff]  ;;  %1570 = vst.msk [vmem:[#allocation2 + $0x118] sm:$0xff] %vm1566_vm8, %v5385_v12 }
 0x12c   : > { %v825_v39 = vsel %vm824_vm10, %v5032_v60, %v821_v58  ;;  %v682_v44 = vsel %vm446_vm0, %v626_v36, 0.0  ;;  %v676_v34 = vsel %vm446_vm0, %v624_v18, 0.0  ;;  %v858_v19 = vmul.f32 %v5742_v48, %v857_v5  ;;  %1571 = vst.msk [vmem:[#allocation2 + $0x120] sm:$0xff] %vm1566_vm8, %v5385_v12 }
 0x12d   : > { %683 = vadd.xlane.f32.xlu0 %v682_v44  ;;  %v666_v46 = vpop.xlane.xlu0 %665  ;;  %v1127_v47 = vmul.f32 %v825_v39, %v5548_v40  ;;  %v839_v52 = vmul.f32 0.5, %v838_v41  ;;  %677 = vadd.xlane.f32.xlu2 %v676_v34  ;;  %vm863_vm3 = vweird.f32 %v5742_v48  ;;  %v5810_v34 = vld [vmem:[%s5506_s19 + $0xa0] sm:$0xff]  ;;  %1572 = vst.msk [vmem:[#allocation2 + $0x128] sm:$0xff] %vm1566_vm8, %v5385_v12 }
 0x12e   : > { %v482_v55 = vpop.xlane.xlu2 %481  ;;  %v748_v56 = vmul.f32 %v666_v46, %v5525_v20  ;;  %493 = vadd.xlane.f32.xlu1 %v492_v45  ;;  %vm864_vm4 = vmor %vm862_vm2, %vm863_vm3  ;;  %v507_v8 = vsel %vm446_vm0, %v5810_v34, 0.0 }
 0x12f   : > { %v561_v60 = vmul.f32 %v5525_v20, %v482_v55  ;;  %v1162_v62 = vmul.f32 %v5680_v6, %v1127_v47  ;;  %v840_v2 = vsub.f32 1.5, %v839_v52 }
 0x130   : > { %v5755_v40 = vadd.f32 1e-05, %v748_v56 }
 0x131   : > { %v5038_v3 = vpop.eup %5037  ;;  %v5763_v50 = vsub.f32 %v5595_v1, %v561_v60  ;;  %v1197_v7 = vadd.f32 %v5692_v14, %v1162_v62  ;;  %v841_v10 = vmul.f32 %v5707_v28, %v840_v2  ;;  %v498_v1 = vsel %vm446_vm0, %v5758_v29, 0.0 }
 0x132   : > { %v847_v59 = vmul.f32 %v5038_v3, %v5709_v32  ;;  %5039 = vrsqrt.f32 %v5755_v40  ;;  %vm853_vm15 = vweird.f32 %v5038_v3  ;;  %vm872_vm5 = vweird.f32 %v5755_v40 }
 0x133   : > { %4856 = vmatmul.msk.f32.gmra.mxu0 %vm446_vm0, %v1197_v7  ;;  %4888 = vmatmul.msk.f32.gmra.mxu1 %vm446_vm0, %v1197_v7  ;;  %v625_v26 = vmul.f32 %v5763_v50, %v5763_v50  ;;  %v845_v21 = vsel %vm5772_vm13, %v5707_v28, %v841_v10  ;;  %v859_v28 = vmul.f32 0.5, %v858_v19  ;;  %vm854_vm1 = vmor %vm852_vm14, %vm853_vm15 }
 0x134   : > { %v848_v13 = vmul.f32 %v5038_v3, %v847_v59  ;;  %v1129_v58 = vmul.f32 %v845_v21, %v5554_v43  ;;  %v501_v43 = vsel %vm446_vm0, %v5796_v38, 0.0 }
 0x135   : > { %v679_v15 = vsel %vm446_vm0, %v625_v26, 0.0  ;;  %v488_v16 = vpop.xlane.xlu0 %487  ;;  %505 = vadd.xlane.f32.xlu0 %v504_v11  ;;  %499 = vadd.xlane.f32.xlu2 %v498_v1  ;;  %v860_v41 = vsub.f32 1.5, %v859_v28 }
 0x136   : > { %v849_v27 = vmul.f32 0.5, %v848_v13  ;;  %v563_v22 = vmul.f32 %v5525_v20, %v488_v16  ;;  %680 = vadd.xlane.f32.xlu1 %v679_v15  ;;  %v1164_v32 = vmul.f32 %v5680_v6, %v1129_v58  ;;  %v439_v15 = vld [vmem:[%s5506_s19 + $0xd8] sm:$0xff] }
 0x137   : > { %v861_v49 = vmul.f32 %v5742_v48, %v860_v41  ;;  %v528_v19 = vsel %vm446_vm0, %v439_v15, 0.0  ;;  %v433_v41 = vld [vmem:[%s5506_s19 + $0xa8] sm:$0xff] }
 0x138   : > { %v5040_v23 = vpop.eup %5039  ;;  %v850_v33 = vsub.f32 1.5, %v849_v27  ;;  %v5791_v37 = vsub.f32 %v5601_v4, %v563_v22  ;;  %v1199_v46 = vadd.f32 %v5692_v14, %v1164_v32 }
 0x139   : > { %v867_v18 = vmul.f32 %v5040_v23, %v5755_v40  ;;  %v865_v56 = vsel %vm864_vm4, %v5742_v48, %v861_v49  ;;  %vm873_vm6 = vweird.f32 %v5040_v23  ;;  %v5833_v40 = vld [vmem:[%s5506_s19 + $0xd0] sm:$0xff] }
 0x13a   : > { %v851_v36 = vmul.f32 %v5038_v3, %v850_v33  ;;  %v627_v39 = vmul.f32 %v5791_v37, %v5791_v37  ;;  %v1131_v2 = vmul.f32 %v865_v56, %v5552_v42  ;;  %vm874_vm7 = vmor %vm872_vm5, %vm873_vm6  ;;  %v525_v42 = vsel %vm446_vm0, %v5833_v40, 0.0 }
 0x13b   : > { %4857 = vmatmul.msk.f32.gmra.mxu0 %vm446_vm0, %v1198_v57  ;;  %4889 = vmatmul.msk.f32.gmra.mxu1 %vm446_vm0, %v1198_v57  ;;  %v868_v45 = vmul.f32 %v5040_v23, %v867_v18  ;;  %v440_v57 = vld [vmem:[%s5506_s19 + $0xe0] sm:$0xff] }
 0x13c   : > { %v685_v4 = vsel %vm446_vm0, %v627_v39, 0.0  ;;  %v855_v44 = vsel %vm854_vm1, %v5038_v3, %v851_v36  ;;  %v1166_v5 = vmul.f32 %v5680_v6, %v1131_v2 }
 0x13d   : > { %686 = vadd.xlane.f32.xlu2 %v685_v4  ;;  %v1130_v47 = vmul.f32 %v855_v44, %v5572_v53  ;;  %v869_v52 = vmul.f32 0.5, %v868_v45  ;;  %v5823_v53 = vld [vmem:[%s5506_s19 + $0xc8] sm:$0xff]  ;;  %v531_v4 = vsel %vm446_vm0, %v440_v57, 0.0 }
 0x13e   : > { %502 = vadd.xlane.f32.xlu1 %v501_v43  ;;  %v522_v48 = vsel %vm446_vm0, %v5823_v53, 0.0  ;;  %v1201_v9 = vadd.f32 %v5692_v14, %v1166_v5 }
 0x13f   : > { %v1165_v55 = vmul.f32 %v5680_v6, %v1130_v47  ;;  %v870_v60 = vsub.f32 1.5, %v869_v52  ;;  %v510_v52 = vsel %vm446_vm0, %v433_v41, 0.0 }
 0x141   : > { %v1200_v62 = vadd.f32 %v5692_v14, %v1165_v55  ;;  %v871_v3 = vmul.f32 %v5040_v23, %v870_v60  ;;  %v5883_v55 = vld [vmem:[%s9394_s7] sm:$0xff] }
 0x142   : > { %v5934_v57 = vperm.slane %v5883_v55, 4 }
 0x143   : > { %4858 = vmatmul.msk.f32.gmra.mxu0 %vm446_vm0, %v1199_v46  ;;  %4890 = vmatmul.msk.f32.gmra.mxu1 %vm446_vm0, %v1199_v46  ;;  %v875_v7 = vsel %vm874_vm7, %v5040_v23, %v871_v3  ;;  %v1605_v23 = vlaneseq }
 0x144   : > { %v1132_v10 = vmul.f32 %v875_v7, %v5587_v61 }
 0x145   : > { %508 = vadd.xlane.f32.xlu2 %v507_v8  ;;  %v5872_v44 = vshrl.u32 %v1605_v23, 7  ;;  %v434_v8 = vld [vmem:[%s5506_s19 + $0xb0] sm:$0xff] }
 0x146   : > { %v1167_v59 = vmul.f32 %v5680_v6, %v1132_v10 }
 0x147   : > { %v1642_v2 = vand.u32 15, %v5872_v44  ;;  %v5889_v3 = vadd.s32 8, %v5872_v44 }
 0x148   : > { %v1202_v11 = vadd.f32 %v5692_v14, %v1167_v59  ;;  %v5897_v59 = vsel %vm446_vm0, %v434_v8, 0.0 }
 0x149   : > { %vm5921_vm12 = vcmp.eq.s32.totalorder %v1642_v2, 0 }
 0x14b   : > { %4859 = vmatmul.msk.f32.gmra.mxu0 %vm446_vm0, %v1200_v62  ;;  %4891 = vmatmul.msk.f32.gmra.mxu1 %vm446_vm0, %v1200_v62 }
 0x14d   : > { %523 = vadd.xlane.f32.xlu2 %v522_v48 }
 0x153   : > { %4860 = vmatmul.msk.f32.gmra.mxu0 %vm446_vm0, %v1201_v9  ;;  %4892 = vmatmul.msk.f32.gmra.mxu1 %vm446_vm0, %v1201_v9 }
 0x155   : > { %526 = vadd.xlane.f32.xlu2 %v525_v42 }
 0x15b   : > { %4861 = vmatmul.msk.f32.gmra.mxu0 %vm446_vm0, %v1202_v11  ;;  %4893 = vmatmul.msk.f32.gmra.mxu1 %vm446_vm0, %v1202_v11  ;;  %v5900_v11 = vperm.slane %v5883_v55, 0 }
 0x15d   : > { %529 = vadd.xlane.f32.xlu2 %v528_v19 }
 0x165   : > { %532 = vadd.xlane.f32.xlu2 %v531_v4  ;;  %v5939_v4 = vperm.slane %v5883_v55, 2 }
 0x190   : > { %v669_v61 = vpop.xlane.xlu2 %668  ;;  %v675_v26 = vpop.xlane.xlu0 %674 }
 0x191   : > { %v749_v1 = vmul.f32 %v669_v61, %v5525_v20  ;;  %v751_v13 = vmul.f32 %v675_v26, %v5525_v20  ;;  %v2088_v26 = vld [vmem:[#allocation2 + $0x7] sm:$0xff] }
 0x193   : > { %v781_v16 = vadd.f32 1e-05, %v749_v1  ;;  %v5854_v17 = vadd.f32 1e-05, %v751_v13  ;;  %v5905_v1 = vperm.slane %v5883_v55, 1 }
 0x195   : > { %5041 = vrsqrt.f32 %v781_v16  ;;  %vm882_vm10 = vweird.f32 %v781_v16  ;;  %vm902_vm13 = vweird.f32 %v5854_v17 }
 0x196   : > { %5043 = vrsqrt.f32 %v5854_v17 }
 0x198   : > { %v491_v21 = vpop.xlane.xlu2 %490  ;;  %v497_v27 = vpop.xlane.xlu0 %496 }
 0x199   : > { %v564_v22 = vmul.f32 %v5525_v20, %v491_v21  ;;  %v672_v33 = vpop.xlane.xlu1 %671  ;;  %v566_v56 = vmul.f32 %v5525_v20, %v497_v27 }
 0x19a   : > { %v750_v28 = vmul.f32 %v672_v33, %v5525_v20  ;;  %v2184_v33 = vsel %vm5921_vm12, 0.0, %v2088_v26 }
 0x19b   : > { %v5042_v58 = vpop.eup %5041  ;;  %v5862_v36 = vsub.f32 %v5663_v54, %v564_v22  ;;  %v5910_v15 = vsub.f32 %v5659_v51, %v566_v56  ;;  %v2217_v8 = vmul.f32 %v5900_v11, %v2184_v33  ;;  %v2089_v56 = vld [vmem:[#allocation2 + $0xf] sm:$0xff] }
 0x19c   : > { %v5864_v18 = vpop.eup %5043  ;;  %v877_v39 = vmul.f32 %v5042_v58, %v781_v16  ;;  %v5867_v43 = vadd.f32 1e-05, %v750_v28  ;;  %vm883_vm9 = vweird.f32 %v5042_v58  ;;  %v5919_v16 = vld [vmem:[%s9391_s4] ss:$0 sm:$0xff] }
 0x19d   : > { %v628_v32 = vmul.f32 %v5862_v36, %v5862_v36  ;;  %v897_v54 = vmul.f32 %v5864_v18, %v5854_v17  ;;  %vm884_vm11 = vmor %vm882_vm10, %vm883_vm9  ;;  %vm903_vm14 = vweird.f32 %v5864_v18 }
 0x19e   : > { %v878_v45 = vmul.f32 %v5042_v58, %v877_v39  ;;  %5045 = vrsqrt.f32 %v5867_v43  ;;  %v2249_v39 = vld [vmem:[#allocation2 + $0x8] sm:$0xff]  ;;  %vm892_vm15 = vweird.f32 %v5867_v43  ;;  %vm5979_vm2 = vmor %vm902_vm13, %vm903_vm14 }
 0x19f   : > { %v688_v46 = vsel %vm446_vm0, %v628_v32, 0.0  ;;  %v898_v5 = vmul.f32 %v5864_v18, %v897_v54  ;;  %v5942_v32 = vadd.s32 16, %v5872_v44 }
 0x1a0   : > { %v879_v47 = vmul.f32 0.5, %v878_v45  ;;  %689 = vadd.xlane.f32.xlu1 %v688_v46  ;;  %v684_v49 = vpop.xlane.xlu0 %683  ;;  %v678_v60 = vpop.xlane.xlu2 %677 }
 0x1a1   : > { %v754_v62 = vmul.f32 %v684_v49, %v5525_v20  ;;  %v494_v7 = vpop.xlane.xlu1 %493  ;;  %v752_v9 = vmul.f32 %v678_v60, %v5525_v20  ;;  %v899_v22 = vmul.f32 0.5, %v898_v5  ;;  %v2282_v5 = vmul.f32 %v5905_v1, %v2249_v39 }
 0x1a2   : > { %v880_v48 = vsub.f32 1.5, %v879_v47  ;;  %v565_v10 = vmul.f32 %v5525_v20, %v494_v7  ;;  %v2250_v7 = vld [vmem:[#allocation2 + $0x10] sm:$0xff] }
 0x1a3   : > { %v5894_v42 = vadd.f32 1e-05, %v754_v62  ;;  %v5902_v61 = vadd.f32 1e-05, %v752_v9  ;;  %v900_v46 = vsub.f32 1.5, %v899_v22  ;;  %v1649_v22 = vand.u32 15, %v5889_v3 }
 0x1a4   : > { %v881_v12 = vmul.f32 %v5042_v58, %v880_v48  ;;  %v5907_v13 = vpop.eup %5045  ;;  %v5913_v19 = vsub.f32 %v5713_v35, %v565_v10 }
 0x1a5   : > { %5047 = vrsqrt.f32 %v5894_v42  ;;  %v887_v51 = vmul.f32 %v5907_v13, %v5867_v43  ;;  %vm893_vm1 = vweird.f32 %v5907_v13  ;;  %v901_v43 = vmul.f32 %v5864_v18, %v900_v46 }
 0x1a6   : > { %v885_v27 = vsel %vm884_vm11, %v5042_v58, %v881_v12  ;;  %5049 = vrsqrt.f32 %v5902_v61  ;;  %v629_v35 = vmul.f32 %v5913_v19, %v5913_v19  ;;  %vm894_vm3 = vmor %vm892_vm15, %vm893_vm1  ;;  %vm932_vm4 = vweird.f32 %v5894_v42 }
 0x1a7   : > { %v1133_v23 = vmul.f32 %v885_v27, %v5643_v31  ;;  %v888_v58 = vmul.f32 %v5907_v13, %v887_v51  ;;  %v5972_v51 = vmul.f32 %v5900_v11, %v2089_v56  ;;  %v2346_v56 = vld [vmem:[#allocation2 + $0x9] sm:$0xff]  ;;  %vm912_vm6 = vweird.f32 %v5902_v61 }
 0x1a8   : > { %v1349_v28 = vpop.f32.mrf.mxu0  ;;  %511 = vadd.xlane.f32.xlu1 %v510_v52  ;;  %v691_v41 = vsel %vm446_vm0, %v629_v35, 0.0  ;;  %v500_v45 = vpop.xlane.xlu2 %499  ;;  %v630_v52 = vmul.f32 %v5910_v15, %v5910_v15  ;;  %vm6049_vm11 = vcmp.eq.s32.totalorder %v1649_v22, 15 }
 0x1a9   : > { %v1350_v31 = vadd.f32 %v5919_v16, %v1349_v28  ;;  %v1168_v54 = vmul.f32 %v5680_v6, %v1133_v23  ;;  %v889_v47 = vmul.f32 0.5, %v888_v58  ;;  %692 = vadd.xlane.f32.xlu0 %v691_v41  ;;  %v681_v49 = vpop.xlane.xlu1 %680  ;;  %v567_v2 = vmul.f32 %v5525_v20, %v500_v45 }
 0x1aa   : > { %v753_v62 = vmul.f32 %v681_v49, %v5525_v20  ;;  %v2283_v58 = vmul.f32 %v5905_v1, %v2250_v7  ;;  %v694_v17 = vsel %vm446_vm0, %v630_v52, 0.0  ;;  %v2314_v45 = vadd.f32 %v2282_v5, %v2217_v8  ;;  %v435_v8 = vld [vmem:[%s5506_s19 + $0xb8] sm:$0xff] }
 0x1ab   : > { %v5951_v60 = vpop.eup %5047  ;;  %1573 = vst.msk [vmem:[#allocation2 + $0x18] sm:$0xff] %vm1566_vm8, %v1350_v31  ;;  %v1203_v48 = vadd.f32 %v5692_v14, %v1168_v54  ;;  %v890_v10 = vsub.f32 1.5, %v889_v47  ;;  %v5989_v28 = vsub.f32 %v5758_v29, %v567_v2  ;;  %v1656_v54 = vand.u32 15, %v5942_v32 }
 0x1ac   : > { %v5958_v9 = vpop.eup %5049  ;;  %v927_v12 = vmul.f32 %v5951_v60, %v5894_v42  ;;  %v5966_v27 = vadd.f32 1e-05, %v753_v62  ;;  %vm933_vm5 = vweird.f32 %v5951_v60  ;;  %v2475_v7 = vmul.f32 %v5939_v4, %v2346_v56 }
 0x1ad   : > { %v907_v26 = vmul.f32 %v5958_v9, %v5902_v61  ;;  %4862 = vmatmul.msk.f32.gmra.mxu0 %vm446_vm0, %v1203_v48  ;;  %4894 = vmatmul.msk.f32.gmra.mxu1 %vm446_vm0, %v1203_v48  ;;  %v891_v23 = vmul.f32 %v5907_v13, %v890_v10  ;;  %v631_v48 = vmul.f32 %v5989_v28, %v5989_v28  ;;  %vm913_vm7 = vweird.f32 %v5958_v9  ;;  %vm6025_vm9 = vmor %vm932_vm4, %vm933_vm5 }
 0x1ae   : > { %v928_v33 = vmul.f32 %v5951_v60, %v927_v12  ;;  %5051 = vrsqrt.f32 %v5966_v27  ;;  %vm6036_vm10 = vmor %vm912_vm6, %vm913_vm7  ;;  %vm6077_vm13 = vcmp.eq.s32.totalorder %v1656_v54, 0  ;;  %vm922_vm14 = vweird.f32 %v5966_v27 }
 0x1af   : > { %v908_v3 = vmul.f32 %v5958_v9, %v907_v26  ;;  %v895_v39 = vsel %vm894_vm3, %v5907_v13, %v891_v23  ;;  %v905_v13 = vsel %vm5979_vm2, %v5864_v18, %v901_v43  ;;  %v506_v18 = vpop.xlane.xlu0 %505  ;;  %v516_v43 = vsel %vm446_vm0, %v435_v8, 0.0 }
 0x1b0   : > { %v929_v31 = vmul.f32 0.5, %v928_v33  ;;  %v1352_v41 = vpop.f32.mrf.mxu0  ;;  %514 = vadd.xlane.f32.xlu1 %v5897_v59  ;;  %v687_v49 = vpop.xlane.xlu2 %686  ;;  %v1134_v29 = vmul.f32 %v895_v39, %v5669_v63  ;;  %v1135_v35 = vmul.f32 %v905_v13, %v5640_v30  ;;  %v569_v39 = vmul.f32 %v5525_v20, %v506_v18 }
 0x1b1   : > { %v909_v46 = vmul.f32 0.5, %v908_v3  ;;  %v1353_v47 = vadd.f32 %v5919_v16, %v1352_v41  ;;  %v755_v59 = vmul.f32 %v687_v49, %v5525_v20  ;;  %695 = vadd.xlane.f32.xlu0 %v694_v17  ;;  %v503_v32 = vpop.xlane.xlu1 %502  ;;  %v436_v17 = vld [vmem:[%s5506_s19 + $0xc0] sm:$0xff]  ;;  %v6047_v41 = vperm.slane %v5883_v55, 3 }
 0x1b2   : > { %v930_v52 = vsub.f32 1.5, %v929_v31  ;;  %v1169_v2 = vmul.f32 %v5680_v6, %v1134_v29  ;;  %v568_v63 = vmul.f32 %v5525_v20, %v503_v32  ;;  %v697_v31 = vsel %vm446_vm0, %v631_v48, 0.0  ;;  %v6068_v32 = vld [vmem:[#allocation2 + $0x17] sm:$0xff] }
 0x1b3   : > { %v910_v62 = vsub.f32 1.5, %v909_v46  ;;  %1574 = vst.msk [vmem:[#allocation2 + $0x20] sm:$0xff] %vm1566_vm8, %v1353_v47  ;;  %v6011_v5 = vadd.f32 1e-05, %v755_v59  ;;  %v6054_v49 = vadd.f32 %v2475_v7, %v2314_v45  ;;  %v6057_v29 = vperm.slane %v5883_v55, 5  ;;  %v6095_v48 = vld [vmem:[#allocation2 + $0x18] sm:$0xff] }
 0x1b4   : > { %v6014_v10 = vpop.eup %5051  ;;  %v931_v12 = vmul.f32 %v5951_v60, %v930_v52  ;;  %v1204_v26 = vadd.f32 %v5692_v14, %v1169_v2  ;;  %v6043_v42 = vsub.f32 %v5796_v38, %v568_v63  ;;  %v6060_v38 = vadd.f32 %v2283_v58, %v5972_v51 }
 0x1b5   : > { %v911_v23 = vmul.f32 %v5958_v9, %v910_v62  ;;  %v917_v3 = vmul.f32 %v6014_v10, %v5966_v27  ;;  %5053 = vrsqrt.f32 %v6011_v5  ;;  %v1170_v52 = vmul.f32 %v5680_v6, %v1135_v35 }
 0x1b6   : > { %4863 = vmatmul.msk.f32.gmra.mxu0 %vm446_vm0, %v1204_v26  ;;  %4895 = vmatmul.msk.f32.gmra.mxu1 %vm446_vm0, %v1204_v26  ;;  %v935_v56 = vsel %vm6025_vm9, %v5951_v60, %v931_v12  ;;  %v519_v59 = vsel %vm446_vm0, %v436_v17, 0.0  ;;  %v6075_v58 = vsub.f32 %v5751_v0, %v569_v39  ;;  %vm923_vm15 = vweird.f32 %v6014_v10  ;;  %v4456_v17 = vld [vmem:[%s9396_s9 + $0x38] sm:$0xff]  ;;  %v4455_v39 = vld [vmem:[%s9396_s9 + $0x30] sm:$0xff] }
 0x1b7   : > { %v918_v61 = vmul.f32 %v6014_v10, %v917_v3  ;;  %v915_v45 = vsel %vm6036_vm10, %v5958_v9, %v911_v23  ;;  %v632_v9 = vmul.f32 %v6043_v42, %v6043_v42  ;;  %v6087_v62 = vperm.slane %v5883_v55, 7  ;;  %vm6113_vm1 = vmor %vm922_vm14, %vm923_vm15  ;;  %4565 = vmatpush.msra.mxu2 %v4456_v17 }
 0x1b8   : > { %v1355_v47 = vpop.f32.mrf.mxu0  ;;  %517 = vadd.xlane.f32.xlu1 %v516_v43  ;;  %v509_v13 = vpop.xlane.xlu2 %508  ;;  %9453 = vst [vmem:[#allocation6_spill] sm:$0xff] %v6075_v58  ;;  %v1138_v63 = vmul.f32 %v935_v56, %v5702_v24  ;;  %v2573_v18 = vsel %vm5921_vm12, 0.0, %v6068_v32  ;;  %v1205_v12 = vadd.f32 %v5692_v14, %v1170_v52  ;;  %v1136_v26 = vmul.f32 %v915_v45, %v5705_v25  ;;  %v441_v43 = vld [vmem:[%s5506_s19 + $0xe8] sm:$0xff] }
 0x1b9   : > { %v1356_v22 = vadd.f32 %v5919_v16, %v1355_v47  ;;  %v919_v8 = vmul.f32 0.5, %v918_v61  ;;  %v570_v51 = vmul.f32 %v5525_v20, %v509_v13  ;;  %698 = vadd.xlane.f32.xlu0 %v697_v31  ;;  %v6106_v35 = vperm.slane %v5883_v55, 6  ;;  %v442_v13 = vld [vmem:[%s5506_s19 + $0xf0] sm:$0xff]  ;;  %4566 = vmatpush.msra.mxu2 %v4455_v39 }
 0x1ba   : > { %v633_v25 = vmul.f32 %v6075_v58, %v6075_v58  ;;  %v6122_v55 = vadd.s32 24, %v5872_v44  ;;  %v700_v27 = vsel %vm446_vm0, %v632_v9, 0.0  ;;  %v6134_v30 = vld [vmem:[#allocation2 + $0x19] sm:$0xff]  ;;  %v2606_v31 = vmul.f32 %v6047_v41, %v2573_v18  ;;  %v4454_v18 = vld [vmem:[%s9396_s9 + $0x28] sm:$0xff] }
 0x1bb   : > { %1575 = vst.msk [vmem:[#allocation2 + $0x28] sm:$0xff] %vm1566_vm8, %v1356_v22  ;;  %v6089_v2 = vpop.eup %5053  ;;  %v920_v0 = vsub.f32 1.5, %v919_v8  ;;  %v6092_v54 = vsub.f32 %v5810_v34, %v570_v51  ;;  %v2347_v34 = vld [vmem:[#allocation2 + $0x11] sm:$0xff]  ;;  %v2641_v61 = vmul.f32 %v5934_v57, %v6095_v48  ;;  %v534_v22 = vsel %vm446_vm0, %v441_v43, 0.0  ;;  %v6168_v23 = vld [vmem:[#allocation2 + $0x1f] sm:$0xff]  ;;  %4567 = vmatpush.msra.mxu2 %v4454_v18 }
 0x1bc   : > { %v937_v7 = vmul.f32 %v6089_v2, %v6011_v5  ;;  %v1173_v52 = vmul.f32 %v5680_v6, %v1138_v63  ;;  %v2443_v45 = vsel %vm6049_vm11, 0.0, %v2347_v34  ;;  %v1663_v43 = vand.u32 15, %v6122_v55  ;;  %v4453_v34 = vld [vmem:[%s9396_s9 + $0x20] sm:$0xff] }
 0x1bd   : > { %v921_v24 = vmul.f32 %v6014_v10, %v920_v0  ;;  %v634_v33 = vmul.f32 %v6092_v54, %v6092_v54  ;;  %v1171_v0 = vmul.f32 %v5680_v6, %v1136_v26  ;;  %vm942_vm2 = vweird.f32 %v6011_v5  ;;  %4568 = vmatpush.msra.mxu2 %v4453_v34  ;;  %v4449_v5 = vld [vmem:[%s9396_s9] sm:$0xff] }
 0x1be   : > { %v938_v3 = vmul.f32 %v6089_v2, %v937_v7  ;;  %4864 = vmatmul.msk.f32.gmra.mxu0 %vm446_vm0, %v1205_v12  ;;  %4896 = vmatmul.msk.f32.gmra.mxu1 %vm446_vm0, %v1205_v12  ;;  %v703_v7 = vsel %vm446_vm0, %v633_v25, 0.0  ;;  %v6163_v26 = vsel %vm446_vm0, %v442_v13, 0.0  ;;  %v1610_v25 = vadd.s32 32, %v5872_v44 }
 0x1bf   : > { %v706_v56 = vsel %vm446_vm0, %v634_v33, 0.0  ;;  %v925_v8 = vsel %vm6113_vm1, %v6014_v10, %v921_v24  ;;  %v2740_v10 = vmul.f32 %v6057_v29, %v6134_v30  ;;  %v2673_v24 = vadd.f32 %v2641_v61, %v2606_v31  ;;  %v6170_v33 = vld [vmem:[#allocation2 + $0x20] sm:$0xff] }
 0x1c0   : > { %v1358_v47 = vpop.f32.mrf.mxu0  ;;  %520 = vadd.xlane.f32.xlu1 %v519_v59  ;;  %v939_v51 = vmul.f32 0.5, %v938_v3  ;;  %707 = vadd.xlane.f32.xlu2 %v706_v56  ;;  %v524_v59 = vpop.xlane.xlu2 %523  ;;  %v1137_v3 = vmul.f32 %v925_v8, %v5763_v50  ;;  %v2476_v39 = vmul.f32 %v5939_v4, %v2443_v45  ;;  %v1206_v61 = vadd.f32 %v5692_v14, %v1171_v0 }
 0x1c1   : > { %v1359_v9 = vadd.f32 %v5919_v16, %v1358_v47  ;;  %v575_v63 = vmul.f32 %v5525_v20, %v524_v59  ;;  %701 = vadd.xlane.f32.xlu0 %v700_v27  ;;  %v6185_v47 = vadd.f32 %v5692_v14, %v1173_v52  ;;  %v2186_v50 = vsel %vm6077_vm13, 0.0, %v6068_v32  ;;  %v4451_v32 = vld [vmem:[%s9396_s9 + $0x10] sm:$0xff] }
 0x1c2   : > { %v6155_v12 = vld [vmem:[#allocation2 + $0x27] sm:$0xff]  ;;  %v940_v31 = vsub.f32 1.5, %v939_v51  ;;  %v2772_v56 = vadd.f32 %v2740_v10, %v2673_v24  ;;  %v2607_v45 = vmul.f32 %v6047_v41, %v6168_v23  ;;  %v2642_v52 = vmul.f32 %v5934_v57, %v6170_v33 }
 0x1c3   : > { %1576 = vst.msk [vmem:[#allocation2 + $0x30] sm:$0xff] %vm1566_vm8, %v1359_v9  ;;  %v6174_v55 = vsub.f32 %v5823_v53, %v575_v63  ;;  %v6177_v27 = vld [vmem:[#allocation2 + $0x28] sm:$0xff]  ;;  %v2838_v17 = vsel %vm5921_vm12, 0.0, %v6155_v12  ;;  %v4452_v53 = vld [vmem:[%s9396_s9 + $0x18] sm:$0xff]  ;;  %vm943_vm12 = vweird.f32 %v6089_v2  ;;  %vm6215_vm3 = vcmp.eq.s32.totalorder %v1663_v43, 15 }
 0x1c4   : > { %v6195_v13 = vld [vmem:[#allocation2 + $0x21] sm:$0xff]  ;;  %v2871_v8 = vmul.f32 %v6106_v35, %v2838_v17  ;;  %v2906_v51 = vmul.f32 %v6087_v62, %v6177_v27  ;;  %v1670_v0 = vand.u32 15, %v1610_v25  ;;  %v1172_v10 = vmul.f32 %v5680_v6, %v1137_v3  ;;  %4569 = vmatpush.msra.mxu2 %v4452_v53  ;;  %vm6239_vm4 = vmor %vm942_vm2, %vm943_vm12 }
 0x1c5   : > { %9458 = vst [vmem:[#allocation7_spill] sm:$0xff] %v6174_v55  ;;  %v639_v21 = vmul.f32 %v6174_v55, %v6174_v55  ;;  %v6213_v9 = vld [vmem:[%s9394_s7 + $0x8] ss:$0 sm:$0xff]  ;;  %v2219_v34 = vmul.f32 %v5900_v11, %v2186_v50  ;;  %v2284_v24 = vmul.f32 %v5905_v1, %v6095_v48  ;;  %v941_v17 = vmul.f32 %v6089_v2, %v940_v31 }
 0x1c6   : > { %4865 = vmatmul.msk.f32.gmra.mxu0 %vm446_vm0, %v1206_v61  ;;  %4897 = vmatmul.msk.f32.gmra.mxu1 %vm446_vm0, %v1206_v61  ;;  %v6230_v25 = vadd.f32 %v2476_v39, %v6060_v38  ;;  %v2708_v6 = vsel %vm6049_vm11, 0.0, %v6195_v13  ;;  %v2804_v38 = vadd.f32 %v2772_v56, %v6054_v49  ;;  %v2674_v39 = vadd.f32 %v2642_v52, %v2607_v45  ;;  %v443_v52 = vld [vmem:[%s5506_s19 + $0xf8] sm:$0xff] }
 0x1c7   : > { %v721_v63 = vsel %vm446_vm0, %v639_v21, 0.0  ;;  %4570 = vmatpush.msra.mxu2 %v4451_v32  ;;  %v2575_v53 = vsel %vm6077_vm13, 0.0, %v6155_v12  ;;  %v2938_v50 = vadd.f32 %v2906_v51, %v2871_v8  ;;  %v6258_v21 = vmul.f32 %v5939_v4, %v6134_v30 }
 0x1c8   : > { %v1361_v18 = vpop.f32.mrf.mxu0  ;;  %535 = vadd.xlane.f32.xlu1 %v534_v22  ;;  %722 = vadd.xlane.f32.xlu2 %v721_v63  ;;  %v527_v61 = vpop.xlane.xlu2 %526  ;;  %v4450_v22 = vld [vmem:[%s9396_s9 + $0x8] sm:$0xff]  ;;  %vm6260_vm5 = vcmp.eq.s32.totalorder %v1670_v0, 0  ;;  %v1207_v45 = vadd.f32 %v5692_v14, %v1172_v10  ;;  %v2741_v51 = vmul.f32 %v6057_v29, %v2708_v6  ;;  %v945_v30 = vsel %vm6239_vm4, %v6089_v2, %v941_v17 }
 0x1c9   : > { %v1362_v43 = vadd.f32 %v5919_v16, %v1361_v18  ;;  %v576_v3 = vmul.f32 %v5525_v20, %v527_v61  ;;  %704 = vadd.xlane.f32.xlu0 %v703_v7  ;;  %4571 = vmatpush.msra.mxu2 %v4450_v22  ;;  %v6274_v18 = vadd.f32 %v2284_v24, %v2219_v34  ;;  %v2188_v34 = vsel %vm6260_vm5, 0.0, %v6155_v12 }
 0x1ca   : > { %v6244_v31 = vld [vmem:[#allocation2 + $0x29] sm:$0xff]  ;;  %v2608_v14 = vmul.f32 %v6047_v41, %v2575_v53  ;;  %v2643_v63 = vmul.f32 %v5934_v57, %v6177_v27  ;;  %v2286_v2 = vmul.f32 %v5905_v1, %v6177_v27  ;;  %v1611_v24 = vadd.s32 40, %v5872_v44 }
 0x1cb   : > { %1577 = vst.msk [vmem:[#allocation2 + $0x38] sm:$0xff] %vm1566_vm8, %v1362_v43  ;;  %v3005_v7 = vmul.f32 %v6213_v9, %v6244_v31  ;;  %v6265_v56 = vsub.f32 %v5833_v40, %v576_v3  ;;  %v6269_v32 = vld [vmem:[#allocation2 + $0x2f] sm:$0xff]  ;;  %v6282_v40 = vld [vmem:[%s9395_s8] ss:$0 sm:$0xff]  ;;  %4572 = vmatpush.msra.mxu2 %v4449_v5  ;;  %v540_v17 = vsel %vm446_vm0, %v443_v52, 0.0  ;;  %v2773_v48 = vadd.f32 %v2741_v51, %v2674_v39 }
 0x1cc   : > { %v6271_v8 = vld [vmem:[#allocation2 + $0x30] sm:$0xff]  ;;  %v2872_v61 = vmul.f32 %v6106_v35, %v6269_v32  ;;  %v6305_v27 = vmul.f32 %v5900_v11, %v6168_v23  ;;  %v2221_v3 = vmul.f32 %v5900_v11, %v2188_v34  ;;  %v2479_v5 = vmul.f32 %v5939_v4, %v6244_v31 }
 0x1cd   : > { %9465 = vst [vmem:[#allocation8_spill] sm:$0xff] %v6265_v56  ;;  %v3037_v0 = vadd.f32 %v3005_v7, %v2938_v50  ;;  %v640_v10 = vmul.f32 %v6265_v56, %v6265_v56  ;;  %v2907_v22 = vmul.f32 %v6087_v62, %v6271_v8  ;;  %v1677_v50 = vand.u32 15, %v1611_v24 }
 0x1ce   : > { %4866 = vmatmul.msk.f32.gmra.mxu0 %vm446_vm0, %v1207_v45  ;;  %4898 = vmatmul.msk.f32.gmra.mxu1 %vm446_vm0, %v1207_v45  ;;  %v1139_v39 = vmul.f32 %v945_v30, %v5791_v37  ;;  %v2285_v23 = vmul.f32 %v5905_v1, %v6170_v33  ;;  %v2445_v52 = vsel %vm6215_vm3, 0.0, %v6195_v13  ;;  %v2318_v51 = vadd.f32 %v2286_v2, %v2221_v3 }
 0x1cf   : > { %v3069_v43 = vadd.f32 %v3037_v0, %v2804_v38  ;;  %v724_v12 = vsel %vm446_vm0, %v640_v10, 0.0  ;;  %v2939_v10 = vadd.f32 %v2907_v22, %v2872_v61  ;;  %v2675_v30 = vadd.f32 %v2643_v63, %v2608_v14 }
 0x1d0   : > { %v1364_v6 = vpop.f32.mrf.mxu0  ;;  %725 = vadd.xlane.f32.xlu2 %v724_v12  ;;  %v2222_v13 = vmul.f32 %v5900_v11, %v6269_v32  ;;  %v2287_v2 = vmul.f32 %v5905_v1, %v6271_v8  ;;  %v2805_v46 = vadd.f32 %v2773_v48, %v6230_v25  ;;  %vm6345_vm6 = vcmp.eq.s32.totalorder %v1677_v50, 15 }
 0x1d1   : > { %v1365_v53 = vadd.f32 %v5919_v16, %v1364_v6  ;;  %v6310_v38 = vadd.f32 %v6282_v40, %v3069_v43  ;;  %538 = vadd.xlane.f32.xlu0 %v6163_v26  ;;  %v6343_v43 = vadd.f32 %v2479_v5, %v2318_v51  ;;  %v2742_v60 = vmul.f32 %v6057_v29, %v6244_v31 }
 0x1d2   : > { %v2351_v7 = vld [vmem:[#allocation2 + $0x31] sm:$0xff]  ;;  %v1612_v31 = vadd.s32 48, %v5872_v44  ;;  %v2319_v5 = vadd.f32 %v2287_v2, %v2222_v13 }
 0x1d3   : > { %v6316_v45 = vld [vmem:[#allocation2 + $0x37] sm:$0xff]  ;;  %1578 = vst.msk [vmem:[#allocation2 + $0x40] sm:$0xff] %vm1566_vm8, %v1365_v53  ;;  %v6325_v0 = vmul.f32 0.70710677, %v6310_v38  ;;  %v2973_v37 = vsel %vm6049_vm11, 0.0, %v2351_v7  ;;  %v2447_v50 = vsel %vm6345_vm6, 0.0, %v2351_v7  ;;  %v2774_v2 = vadd.f32 %v2742_v60, %v2675_v30 }
 0x1d4   : > { %v6329_v26 = vld [vmem:[#allocation2 + $0x38] sm:$0xff]  ;;  %v3006_v34 = vmul.f32 %v6213_v9, %v2973_v37  ;;  %v2840_v33 = vsel %vm6077_vm13, 0.0, %v6316_v45  ;;  %v2577_v61 = vsel %vm6260_vm5, 0.0, %v6316_v45  ;;  %v2509_v30 = vadd.f32 %v6258_v21, %v6274_v18 }
 0x1d5   : > { %v6340_v24 = vand.u32 2147483647, %v6325_v0  ;;  %v2645_v22 = vmul.f32 %v5934_v57, %v6329_v26  ;;  %v2873_v6 = vmul.f32 %v6106_v35, %v2840_v33  ;;  %v2610_v12 = vmul.f32 %v6047_v41, %v2577_v61  ;;  %v6401_v61 = vld [vmem:[%s9389_s2] ss:$0 sm:$0xff] }
 0x1d6   : > { %v3038_v63 = vadd.f32 %v3006_v34, %v2939_v10  ;;  %4867 = vmatmul.msk.f32.gmra.mxu0 %vm446_vm0, %v6185_v47  ;;  %4899 = vmatmul.msk.f32.gmra.mxu1 %vm446_vm0, %v6185_v47  ;;  %v2908_v53 = vmul.f32 %v6087_v62, %v6329_v26  ;;  %v6372_v47 = vld [vmem:[%s9438_s1] ss:$0 sm:$0xff]  ;;  %v2609_v34 = vmul.f32 %v6047_v41, %v6269_v32 }
 0x1d7   : > { %v3233_v25 = vmul.f32 0.3275911, %v6340_v24  ;;  %v1174_v10 = vmul.f32 %v6372_v47, %v1139_v39  ;;  %v2644_v39 = vmul.f32 %v5934_v57, %v6271_v8  ;;  %v2480_v32 = vmul.f32 %v5939_v4, %v2447_v50 }
 0x1d8   : > { %v1367_v48 = vpop.f32.mrf.mxu0  ;;  %v3070_v3 = vadd.f32 %v3038_v63, %v2805_v46  ;;  %v2677_v46 = vadd.f32 %v2645_v22, %v2610_v12  ;;  %v2940_v60 = vadd.f32 %v2908_v53, %v2873_v6  ;;  %v2478_v22 = vmul.f32 %v5939_v4, %v2445_v52 }
 0x1d9   : > { %v1368_v51 = vadd.f32 %v5919_v16, %v1367_v48  ;;  %v6375_v37 = vadd.f32 1.0, %v3233_v25  ;;  %541 = vadd.xlane.f32.xlu0 %v540_v17  ;;  %v2710_v16 = vsel %vm6215_vm3, 0.0, %v2351_v7  ;;  %v1684_v17 = vand.u32 15, %v1612_v31 }
 0x1da   : > { %v6380_v33 = vadd.f32 %v6282_v40, %v3070_v3  ;;  %v6382_v13 = vld [vmem:[#allocation2 + $0x39] sm:$0xff]  ;;  %v1209_v8 = vadd.f32 %v6401_v61, %v1174_v10  ;;  %v2743_v25 = vmul.f32 %v6057_v29, %v2710_v16  ;;  %v2806_v31 = vadd.f32 %v2774_v2, %v2509_v30 }
 0x1db   : > { %1579 = vst.msk [vmem:[#allocation2 + $0x48] sm:$0xff] %vm1566_vm8, %v1368_v51  ;;  %5055 = vrcp.f32 %v6375_v37  ;;  %v3007_v7 = vmul.f32 %v6213_v9, %v6382_v13  ;;  %v6409_v18 = vld [vmem:[#allocation2 + $0x3f] sm:$0xff]  ;;  %v2317_v6 = vadd.f32 %v2285_v23, %v6305_v27  ;;  %v2676_v3 = vadd.f32 %v2644_v39, %v2609_v34 }
 0x1dc   : > { %v6392_v63 = vmul.f32 0.70710677, %v6380_v33  ;;  %v6414_v48 = vld [vmem:[#allocation2 + $0x40] sm:$0xff]  ;;  %v2744_v52 = vmul.f32 %v6057_v29, %v6382_v13  ;;  %v2512_v53 = vadd.f32 %v2480_v32, %v2319_v5  ;;  %vm6418_vm7 = vcmp.eq.s32.totalorder %v1684_v17, 0 }
 0x1dd   : > { %v3039_v21 = vadd.f32 %v3007_v7, %v2940_v60  ;;  %v2510_v27 = vadd.f32 %v2478_v22, %v2317_v6  ;;  %v2775_v23 = vadd.f32 %v2743_v25, %v2676_v3  ;;  %v2874_v16 = vmul.f32 %v6106_v35, %v6409_v18 }
 0x1de   : > { %v6407_v12 = vand.u32 2147483647, %v6392_v63  ;;  %4868 = vmatmul.msk.f32.gmra.mxu0 %vm446_vm0, %v1209_v8  ;;  %4900 = vmatmul.msk.f32.gmra.mxu1 %vm446_vm0, %v1209_v8  ;;  %v2776_v30 = vadd.f32 %v2744_v52, %v2677_v46  ;;  %v2909_v5 = vmul.f32 %v6087_v62, %v6414_v48  ;;  %v2190_v32 = vsel %vm6418_vm7, 0.0, %v6316_v45 }
 0x1df   : > { %v3071_v10 = vadd.f32 %v3039_v21, %v2806_v31  ;;  %v3306_v17 = vand.u32 2147483647, %v6375_v37  ;;  %v2611_v25 = vmul.f32 %v6047_v41, %v6409_v18  ;;  %v2646_v45 = vmul.f32 %v5934_v57, %v6414_v48 }
 0x1e0   : > { %v3234_v51 = vmul.f32 0.3275911, %v6407_v12  ;;  %v6443_v8 = vadd.f32 %v2776_v30, %v6343_v43  ;;  %v3308_v31 = vand.u32 2147483648, %v6375_v37  ;;  %v2223_v59 = vmul.f32 %v5900_v11, %v2190_v32 }
 0x1e1   : > { %v5056_v2 = vpop.eup %5055  ;;  %v6437_v7 = vadd.f32 %v6282_v40, %v3071_v10  ;;  %v2288_v43 = vmul.f32 %v5905_v1, %v6329_v26  ;;  %v2941_v3 = vadd.f32 %v2909_v5, %v2874_v16  ;;  %v2807_v30 = vadd.f32 %v2775_v23, %v2510_v27 }
 0x1e2   : > { %v3298_v34 = vmul.f32 %v5056_v2, %v6375_v37  ;;  %v6426_v39 = vadd.f32 1.0, %v3234_v51  ;;  %v6428_v60 = vld [vmem:[#allocation2 + $0x41] sm:$0xff]  ;;  %vm3303_vm9 = vweird.f32 %v5056_v2  ;;  %v4065_v51 = vsub.f32 0.0, %v6340_v24 }
 0x1e3   : > { %v2975_v46 = vsel %vm6215_vm3, 0.0, %v6428_v60  ;;  %v6452_v21 = vmul.f32 0.70710677, %v6437_v7  ;;  %vm3302_vm10 = vweird.f32 %v6375_v37  ;;  %v2678_v58 = vadd.f32 %v2646_v45, %v2611_v25 }
 0x1e4   : > { %v3299_v22 = vsub.f32 1.0, %v3298_v34  ;;  %5057 = vrcp.f32 %v6426_v39  ;;  %v3008_v52 = vmul.f32 %v6213_v9, %v2975_v46  ;;  %vm3304_vm11 = vmor %vm3302_vm10, %vm3303_vm9  ;;  %v3309_v32 = vor.u32 1.1754944e-38, %v3308_v31 }
 0x1e5   : > { %v6460_v10 = vand.u32 2147483647, %v6452_v21  ;;  %v2712_v16 = vsel %vm6345_vm6, 0.0, %v6428_v60  ;;  %v2320_v5 = vadd.f32 %v2288_v43, %v2223_v59  ;;  %vm3307_vm13 = vcmp.eq.f32.partialorder %v3306_v17, 8.507059e+37 }
 0x1e6   : > { %v3300_v6 = vmul.f32 %v5056_v2, %v3299_v22  ;;  %v3040_v56 = vadd.f32 %v3008_v52, %v2941_v3  ;;  %v2745_v27 = vmul.f32 %v6057_v29, %v2712_v16  ;;  %v4097_v59 = vmul.f32 %v4065_v51, %v6340_v24 }
 0x1e7   : > { %v3235_v26 = vmul.f32 0.3275911, %v6460_v10  ;;  %v3323_v17 = vand.u32 2147483648, %v6426_v39  ;;  %vm3317_vm15 = vweird.f32 %v6426_v39  ;;  %v4066_v16 = vsub.f32 0.0, %v6407_v12 }
 0x1e8   : > { %v3301_v34 = vadd.f32 %v5056_v2, %v3300_v6  ;;  %v3072_v55 = vadd.f32 %v3040_v56, %v2807_v30  ;;  %v2777_v6 = vadd.f32 %v2745_v27, %v2678_v58  ;;  %v2481_v58 = vmul.f32 %v5939_v4, %v6382_v13 }
 0x1e9   : > { %v6471_v25 = vadd.f32 1.0, %v3235_v26  ;;  %v4129_v24 = vmul.f32 1.442695, %v4097_v59  ;;  %v3324_v26 = vor.u32 1.1754944e-38, %v3323_v17  ;;  %v1613_v13 = vadd.s32 56, %v5872_v44 }
 0x1ea   : > { %v5058_v46 = vpop.eup %5057  ;;  %v3305_v22 = vsel %vm3304_vm11, %v5056_v2, %v3301_v34  ;;  %v6475_v31 = vadd.f32 %v6282_v40, %v3072_v55  ;;  %v3321_v2 = vand.u32 2147483647, %v6426_v39  ;;  %v6484_v30 = vadd.f32 %v2777_v6, %v2512_v53 }
 0x1eb   : > { %v6468_v23 = vsel %vm3307_vm13, %v3309_v32, %v3305_v22  ;;  %v3313_v37 = vmul.f32 %v5058_v46, %v6426_v39  ;;  %5059 = vrcp.f32 %v6471_v25  ;;  %vm3318_vm14 = vweird.f32 %v5058_v46 }
 0x1ec   : > { %v3777_v45 = vmul.f32 1.0614054, %v6468_v23  ;;  %v6482_v52 = vmul.f32 0.70710677, %v6475_v31  ;;  %vm3319_vm1 = vmor %vm3317_vm15, %vm3318_vm14  ;;  %v6494_v22 = vadd.f32 %v2481_v58, %v2320_v5  ;;  %vm3322_vm2 = vcmp.eq.f32.partialorder %v3321_v2, 8.507059e+37 }
 0x1ed   : > { %v3314_v43 = vsub.f32 1.0, %v3313_v37  ;;  %5061 = vpow2.f32 %v4129_v24  ;;  %v1691_v2 = vand.u32 15, %v1613_v13  ;;  %vm3332_vm4 = vweird.f32 %v6471_v25 }
 0x1ee   : > { %v3809_v56 = vadd.f32 -1.4531521, %v3777_v45  ;;  %v6491_v34 = vand.u32 2147483647, %v6482_v52  ;;  %vm4257_vm13 = vcmp.lt.f32.partialorder %v6325_v0, 0.0 }
 0x1ef   : > { %v3315_v3 = vmul.f32 %v5058_v46, %v3314_v43  ;;  %vm6513_vm3 = vcmp.eq.s32.totalorder %v1691_v2, 15 }
 0x1f0   : > { %v3841_v55 = vmul.f32 %v3809_v56, %v6468_v23  ;;  %v3236_v37 = vmul.f32 0.3275911, %v6491_v34  ;;  %v4098_v56 = vmul.f32 %v4066_v16, %v6407_v12 }
 0x1f1   : > { %v3316_v51 = vadd.f32 %v5058_v46, %v3315_v3  ;;  %v5060_v53 = vpop.eup %5059  ;;  %v3338_v3 = vand.u32 2147483648, %v6471_v25 }
 0x1f2   : > { %v3873_v32 = vadd.f32 1.4214138, %v3841_v55  ;;  %v3328_v6 = vmul.f32 %v5060_v53, %v6471_v25  ;;  %v6503_v43 = vadd.f32 1.0, %v3236_v37  ;;  %v2224_v55 = vmul.f32 %v5900_v11, %v6409_v18 }
 0x1f3   : > { %v3320_v27 = vsel %vm3319_vm1, %v5058_v46, %v3316_v51  ;;  %vm3333_vm12 = vweird.f32 %v5060_v53  ;;  %v3336_v51 = vand.u32 2147483647, %v6471_v25  ;;  %v5062_v18 = vpop.eup %5061  ;;  %v4067_v25 = vsub.f32 0.0, %v6460_v10 }
 0x1f4   : > { %v3905_v45 = vmul.f32 %v3873_v32, %v6468_v23  ;;  %v6499_v39 = vsel %vm3322_vm2, %v3324_v26, %v3320_v27  ;;  %v3329_v46 = vsub.f32 1.0, %v3328_v6  ;;  %5063 = vrcp.f32 %v6503_v43  ;;  %vm3334_vm9 = vmor %vm3332_vm4, %vm3333_vm12 }
 0x1f5   : > { %v3778_v59 = vmul.f32 1.0614054, %v6499_v39  ;;  %v2289_v26 = vmul.f32 %v5905_v1, %v6414_v48  ;;  %v4131_v27 = vmul.f32 1.442695, %v4098_v56  ;;  %vm3337_vm10 = vcmp.eq.f32.partialorder %v3336_v51, 8.507059e+37 }
 0x1f6   : > { %v3937_v5 = vadd.f32 -0.28449672, %v3905_v45  ;;  %v3330_v24 = vmul.f32 %v5060_v53, %v3329_v46  ;;  %v3339_v45 = vor.u32 1.1754944e-38, %v3338_v3  ;;  %vm3347_vm14 = vweird.f32 %v6503_v43 }
 0x1f7   : > { %v3810_v17 = vadd.f32 -1.4531521, %v3778_v59  ;;  %v2321_v6 = vadd.f32 %v2289_v26, %v2224_v55  ;;  %v2449_v59 = vsel %vm6513_vm3, 0.0, %v6428_v60  ;;  %5065 = vpow2.f32 %v4131_v27 }
 0x1f8   : > { %v3969_v58 = vmul.f32 %v3937_v5, %v6468_v23  ;;  %v3331_v37 = vadd.f32 %v5060_v53, %v3330_v24  ;;  %v2482_v48 = vmul.f32 %v5939_v4, %v2449_v59  ;;  %v4099_v26 = vmul.f32 %v4067_v25, %v6460_v10 }
 0x1f9   : > { %v3842_v32 = vmul.f32 %v3810_v17, %v6499_v39  ;;  %v3137_v27 = vmul.f32 0.5, %v6310_v38  ;;  %vm4258_vm2 = vcmp.lt.f32.partialorder %v6392_v63, 0.0  ;;  %vm4259_vm12 = vcmp.lt.f32.partialorder %v6452_v21, 0.0 }
 0x1fa   : > { %v4001_v16 = vadd.f32 0.2548296, %v3969_v58  ;;  %v3335_v46 = vsel %vm3334_vm9, %v5060_v53, %v3331_v37  ;;  %v5064_v2 = vpop.eup %5063  ;;  %v3353_v37 = vand.u32 2147483648, %v6503_v43  ;;  %vm4260_vm4 = vcmp.lt.f32.partialorder %v6482_v52, 0.0 }
 0x1fb   : > { %v3874_v13 = vadd.f32 1.4214138, %v3842_v32  ;;  %v3340_v17 = vsel %vm3337_vm10, %v3339_v45, %v3335_v46  ;;  %v3343_v3 = vmul.f32 %v5064_v2, %v6503_v43  ;;  %v6528_v32 = vadd.f32 %v2482_v48, %v2321_v6 }
 0x1fc   : > { %v4033_v5 = vmul.f32 %v4001_v16, %v6468_v23  ;;  %v3779_v24 = vmul.f32 1.0614054, %v3340_v17  ;;  %v3351_v16 = vand.u32 2147483647, %v6503_v43  ;;  %vm3348_vm11 = vweird.f32 %v5064_v2 }
 0x1fd   : > { %v3906_v56 = vmul.f32 %v3874_v13, %v6499_v39  ;;  %v3344_v53 = vsub.f32 1.0, %v3343_v3  ;;  %v1470_v13 = vpop.f32.mrf.mxu1  ;;  %vm3349_vm15 = vmor %vm3347_vm14, %vm3348_vm11  ;;  %v5066_v3 = vpop.eup %5065 }
 0x1fe   : > { %v4193_v58 = vmul.f32 %v5062_v18, %v4033_v5  ;;  %v3811_v23 = vadd.f32 -1.4531521, %v3779_v24  ;;  %v6537_v18 = vld [vmem:[%s9393_s6] ss:$0 sm:$0xff]  ;;  %v3354_v24 = vor.u32 1.1754944e-38, %v3353_v37  ;;  %vm3352_vm1 = vcmp.eq.f32.partialorder %v3351_v16, 8.507059e+37 }
 0x1ff   : > { %v3938_v55 = vadd.f32 -0.28449672, %v3906_v56  ;;  %v3345_v59 = vmul.f32 %v5064_v2, %v3344_v53 }
 0x200   : > { %v4225_v60 = vsub.f32 1.0, %v4193_v58  ;;  %v3843_v6 = vmul.f32 %v3811_v23, %v3340_v17  ;;  %v4133_v58 = vmul.f32 1.442695, %v4099_v26 }
 0x201   : > { %v3970_v51 = vmul.f32 %v3938_v55, %v6499_v39  ;;  %v3346_v48 = vadd.f32 %v5064_v2, %v3345_v59  ;;  %v1471_v55 = vadd.f32 %v6537_v18, %v1470_v13 }
 0x202   : > { %v4289_v45 = vsub.f32 0.0, %v4225_v60  ;;  %v3875_v46 = vadd.f32 1.4214138, %v3843_v6  ;;  %5067 = vpow2.f32 %v4133_v58 }
 0x203   : > { %v4002_v5 = vadd.f32 0.2548296, %v3970_v51  ;;  %v3350_v53 = vsel %vm3349_vm15, %v5064_v2, %v3346_v48 }
 0x204   : > { %v4321_v10 = vsel %vm4257_vm13, %v4289_v45, %v4225_v60  ;;  %v3907_v23 = vmul.f32 %v3875_v46, %v3340_v17  ;;  %v3355_v51 = vsel %vm3352_vm1, %v3354_v24, %v3350_v53  ;;  %v4068_v60 = vsub.f32 0.0, %v6491_v34 }
 0x205   : > { %v4353_v56 = vadd.f32 1.0, %v4321_v10  ;;  %v4034_v25 = vmul.f32 %v4002_v5, %v6499_v39  ;;  %v3780_v6 = vmul.f32 1.0614054, %v3355_v51  ;;  %v1473_v5 = vpop.f32.mrf.mxu1  ;;  %v3138_v10 = vmul.f32 0.5, %v6380_v33 }
 0x206   : > { %v3939_v45 = vadd.f32 -0.28449672, %v3907_v23  ;;  %v4100_v13 = vmul.f32 %v4068_v60, %v6491_v34  ;;  %v1474_v24 = vadd.f32 %v6537_v18, %v1473_v5 }
 0x207   : > { %v4385_v38 = vmul.f32 %v4353_v56, %v3137_v27  ;;  %v4194_v0 = vmul.f32 %v5066_v3, %v4034_v25  ;;  %v3812_v26 = vadd.f32 -1.4531521, %v3780_v6 }
 0x208   : > { %v3971_v39 = vmul.f32 %v3939_v45, %v3340_v17  ;;  %v5068_v25 = vpop.eup %5067  ;;  %v4135_v58 = vmul.f32 1.442695, %v4100_v13 }
 0x209   : > { %v4417_v43 = vmul.f32 %v4385_v38, %v1471_v55  ;;  %v4226_v59 = vsub.f32 1.0, %v4194_v0  ;;  %v3844_v16 = vmul.f32 %v3812_v26, %v3355_v51 }
 0x20a   : > { %v4003_v2 = vadd.f32 0.2548296, %v3971_v39  ;;  %5069 = vpow2.f32 %v4135_v58  ;;  %v530_v58 = vpop.xlane.xlu2 %529 }
 0x20b   : > { %4919 = vmatmul.msk.f32.vlgmr.msra.gmra.mxu2 %vm1566_vm8, %v4417_v43  ;;  %v4290_v37 = vsub.f32 0.0, %v4226_v59  ;;  %v3876_v56 = vadd.f32 1.4214138, %v3844_v16 }
 0x20c   : > { %v4035_v48 = vmul.f32 %v4003_v2, %v3340_v17 }
 0x20d   : > { %v4322_v27 = vsel %vm4258_vm2, %v4290_v37, %v4226_v59  ;;  %v3908_v23 = vmul.f32 %v3876_v56, %v3355_v51  ;;  %v1476_v17 = vpop.f32.mrf.mxu1  ;;  %v3139_v59 = vmul.f32 0.5, %v6437_v7  ;;  %v5221_v56 = vld [vmem:[%s5506_s19 + $0xa8] sm:$0xff] }
 0x20e   : > { %v4354_v46 = vadd.f32 1.0, %v4322_v27  ;;  %v4195_v55 = vmul.f32 %v5068_v25, %v4035_v48  ;;  %v1477_v13 = vadd.f32 %v6537_v18, %v1476_v17 }
 0x20f   : > { %v3940_v38 = vadd.f32 -0.28449672, %v3908_v23 }
 0x210   : > { %v4386_v3 = vmul.f32 %v4354_v46, %v3138_v10  ;;  %v4227_v34 = vsub.f32 1.0, %v4195_v55  ;;  %v5070_v37 = vpop.eup %5069 }
 0x211   : > { %v3972_v60 = vmul.f32 %v3940_v38, %v3355_v51  ;;  %v3140_v38 = vmul.f32 0.5, %v6475_v31 }
 0x212   : > { %v4418_v53 = vmul.f32 %v4386_v3, %v1474_v24  ;;  %v4291_v33 = vsub.f32 0.0, %v4227_v34 }
 0x213   : > { %v690_v0 = vpop.xlane.xlu1 %689  ;;  %v4004_v43 = vadd.f32 0.2548296, %v3972_v60 }
 0x214   : > { %v756_v63 = vmul.f32 %v690_v0, %v5525_v20  ;;  %4920 = vmatmul.msk.f32.gmra.mxu2 %vm1566_vm8, %v4418_v53  ;;  %v4323_v6 = vsel %vm4259_vm12, %v4291_v33, %v4227_v34 }
 0x215   : > { %v4355_v39 = vadd.f32 1.0, %v4323_v6  ;;  %v4036_v26 = vmul.f32 %v4004_v43, %v3355_v51  ;;  %v1479_v3 = vpop.f32.mrf.mxu1  ;;  %v577_v43 = vmul.f32 %v5525_v20, %v530_v58  ;;  %v6586_v58 = vld [vmem:[#allocation2 + $0x47] sm:$0xff] }
 0x216   : > { %v788_v45 = vadd.f32 1e-05, %v756_v63  ;;  %v1480_v33 = vadd.f32 %v6537_v18, %v1479_v3 }
 0x217   : > { %v4387_v5 = vmul.f32 %v4355_v39, %v3139_v59  ;;  %v4196_v2 = vmul.f32 %v5070_v37, %v4036_v26  ;;  %v5222_v26 = vld [vmem:[%s5506_s19 + $0xb0] sm:$0xff] }
 0x218   : > { %5071 = vrsqrt.f32 %v788_v45  ;;  %vm952_vm10 = vweird.f32 %v788_v45 }
 0x219   : > { %v4419_v27 = vmul.f32 %v4387_v5, %v1477_v13  ;;  %v4228_v21 = vsub.f32 1.0, %v4196_v2 }
 0x21b   : > { %v512_v16 = vpop.xlane.xlu1 %511  ;;  %v4292_v51 = vsub.f32 0.0, %v4228_v21 }
 0x21c   : > { %v571_v10 = vmul.f32 %v5525_v20, %v512_v16  ;;  %4921 = vmatmul.msk.f32.gmra.mxu2 %vm1566_vm8, %v4419_v27  ;;  %v693_v46 = vpop.xlane.xlu0 %692  ;;  %v5223_v16 = vld [vmem:[%s5506_s19 + $0xd8] sm:$0xff] }
 0x21d   : > { %v757_v7 = vmul.f32 %v693_v46, %v5525_v20  ;;  %v4324_v53 = vsel %vm4260_vm4, %v4292_v51, %v4228_v21  ;;  %v6578_v27 = vsub.f32 %v5223_v16, %v577_v43  ;;  %v533_v46 = vpop.xlane.xlu2 %532  ;;  %v5226_v43 = vld [vmem:[%s5506_s19 + $0xb8] sm:$0xff] }
 0x21e   : > { %v5072_v48 = vpop.eup %5071  ;;  %v6558_v25 = vsub.f32 %v5221_v56, %v571_v10  ;;  %v4356_v0 = vadd.f32 1.0, %v4324_v53  ;;  %v578_v51 = vmul.f32 %v5525_v20, %v533_v46 }
 0x21f   : > { %v947_v24 = vmul.f32 %v5072_v48, %v788_v45  ;;  %v6562_v55 = vadd.f32 1e-05, %v757_v7  ;;  %vm953_vm9 = vweird.f32 %v5072_v48  ;;  %9474 = vst [vmem:[#allocation11_spill] sm:$0xff] %v6578_v27 }
 0x220   : > { %9472 = vst [vmem:[#allocation9_spill] sm:$0xff] %v6558_v25  ;;  %v635_v23 = vmul.f32 %v6558_v25, %v6558_v25  ;;  %v4388_v17 = vmul.f32 %v4356_v0, %v3140_v38  ;;  %vm954_vm11 = vmor %vm952_vm10, %vm953_vm9 }
 0x221   : > { %v948_v34 = vmul.f32 %v5072_v48, %v947_v24  ;;  %5073 = vrsqrt.f32 %v6562_v55  ;;  %vm962_vm13 = vweird.f32 %v6562_v55 }
 0x222   : > { %v709_v63 = vsel %vm446_vm0, %v635_v23, 0.0  ;;  %v4420_v39 = vmul.f32 %v4388_v17, %v1480_v33 }
 0x223   : > { %v949_v60 = vmul.f32 0.5, %v948_v34  ;;  %710 = vadd.xlane.f32.xlu1 %v709_v63  ;;  %v515_v52 = vpop.xlane.xlu1 %514  ;;  %v641_v63 = vmul.f32 %v6578_v27, %v6578_v27 }
 0x224   : > { %v572_v6 = vmul.f32 %v5525_v20, %v515_v52  ;;  %v696_v31 = vpop.xlane.xlu0 %695  ;;  %4922 = vmatmul.msk.f32.gmra.mxu2 %vm1566_vm8, %v4420_v39 }
 0x225   : > { %v950_v59 = vsub.f32 1.5, %v949_v60  ;;  %v758_v13 = vmul.f32 %v696_v31, %v5525_v20  ;;  %v5225_v60 = vld [vmem:[%s5506_s19 + $0xe0] sm:$0xff]  ;;  %v727_v16 = vsel %vm446_vm0, %v641_v63, 0.0  ;;  %v2579_v63 = vsel %vm6418_vm7, 0.0, %v6586_v58 }
 0x226   : > { %v6573_v37 = vsub.f32 %v5222_v26, %v572_v6  ;;  %v6606_v52 = vsub.f32 %v5225_v60, %v578_v51  ;;  %v6608_v6 = vld [vmem:[#allocation2 + $0x48] sm:$0xff] }
 0x227   : > { %v951_v5 = vmul.f32 %v5072_v48, %v950_v59  ;;  %v5074_v2 = vpop.eup %5073  ;;  %v6580_v10 = vadd.f32 1e-05, %v758_v13  ;;  %v2910_v46 = vmul.f32 %v6087_v62, %v6608_v6 }
 0x228   : > { %9473 = vst [vmem:[#allocation10_spill] sm:$0xff] %v6573_v37  ;;  %v636_v21 = vmul.f32 %v6573_v37, %v6573_v37  ;;  %v957_v7 = vmul.f32 %v5074_v2, %v6562_v55 }
 0x229   : > { %v955_v56 = vsel %vm954_vm11, %v5072_v48, %v951_v5  ;;  %5075 = vrsqrt.f32 %v6580_v10  ;;  %v6594_v48 = vld [vmem:[%s9391_s4] ss:$0 sm:$0xff]  ;;  %9475 = vst [vmem:[#allocation12_spill] sm:$0xff] %v6606_v52  ;;  %vm972_vm15 = vweird.f32 %v6580_v10 }
 0x22a   : > { %v1370_v45 = vpop.f32.mrf.mxu0  ;;  %v712_v24 = vsel %vm446_vm0, %v636_v21, 0.0  ;;  %v1140_v3 = vmul.f32 %v955_v56, %v5862_v36  ;;  %v958_v23 = vmul.f32 %v5074_v2, %v957_v7  ;;  %v2842_v36 = vsel %vm6260_vm5, 0.0, %v6586_v58 }
 0x22b   : > { %v1371_v53 = vadd.f32 %v6594_v48, %v1370_v45  ;;  %713 = vadd.xlane.f32.xlu1 %v712_v24  ;;  %v518_v34 = vpop.xlane.xlu1 %517  ;;  %vm963_vm5 = vweird.f32 %v5074_v2  ;;  %v2875_v49 = vmul.f32 %v6106_v35, %v2842_v36  ;;  %v642_v7 = vmul.f32 %v6606_v52, %v6606_v52 }
 0x22c   : > { %v573_v38 = vmul.f32 %v5525_v20, %v518_v34  ;;  %v1175_v0 = vmul.f32 %v6372_v47, %v1140_v3  ;;  %v959_v33 = vmul.f32 0.5, %v958_v23  ;;  %v699_v17 = vpop.xlane.xlu0 %698  ;;  %vm964_vm14 = vmor %vm962_vm13, %vm963_vm5 }
 0x22d   : > { %1580 = vst.msk [vmem:[#allocation2 + $0x50] sm:$0xff] %vm1566_vm8, %v1371_v53  ;;  %v759_v39 = vmul.f32 %v699_v17, %v5525_v20  ;;  %v730_v17 = vsel %vm446_vm0, %v642_v7, 0.0 }
 0x22e   : > { %v6611_v59 = vsub.f32 %v5226_v43, %v573_v38  ;;  %v1210_v31 = vadd.f32 %v6401_v61, %v1175_v0  ;;  %v960_v26 = vsub.f32 1.5, %v959_v33  ;;  %v2942_v0 = vadd.f32 %v2910_v46, %v2875_v49 }
 0x22f   : > { %v6617_v13 = vpop.eup %5075  ;;  %v6619_v5 = vadd.f32 1e-05, %v759_v39  ;;  %v5227_v39 = vld [vmem:[%s5506_s19 + $0xc0] sm:$0xff] }
 0x230   : > { %9476 = vst [vmem:[#allocation13_spill] sm:$0xff] %v6611_v59  ;;  %4869 = vmatmul.msk.f32.gmra.mxu0 %vm446_vm0, %v1210_v31  ;;  %4901 = vmatmul.msk.f32.gmra.mxu1 %vm446_vm0, %v1210_v31  ;;  %v637_v21 = vmul.f32 %v6611_v59, %v6611_v59  ;;  %v961_v55 = vmul.f32 %v5074_v2, %v960_v26  ;;  %vm973_vm1 = vweird.f32 %v6617_v13 }
 0x231   : > { %v967_v56 = vmul.f32 %v6617_v13, %v6580_v10  ;;  %5077 = vrsqrt.f32 %v6619_v5  ;;  %vm6674_vm2 = vmor %vm972_vm15, %vm973_vm1  ;;  %vm982_vm12 = vweird.f32 %v6619_v5 }
 0x232   : > { %v715_v51 = vsel %vm446_vm0, %v637_v21, 0.0  ;;  %v965_v45 = vsel %vm964_vm14, %v5074_v2, %v961_v55 }
 0x233   : > { %v968_v24 = vmul.f32 %v6617_v13, %v967_v56  ;;  %v521_v3 = vpop.xlane.xlu1 %520  ;;  %728 = vadd.xlane.f32.xlu1 %v727_v16  ;;  %716 = vadd.xlane.f32.xlu0 %v715_v51  ;;  %v1373_v23 = vpop.f32.mrf.mxu0  ;;  %v1141_v34 = vmul.f32 %v965_v45, %v5913_v19 }
 0x234   : > { %v574_v53 = vmul.f32 %v5525_v20, %v521_v3  ;;  %v6637_v38 = vld [vmem:[#allocation2 + $0x49] sm:$0xff]  ;;  %v1374_v2 = vadd.f32 %v6594_v48, %v1373_v23  ;;  %v708_v33 = vpop.xlane.xlu2 %707  ;;  %v702_v60 = vpop.xlane.xlu0 %701  ;;  %v6672_v3 = vld [vmem:[%s9398_s11] ss:$0 sm:$0xff] }
 0x235   : > { %v969_v36 = vmul.f32 0.5, %v968_v24  ;;  %v3009_v43 = vmul.f32 %v6213_v9, %v6637_v38  ;;  %v762_v19 = vmul.f32 %v708_v33, %v5525_v20  ;;  %v760_v26 = vmul.f32 %v702_v60, %v5525_v20 }
 0x236   : > { %v6647_v31 = vsub.f32 %v5227_v39, %v574_v53  ;;  %v1176_v49 = vmul.f32 %v6372_v47, %v1141_v34  ;;  %1581 = vst.msk [vmem:[#allocation2 + $0x58] sm:$0xff] %vm1566_vm8, %v1374_v2  ;;  %v1614_v24 = vadd.s32 64, %v5872_v44  ;;  %v5228_v2 = vld [vmem:[%s5506_s19 + $0x10] sm:$0xff]  ;;  %v2612_v39 = vmul.f32 %v6047_v41, %v2579_v63 }
 0x237   : > { %v970_v16 = vsub.f32 1.5, %v969_v36  ;;  %v3041_v21 = vadd.f32 %v3009_v43, %v2942_v0  ;;  %v6655_v46 = vpop.eup %5077  ;;  %v6657_v9 = vadd.f32 1e-05, %v762_v19  ;;  %v6659_v55 = vadd.f32 1e-05, %v760_v26 }
 0x238   : > { %9477 = vst [vmem:[#allocation14_spill] sm:$0xff] %v6647_v31  ;;  %v1211_v56 = vadd.f32 %v6401_v61, %v1176_v49  ;;  %v638_v7 = vmul.f32 %v6647_v31, %v6647_v31  ;;  %v977_v10 = vmul.f32 %v6655_v46, %v6619_v5  ;;  %v6692_v33 = vmul.f32 %v5228_v2, %v6672_v3 }
 0x239   : > { %v971_v51 = vmul.f32 %v6617_v13, %v970_v16  ;;  %v3073_v45 = vadd.f32 %v3041_v21, %v6443_v8  ;;  %5079 = vrsqrt.f32 %v6657_v9  ;;  %v5229_v21 = vld [vmem:[%s5506_s19 + $0xe8] sm:$0xff]  ;;  %vm983_vm4 = vweird.f32 %v6655_v46 }
 0x23a   : > { %4870 = vmatmul.msk.f32.gmra.mxu0 %vm446_vm0, %v1211_v56  ;;  %4902 = vmatmul.msk.f32.gmra.mxu1 %vm446_vm0, %v1211_v56  ;;  %v718_v53 = vsel %vm446_vm0, %v638_v7, 0.0  ;;  %v978_v34 = vmul.f32 %v6655_v46, %v977_v10  ;;  %5081 = vrsqrt.f32 %v6659_v55  ;;  %9480 = vst [vmem:[#allocation15_spill] sm:$0xff] %v6692_v33  ;;  %vm984_vm9 = vmor %vm982_vm12, %vm983_vm4  ;;  %vm1012_vm11 = vweird.f32 %v6657_v9 }
 0x23b   : > { %v975_v8 = vsel %vm6674_vm2, %v6617_v13, %v971_v51  ;;  %v536_v0 = vpop.xlane.xlu1 %535  ;;  %719 = vadd.xlane.f32.xlu2 %v718_v53  ;;  %731 = vadd.xlane.f32.xlu0 %v730_v17  ;;  %v6688_v36 = vadd.f32 %v6282_v40, %v3073_v45  ;;  %v1376_v60 = vpop.f32.mrf.mxu0  ;;  %v2647_v40 = vmul.f32 %v5934_v57, %v6608_v6  ;;  %v1698_v17 = vand.u32 15, %v1614_v24  ;;  %v6712_v45 = vld [vmem:[#allocation2 + $0x4f] sm:$0xff] }
 0x23c   : > { %v579_v43 = vmul.f32 %v5525_v20, %v536_v0  ;;  %v1142_v13 = vmul.f32 %v975_v8, %v5910_v15  ;;  %v979_v19 = vmul.f32 0.5, %v978_v34  ;;  %v1377_v26 = vadd.f32 %v6594_v48, %v1376_v60  ;;  %v723_v49 = vpop.xlane.xlu2 %722  ;;  %v705_v16 = vpop.xlane.xlu0 %704  ;;  %v6723_v0 = vld [vmem:[#allocation2 + $0x50] sm:$0xff] }
 0x23d   : > { %v767_v7 = vmul.f32 %v723_v49, %v5525_v20  ;;  %v761_v51 = vmul.f32 %v705_v16, %v5525_v20  ;;  %v6710_v63 = vmul.f32 0.70710677, %v6688_v36  ;;  %v2876_v49 = vmul.f32 %v6106_v35, %v6712_v45 }
 0x23e   : > { %v6701_v56 = vsub.f32 %v5229_v21, %v579_v43  ;;  %v1177_v15 = vmul.f32 %v6372_v47, %v1142_v13  ;;  %v980_v10 = vsub.f32 1.5, %v979_v19  ;;  %1582 = vst.msk [vmem:[#allocation2 + $0x60] sm:$0xff] %vm1566_vm8, %v1377_v26  ;;  %v6733_v19 = vadd.f32 %v2647_v40, %v2612_v39 }
 0x23f   : > { %v6714_v24 = vpop.eup %5079  ;;  %v6716_v23 = vadd.f32 1e-05, %v767_v7  ;;  %v6718_v53 = vadd.f32 1e-05, %v761_v51  ;;  %v6731_v13 = vand.u32 2147483647, %v6710_v63  ;;  %v2911_v40 = vmul.f32 %v6087_v62, %v6723_v0 }
 0x240   : > { %9481 = vst [vmem:[#allocation16_spill] sm:$0xff] %v6701_v56  ;;  %v1212_v8 = vadd.f32 %v6401_v61, %v1177_v15  ;;  %v643_v34 = vmul.f32 %v6701_v56, %v6701_v56  ;;  %v6725_v2 = vpop.eup %5081  ;;  %v981_v60 = vmul.f32 %v6655_v46, %v980_v10  ;;  %v1007_v43 = vmul.f32 %v6714_v24, %v6657_v9 }
 0x241   : > { %v987_v26 = vmul.f32 %v6725_v2, %v6659_v55  ;;  %5083 = vrsqrt.f32 %v6716_v23  ;;  %vm6746_vm10 = vcmp.eq.s32.totalorder %v1698_v17, 0  ;;  %v3237_v17 = vmul.f32 0.3275911, %v6731_v13 }
 0x242   : > { %4871 = vmatmul.msk.f32.gmra.mxu0 %vm446_vm0, %v1212_v8  ;;  %4903 = vmatmul.msk.f32.gmra.mxu1 %vm446_vm0, %v1212_v8  ;;  %v985_v16 = vsel %vm984_vm9, %v6655_v46, %v981_v60  ;;  %v1008_v5 = vmul.f32 %v6714_v24, %v1007_v43  ;;  %5085 = vrsqrt.f32 %v6718_v53  ;;  %v733_v51 = vsel %vm446_vm0, %v643_v34, 0.0 }
 0x243   : > { %v988_v21 = vmul.f32 %v6725_v2, %v987_v26  ;;  %v1379_v7 = vpop.f32.mrf.mxu0  ;;  %v1143_v15 = vmul.f32 %v985_v16, %v5989_v28  ;;  %vm992_vm13 = vweird.f32 %v6659_v55  ;;  %734 = vadd.xlane.f32.xlu1 %v733_v51  ;;  %vm1013_vm5 = vweird.f32 %v6714_v24  ;;  %v6772_v51 = vpop.f32.mrf.mxu1 }
 0x244   : > { %v1009_v10 = vmul.f32 0.5, %v1008_v5  ;;  %v1380_v46 = vadd.f32 %v6594_v48, %v1379_v7  ;;  %v726_v8 = vpop.xlane.xlu2 %725  ;;  %v539_v60 = vpop.xlane.xlu0 %538  ;;  %vm993_vm14 = vweird.f32 %v6725_v2  ;;  %v6768_v5 = vadd.f32 1.0, %v3237_v17  ;;  %v6785_v17 = vld [vmem:[#allocation2 + $0x51] sm:$0xff]  ;;  %vm6799_vm15 = vmor %vm1012_vm11, %vm1013_vm5 }
 0x245   : > { %v989_v43 = vmul.f32 0.5, %v988_v21  ;;  %v768_v26 = vmul.f32 %v726_v8, %v5525_v20  ;;  %v580_v34 = vmul.f32 %v5525_v20, %v539_v60  ;;  %v1178_v28 = vmul.f32 %v6372_v47, %v1143_v15  ;;  %v5230_v8 = vld [vmem:[%s5506_s19 + $0xf0] sm:$0xff]  ;;  %vm6813_vm1 = vmor %vm992_vm13, %vm993_vm14 }
 0x246   : > { %v1010_v16 = vsub.f32 1.5, %v1009_v10  ;;  %1583 = vst.msk [vmem:[#allocation2 + $0x68] sm:$0xff] %vm1566_vm8, %v1380_v46  ;;  %5087 = vrcp.f32 %v6768_v5  ;;  %v2746_v46 = vmul.f32 %v6057_v29, %v6637_v38  ;;  %vm1062_vm2 = vweird.f32 %v6716_v23 }
 0x247   : > { %v6770_v7 = vpop.eup %5083  ;;  %v990_v21 = vsub.f32 1.5, %v989_v43  ;;  %v6774_v56 = vadd.f32 1e-05, %v768_v26  ;;  %v6777_v60 = vsub.f32 %v5230_v8, %v580_v34  ;;  %v1213_v15 = vadd.f32 %v6401_v61, %v1178_v28 }
 0x248   : > { %v6780_v10 = vpop.eup %5085  ;;  %v1057_v52 = vmul.f32 %v6770_v7, %v6716_v23  ;;  %v6792_v43 = vmul.f32 %v5905_v1, %v6608_v6  ;;  %v1011_v26 = vmul.f32 %v6714_v24, %v1010_v16  ;;  %vm1063_vm12 = vweird.f32 %v6770_v7 }
 0x249   : > { %9484 = vst [vmem:[#allocation17_spill] sm:$0xff] %v6777_v60  ;;  %v991_v28 = vmul.f32 %v6725_v2, %v990_v21  ;;  %v997_v8 = vmul.f32 %v6780_v10, %v6718_v53  ;;  %5089 = vrsqrt.f32 %v6774_v56  ;;  %v644_v16 = vmul.f32 %v6777_v60, %v6777_v60  ;;  %vm6852_vm9 = vmor %vm1062_vm2, %vm1063_vm12 }
 0x24a   : > { %4872 = vmatmul.msk.f32.gmra.mxu0 %vm446_vm0, %v1213_v15  ;;  %4904 = vmatmul.msk.f32.gmra.mxu1 %vm446_vm0, %v1213_v15  ;;  %v1058_v9 = vmul.f32 %v6770_v7, %v1057_v52  ;;  %v2943_v21 = vadd.f32 %v2911_v40, %v2876_v49  ;;  %v2977_v52 = vsel %vm6345_vm6, 0.0, %v6785_v17  ;;  %vm1002_vm6 = vweird.f32 %v6718_v53 }
 0x24b   : > { %v995_v15 = vsel %vm6813_vm1, %v6725_v2, %v991_v28  ;;  %v998_v55 = vmul.f32 %v6780_v10, %v997_v8  ;;  %v1382_v31 = vpop.f32.mrf.mxu0  ;;  %v736_v40 = vsel %vm446_vm0, %v644_v16, 0.0  ;;  %v1015_v2 = vsel %vm6799_vm15, %v6714_v24, %v1011_v26  ;;  %v5231_v24 = vld [vmem:[%s5506_s19 + $0xf8] sm:$0xff] }
 0x24c   : > { %v1059_v59 = vmul.f32 0.5, %v1058_v9  ;;  %v1383_v49 = vadd.f32 %v6594_v48, %v1382_v31  ;;  %v542_v60 = vpop.xlane.xlu0 %541  ;;  %737 = vadd.xlane.f32.xlu2 %v736_v40  ;;  %v1144_v14 = vmul.f32 %v995_v15, %v6043_v42  ;;  %v6838_v6 = vpop.eup %5087  ;;  %vm1003_vm4 = vweird.f32 %v6780_v10  ;;  %v9494_v42 = vld [vmem:[#allocation7_spill] sm:$0xff] }
 0x24d   : > { %v999_v28 = vmul.f32 0.5, %v998_v55  ;;  %v581_v8 = vmul.f32 %v5525_v20, %v542_v60  ;;  %v6844_v31 = vadd.f32 %v2746_v46, %v6733_v19  ;;  %vm1072_vm11 = vweird.f32 %v6774_v56  ;;  %v6869_v15 = vpop.f32.mrf.mxu1  ;;  %vm6888_vm13 = vmor %vm1002_vm6, %vm1003_vm4 }
 0x24e   : > { %v1060_v9 = vsub.f32 1.5, %v1059_v59  ;;  %1584 = vst.msk [vmem:[#allocation2 + $0x70] sm:$0xff] %vm1566_vm8, %v1383_v49  ;;  %v1179_v26 = vmul.f32 %v6372_v47, %v1144_v14  ;;  %v6865_v16 = vmul.f32 %v1015_v2, %v6092_v54  ;;  %v3358_v23 = vmul.f32 %v6838_v6, %v6768_v5 }
 0x24f   : > { %v6846_v34 = vpop.eup %5089  ;;  %v1000_v59 = vsub.f32 1.5, %v999_v28  ;;  %v6858_v60 = vsub.f32 %v5231_v24, %v581_v8  ;;  %v6878_v28 = vld [vmem:[%s9394_s7 + $0x8] ss:$0 sm:$0xff]  ;;  %vm3363_vm14 = vweird.f32 %v6838_v6  ;;  %vm3362_vm15 = vweird.f32 %v6768_v5 }
 0x250   : > { %v1061_v19 = vmul.f32 %v6770_v7, %v1060_v9  ;;  %v1067_v46 = vmul.f32 %v6846_v34, %v6774_v56  ;;  %v1214_v49 = vadd.f32 %v6401_v61, %v1179_v26  ;;  %v3010_v54 = vmul.f32 %v6878_v28, %v2977_v52 }
 0x251   : > { %9491 = vst [vmem:[#allocation18_spill] sm:$0xff] %v6858_v60  ;;  %v1001_v55 = vmul.f32 %v6780_v10, %v1000_v59  ;;  %v645_v40 = vmul.f32 %v6858_v60, %v6858_v60  ;;  %v3359_v9 = vsub.f32 1.0, %v3358_v23  ;;  %v3366_v59 = vand.u32 2147483647, %v6768_v5 }
 0x252   : > { %v1065_v2 = vsel %vm6852_vm9, %v6770_v7, %v1061_v19  ;;  %v1068_v14 = vmul.f32 %v6846_v34, %v1067_v46  ;;  %4873 = vmatmul.msk.f32.gmra.mxu0 %vm446_vm0, %v1214_v49  ;;  %4905 = vmatmul.msk.f32.gmra.mxu1 %vm446_vm0, %v1214_v49  ;;  %v3368_v26 = vand.u32 2147483648, %v6768_v5  ;;  %v6902_v19 = vld [vmem:[#allocation2 + $0x57] sm:$0xff]  ;;  %vm1073_vm5 = vweird.f32 %v6846_v34 }
 0x253   : > { %v1005_v52 = vsel %vm6888_vm13, %v6780_v10, %v1001_v55  ;;  %v1385_v7 = vpop.f32.mrf.mxu0  ;;  %v739_v53 = vsel %vm446_vm0, %v645_v40, 0.0  ;;  %v1151_v24 = vmul.f32 %v1065_v2, %v9494_v42  ;;  %v9495_v10 = vld [vmem:[#allocation6_spill] sm:$0xff]  ;;  %v3360_v49 = vmul.f32 %v6838_v6, %v3359_v9  ;;  %v6910_v2 = vld [vmem:[#allocation2 + $0x58] sm:$0xff]  ;;  %vm6926_vm1 = vmor %vm1072_vm11, %vm1073_vm5 }
 0x254   : > { %v1069_v46 = vmul.f32 0.5, %v1068_v14  ;;  %v1386_v23 = vadd.f32 %v6594_v48, %v1385_v7  ;;  %740 = vadd.xlane.f32.xlu0 %v739_v53  ;;  %v1145_v55 = vmul.f32 %v1005_v52, %v9495_v10  ;;  %v3042_v40 = vadd.f32 %v3010_v54, %v2943_v21  ;;  %v5233_v14 = vld [vmem:[%s9438_s1] ss:$0 sm:$0xff] }
 0x255   : > { %v1186_v8 = vmul.f32 %v6372_v47, %v1151_v24  ;;  %v6917_v52 = vld [vmem:[#allocation2 + $0x59] sm:$0xff]  ;;  %v2844_v47 = vsel %vm6418_vm7, 0.0, %v6902_v19  ;;  %v3361_v9 = vadd.f32 %v6838_v6, %v3360_v49  ;;  %v3369_v5 = vor.u32 1.1754944e-38, %v3368_v26  ;;  %vm3364_vm7 = vmor %vm3362_vm15, %vm3363_vm14  ;;  %v6964_v49 = vpop.f32.mrf.mxu1 }
 0x256   : > { %v1070_v42 = vsub.f32 1.5, %v1069_v46  ;;  %1585 = vst.msk [vmem:[#allocation2 + $0x78] sm:$0xff] %vm1566_vm8, %v1386_v23  ;;  %v1180_v7 = vmul.f32 %v5233_v14, %v1145_v55  ;;  %v3074_v53 = vadd.f32 %v3042_v40, %v6484_v30  ;;  %v2877_v56 = vmul.f32 %v6106_v35, %v2844_v47  ;;  %v6948_v30 = vld [vmem:[%s9395_s8] ss:$0 sm:$0xff] }
 0x257   : > { %v6931_v54 = vadd.f32 %v6401_v61, %v1186_v8  ;;  %v2912_v46 = vmul.f32 %v6087_v62, %v6910_v2  ;;  %v3365_v23 = vsel %vm3364_vm7, %v6838_v6, %v3361_v9  ;;  %vm3367_vm2 = vcmp.eq.f32.partialorder %v3366_v59, 8.507059e+37  ;;  %v5235_v8 = vld [vmem:[%s9396_s9 + $0x38] sm:$0xff] }
 0x258   : > { %v1071_v24 = vmul.f32 %v6846_v34, %v1070_v42  ;;  %v1215_v50 = vadd.f32 %v6401_v61, %v1180_v7  ;;  %v6951_v61 = vadd.f32 %v6948_v30, %v3074_v53  ;;  %v3011_v26 = vmul.f32 %v6878_v28, %v6917_v52  ;;  %v9499_v42 = vld [vmem:[#allocation8_spill] sm:$0xff] }
 0x259   : > { %9498 = vst [vmem:[#allocation7_spill] sm:$0xff] %v6931_v54  ;;  %4880 = vmatmul.msk.f32.vlgmr.msra.gmra.mxu3 %vm446_vm0, %v6931_v54  ;;  %v6958_v55 = vsel %vm3367_vm2, %v3369_v5, %v3365_v23  ;;  %v4069_v6 = vsub.f32 0.0, %v6731_v13  ;;  %v2944_v59 = vadd.f32 %v2912_v46, %v2877_v56  ;;  %v2810_v21 = vadd.f32 %v6844_v31, %v6494_v22  ;;  %v6975_v9 = vld [vmem:[#allocation2 + $0x5f] sm:$0xff]  ;;  %v5236_v46 = vld [vmem:[%s9396_s9 + $0x30] sm:$0xff]  ;;  %v5243_v54 = vld [vmem:[%s9396_s9 + $0x8] sm:$0xff] }
 0x25a   : > { %v1075_v10 = vsel %vm6926_vm1, %v6846_v34, %v1071_v24  ;;  %4966 = vmatpush.msra.mxu3 %v5235_v8  ;;  %4874 = vmatmul.msk.f32.gmra.mxu0 %vm446_vm0, %v1215_v50  ;;  %v3781_v34 = vmul.f32 1.0614054, %v6958_v55  ;;  %v6971_v47 = vmul.f32 0.70710677, %v6951_v61  ;;  %v6978_v24 = vld [vmem:[#allocation2 + $0x60] sm:$0xff]  ;;  %v2648_v56 = vmul.f32 %v5934_v57, %v6723_v0 }
 0x25b   : > { %4906 = vmatmul.msk.f32.gmra.mxu1 %vm446_vm0, %v1215_v50  ;;  %v1388_v40 = vpop.f32.mrf.mxu0  ;;  %v1152_v7 = vmul.f32 %v1075_v10, %v9499_v42  ;;  %v3043_v53 = vadd.f32 %v3011_v26, %v2944_v59  ;;  %v2613_v50 = vmul.f32 %v6047_v41, %v6712_v45  ;;  %v1181_v22 = vmul.f32 %v5233_v14, %v6865_v16  ;;  %v6989_v26 = vld [vmem:[#allocation2 + $0x61] sm:$0xff] }
 0x25c   : > { %v1389_v5 = vadd.f32 %v6594_v48, %v1388_v40  ;;  %4967 = vmatpush.msra.mxu3 %v5236_v46  ;;  %v3813_v23 = vadd.f32 -1.4531521, %v3781_v34  ;;  %v3206_v48 = vand.u32 2147483647, %v6971_v47  ;;  %v4101_v10 = vmul.f32 %v4069_v6, %v6731_v13  ;;  %v5237_v16 = vld [vmem:[%s9396_s9 + $0x28] sm:$0xff]  ;;  %v5239_v46 = vld [vmem:[%s9396_s9 + $0x20] sm:$0xff] }
 0x25d   : > { %v1187_v31 = vmul.f32 %v5233_v14, %v1152_v7  ;;  %v3075_v59 = vadd.f32 %v3043_v53, %v2810_v21  ;;  %v2714_v8 = vsel %vm6513_vm3, 0.0, %v6785_v17  ;;  %v2878_v40 = vmul.f32 %v6106_v35, %v6975_v9  ;;  %v7004_v14 = vld [vmem:[%s9389_s2] ss:$0 sm:$0xff] }
 0x25e   : > { %1586 = vst.msk [vmem:[#allocation2 + $0x80] sm:$0xff] %vm1566_vm8, %v1389_v5  ;;  %4968 = vmatpush.msra.mxu3 %v5237_v16  ;;  %v3845_v6 = vmul.f32 %v3813_v23, %v6958_v55  ;;  %v3238_v42 = vmul.f32 0.3275911, %v3206_v48  ;;  %v2913_v7 = vmul.f32 %v6087_v62, %v6978_v24  ;;  %v2680_v21 = vadd.f32 %v2648_v56, %v2613_v50 }
 0x25f   : > { %9500 = vst [vmem:[#allocation6_spill] sm:$0xff] %v7004_v14  ;;  %v7007_v13 = vadd.f32 %v7004_v14, %v1187_v31  ;;  %v7013_v34 = vadd.f32 %v6948_v30, %v3075_v59  ;;  %v2747_v5 = vmul.f32 %v6057_v29, %v2714_v8  ;;  %v2979_v53 = vsel %vm6513_vm3, 0.0, %v6989_v26 }
 0x260   : > { %4969 = vmatpush.msra.mxu3 %v5239_v46  ;;  %v1216_v31 = vadd.f32 %v7004_v14, %v1181_v22  ;;  %v3877_v23 = vadd.f32 1.4214138, %v3845_v6  ;;  %v7025_v59 = vadd.f32 1.0, %v3238_v42  ;;  %v3012_v50 = vmul.f32 %v6878_v28, %v2979_v53  ;;  %v5240_v6 = vld [vmem:[%s9396_s9 + $0x18] sm:$0xff]  ;;  %v1491_v42 = vpop.f32.mrf.mxu1  ;;  %v5241_v53 = vld [vmem:[%s5506_s19] sm:$0xff] }
 0x261   : > { %9501 = vst [vmem:[#allocation8_spill] sm:$0xff] %v7007_v13  ;;  %4881 = vmatmul.msk.f32.gmra.mxu3 %vm446_vm0, %v7007_v13  ;;  %v4137_v56 = vmul.f32 1.442695, %v4101_v10  ;;  %v7029_v12 = vmul.f32 0.70710677, %v7013_v34  ;;  %v2779_v8 = vadd.f32 %v2747_v5, %v2680_v21  ;;  %v9502_v16 = vsel %vm6746_vm10, 0.0, %v6586_v58 }
 0x262   : > { %v2225_v22 = vmul.f32 %v5900_v11, %v9502_v16  ;;  %4970 = vmatpush.msra.mxu3 %v5240_v6  ;;  %4875 = vmatmul.msk.f32.gmra.mxu0 %vm446_vm0, %v1216_v31  ;;  %v3909_v10 = vmul.f32 %v3877_v23, %v6958_v55  ;;  %5091 = vrcp.f32 %v7025_v59  ;;  %v4070_v21 = vsub.f32 0.0, %v3206_v48  ;;  %v5242_v23 = vld [vmem:[%s9396_s9 + $0x10] sm:$0xff] }
 0x263   : > { %4907 = vmatmul.msk.f32.gmra.mxu1 %vm446_vm0, %v1216_v31  ;;  %v2945_v5 = vadd.f32 %v2913_v7, %v2878_v40  ;;  %v7045_v58 = vmul.f32 %v5241_v53, %v6672_v3  ;;  %v7049_v46 = vadd.f32 %v6537_v18, %v6772_v51  ;;  %v7053_v16 = vadd.f32 %v6537_v18, %v6869_v15 }
 0x264   : > { %v3207_v31 = vand.u32 2147483647, %v7029_v12  ;;  %4971 = vmatpush.msra.mxu3 %v5242_v23  ;;  %v7061_v40 = vadd.f32 %v6537_v18, %v6964_v49  ;;  %v3941_v7 = vadd.f32 -0.28449672, %v3909_v10  ;;  %v2811_v6 = vadd.f32 %v2779_v8, %v6528_v32 }
 0x265   : > { %v3044_v51 = vadd.f32 %v3012_v50, %v2945_v5  ;;  %v7065_v53 = vadd.f32 %v6537_v18, %v1491_v42  ;;  %5093 = vpow2.f32 %v4137_v56  ;;  %v2322_v13 = vadd.f32 %v6792_v43, %v2225_v22 }
 0x266   : > { %9503 = vst [vmem:[#allocation19_spill] sm:$0xff] %v7061_v40  ;;  %v3239_v15 = vmul.f32 0.3275911, %v3207_v31  ;;  %4972 = vmatpush.msra.mxu3 %v5243_v54  ;;  %v3973_v23 = vmul.f32 %v3941_v7, %v6958_v55  ;;  %v4102_v49 = vmul.f32 %v4070_v21, %v3206_v48  ;;  %v2581_v32 = vsel %vm6746_vm10, 0.0, %v6902_v19  ;;  %v5244_v54 = vld [vmem:[%s9396_s9] sm:$0xff] }
 0x267   : > { %9504 = vst [vmem:[#allocation20_spill] sm:$0xff] %v7065_v53  ;;  %v3076_v60 = vadd.f32 %v3044_v51, %v2811_v6  ;;  %v7076_v18 = vmul.f32 0.5, %v6688_v36  ;;  %v7079_v50 = vmul.f32 0.5, %v6951_v61  ;;  %v2483_v56 = vmul.f32 %v5939_v4, %v6637_v38  ;;  %v7093_v61 = vld [vmem:[#allocation2 + $0x67] sm:$0xff] }
 0x268   : > { %v7081_v43 = vadd.f32 1.0, %v3239_v15  ;;  %4973 = vmatpush.msra.mxu3 %v5244_v54  ;;  %v5092_v48 = vpop.eup %5091  ;;  %v4005_v8 = vadd.f32 0.2548296, %v3973_v23  ;;  %v3381_v22 = vand.u32 2147483647, %v7025_v59  ;;  %v3383_v36 = vand.u32 2147483648, %v7025_v59 }
 0x269   : > { %v7091_v42 = vadd.f32 %v6948_v30, %v3076_v60  ;;  %vm4261_vm3 = vcmp.lt.f32.partialorder %v6710_v63, 0.0  ;;  %v3373_v38 = vmul.f32 %v5092_v48, %v7025_v59  ;;  %v2614_v10 = vmul.f32 %v6047_v41, %v2581_v32  ;;  %v7106_v23 = vld [vmem:[#allocation2 + $0x68] sm:$0xff] }
 0x26a   : > { %5095 = vrcp.f32 %v7081_v43  ;;  %v2649_v21 = vmul.f32 %v5934_v57, %v6910_v2  ;;  %v4037_v5 = vmul.f32 %v4005_v8, %v6958_v55  ;;  %vm3377_vm12 = vweird.f32 %v7025_v59  ;;  %v7108_v54 = vld [vmem:[#allocation2 + $0x69] sm:$0xff] }
 0x26b   : > { %9505 = vst [vmem:[#allocation21_spill] sm:$0xff] %v7091_v42  ;;  %v4139_v7 = vmul.f32 1.442695, %v4102_v49  ;;  %v4071_v60 = vsub.f32 0.0, %v3207_v31  ;;  %v5094_v6 = vpop.eup %5093  ;;  %v3374_v51 = vsub.f32 1.0, %v3373_v38  ;;  %v2748_v32 = vmul.f32 %v6057_v29, %v6917_v52 }
 0x26c   : > { %v7104_v15 = vmul.f32 0.70710677, %v7091_v42  ;;  %v2846_v55 = vsel %vm6746_vm10, 0.0, %v7093_v61  ;;  %v4197_v8 = vmul.f32 %v5094_v6, %v4037_v5  ;;  %vm7115_vm6 = vcmp.eq.f32.partialorder %v3381_v22, 8.507059e+37 }
 0x26d   : > { %v3384_v38 = vor.u32 1.1754944e-38, %v3383_v36  ;;  %v2515_v14 = vadd.f32 %v2483_v56, %v2322_v13  ;;  %v3375_v37 = vmul.f32 %v5092_v48, %v3374_v51  ;;  %vm3378_vm4 = vweird.f32 %v5092_v48 }
 0x26e   : > { %9506 = vst [vmem:[#allocation22_spill] sm:$0xff] %v7104_v15  ;;  %v3208_v27 = vand.u32 2147483647, %v7104_v15  ;;  %v2681_v25 = vadd.f32 %v2649_v21, %v2614_v10  ;;  %v4229_v33 = vsub.f32 1.0, %v4197_v8  ;;  %v2879_v53 = vmul.f32 %v6106_v35, %v2846_v55  ;;  %vm3379_vm10 = vmor %vm3377_vm12, %vm3378_vm4 }
 0x26f   : > { %v2914_v42 = vmul.f32 %v6087_v62, %v7106_v23  ;;  %v3013_v39 = vmul.f32 %v6878_v28, %v7108_v54  ;;  %v3376_v5 = vadd.f32 %v5092_v48, %v3375_v37  ;;  %v4103_v6 = vmul.f32 %v4071_v60, %v3207_v31 }
 0x270   : > { %v5096_v22 = vpop.eup %5095  ;;  %v3240_v40 = vmul.f32 0.3275911, %v3208_v27  ;;  %v2780_v36 = vadd.f32 %v2748_v32, %v2681_v25  ;;  %v4293_v13 = vsub.f32 0.0, %v4229_v33  ;;  %v3398_v10 = vand.u32 2147483648, %v7081_v43 }
 0x271   : > { %v3388_v56 = vmul.f32 %v5096_v22, %v7081_v43  ;;  %v2946_v21 = vadd.f32 %v2914_v42, %v2879_v53  ;;  %v3380_v51 = vsel %vm3379_vm10, %v5092_v48, %v3376_v5  ;;  %v4072_v8 = vsub.f32 0.0, %v3208_v27 }
 0x272   : > { %v7129_v55 = vadd.f32 1.0, %v3240_v40  ;;  %v1615_v15 = vadd.s32 72, %v5872_v44  ;;  %v4325_v37 = vsel %vm4261_vm3, %v4293_v13, %v4229_v33  ;;  %v7136_v25 = vsel %vm7115_vm6, %v3384_v38, %v3380_v51 }
 0x273   : > { %v3389_v59 = vsub.f32 1.0, %v3388_v56  ;;  %v3045_v31 = vadd.f32 %v3013_v39, %v2946_v21  ;;  %v4357_v60 = vadd.f32 1.0, %v4325_v37  ;;  %v3782_v32 = vmul.f32 1.0614054, %v7136_v25 }
 0x274   : > { %5097 = vrcp.f32 %v7129_v55  ;;  %v2812_v53 = vadd.f32 %v2780_v36, %v2515_v14  ;;  %vm3393_vm9 = vweird.f32 %v5096_v22  ;;  %v3396_v48 = vand.u32 2147483647, %v7081_v43 }
 0x275   : > { %v3390_v40 = vmul.f32 %v5096_v22, %v3389_v59  ;;  %v4141_v42 = vmul.f32 1.442695, %v4103_v6  ;;  %v4389_v63 = vmul.f32 %v4357_v60, %v7076_v18  ;;  %v3814_v33 = vadd.f32 -1.4531521, %v3782_v32 }
 0x276   : > { %v3077_v5 = vadd.f32 %v3045_v31, %v2812_v53  ;;  %v1705_v49 = vand.u32 15, %v1615_v15  ;;  %5099 = vpow2.f32 %v4139_v7  ;;  %vm3392_vm11 = vweird.f32 %v7081_v43 }
 0x277   : > { %v3391_v38 = vadd.f32 %v5096_v22, %v3390_v40  ;;  %v3399_v39 = vor.u32 1.1754944e-38, %v3398_v10  ;;  %v4421_v13 = vmul.f32 %v4389_v63, %v7049_v46  ;;  %v3846_v56 = vmul.f32 %v3814_v33, %v7136_v25  ;;  %vm3394_vm13 = vmor %vm3392_vm11, %vm3393_vm9 }
 0x278   : > { %v4104_v14 = vmul.f32 %v4072_v8, %v3208_v27  ;;  %v7146_v36 = vadd.f32 %v6948_v30, %v3077_v5  ;;  %vm3397_vm5 = vcmp.eq.f32.partialorder %v3396_v48, 8.507059e+37  ;;  %5101 = vpow2.f32 %v4141_v42 }
 0x279   : > { %v3395_v6 = vsel %vm3394_vm13, %v5096_v22, %v3391_v38  ;;  %vm3407_vm14 = vweird.f32 %v7129_v55  ;;  %4923 = vmatmul.msk.f32.gmra.mxu2 %vm1566_vm8, %v4421_v13  ;;  %v3878_v7 = vadd.f32 1.4214138, %v3846_v56  ;;  %vm7155_vm15 = vcmp.eq.s32.totalorder %v1705_v49, 15 }
 0x27a   : > { %v5098_v18 = vpop.eup %5097  ;;  %v7150_v43 = vsel %vm3397_vm5, %v3399_v39, %v3395_v6  ;;  %v7153_v46 = vmul.f32 0.70710677, %v7146_v36  ;;  %v3411_v10 = vand.u32 2147483647, %v7129_v55  ;;  %v3413_v21 = vand.u32 2147483648, %v7129_v55  ;;  %v7189_v6 = vld [vmem:[#allocation2 + $0x6f] sm:$0xff] }
 0x27b   : > { %v3783_v27 = vmul.f32 1.0614054, %v7150_v43  ;;  %v3403_v22 = vmul.f32 %v5098_v18, %v7129_v55  ;;  %v3910_v51 = vmul.f32 %v3878_v7, %v7136_v25  ;;  %v4143_v8 = vmul.f32 1.442695, %v4104_v14  ;;  %v7191_v7 = vld [vmem:[#allocation2 + $0x70] sm:$0xff] }
 0x27c   : > { %v3209_v37 = vand.u32 2147483647, %v7153_v46  ;;  %v2226_v59 = vmul.f32 %v5900_v11, %v6712_v45  ;;  %v5100_v31 = vpop.eup %5099  ;;  %v2291_v53 = vmul.f32 %v5905_v1, %v6723_v0  ;;  %v2451_v40 = vsel %vm7155_vm15, 0.0, %v6785_v17 }
 0x27d   : > { %v3815_v60 = vadd.f32 -1.4531521, %v3783_v27  ;;  %v3404_v32 = vsub.f32 1.0, %v3403_v22  ;;  %v3942_v48 = vadd.f32 -0.28449672, %v3910_v51  ;;  %vm3408_vm1 = vweird.f32 %v5098_v18 }
 0x27e   : > { %v3241_v42 = vmul.f32 0.3275911, %v3209_v37  ;;  %v2615_v63 = vmul.f32 %v6047_v41, %v6975_v9  ;;  %v7174_v33 = vpop.eup %5101  ;;  %v2650_v49 = vmul.f32 %v5934_v57, %v6978_v24  ;;  %v2716_v0 = vsel %vm7155_vm15, 0.0, %v6989_v26  ;;  %vm3409_vm2 = vmor %vm3407_vm14, %vm3408_vm1 }
 0x27f   : > { %v3847_v45 = vmul.f32 %v3815_v60, %v7150_v43  ;;  %v3405_v5 = vmul.f32 %v5098_v18, %v3404_v32  ;;  %v3974_v17 = vmul.f32 %v3942_v48, %v7136_v25  ;;  %vm7183_vm7 = vcmp.eq.f32.partialorder %v3411_v10, 8.507059e+37  ;;  %v7201_v32 = vld [vmem:[#allocation2 + $0x71] sm:$0xff] }
 0x280   : > { %v3414_v39 = vor.u32 1.1754944e-38, %v3413_v21  ;;  %v7187_v13 = vadd.f32 1.0, %v3241_v42  ;;  %5103 = vpow2.f32 %v4143_v8  ;;  %v2484_v27 = vmul.f32 %v5939_v4, %v2451_v40 }
 0x281   : > { %v3879_v56 = vadd.f32 1.4214138, %v3847_v45  ;;  %v3406_v14 = vadd.f32 %v5098_v18, %v3405_v5  ;;  %v4006_v22 = vadd.f32 0.2548296, %v3974_v17  ;;  %v2323_v10 = vadd.f32 %v2291_v53, %v2226_v59 }
 0x282   : > { %5105 = vrcp.f32 %v7187_v13  ;;  %v2749_v21 = vmul.f32 %v6057_v29, %v2716_v0  ;;  %vm4262_vm3 = vcmp.lt.f32.partialorder %v6971_v47, 0.0  ;;  %v4073_v60 = vsub.f32 0.0, %v3209_v37 }
 0x283   : > { %v3911_v51 = vmul.f32 %v3879_v56, %v7150_v43  ;;  %v3410_v8 = vsel %vm3409_vm2, %v5098_v18, %v3406_v14  ;;  %v2682_v48 = vadd.f32 %v2650_v49, %v2615_v63  ;;  %v4038_v40 = vmul.f32 %v4006_v22, %v7136_v25 }
 0x284   : > { %v7206_v55 = vsel %vm7183_vm7, %v3414_v39, %v3410_v8  ;;  %v2880_v59 = vmul.f32 %v6106_v35, %v7189_v6  ;;  %v2915_v53 = vmul.f32 %v6087_v62, %v7191_v7  ;;  %v3426_v18 = vand.u32 2147483647, %v7187_v13 }
 0x285   : > { %v3943_v42 = vadd.f32 -0.28449672, %v3911_v51  ;;  %v3784_v45 = vmul.f32 1.0614054, %v7206_v55  ;;  %v2516_v5 = vadd.f32 %v2484_v27, %v2323_v10  ;;  %v4198_v63 = vmul.f32 %v5100_v31, %v4038_v40  ;;  %v7234_v40 = vld [vmem:[%s9397_s10] ss:$0 sm:$0xff] }
 0x286   : > { %v3428_v25 = vand.u32 2147483648, %v7187_v13  ;;  %v2781_v49 = vadd.f32 %v2749_v21, %v2682_v48  ;;  %v2981_v0 = vsel %vm7155_vm15, 0.0, %v7201_v32  ;;  %v7218_v17 = vpop.eup %5103  ;;  %v1616_v14 = vadd.s32 80, %v5872_v44 }
 0x287   : > { %v3975_v38 = vmul.f32 %v3943_v42, %v7150_v43  ;;  %v3816_v39 = vadd.f32 -1.4531521, %v3784_v45  ;;  %v3014_v56 = vmul.f32 %v6878_v28, %v2981_v0  ;;  %v4230_v27 = vsub.f32 1.0, %v4198_v63 }
 0x288   : > { %v5106_v22 = vpop.eup %5105  ;;  %vm3422_vm12 = vweird.f32 %v7187_v13  ;;  %v4105_v31 = vmul.f32 %v4073_v60, %v3209_v37  ;;  %v2947_v10 = vadd.f32 %v2915_v53, %v2880_v59  ;;  %vm7227_vm6 = vcmp.eq.f32.partialorder %v3426_v18, 8.507059e+37 }
 0x289   : > { %v4007_v21 = vadd.f32 0.2548296, %v3975_v38  ;;  %v3848_v15 = vmul.f32 %v3816_v39, %v7206_v55  ;;  %v3418_v51 = vmul.f32 %v5106_v22, %v7187_v13  ;;  %v4294_v48 = vsub.f32 0.0, %v4230_v27 }
 0x28a   : > { %v2813_v42 = vadd.f32 %v2781_v49, %v2516_v5  ;;  %v3046_v37 = vadd.f32 %v3014_v56, %v2947_v10  ;;  %v1712_v60 = vand.u32 15, %v1616_v14  ;;  %v3429_v63 = vor.u32 1.1754944e-38, %v3428_v25 }
 0x28b   : > { %v4039_v59 = vmul.f32 %v4007_v21, %v7150_v43  ;;  %v3880_v53 = vadd.f32 1.4214138, %v3848_v15  ;;  %v3419_v45 = vsub.f32 1.0, %v3418_v51  ;;  %v4326_v18 = vsel %vm4262_vm3, %v4294_v48, %v4230_v27 }
 0x28c   : > { %vm3423_vm4 = vweird.f32 %v5106_v22  ;;  %v3078_v0 = vadd.f32 %v3046_v37, %v2813_v42  ;;  %vm7241_vm10 = vcmp.eq.s32.totalorder %v1712_v60, 0  ;;  %v4358_v39 = vadd.f32 1.0, %v4326_v18 }
 0x28d   : > { %v4199_v5 = vmul.f32 %v7174_v33, %v4039_v59  ;;  %v3912_v43 = vmul.f32 %v3880_v53, %v7206_v55  ;;  %v3420_v56 = vmul.f32 %v5106_v22, %v3419_v45  ;;  %v2194_v14 = vsel %vm7241_vm10, 0.0, %v6902_v19  ;;  %vm3424_vm9 = vmor %vm3422_vm12, %vm3423_vm4 }
 0x28e   : > { %v4574_v49 = vpop.f32.mrf.mxu2  ;;  %v7249_v47 = vadd.f32 %v6948_v30, %v3078_v0  ;;  %v2292_v27 = vmul.f32 %v5905_v1, %v6910_v2  ;;  %v4390_v10 = vmul.f32 %v4358_v39, %v7079_v50  ;;  %v2227_v42 = vmul.f32 %v5900_v11, %v2194_v14  ;;  %v5245_v39 = vld [vmem:[%s5506_s19 + $0x8] sm:$0xff] }
 0x28f   : > { %v4575_v25 = vadd.f32 %v7234_v40, %v4574_v49  ;;  %v4231_v21 = vsub.f32 1.0, %v4199_v5  ;;  %v3944_v33 = vadd.f32 -0.28449672, %v3912_v43  ;;  %v3421_v15 = vadd.f32 %v5106_v22, %v3420_v56 }
 0x290   : > { %v7262_v48 = vmul.f32 0.70710677, %v7249_v47  ;;  %v2485_v19 = vmul.f32 %v5939_v4, %v6917_v52  ;;  %v4422_v2 = vmul.f32 %v4390_v10, %v7053_v16  ;;  %vm4263_vm11 = vcmp.lt.f32.partialorder %v7029_v12, 0.0 }
 0x291   : > { %v4706_v51 = vadd.f32 %v7045_v58, %v4575_v25  ;;  %v4295_v50 = vsub.f32 0.0, %v4231_v21  ;;  %v3976_v37 = vmul.f32 %v3944_v33, %v7206_v55  ;;  %v3425_v60 = vsel %vm3424_vm9, %v5106_v22, %v3421_v15 }
 0x292   : > { %v7276_v58 = vsel %vm7227_vm6, %v3429_v63, %v3425_v60  ;;  %v7279_v52 = vand.u32 2147483647, %v7262_v48  ;;  %v2324_v16 = vadd.f32 %v2292_v27, %v2227_v42  ;;  %4924 = vmatmul.msk.f32.gmra.mxu2 %vm1566_vm8, %v4422_v2  ;;  %v3143_v13 = vmul.f32 0.5, %v7013_v34  ;;  %v7296_v27 = vld [vmem:[#allocation2 + $0x77] sm:$0xff] }
 0x293   : > { %4738 = vst.msk [vmem:[%s7270_s28] sm:$0xff] %vm446_vm0, %v4706_v51  ;;  %v4327_v22 = vsel %vm4263_vm11, %v4295_v50, %v4231_v21  ;;  %v4008_v12 = vadd.f32 0.2548296, %v3976_v37  ;;  %v3785_v59 = vmul.f32 1.0614054, %v7276_v58  ;;  %v2583_v8 = vsel %vm7241_vm10, 0.0, %v7093_v61 }
 0x294   : > { %v4359_v53 = vadd.f32 1.0, %v4327_v22  ;;  %v3242_v45 = vmul.f32 0.3275911, %v7279_v52  ;;  %v7285_v18 = vadd.f32 %v2485_v19, %v2324_v16  ;;  %v4675_v5 = vmul.f32 %v5245_v39, %v6672_v3  ;;  %v9518_v50 = vld [vmem:[#allocation21_spill] sm:$0xff]  ;;  %v9519_v60 = vld [vmem:[#allocation22_spill] sm:$0xff] }
 0x295   : > { %v4040_v63 = vmul.f32 %v4008_v12, %v7206_v55  ;;  %v3817_v34 = vadd.f32 -1.4531521, %v3785_v59  ;;  %v4145_v49 = vmul.f32 1.442695, %v4105_v31  ;;  %v2651_v10 = vmul.f32 %v5934_v57, %v7106_v23  ;;  %v9517_v31 = vld [vmem:[#allocation19_spill] sm:$0xff] }
 0x296   : > { %v711_v0 = vpop.xlane.xlu1 %710  ;;  %v4391_v43 = vmul.f32 %v4359_v53, %v3143_v13  ;;  %v7294_v14 = vadd.f32 1.0, %v3242_v45  ;;  %v2616_v3 = vmul.f32 %v6047_v41, %v2583_v8  ;;  %v2750_v51 = vmul.f32 %v6057_v29, %v7108_v54  ;;  %v7321_v13 = vld [vmem:[#allocation2 + $0x79] sm:$0xff] }
 0x297   : > { %v763_v56 = vmul.f32 %v711_v0, %v5525_v20  ;;  %v4577_v25 = vpop.f32.mrf.mxu2  ;;  %v4200_v61 = vmul.f32 %v7218_v17, %v4040_v63  ;;  %v3849_v21 = vmul.f32 %v3817_v34, %v7276_v58  ;;  %v7310_v17 = vld [vmem:[#allocation2 + $0x78] sm:$0xff]  ;;  %v2848_v2 = vsel %vm7241_vm10, 0.0, %v7296_v27 }
 0x298   : > { %v4578_v55 = vadd.f32 %v7234_v40, %v4577_v25  ;;  %v4423_v33 = vmul.f32 %v4391_v43, %v9517_v31  ;;  %5107 = vrcp.f32 %v7294_v14  ;;  %v3144_v37 = vmul.f32 0.5, %v9518_v50 }
 0x299   : > { %v7305_v15 = vadd.f32 1e-05, %v763_v56  ;;  %v4232_v42 = vsub.f32 1.0, %v4200_v61  ;;  %v3881_v19 = vadd.f32 1.4214138, %v3849_v21  ;;  %vm4264_vm13 = vcmp.lt.f32.partialorder %v9519_v60, 0.0 }
 0x29a   : > { %v4707_v23 = vadd.f32 %v4675_v5, %v4578_v55  ;;  %v7319_v16 = vmul.f32 0.5, %v7146_v36  ;;  %4925 = vmatmul.msk.f32.gmra.mxu2 %vm1566_vm8, %v4423_v33  ;;  %v2683_v38 = vadd.f32 %v2651_v10, %v2616_v3  ;;  %v1617_v12 = vadd.s32 88, %v5872_v44  ;;  %v9520_v60 = vld [vmem:[#allocation20_spill] sm:$0xff] }
 0x29b   : > { %5109 = vrsqrt.f32 %v7305_v15  ;;  %v4296_v54 = vsub.f32 0.0, %v4232_v42  ;;  %v3913_v22 = vmul.f32 %v3881_v19, %v7276_v58  ;;  %v4074_v59 = vsub.f32 0.0, %v7279_v52 }
 0x29c   : > { %4739 = vst.msk [vmem:[%s7270_s28 + $0x8] sm:$0xff] %vm446_vm0, %v4707_v23  ;;  %5111 = vpow2.f32 %v4145_v49  ;;  %v2881_v53 = vmul.f32 %v6106_v35, %v2848_v2  ;;  %v2916_v36 = vmul.f32 %v6087_v62, %v7310_v17  ;;  %v2782_v0 = vadd.f32 %v2750_v51, %v2683_v38 }
 0x29d   : > { %v4328_v45 = vsel %vm4264_vm13, %v4296_v54, %v4232_v42  ;;  %v3945_v8 = vadd.f32 -0.28449672, %v3913_v22  ;;  %v3015_v39 = vmul.f32 %v6878_v28, %v7321_v13  ;;  %v3441_v49 = vand.u32 2147483647, %v7294_v14  ;;  %v9521_v22 = vld [vmem:[#allocation15_spill] sm:$0xff] }
 0x29e   : > { %v714_v63 = vpop.xlane.xlu1 %713  ;;  %v5108_v5 = vpop.eup %5107  ;;  %v4360_v34 = vadd.f32 1.0, %v4328_v45  ;;  %v2948_v56 = vadd.f32 %v2916_v36, %v2881_v53  ;;  %v3443_v55 = vand.u32 2147483648, %v7294_v14  ;;  %v1719_v21 = vand.u32 15, %v1617_v12 }
 0x29f   : > { %v764_v43 = vmul.f32 %v714_v63, %v5525_v20  ;;  %v3977_v25 = vmul.f32 %v3945_v8, %v7276_v58  ;;  %v4580_v10 = vpop.f32.mrf.mxu2  ;;  %v3433_v61 = vmul.f32 %v5108_v5, %v7294_v14  ;;  %v2814_v2 = vadd.f32 %v2782_v0, %v7285_v18  ;;  %v1494_v45 = vpop.f32.mrf.mxu1 }
 0x2a0   : > { %v4392_v31 = vmul.f32 %v4360_v34, %v3144_v37  ;;  %v4581_v28 = vadd.f32 %v7234_v40, %v4580_v10  ;;  %v3047_v51 = vadd.f32 %v3015_v39, %v2948_v56  ;;  %vm3438_vm5 = vweird.f32 %v5108_v5 }
 0x2a1   : > { %v7339_v3 = vpop.eup %5109  ;;  %v7341_v33 = vadd.f32 1e-05, %v764_v43  ;;  %v4009_v23 = vadd.f32 0.2548296, %v3977_v25  ;;  %v3434_v19 = vsub.f32 1.0, %v3433_v61  ;;  %vm7351_vm14 = vcmp.eq.s32.totalorder %v1719_v21, 15 }
 0x2a2   : > { %v1017_v42 = vmul.f32 %v7339_v3, %v7305_v15  ;;  %v5112_v50 = vpop.eup %5111  ;;  %v4424_v54 = vmul.f32 %v4392_v31, %v9520_v60  ;;  %v4708_v37 = vadd.f32 %v9521_v22, %v4581_v28  ;;  %v3079_v53 = vadd.f32 %v3047_v51, %v2814_v2 }
 0x2a3   : > { %5113 = vrsqrt.f32 %v7341_v33  ;;  %v4041_v38 = vmul.f32 %v4009_v23, %v7276_v58  ;;  %v3435_v12 = vmul.f32 %v5108_v5, %v3434_v19  ;;  %vm4265_vm15 = vcmp.lt.f32.partialorder %v7153_v46, 0.0  ;;  %v5246_v23 = vld [vmem:[%s5506_s19 + $0x18] sm:$0xff] }
 0x2a4   : > { %4926 = vmatmul.msk.f32.gmra.mxu2 %vm1566_vm8, %v4424_v54  ;;  %4740 = vst.msk [vmem:[%s7270_s28 + $0x10] sm:$0xff] %vm446_vm0, %v4708_v37  ;;  %vm3437_vm1 = vweird.f32 %v7294_v14  ;;  %v2617_v18 = vmul.f32 %v6047_v41, %v7189_v6  ;;  %v2652_v58 = vmul.f32 %v5934_v57, %v7191_v7  ;;  %v1018_v8 = vmul.f32 %v7339_v3, %v1017_v42 }
 0x2a5   : > { %v4201_v63 = vmul.f32 %v5112_v50, %v4041_v38  ;;  %v3436_v0 = vadd.f32 %v5108_v5, %v3435_v12  ;;  %v7366_v39 = vadd.f32 %v6948_v30, %v3079_v53  ;;  %vm3439_vm7 = vmor %vm3437_vm1, %vm3438_vm5  ;;  %v3444_v34 = vor.u32 1.1754944e-38, %v3443_v55 }
 0x2a6   : > { %v4106_v43 = vmul.f32 %v4074_v59, %v7279_v52  ;;  %v2453_v14 = vsel %vm7351_vm14, 0.0, %v6989_v26  ;;  %v2684_v56 = vadd.f32 %v2652_v58, %v2617_v18  ;;  %vm3442_vm2 = vcmp.eq.f32.partialorder %v3441_v49, 8.507059e+37  ;;  %v729_v31 = vpop.xlane.xlu1 %728  ;;  %v7412_v18 = vld [vmem:[%s9393_s6] ss:$0 sm:$0xff] }
 0x2a7   : > { %v4233_v25 = vsub.f32 1.0, %v4201_v63  ;;  %v3440_v10 = vsel %vm3439_vm7, %v5108_v5, %v3436_v0  ;;  %v2228_v61 = vmul.f32 %v5900_v11, %v6975_v9  ;;  %v7380_v55 = vmul.f32 0.70710677, %v7366_v39  ;;  %v4583_v9 = vpop.f32.mrf.mxu2 }
 0x2a8   : > { %v7377_v30 = vsel %vm3442_vm2, %v3444_v34, %v3440_v10  ;;  %v2293_v52 = vmul.f32 %v5905_v1, %v6978_v24  ;;  %v2718_v26 = vsel %vm7351_vm14, 0.0, %v7201_v32  ;;  %v1019_v59 = vmul.f32 0.5, %v1018_v8  ;;  %v7396_v24 = vld [vmem:[%s9398_s11] ss:$0 sm:$0xff] }
 0x2a9   : > { %v7375_v21 = vpop.eup %5113  ;;  %v4297_v5 = vsub.f32 0.0, %v4233_v25  ;;  %v2486_v28 = vmul.f32 %v5939_v4, %v2453_v14  ;;  %v3786_v51 = vmul.f32 1.0614054, %v7377_v30  ;;  %v4584_v42 = vadd.f32 %v7234_v40, %v4583_v9  ;;  %v1497_v14 = vpop.f32.mrf.mxu1 }
 0x2aa   : > { %v1027_v49 = vmul.f32 %v7375_v21, %v7341_v33  ;;  %v4677_v19 = vmul.f32 %v7396_v24, %v5246_v23  ;;  %v769_v2 = vmul.f32 %v729_v31, %v5525_v20  ;;  %v7404_v54 = vand.u32 2147483647, %v7380_v55 }
 0x2ab   : > { %v4329_v50 = vsel %vm4265_vm15, %v4297_v5, %v4233_v25  ;;  %v2751_v22 = vmul.f32 %v6057_v29, %v2718_v26  ;;  %v3818_v38 = vadd.f32 -1.4531521, %v3786_v51  ;;  %v1495_v46 = vadd.f32 %v7412_v18, %v1494_v45 }
 0x2ac   : > { %v1028_v60 = vmul.f32 %v7375_v21, %v1027_v49  ;;  %v4361_v37 = vadd.f32 1.0, %v4329_v50  ;;  %v4709_v12 = vadd.f32 %v4677_v19, %v4584_v42  ;;  %v7407_v53 = vadd.f32 1e-05, %v769_v2 }
 0x2ad   : > { %v3243_v58 = vmul.f32 0.3275911, %v7404_v54  ;;  %v2325_v8 = vadd.f32 %v2293_v52, %v2228_v61  ;;  %v3850_v34 = vmul.f32 %v3818_v38, %v7377_v30  ;;  %v4147_v25 = vmul.f32 1.442695, %v4106_v43 }
 0x2ae   : > { %v4393_v63 = vmul.f32 %v4361_v37, %v7319_v16  ;;  %v1029_v0 = vmul.f32 0.5, %v1028_v60  ;;  %4741 = vst.msk [vmem:[%s7270_s28 + $0x18] sm:$0xff] %vm446_vm0, %v4709_v12  ;;  %5115 = vrsqrt.f32 %v7407_v53  ;;  %v2783_v26 = vadd.f32 %v2751_v22, %v2684_v56 }
 0x2af   : > { %v7421_v10 = vadd.f32 1.0, %v3243_v58  ;;  %v1020_v5 = vsub.f32 1.5, %v1019_v59  ;;  %v3882_v45 = vadd.f32 1.4214138, %v3850_v34  ;;  %v2518_v9 = vadd.f32 %v2486_v28, %v2325_v8 }
 0x2b0   : > { %v4425_v49 = vmul.f32 %v4393_v63, %v1495_v46  ;;  %v7425_v16 = vadd.f32 %v7412_v18, %v1497_v14  ;;  %v1030_v61 = vsub.f32 1.5, %v1029_v0  ;;  %vm1022_vm3 = vweird.f32 %v7305_v15 }
 0x2b1   : > { %5117 = vrcp.f32 %v7421_v10  ;;  %v3914_v52 = vmul.f32 %v3882_v45, %v7377_v30  ;;  %v7429_v31 = vadd.f32 %v2783_v26, %v2518_v9  ;;  %v7433_v43 = vmul.f32 0.5, %v7249_v47 }
 0x2b2   : > { %4927 = vmatmul.msk.f32.gmra.mxu2 %vm1566_vm8, %v4425_v49  ;;  %5119 = vpow2.f32 %v4147_v25  ;;  %v1618_v56 = vadd.s32 96, %v5872_v44  ;;  %v7439_v28 = vmul.f32 %v7339_v3, %v1020_v5  ;;  %vm1023_vm12 = vweird.f32 %v7339_v3 }
 0x2b3   : > { %vm1032_vm6 = vweird.f32 %v7341_v33  ;;  %v3946_v51 = vadd.f32 -0.28449672, %v3914_v52  ;;  %vm1033_vm4 = vweird.f32 %v7375_v21  ;;  %vm1082_vm10 = vweird.f32 %v7407_v53  ;;  %vm7483_vm1 = vmor %vm1022_vm3, %vm1023_vm12 }
 0x2b4   : > { %v7436_v59 = vpop.eup %5115  ;;  %v1726_v47 = vand.u32 15, %v1618_v56  ;;  %v7448_v23 = vmul.f32 %v7375_v21, %v1030_v61  ;;  %v3456_v2 = vand.u32 2147483647, %v7421_v10  ;;  %v1619_v50 = vadd.s32 104, %v5872_v44  ;;  %vm7498_vm7 = vmor %vm1032_vm6, %vm1033_vm4  ;;  %v9536_v61 = vld [vmem:[#allocation10_spill] sm:$0xff] }
 0x2b5   : > { %v1077_v42 = vmul.f32 %v7436_v59, %v7407_v53  ;;  %v3978_v19 = vmul.f32 %v3946_v51, %v7377_v30  ;;  %v3458_v37 = vand.u32 2147483648, %v7421_v10  ;;  %v2230_v38 = vmul.f32 %v5900_v11, %v7189_v6 }
 0x2b6   : > { %v2295_v12 = vmul.f32 %v5905_v1, %v7191_v7  ;;  %vm7460_vm9 = vcmp.eq.s32.totalorder %v1726_v47, 0  ;;  %v2653_v63 = vmul.f32 %v5934_v57, %v7310_v17  ;;  %vm4266_vm11 = vcmp.lt.f32.partialorder %v7262_v48, 0.0  ;;  %v7544_v48 = vld [vmem:[%s9438_s1] ss:$0 sm:$0xff] }
 0x2b7   : > { %v5118_v60 = vpop.eup %5117  ;;  %v1078_v22 = vmul.f32 %v7436_v59, %v1077_v42  ;;  %v4010_v46 = vadd.f32 0.2548296, %v3978_v19  ;;  %v2585_v6 = vsel %vm7460_vm9, 0.0, %v7296_v27  ;;  %v2752_v7 = vmul.f32 %v6057_v29, %v7321_v13 }
 0x2b8   : > { %v3448_v58 = vmul.f32 %v5118_v60, %v7421_v10  ;;  %v5120_v0 = vpop.eup %5119  ;;  %v1733_v14 = vand.u32 15, %v1619_v50  ;;  %v2618_v5 = vmul.f32 %v6047_v41, %v2585_v6  ;;  %v2327_v49 = vadd.f32 %v2295_v12, %v2230_v38 }
 0x2b9   : > { %v1079_v34 = vmul.f32 0.5, %v1078_v22  ;;  %v4042_v25 = vmul.f32 %v4010_v46, %v7377_v30  ;;  %vm1083_vm13 = vweird.f32 %v7436_v59  ;;  %vm3453_vm5 = vweird.f32 %v5118_v60 }
 0x2ba   : > { %v3449_v26 = vsub.f32 1.0, %v3448_v58  ;;  %vm7475_vm15 = vcmp.eq.s32.totalorder %v1733_v14, 15  ;;  %v2685_v56 = vadd.f32 %v2653_v63, %v2618_v5  ;;  %v1025_v42 = vsel %vm7483_vm1, %v7339_v3, %v7439_v28  ;;  %vm7507_vm2 = vmor %vm1082_vm10, %vm1083_vm13 }
 0x2bb   : > { %v1080_v45 = vsub.f32 1.5, %v1079_v34  ;;  %v4202_v30 = vmul.f32 %v5120_v0, %v4042_v25  ;;  %v2455_v51 = vsel %vm7475_vm15, 0.0, %v7201_v32  ;;  %v4075_v19 = vsub.f32 0.0, %v7404_v54  ;;  %v717_v34 = vpop.xlane.xlu0 %716  ;;  %v720_v25 = vpop.xlane.xlu2 %719 }
 0x2bc   : > { %v3450_v52 = vmul.f32 %v5118_v60, %v3449_v26  ;;  %v2488_v50 = vmul.f32 %v5939_v4, %v2455_v51  ;;  %vm3452_vm3 = vweird.f32 %v7421_v10  ;;  %v7512_v33 = vadd.f32 %v2752_v7, %v2685_v56  ;;  %v9535_v7 = vld [vmem:[#allocation11_spill] sm:$0xff] }
 0x2bd   : > { %v1081_v47 = vmul.f32 %v7436_v59, %v1080_v45  ;;  %v4234_v32 = vsub.f32 1.0, %v4202_v30  ;;  %v1035_v28 = vsel %vm7498_vm7, %v7375_v21, %v7448_v23  ;;  %vm3454_vm12 = vmor %vm3452_vm3, %vm3453_vm5  ;;  %v3459_v53 = vor.u32 1.1754944e-38, %v3458_v37  ;;  %v1391_v21 = vpop.f32.mrf.mxu0  ;;  %v9534_v23 = vld [vmem:[#allocation9_spill] sm:$0xff]  ;;  %v735_v45 = vpop.xlane.xlu1 %734 }
 0x2be   : > { %v3451_v3 = vadd.f32 %v5118_v60, %v3450_v52  ;;  %v7522_v12 = vadd.f32 %v2488_v50, %v2327_v49  ;;  %vm3457_vm6 = vcmp.eq.f32.partialorder %v3456_v2, 8.507059e+37  ;;  %v1620_v10 = vadd.s32 112, %v5872_v44  ;;  %v7537_v2 = vld [vmem:[%s9391_s4] ss:$0 sm:$0xff] }
 0x2bf   : > { %v1085_v38 = vsel %vm7507_vm2, %v7436_v59, %v1081_v47  ;;  %v4298_v46 = vsub.f32 0.0, %v4234_v32  ;;  %v4107_v0 = vmul.f32 %v4075_v19, %v7404_v54  ;;  %v1147_v6 = vmul.f32 %v1025_v42, %v9534_v23  ;;  %v9537_v19 = vld [vmem:[#allocation6_spill] sm:$0xff] }
 0x2c0   : > { %v3455_v58 = vsel %vm3454_vm12, %v5118_v60, %v3451_v3  ;;  %v1153_v59 = vmul.f32 %v1085_v38, %v9535_v7  ;;  %v765_v60 = vmul.f32 %v717_v34, %v5525_v20  ;;  %v1392_v54 = vadd.f32 %v7537_v2, %v1391_v21 }
 0x2c1   : > { %v7525_v63 = vsel %vm3457_vm6, %v3459_v53, %v3455_v58  ;;  %v4330_v37 = vsel %vm4266_vm11, %v4298_v46, %v4234_v32  ;;  %v766_v5 = vmul.f32 %v720_v25, %v5525_v20  ;;  %v1182_v49 = vmul.f32 %v7544_v48, %v1147_v6 }
 0x2c2   : > { %v3787_v14 = vmul.f32 1.0614054, %v7525_v63  ;;  %v4362_v26 = vadd.f32 1.0, %v4330_v37  ;;  %v1148_v30 = vmul.f32 %v1035_v28, %v9536_v61  ;;  %v7548_v56 = vadd.f32 1e-05, %v765_v60  ;;  %1587 = vst.msk [vmem:[#allocation2 + $0x88] sm:$0xff] %vm1566_vm8, %v1392_v54 }
 0x2c3   : > { %v771_v51 = vmul.f32 %v735_v45, %v5525_v20  ;;  %v1740_v42 = vand.u32 15, %v1620_v10  ;;  %v7553_v47 = vadd.f32 1e-05, %v766_v5  ;;  %v1217_v50 = vadd.f32 %v9537_v19, %v1182_v49  ;;  %v732_v58 = vpop.xlane.xlu0 %731  ;;  %v738_v6 = vpop.xlane.xlu2 %737 }
 0x2c4   : > { %v3819_v52 = vadd.f32 -1.4531521, %v3787_v14  ;;  %v4394_v15 = vmul.f32 %v4362_v26, %v7433_v43  ;;  %v1188_v32 = vmul.f32 %v7544_v48, %v1153_v59  ;;  %5121 = vrsqrt.f32 %v7548_v56 }
 0x2c5   : > { %v7559_v3 = vadd.f32 1e-05, %v771_v51  ;;  %5123 = vrsqrt.f32 %v7553_v47  ;;  %4876 = vmatmul.msk.f32.gmra.mxu0 %vm446_vm0, %v1217_v50  ;;  %4908 = vmatmul.msk.f32.gmra.mxu1 %vm446_vm0, %v1217_v50  ;;  %v1183_v43 = vmul.f32 %v7544_v48, %v1148_v30  ;;  %v4149_v53 = vmul.f32 1.442695, %v4107_v0  ;;  %v1394_v10 = vpop.f32.mrf.mxu0 }
 0x2c6   : > { %v3851_v22 = vmul.f32 %v3819_v52, %v7525_v63  ;;  %v4426_v28 = vmul.f32 %v4394_v15, %v7425_v16  ;;  %v7568_v46 = vadd.f32 %v9537_v19, %v1188_v32  ;;  %vm7571_vm4 = vcmp.eq.s32.totalorder %v1740_v42, 0 }
 0x2c7   : > { %5125 = vrsqrt.f32 %v7559_v3  ;;  %v2296_v34 = vmul.f32 %v5905_v1, %v7310_v17  ;;  %v770_v0 = vmul.f32 %v732_v58, %v5525_v20  ;;  %v1395_v23 = vadd.f32 %v7537_v2, %v1394_v10 }
 0x2c8   : > { %v3883_v38 = vadd.f32 1.4214138, %v3851_v22  ;;  %4928 = vmatmul.msk.f32.gmra.mxu2 %vm1566_vm8, %v4426_v28  ;;  %4882 = vmatmul.msk.f32.gmra.mxu3 %vm446_vm0, %v7568_v46  ;;  %v2198_v7 = vsel %vm7571_vm4, 0.0, %v7296_v27  ;;  %v1218_v59 = vadd.f32 %v9537_v19, %v1183_v43  ;;  %v772_v37 = vmul.f32 %v738_v6, %v5525_v20 }
 0x2c9   : > { %v2231_v17 = vmul.f32 %v5900_v11, %v2198_v7  ;;  %5127 = vpow2.f32 %v4149_v53  ;;  %v7588_v54 = vadd.f32 1e-05, %v770_v0  ;;  %1588 = vst.msk [vmem:[#allocation2 + $0x90] sm:$0xff] %vm1566_vm8, %v1395_v23  ;;  %v2489_v49 = vmul.f32 %v5939_v4, %v7321_v13 }
 0x2ca   : > { %v3915_v21 = vmul.f32 %v3883_v38, %v7525_v63  ;;  %v5122_v14 = vpop.eup %5121  ;;  %v7594_v5 = vadd.f32 1e-05, %v772_v37  ;;  %v3147_v15 = vmul.f32 0.5, %v7366_v39  ;;  %vm4267_vm10 = vcmp.lt.f32.partialorder %v7380_v55, 0.0 }
 0x2cb   : > { %v7591_v25 = vpop.eup %5123  ;;  %v1037_v26 = vmul.f32 %v5122_v14, %v7548_v56  ;;  %v2328_v27 = vadd.f32 %v2296_v34, %v2231_v17  ;;  %5129 = vrsqrt.f32 %v7588_v54  ;;  %v741_v22 = vpop.xlane.xlu0 %740  ;;  %vm1043_vm11 = vweird.f32 %v5122_v14 }
 0x2cc   : > { %v3947_v60 = vadd.f32 -0.28449672, %v3915_v21  ;;  %v1047_v30 = vmul.f32 %v7591_v25, %v7553_v47  ;;  %5131 = vrsqrt.f32 %v7594_v5  ;;  %v773_v10 = vmul.f32 %v741_v22, %v5525_v20 }
 0x2cd   : > { %v7598_v45 = vpop.eup %5125  ;;  %v1038_v52 = vmul.f32 %v5122_v14, %v1037_v26  ;;  %4877 = vmatmul.msk.f32.gmra.mxu0 %vm446_vm0, %v1218_v59  ;;  %4909 = vmatmul.msk.f32.gmra.mxu1 %vm446_vm0, %v1218_v59  ;;  %v1397_v32 = vpop.f32.mrf.mxu0  ;;  %v7612_v28 = vadd.f32 %v2489_v49, %v2328_v27  ;;  %vm1053_vm13 = vweird.f32 %v7591_v25  ;;  %vm1042_vm5 = vweird.f32 %v7548_v56 }
 0x2ce   : > { %v3979_v61 = vmul.f32 %v3947_v60, %v7525_v63  ;;  %v1097_v51 = vmul.f32 %v7598_v45, %v7559_v3  ;;  %v1048_v13 = vmul.f32 %v7591_v25, %v1047_v30  ;;  %v1398_v58 = vadd.f32 %v7537_v2, %v1397_v32  ;;  %vm1044_vm1 = vmor %vm1042_vm5, %vm1043_vm11 }
 0x2cf   : > { %v1039_v19 = vmul.f32 0.5, %v1038_v52  ;;  %v5128_v43 = vpop.eup %5127  ;;  %v7620_v6 = vadd.f32 1e-05, %v773_v10  ;;  %vm1052_vm7 = vweird.f32 %v7553_v47  ;;  %vm1102_vm3 = vweird.f32 %v7559_v3 }
 0x2d0   : > { %v4011_v42 = vadd.f32 0.2548296, %v3979_v61  ;;  %v1098_v50 = vmul.f32 %v7598_v45, %v1097_v51  ;;  %v1049_v53 = vmul.f32 0.5, %v1048_v13  ;;  %1589 = vst.msk [vmem:[#allocation2 + $0x98] sm:$0xff] %vm1566_vm8, %v1398_v58  ;;  %vm1054_vm2 = vmor %vm1052_vm7, %vm1053_vm13  ;;  %vm1092_vm12 = vweird.f32 %v7588_v54  ;;  %v9540_v61 = vld [vmem:[#allocation13_spill] sm:$0xff] }
 0x2d1   : > { %v1040_v34 = vsub.f32 1.5, %v1039_v19  ;;  %v5130_v21 = vpop.eup %5129  ;;  %5133 = vrsqrt.f32 %v7620_v6  ;;  %vm1103_vm6 = vweird.f32 %v7598_v45  ;;  %v9541_v19 = vld [vmem:[#allocation14_spill] sm:$0xff]  ;;  %v7648_v58 = vld [vmem:[%s9389_s2] ss:$0 sm:$0xff]  ;;  %vm1112_vm5 = vweird.f32 %v7594_v5 }
 0x2d2   : > { %v4043_v38 = vmul.f32 %v4011_v42, %v7525_v63  ;;  %v1099_v39 = vmul.f32 0.5, %v1098_v50  ;;  %v1050_v23 = vsub.f32 1.5, %v1049_v53  ;;  %v1087_v7 = vmul.f32 %v5130_v21, %v7588_v54  ;;  %v7624_v59 = vpop.eup %5131  ;;  %v1500_v42 = vpop.f32.mrf.mxu1 }
 0x2d3   : > { %v1041_v63 = vmul.f32 %v5122_v14, %v1040_v34  ;;  %v1107_v56 = vmul.f32 %v7624_v59, %v7594_v5  ;;  %vm1093_vm11 = vweird.f32 %v5130_v21  ;;  %v1501_v34 = vadd.f32 %v7412_v18, %v1500_v42 }
 0x2d4   : > { %v4203_v0 = vmul.f32 %v5128_v43, %v4043_v38  ;;  %v1100_v20 = vsub.f32 1.5, %v1099_v39  ;;  %v1051_v17 = vmul.f32 %v7591_v25, %v1050_v23  ;;  %v1088_v26 = vmul.f32 %v5130_v21, %v1087_v7  ;;  %vm1094_vm13 = vmor %vm1092_vm12, %vm1093_vm11 }
 0x2d5   : > { %v1045_v60 = vsel %vm1044_vm1, %v5122_v14, %v1041_v63  ;;  %v1108_v14 = vmul.f32 %v7624_v59, %v1107_v56  ;;  %v1400_v51 = vpop.f32.mrf.mxu0  ;;  %vm1113_vm1 = vweird.f32 %v7624_v59 }
 0x2d6   : > { %v4235_v37 = vsub.f32 1.0, %v4203_v0  ;;  %v1055_v49 = vsel %vm1054_vm2, %v7591_v25, %v1051_v17  ;;  %v1149_v30 = vmul.f32 %v1045_v60, %v9540_v61  ;;  %v1089_v52 = vmul.f32 0.5, %v1088_v26  ;;  %v9544_v26 = vld [vmem:[#allocation12_spill] sm:$0xff]  ;;  %vm1114_vm7 = vmor %vm1112_vm5, %vm1113_vm1 }
 0x2d7   : > { %v1101_v47 = vmul.f32 %v7598_v45, %v1100_v20  ;;  %v1150_v50 = vmul.f32 %v1055_v49, %v9541_v19  ;;  %v1401_v32 = vadd.f32 %v7537_v2, %v1400_v51  ;;  %v1109_v38 = vmul.f32 0.5, %v1108_v14  ;;  %v7643_v53 = vpop.eup %5133  ;;  %v9545_v61 = vld [vmem:[#allocation16_spill] sm:$0xff] }
 0x2d8   : > { %v4299_v27 = vsub.f32 0.0, %v4235_v37  ;;  %v1184_v25 = vmul.f32 %v7544_v48, %v1149_v30  ;;  %v1090_v43 = vsub.f32 1.5, %v1089_v52  ;;  %v1117_v63 = vmul.f32 %v7643_v53, %v7620_v6 }
 0x2d9   : > { %1590 = vst.msk [vmem:[#allocation2 + $0xa0] sm:$0xff] %vm1566_vm8, %v1401_v32  ;;  %v1185_v3 = vmul.f32 %v7544_v48, %v1150_v50  ;;  %v1110_v17 = vsub.f32 1.5, %v1109_v38  ;;  %v7695_v50 = vld [vmem:[#allocation2 + $0x7f] sm:$0xff]  ;;  %vm1122_vm2 = vweird.f32 %v7620_v6 }
 0x2da   : > { %v4331_v13 = vsel %vm4267_vm10, %v4299_v27, %v4235_v37  ;;  %v1219_v55 = vadd.f32 %v7648_v58, %v1184_v25  ;;  %v1091_v0 = vmul.f32 %v5130_v21, %v1090_v43  ;;  %vm7657_vm10 = vmor %vm1102_vm3, %vm1103_vm6  ;;  %v1118_v60 = vmul.f32 %v7643_v53, %v1117_v63  ;;  %v7697_v25 = vld [vmem:[#allocation2 + $0x80] sm:$0xff]  ;;  %v9546_v43 = vld [vmem:[#allocation17_spill] sm:$0xff] }
 0x2db   : > { %v4363_v22 = vadd.f32 1.0, %v4331_v13  ;;  %v1105_v7 = vsel %vm7657_vm10, %v7598_v45, %v1101_v47  ;;  %v1220_v56 = vadd.f32 %v7648_v58, %v1185_v3  ;;  %vm1123_vm3 = vweird.f32 %v7643_v53  ;;  %v7724_v63 = vld [vmem:[%s9394_s7 + $0x8] ss:$0 sm:$0xff] }
 0x2dc   : > { %v1424_v10 = vpop.f32.mrf.mxu3  ;;  %4878 = vmatmul.msk.f32.gmra.mxu0 %vm446_vm0, %v1219_v55  ;;  %4910 = vmatmul.msk.f32.gmra.mxu1 %vm446_vm0, %v1219_v55  ;;  %v1095_v37 = vsel %vm1094_vm13, %v5130_v21, %v1091_v0  ;;  %v1155_v30 = vmul.f32 %v1105_v7, %v9545_v61  ;;  %v1111_v21 = vmul.f32 %v7624_v59, %v1110_v17  ;;  %v1119_v52 = vmul.f32 0.5, %v1118_v60  ;;  %vm1124_vm12 = vmor %vm1122_vm2, %vm1123_vm3 }
 0x2dd   : > { %v4395_v39 = vmul.f32 %v4363_v22, %v3147_v15  ;;  %v1425_v15 = vadd.f32 %v7537_v2, %v1424_v10  ;;  %v1154_v54 = vmul.f32 %v1095_v37, %v9544_v26  ;;  %v1403_v45 = vpop.f32.mrf.mxu0  ;;  %v2917_v10 = vmul.f32 %v6087_v62, %v7697_v25  ;;  %v9547_v37 = vld [vmem:[#allocation18_spill] sm:$0xff] }
 0x2de   : > { %v1404_v49 = vadd.f32 %v7537_v2, %v1403_v45  ;;  %v1190_v42 = vmul.f32 %v7544_v48, %v1155_v30  ;;  %v1115_v5 = vsel %vm1114_vm7, %v7624_v59, %v1111_v21  ;;  %v1120_v13 = vsub.f32 1.5, %v1119_v52 }
 0x2df   : > { %v4427_v20 = vmul.f32 %v4395_v39, %v1501_v34  ;;  %1598 = vst.msk [vmem:[#allocation2 + $0xe0] sm:$0xff] %vm1566_vm8, %v1425_v15  ;;  %v1189_v27 = vmul.f32 %v7544_v48, %v1154_v54  ;;  %v1156_v38 = vmul.f32 %v1115_v5, %v9546_v43  ;;  %v2882_v59 = vmul.f32 %v6106_v35, %v7695_v50  ;;  %v7715_v39 = vld [vmem:[#allocation2 + $0x81] sm:$0xff]  ;;  %v1503_v15 = vpop.f32.mrf.mxu1  ;;  %v7740_v54 = vld [vmem:[%s9395_s8] ss:$0 sm:$0xff]  ;;  %v5257_v43 = vld [vmem:[#allocation2 + $0x69] sm:$0xff] }
 0x2e0   : > { %1591 = vst.msk [vmem:[#allocation2 + $0xa8] sm:$0xff] %vm1566_vm8, %v1404_v49  ;;  %v7700_v32 = vadd.f32 %v7648_v58, %v1190_v42  ;;  %v1121_v55 = vmul.f32 %v7643_v53, %v1120_v13  ;;  %v2983_v0 = vsel %vm7351_vm14, 0.0, %v7715_v39  ;;  %v7761_v42 = vld [vmem:[#allocation2 + $0x87] sm:$0xff] }
 0x2e1   : > { %4929 = vmatmul.msk.f32.gmra.mxu2 %vm1566_vm8, %v4427_v20  ;;  %v7684_v47 = vadd.f32 %v7648_v58, %v1189_v27  ;;  %v1191_v34 = vmul.f32 %v7544_v48, %v1156_v38  ;;  %v2949_v23 = vadd.f32 %v2917_v10, %v2882_v59  ;;  %v3016_v7 = vmul.f32 %v7724_v63, %v2983_v0  ;;  %v5254_v27 = vld [vmem:[%s5506_s19 + $0x20] sm:$0xff]  ;;  %v5256_v13 = vld [vmem:[#allocation2 + $0x68] sm:$0xff] }
 0x2e2   : > { %v1125_v6 = vsel %vm1124_vm12, %v7643_v53, %v1121_v55  ;;  %v2487_v38 = vmul.f32 %v5257_v43, %v5939_v4  ;;  %v7772_v59 = vadd.f32 %v7412_v18, %v1503_v15  ;;  %v2619_v15 = vmul.f32 %v6047_v41, %v7695_v50  ;;  %v7801_v43 = vld [vmem:[#allocation2 + $0x8f] sm:$0xff] }
 0x2e3   : > { %4883 = vmatmul.msk.f32.gmra.mxu3 %vm446_vm0, %v7684_v47  ;;  %v7728_v20 = vadd.f32 %v7648_v58, %v1191_v34  ;;  %v1157_v17 = vmul.f32 %v1125_v6, %v9547_v37  ;;  %v3048_v36 = vadd.f32 %v3016_v7, %v2949_v23  ;;  %v9548_v34 = vld [vmem:[#allocation7_spill] sm:$0xff]  ;;  %v1621_v6 = vadd.s32 120, %v5872_v44 }
 0x2e4   : > { %v1427_v14 = vpop.f32.mrf.mxu3  ;;  %4879 = vmatmul.msk.f32.gmra.mxu0 %vm446_vm0, %v1220_v56  ;;  %4911 = vmatmul.msk.f32.gmra.mxu1 %vm446_vm0, %v1220_v56  ;;  %v2654_v37 = vmul.f32 %v5934_v57, %v7697_v25 }
 0x2e5   : > { %v1428_v51 = vadd.f32 %v7537_v2, %v1427_v14  ;;  %v1406_v19 = vpop.f32.mrf.mxu0  ;;  %v3080_v60 = vadd.f32 %v3048_v36, %v7429_v31  ;;  %v1192_v26 = vmul.f32 %v7544_v48, %v1157_v17  ;;  %v4678_v48 = vmul.f32 %v5254_v27, %v7396_v24 }
 0x2e6   : > { %v1407_v22 = vadd.f32 %v7537_v2, %v1406_v19  ;;  %v2294_v19 = vmul.f32 %v5256_v13, %v5905_v1  ;;  %v2232_v13 = vmul.f32 %v5900_v11, %v7695_v50  ;;  %v2297_v50 = vmul.f32 %v5905_v1, %v7697_v25 }
 0x2e7   : > { %1599 = vst.msk [vmem:[#allocation2 + $0xe8] sm:$0xff] %vm1566_vm8, %v1428_v51  ;;  %v7743_v45 = vadd.f32 %v7740_v54, %v3080_v60  ;;  %v7749_v56 = vadd.f32 %v7648_v58, %v1192_v26  ;;  %v1506_v49 = vpop.f32.mrf.mxu1  ;;  %v5255_v51 = vld [vmem:[#allocation2 + $0x67] sm:$0xff]  ;;  %v1622_v26 = vadd.s32 128, %v5872_v44 }
 0x2e8   : > { %1592 = vst.msk [vmem:[#allocation2 + $0xb0] sm:$0xff] %vm1566_vm8, %v1407_v22  ;;  %v2196_v58 = vsel %vm7460_vm9, 0.0, %v5255_v51  ;;  %v7765_v22 = vld [vmem:[#allocation2 + $0x88] sm:$0xff] }
 0x2e9   : > { %v2229_v5 = vmul.f32 %v5900_v11, %v2196_v58  ;;  %v2918_v8 = vmul.f32 %v6087_v62, %v7765_v22 }
 0x2eb   : > { %4884 = vmatmul.msk.f32.gmra.mxu3 %vm446_vm0, %v7700_v32  ;;  %v2326_v23 = vadd.f32 %v2294_v19, %v2229_v5  ;;  %v2686_v5 = vadd.f32 %v2654_v37, %v2619_v15 }
 0x2ed   : > { %v1409_v3 = vpop.f32.mrf.mxu0  ;;  %v2519_v60 = vadd.f32 %v2487_v38, %v2326_v23  ;;  %v7803_v38 = vld [vmem:[#allocation2 + $0x90] sm:$0xff]  ;;  %v2587_v23 = vsel %vm7571_vm4, 0.0, %v7761_v42 }
 0x2ee   : > { %v1410_v53 = vadd.f32 %v7537_v2, %v1409_v3  ;;  %v7746_v2 = vmul.f32 0.70710677, %v7743_v45  ;;  %v7781_v3 = vadd.f32 %v7412_v18, %v1506_v49  ;;  %v2720_v49 = vsel %vm7475_vm15, 0.0, %v7715_v39 }
 0x2ef   : > { %v1509_v10 = vpop.f32.mrf.mxu1  ;;  %v2816_v58 = vadd.f32 %v7512_v33, %v2519_v60  ;;  %v2919_v15 = vmul.f32 %v6087_v62, %v7803_v38  ;;  %v7834_v60 = vld [vmem:[#allocation2 + $0x91] sm:$0xff] }
 0x2f0   : > { %1593 = vst.msk [vmem:[#allocation2 + $0xb8] sm:$0xff] %vm1566_vm8, %v1410_v53  ;;  %v3212_v31 = vand.u32 2147483647, %v7746_v2  ;;  %v7788_v17 = vadd.f32 %v7412_v18, %v1509_v10  ;;  %v1754_v10 = vand.u32 15, %v1622_v26 }
 0x2f2   : > { %v3244_v61 = vmul.f32 0.3275911, %v3212_v31  ;;  %v4076_v53 = vsub.f32 0.0, %v3212_v31  ;;  %vm7830_vm13 = vcmp.eq.s32.totalorder %v1754_v10, 0  ;;  %v7857_v10 = vld [vmem:[#allocation2 + $0x97] sm:$0xff] }
 0x2f3   : > { %4885 = vmatmul.msk.f32.gmra.mxu3 %vm446_vm0, %v7728_v20  ;;  %9554 = vst [vmem:[#allocation19_spill] sm:$0xff] %v7857_v10 }
 0x2f4   : > { %v3276_v52 = vadd.f32 1.0, %v3244_v61  ;;  %v7791_v61 = vld [vmem:[#allocation2 + $0x89] sm:$0xff]  ;;  %v4108_v51 = vmul.f32 %v4076_v53, %v3212_v31  ;;  %v2753_v31 = vmul.f32 %v6057_v29, %v2720_v49  ;;  %v2884_v53 = vmul.f32 %v6106_v35, %v7801_v43 }
 0x2f5   : > { %v3017_v18 = vmul.f32 %v7724_v63, %v7791_v61  ;;  %v2329_v49 = vadd.f32 %v2297_v50, %v2232_v13  ;;  %v5258_v13 = vld [vmem:[%s5506_s19 + $0x28] sm:$0xff] }
 0x2f6   : > { %5135 = vrcp.f32 %v3276_v52  ;;  %v3471_v27 = vand.u32 2147483647, %v3276_v52  ;;  %v2785_v26 = vadd.f32 %v2753_v31, %v2686_v5  ;;  %v2200_v5 = vsel %vm7830_vm13, 0.0, %v7761_v42 }
 0x2f8   : > { %vm3472_vm10 = vcmp.eq.f32.partialorder %v3471_v27, 8.507059e+37  ;;  %v2620_v27 = vmul.f32 %v6047_v41, %v2587_v23 }
 0x2fb   : > { %4886 = vmatmul.msk.f32.gmra.mxu3 %vm446_vm0, %v7749_v56 }
 0x2fc   : > { %v4586_v30 = vpop.f32.mrf.mxu2  ;;  %v5136_v55 = vpop.eup %5135 }
 0x2fd   : > { %v4587_v21 = vadd.f32 %v7234_v40, %v4586_v30  ;;  %v2850_v40 = vsel %vm7460_vm9, 0.0, %v7761_v42  ;;  %v3463_v0 = vmul.f32 %v5136_v55, %v3276_v52  ;;  %v1747_v30 = vand.u32 15, %v1621_v6 }
 0x2fe   : > { %v2883_v7 = vmul.f32 %v6106_v35, %v2850_v40  ;;  %vm3468_vm14 = vweird.f32 %v5136_v55  ;;  %vm3467_vm9 = vweird.f32 %v3276_v52  ;;  %v2298_v42 = vmul.f32 %v5905_v1, %v7765_v22 }
 0x2ff   : > { %v4710_v14 = vadd.f32 %v4678_v48, %v4587_v21  ;;  %v3464_v36 = vsub.f32 1.0, %v3463_v0  ;;  %v3473_v48 = vand.u32 2147483648, %v3276_v52  ;;  %vm3469_vm6 = vmor %vm3467_vm9, %vm3468_vm14  ;;  %vm7808_vm11 = vcmp.eq.s32.totalorder %v1747_v30, 15 }
 0x300   : > { %v7840_v30 = vmul.f32 0.5, %v7743_v45  ;;  %v2722_v16 = vsel %vm7808_vm11, 0.0, %v7834_v60 }
 0x301   : > { %4742 = vst.msk [vmem:[%s7270_s28 + $0x20] sm:$0xff] %vm446_vm0, %v4710_v14  ;;  %v3465_v21 = vmul.f32 %v5136_v55, %v3464_v36  ;;  %v2950_v14 = vadd.f32 %v2918_v8, %v2883_v7  ;;  %v3474_v6 = vor.u32 1.1754944e-38, %v3473_v48  ;;  %v4151_v8 = vmul.f32 1.442695, %v4108_v51 }
 0x302   : > { %v2655_v48 = vmul.f32 %v5934_v57, %v7765_v22  ;;  %v2852_v22 = vsel %vm7571_vm4, 0.0, %v7857_v10 }
 0x303   : > { %4912 = vmatmul.msk.f32.vlgmr.msrb.gmra.mxu3 %vm446_vm0, %v9548_v34  ;;  %v3466_v19 = vadd.f32 %v5136_v55, %v3465_v21  ;;  %v3049_v40 = vadd.f32 %v3017_v18, %v2950_v14  ;;  %v9549_v34 = vld [vmem:[#allocation8_spill] sm:$0xff]  ;;  %v2985_v14 = vsel %vm7475_vm15, 0.0, %v7834_v60  ;;  %v2951_v18 = vadd.f32 %v2919_v15, %v2884_v53  ;;  %v7871_v53 = vld [vmem:[#allocation2 + $0x98] sm:$0xff] }
 0x304   : > { %v3018_v51 = vmul.f32 %v7724_v63, %v2985_v14  ;;  %5137 = vpow2.f32 %v4151_v8  ;;  %v2687_v31 = vadd.f32 %v2655_v48, %v2620_v27  ;;  %v2233_v8 = vmul.f32 %v5900_v11, %v2200_v5  ;;  %9555 = vst [vmem:[#allocation21_spill] sm:$0xff] %v7871_v53 }
 0x305   : > { %v3470_v52 = vsel %vm3469_vm6, %v5136_v55, %v3466_v19  ;;  %v3081_v0 = vadd.f32 %v3049_v40, %v2816_v58  ;;  %v2457_v55 = vsel %vm7808_vm11, 0.0, %v7715_v39  ;;  %v4679_v19 = vmul.f32 %v5258_v13, %v7396_v24 }
 0x306   : > { %v7817_v7 = vsel %vm3472_vm10, %v3474_v6, %v3470_v52  ;;  %v2490_v58 = vmul.f32 %v5939_v4, %v2457_v55  ;;  %v3050_v6 = vadd.f32 %v3018_v51, %v2951_v18  ;;  %v7867_v52 = vld [vmem:[%s9397_s10] ss:$0 sm:$0xff]  ;;  %v2621_v27 = vmul.f32 %v6047_v41, %v7801_v43 }
 0x307   : > { %v3788_v37 = vmul.f32 1.0614054, %v7817_v7  ;;  %v7825_v25 = vadd.f32 %v7740_v54, %v3081_v0  ;;  %v2885_v51 = vmul.f32 %v6106_v35, %v2852_v22  ;;  %v2330_v13 = vadd.f32 %v2298_v42, %v2233_v8 }
 0x308   : > { %v7878_v15 = vadd.f32 %v2490_v58, %v2329_v49  ;;  %v2491_v49 = vmul.f32 %v5939_v4, %v7791_v61  ;;  %v2920_v58 = vmul.f32 %v6087_v62, %v7871_v53  ;;  %vm4268_vm15 = vcmp.lt.f32.partialorder %v7746_v2, 0.0 }
 0x309   : > { %v3820_v21 = vadd.f32 -1.4531521, %v3788_v37  ;;  %v7843_v39 = vmul.f32 0.70710677, %v7825_v25 }
 0x30a   : > { %v5138_v14 = vpop.eup %5137 }
 0x30b   : > { %4913 = vmatmul.msk.f32.gmra.mxu3 %vm446_vm0, %v9549_v34  ;;  %v3852_v45 = vmul.f32 %v3820_v21, %v7817_v7  ;;  %v3213_v40 = vand.u32 2147483647, %v7843_v39  ;;  %v2817_v34 = vadd.f32 %v2785_v26, %v7522_v12  ;;  %v2754_v12 = vmul.f32 %v6057_v29, %v7791_v61 }
 0x30c   : > { %v2656_v21 = vmul.f32 %v5934_v57, %v7803_v38  ;;  %vm4269_vm6 = vcmp.lt.f32.partialorder %v7843_v39, 0.0 }
 0x30d   : > { %v3884_v50 = vadd.f32 1.4214138, %v3852_v45  ;;  %v3245_v23 = vmul.f32 0.3275911, %v3213_v40  ;;  %v2786_v45 = vadd.f32 %v2754_v12, %v2687_v31 }
 0x30e   : > { %v2688_v42 = vadd.f32 %v2656_v21, %v2621_v27 }
 0x30f   : > { %v3916_v37 = vmul.f32 %v3884_v50, %v7817_v7  ;;  %v7881_v26 = vadd.f32 1.0, %v3245_v23  ;;  %v7913_v50 = vmul.f32 %v5900_v11, %v7801_v43  ;;  %v7924_v23 = vmul.f32 %v5905_v1, %v7803_v38 }
 0x310   : > { %v2589_v43 = vsel %vm7830_vm13, 0.0, %v7857_v10 }
 0x311   : > { %v3948_v18 = vadd.f32 -0.28449672, %v3916_v37  ;;  %5139 = vrcp.f32 %v7881_v26  ;;  %v2818_v37 = vadd.f32 %v2786_v45, %v7612_v28  ;;  %v2622_v28 = vmul.f32 %v6047_v41, %v2589_v43 }
 0x312   : > { %vm3482_vm4 = vweird.f32 %v7881_v26 }
 0x313   : > { %4914 = vmatmul.msk.f32.gmra.mxu3 %vm446_vm0, %v7568_v46  ;;  %v3082_v46 = vadd.f32 %v3050_v6, %v2817_v34  ;;  %v3980_v61 = vmul.f32 %v3948_v18, %v7817_v7  ;;  %v7908_v34 = vld [vmem:[#allocation2 + $0x99] sm:$0xff]  ;;  %v2755_v6 = vmul.f32 %v6057_v29, %v2722_v16 }
 0x314   : > { %9556 = vst [vmem:[#allocation22_spill] sm:$0xff] %v7908_v34  ;;  %v3019_v12 = vmul.f32 %v7724_v63, %v7908_v34  ;;  %v2756_v43 = vmul.f32 %v6057_v29, %v7908_v34  ;;  %v7982_v34 = vld [vmem:[#allocation2 + $0xa8] sm:$0xff] }
 0x315   : > { %v4589_v9 = vpop.f32.mrf.mxu2  ;;  %v7886_v48 = vadd.f32 %v7740_v54, %v3082_v46  ;;  %v4012_v8 = vadd.f32 0.2548296, %v3980_v61  ;;  %v2952_v46 = vadd.f32 %v2920_v58, %v2885_v51  ;;  %v2787_v18 = vadd.f32 %v2755_v6, %v2688_v42  ;;  %v7955_v6 = vld [vmem:[#allocation2 + $0xa1] sm:$0xff] }
 0x316   : > { %v4590_v0 = vadd.f32 %v7867_v52, %v4589_v9  ;;  %v4077_v9 = vsub.f32 0.0, %v3213_v40  ;;  %v3488_v61 = vand.u32 2147483648, %v7881_v26 }
 0x317   : > { %v7902_v5 = vmul.f32 0.70710677, %v7886_v48  ;;  %v4044_v27 = vmul.f32 %v4012_v8, %v7817_v7  ;;  %v3051_v16 = vadd.f32 %v3019_v12, %v2952_v46  ;;  %v7964_v12 = vld [vmem:[#allocation2 + $0xa7] sm:$0xff] }
 0x318   : > { %v4711_v55 = vadd.f32 %v4679_v19, %v4590_v0  ;;  %v7905_v19 = vadd.s32 136, %v5872_v44  ;;  %v7920_v0 = vadd.f32 %v2491_v49, %v2330_v13  ;;  %v7939_v21 = vmul.f32 %v4077_v9, %v3213_v40  ;;  %v7941_v49 = vld [vmem:[#allocation2 + $0x9f] sm:$0xff] }
 0x319   : > { %v7918_v31 = vand.u32 2147483647, %v7902_v5  ;;  %v7947_v13 = vld [vmem:[#allocation2 + $0xa0] sm:$0xff]  ;;  %v4204_v45 = vmul.f32 %v5138_v14, %v4044_v27  ;;  %v3083_v7 = vadd.f32 %v3051_v16, %v2818_v37  ;;  %v2657_v40 = vmul.f32 %v5934_v57, %v7871_v53  ;;  %v8009_v37 = vld [vmem:[#allocation2 + $0xa9] sm:$0xff] }
 0x31a   : > { %4743 = vst.msk [vmem:[%s7270_s28 + $0x28] sm:$0xff] %vm446_vm0, %v4711_v55  ;;  %v5140_v55 = vpop.eup %5139  ;;  %v2886_v42 = vmul.f32 %v6106_v35, %v7941_v49  ;;  %v2921_v14 = vmul.f32 %v6087_v62, %v7947_v13  ;;  %v2987_v27 = vsel %vm7808_vm11, 0.0, %v7955_v6 }
 0x31b   : > { %4915 = vmatmul.msk.f32.gmra.mxu3 %vm446_vm0, %v7684_v47  ;;  %v7933_v47 = vmul.f32 0.5, %v7825_v25  ;;  %v3246_v22 = vmul.f32 0.3275911, %v7918_v31  ;;  %v3478_v51 = vmul.f32 %v5140_v55, %v7881_v26  ;;  %v3486_v25 = vand.u32 2147483647, %v7881_v26 }
 0x31c   : > { %v4236_v8 = vsub.f32 1.0, %v4204_v45  ;;  %v7960_v46 = vadd.f32 %v7740_v54, %v3083_v7  ;;  %vm3483_vm5 = vweird.f32 %v5140_v55  ;;  %v2819_v45 = vadd.f32 %v2787_v18, %v7878_v15 }
 0x31d   : > { %v7945_v58 = vadd.f32 1.0, %v3246_v22  ;;  %v3479_v9 = vsub.f32 1.0, %v3478_v51  ;;  %vm7968_vm1 = vcmp.eq.f32.partialorder %v3486_v25, 8.507059e+37  ;;  %v3489_v51 = vor.u32 1.1754944e-38, %v3488_v61  ;;  %vm3484_vm7 = vmor %vm3482_vm4, %vm3483_vm5  ;;  %v4592_v2 = vpop.f32.mrf.mxu2 }
 0x31e   : > { %v4300_v16 = vsub.f32 0.0, %v4236_v8  ;;  %v2689_v7 = vadd.f32 %v2657_v40, %v2622_v28  ;;  %v7980_v25 = vmul.f32 0.70710677, %v7960_v46  ;;  %v2953_v15 = vadd.f32 %v2921_v14, %v2886_v42 }
 0x31f   : > { %5141 = vrcp.f32 %v7945_v58  ;;  %v3480_v22 = vmul.f32 %v5140_v55, %v3479_v9  ;;  %v4078_v9 = vsub.f32 0.0, %v7918_v31  ;;  %v3020_v18 = vmul.f32 %v7724_v63, %v2987_v27 }
 0x320   : > { %v4332_v33 = vsel %vm4268_vm15, %v4300_v16, %v4236_v8  ;;  %v2788_v28 = vadd.f32 %v2756_v43, %v2689_v7  ;;  %v7993_v53 = vand.u32 2147483647, %v7980_v25  ;;  %v5260_v8 = vld [vmem:[%s5506_s19 + $0x30] sm:$0xff]  ;;  %v2922_v14 = vmul.f32 %v6087_v62, %v7982_v34 }
 0x321   : > { %v3481_v38 = vadd.f32 %v5140_v55, %v3480_v22  ;;  %v4364_v40 = vadd.f32 1.0, %v4332_v33  ;;  %v4680_v26 = vmul.f32 %v5260_v8, %v7396_v24  ;;  %v4593_v43 = vadd.f32 %v7867_v52, %v4592_v2 }
 0x322   : > { %v3247_v27 = vmul.f32 0.3275911, %v7993_v53  ;;  %v3503_v24 = vand.u32 2147483648, %v7945_v58  ;;  %v3052_v7 = vadd.f32 %v3020_v18, %v2953_v15  ;;  %v3021_v8 = vmul.f32 %v7724_v63, %v8009_v37 }
 0x323   : > { %4916 = vmatmul.msk.f32.gmra.mxu3 %vm446_vm0, %v7700_v32  ;;  %v2854_v32 = vsel %vm7830_vm13, 0.0, %v7964_v12  ;;  %v3485_v22 = vsel %vm3484_vm7, %v5140_v55, %v3481_v38  ;;  %v4396_v38 = vmul.f32 %v4364_v40, %v7840_v30  ;;  %v4153_v15 = vmul.f32 1.442695, %v7939_v21 }
 0x324   : > { %v2887_v10 = vmul.f32 %v6106_v35, %v2854_v32  ;;  %v7998_v36 = vsel %vm7968_vm1, %v3489_v51, %v3485_v22  ;;  %v3501_v51 = vand.u32 2147483647, %v7945_v58  ;;  %v4712_v22 = vadd.f32 %v4680_v26, %v4593_v43 }
 0x325   : > { %v5142_v61 = vpop.eup %5141  ;;  %v3789_v55 = vmul.f32 1.0614054, %v7998_v36  ;;  %v4428_v32 = vmul.f32 %v4396_v38, %v7772_v59  ;;  %v8014_v30 = vadd.f32 1.0, %v3247_v27  ;;  %v3084_v2 = vadd.f32 %v3052_v7, %v2819_v45  ;;  %v5261_v7 = vld [vmem:[%s5506_s19 + $0x38] sm:$0xff] }
 0x326   : > { %v3493_v42 = vmul.f32 %v5142_v61, %v7945_v58  ;;  %vm3498_vm2 = vweird.f32 %v5142_v61  ;;  %4744 = vst.msk [vmem:[%s7270_s28 + $0x30] sm:$0xff] %vm446_vm0, %v4712_v22  ;;  %v2954_v59 = vadd.f32 %v2922_v14, %v2887_v10  ;;  %v8027_v18 = vmul.f32 0.5, %v7886_v48 }
 0x327   : > { %v3821_v33 = vadd.f32 -1.4531521, %v3789_v55  ;;  %4930 = vmatmul.msk.f32.gmra.mxu2 %vm1566_vm8, %v4428_v32  ;;  %5143 = vrcp.f32 %v8014_v30  ;;  %vm3497_vm3 = vweird.f32 %v7945_v58  ;;  %v8031_v45 = vadd.f32 %v7740_v54, %v3084_v2 }
 0x328   : > { %v3494_v16 = vsub.f32 1.0, %v3493_v42  ;;  %vm3499_vm12 = vmor %vm3497_vm3, %vm3498_vm2  ;;  %v3504_v38 = vor.u32 1.1754944e-38, %v3503_v24  ;;  %v4110_v21 = vmul.f32 %v4078_v9, %v7918_v31  ;;  %v3053_v55 = vadd.f32 %v3021_v8, %v2954_v59  ;;  %v8048_v31 = vld [vmem:[%s9398_s11] ss:$0 sm:$0xff] }
 0x329   : > { %v3853_v42 = vmul.f32 %v3821_v33, %v7998_v36  ;;  %vm3502_vm14 = vcmp.eq.f32.partialorder %v3501_v51, 8.507059e+37  ;;  %v2820_v10 = vadd.f32 %v2788_v28, %v7920_v0  ;;  %v9559_v48 = vand.u32 15, %v7905_v19 }
 0x32a   : > { %v3495_v40 = vmul.f32 %v5142_v61, %v3494_v16  ;;  %v4595_v16 = vpop.f32.mrf.mxu2  ;;  %v4681_v9 = vmul.f32 %v8048_v31, %v5261_v7  ;;  %v8052_v0 = vmul.f32 0.70710677, %v8031_v45  ;;  %v4155_v33 = vmul.f32 1.442695, %v4110_v21 }
 0x32b   : > { %4917 = vmatmul.msk.f32.gmra.mxu3 %vm446_vm0, %v7728_v20  ;;  %v3885_v26 = vadd.f32 1.4214138, %v3853_v42  ;;  %vm8037_vm9 = vcmp.eq.s32.totalorder %v9559_v48, 15  ;;  %v4596_v28 = vadd.f32 %v7867_v52, %v4595_v16  ;;  %v3085_v51 = vadd.f32 %v3053_v55, %v2820_v10 }
 0x32c   : > { %v3496_v20 = vadd.f32 %v5142_v61, %v3495_v40  ;;  %v8058_v22 = vand.u32 2147483647, %v8052_v0  ;;  %v2331_v40 = vadd.f32 %v7924_v23, %v7913_v50  ;;  %5145 = vpow2.f32 %v4153_v15 }
 0x32d   : > { %v3917_v58 = vmul.f32 %v3885_v26, %v7998_v36  ;;  %v5144_v24 = vpop.eup %5143  ;;  %v4713_v8 = vadd.f32 %v4681_v9, %v4596_v28  ;;  %v8068_v26 = vadd.f32 %v7740_v54, %v3085_v51  ;;  %v3516_v23 = vand.u32 2147483647, %v8014_v30 }
 0x32e   : > { %v3500_v43 = vsel %vm3499_vm12, %v5142_v61, %v3496_v20  ;;  %v4079_v61 = vsub.f32 0.0, %v7993_v53  ;;  %v3508_v42 = vmul.f32 %v5144_v24, %v8014_v30  ;;  %v3248_v20 = vmul.f32 0.3275911, %v8058_v22 }
 0x32f   : > { %v8042_v27 = vsel %vm3502_vm14, %v3504_v38, %v3500_v43  ;;  %v3949_v32 = vadd.f32 -0.28449672, %v3917_v58  ;;  %v2459_v38 = vsel %vm8037_vm9, 0.0, %v7834_v60  ;;  %4745 = vst.msk [vmem:[%s7270_s28 + $0x38] sm:$0xff] %vm446_vm0, %v4713_v8  ;;  %5147 = vpow2.f32 %v4155_v33 }
 0x330   : > { %v3790_v19 = vmul.f32 1.0614054, %v8042_v27  ;;  %v3509_v50 = vsub.f32 1.0, %v3508_v42  ;;  %v4111_v15 = vmul.f32 %v4079_v61, %v7993_v53  ;;  %v3518_v55 = vand.u32 2147483648, %v8014_v30 }
 0x331   : > { %v3981_v59 = vmul.f32 %v3949_v32, %v7998_v36  ;;  %v8079_v43 = vadd.f32 1.0, %v3248_v20  ;;  %vm3513_vm11 = vweird.f32 %v5144_v24  ;;  %v8083_v60 = vmul.f32 0.70710677, %v8068_v26 }
 0x332   : > { %v3822_v2 = vadd.f32 -1.4531521, %v3790_v19  ;;  %v3510_v48 = vmul.f32 %v5144_v24, %v3509_v50  ;;  %vm3512_vm10 = vweird.f32 %v8014_v30  ;;  %v2492_v53 = vmul.f32 %v5939_v4, %v2459_v38  ;;  %v5146_v16 = vpop.eup %5145  ;;  %v5263_v38 = vld [vmem:[%s5506_s19 + $0x40] sm:$0xff] }
 0x333   : > { %4918 = vmatmul.msk.f32.gmra.mxu3 %vm446_vm0, %v7749_v56  ;;  %v4013_v21 = vadd.f32 0.2548296, %v3981_v59  ;;  %5149 = vrcp.f32 %v8079_v43  ;;  %vm3517_vm13 = vcmp.eq.f32.partialorder %v3516_v23, 8.507059e+37  ;;  %v4157_v19 = vmul.f32 1.442695, %v4111_v15  ;;  %vm3514_vm15 = vmor %vm3512_vm10, %vm3513_vm11 }
 0x334   : > { %v3854_v56 = vmul.f32 %v3822_v2, %v8042_v27  ;;  %v3511_v9 = vadd.f32 %v5144_v24, %v3510_v48  ;;  %v3519_v61 = vor.u32 1.1754944e-38, %v3518_v55  ;;  %v8091_v51 = vand.u32 2147483647, %v8083_v60 }
 0x335   : > { %v4045_v58 = vmul.f32 %v4013_v21, %v7998_v36  ;;  %v2623_v36 = vmul.f32 %v6047_v41, %v7941_v49  ;;  %v2658_v33 = vmul.f32 %v5934_v57, %v7947_v13  ;;  %v2724_v2 = vsel %vm8037_vm9, 0.0, %v7955_v6  ;;  %v5148_v8 = vpop.eup %5147  ;;  %v4598_v20 = vpop.f32.mrf.mxu2 }
 0x336   : > { %v3886_v10 = vadd.f32 1.4214138, %v3854_v56  ;;  %v3515_v32 = vsel %vm3514_vm15, %v5144_v24, %v3511_v9  ;;  %v4682_v56 = vmul.f32 %v5263_v38, %v8048_v31  ;;  %v3249_v50 = vmul.f32 0.3275911, %v8091_v51  ;;  %v8123_v38 = vld [vmem:[#allocation2 + $0xb0] sm:$0xff] }
 0x337   : > { %v4205_v28 = vmul.f32 %v5146_v16, %v4045_v58  ;;  %v8100_v59 = vsel %vm3517_vm13, %v3519_v61, %v3515_v32  ;;  %v4599_v15 = vadd.f32 %v7867_v52, %v4598_v20  ;;  %v2524_v21 = vadd.f32 %v2492_v53, %v2331_v40  ;;  %v8121_v20 = vld [vmem:[#allocation2 + $0xaf] sm:$0xff] }
 0x338   : > { %v3918_v7 = vmul.f32 %v3886_v10, %v8042_v27  ;;  %v3791_v24 = vmul.f32 1.0614054, %v8100_v59  ;;  %5151 = vpow2.f32 %v4157_v19  ;;  %v8108_v48 = vadd.f32 1.0, %v3249_v50 }
 0x339   : > { %v4237_v42 = vsub.f32 1.0, %v4205_v28  ;;  %v5150_v55 = vpop.eup %5149  ;;  %v2757_v58 = vmul.f32 %v6057_v29, %v2724_v2  ;;  %v4714_v9 = vadd.f32 %v4682_v56, %v4599_v15  ;;  %vm4270_vm4 = vcmp.lt.f32.partialorder %v7902_v5, 0.0 }
 0x33a   : > { %v3950_v30 = vadd.f32 -0.28449672, %v3918_v7  ;;  %v3823_v7 = vadd.f32 -1.4531521, %v3791_v24  ;;  %v3523_v28 = vmul.f32 %v5150_v55, %v8079_v43  ;;  %v4080_v40 = vsub.f32 0.0, %v8058_v22 }
 0x33b   : > { %v4301_v10 = vsub.f32 0.0, %v4237_v42  ;;  %5153 = vrcp.f32 %v8108_v48  ;;  %v2690_v53 = vadd.f32 %v2658_v33, %v2623_v36  ;;  %4746 = vst.msk [vmem:[%s7270_s28 + $0x40] sm:$0xff] %vm446_vm0, %v4714_v9  ;;  %vm3528_vm5 = vweird.f32 %v5150_v55 }
 0x33c   : > { %v3982_v23 = vmul.f32 %v3950_v30, %v8042_v27  ;;  %v3855_v32 = vmul.f32 %v3823_v7, %v8100_v59  ;;  %v3524_v2 = vsub.f32 1.0, %v3523_v28  ;;  %v3531_v39 = vand.u32 2147483647, %v8079_v43 }
 0x33d   : > { %v4333_v61 = vsel %vm4269_vm6, %v4301_v10, %v4237_v42  ;;  %v3533_v42 = vand.u32 2147483648, %v8079_v43  ;;  %v2789_v56 = vadd.f32 %v2757_v58, %v2690_v53  ;;  %vm3527_vm1 = vweird.f32 %v8079_v43 }
 0x33e   : > { %v4014_v16 = vadd.f32 0.2548296, %v3982_v23  ;;  %v4365_v19 = vadd.f32 1.0, %v4333_v61  ;;  %v3887_v50 = vadd.f32 1.4214138, %v3855_v32  ;;  %v8128_v23 = vld [vmem:[#allocation2 + $0xb1] sm:$0xff]  ;;  %v5152_v24 = vpop.eup %5151  ;;  %v4112_v15 = vmul.f32 %v4080_v40, %v8058_v22  ;;  %vm3529_vm7 = vmor %vm3527_vm1, %vm3528_vm5 }
 0x33f   : > { %v2888_v10 = vmul.f32 %v6106_v35, %v8121_v20  ;;  %vm3532_vm2 = vcmp.eq.f32.partialorder %v3531_v39, 8.507059e+37  ;;  %v3534_v43 = vor.u32 1.1754944e-38, %v3533_v42  ;;  %v2821_v28 = vadd.f32 %v2789_v56, %v2524_v21  ;;  %v5264_v32 = vld [vmem:[%s5506_s19 + $0x48] sm:$0xff] }
 0x340   : > { %v4046_v30 = vmul.f32 %v4014_v16, %v8042_v27  ;;  %v4397_v36 = vmul.f32 %v4365_v19, %v7933_v47  ;;  %v3525_v27 = vmul.f32 %v5150_v55, %v3524_v2  ;;  %v2923_v16 = vmul.f32 %v6087_v62, %v8123_v38 }
 0x341   : > { %v3919_v47 = vmul.f32 %v3887_v50, %v8100_v59  ;;  %v5154_v9 = vpop.eup %5153  ;;  %v2989_v22 = vsel %vm8037_vm9, 0.0, %v8128_v23  ;;  %v4683_v2 = vmul.f32 %v5264_v32, %v8048_v31  ;;  %v3546_v50 = vand.u32 2147483647, %v8108_v48 }
 0x342   : > { %v4206_v33 = vmul.f32 %v5148_v8, %v4046_v30  ;;  %v4429_v58 = vmul.f32 %v4397_v36, %v7781_v3  ;;  %v3526_v8 = vadd.f32 %v5150_v55, %v3525_v27  ;;  %v3538_v53 = vmul.f32 %v5154_v9, %v8108_v48 }
 0x343   : > { %v3951_v40 = vadd.f32 -0.28449672, %v3919_v47  ;;  %v2955_v39 = vadd.f32 %v2923_v16, %v2888_v10  ;;  %v3022_v21 = vmul.f32 %v7724_v63, %v2989_v22  ;;  %v3548_v63 = vand.u32 2147483648, %v8108_v48 }
 0x344   : > { %v4238_v7 = vsub.f32 1.0, %v4206_v33  ;;  %4931 = vmatmul.msk.f32.gmra.mxu2 %vm1566_vm8, %v4429_v58  ;;  %v3530_v3 = vsel %vm3529_vm7, %v5150_v55, %v3526_v8  ;;  %v3539_v33 = vsub.f32 1.0, %v3538_v53  ;;  %vm3543_vm3 = vweird.f32 %v5154_v9 }
 0x345   : > { %v8144_v19 = vsel %vm3532_vm2, %v3534_v43, %v3530_v3  ;;  %v3983_v42 = vmul.f32 %v3951_v40, %v8100_v59  ;;  %v3054_v27 = vadd.f32 %v3022_v21, %v2955_v39  ;;  %vm3542_vm12 = vweird.f32 %v8108_v48  ;;  %v1512_v39 = vpop.f32.mrf.mxu1 }
 0x346   : > { %v4302_v61 = vsub.f32 0.0, %v4238_v7  ;;  %v3792_v56 = vmul.f32 1.0614054, %v8144_v19  ;;  %v3540_v16 = vmul.f32 %v5154_v9, %v3539_v33  ;;  %vm3544_vm14 = vmor %vm3542_vm12, %vm3543_vm3  ;;  %vm3547_vm9 = vcmp.eq.f32.partialorder %v3546_v50, 8.507059e+37 }
 0x347   : > { %v4015_v58 = vadd.f32 0.2548296, %v3983_v42  ;;  %v4081_v48 = vsub.f32 0.0, %v8091_v51  ;;  %vm4271_vm6 = vcmp.lt.f32.partialorder %v7980_v25, 0.0  ;;  %vm4272_vm11 = vcmp.lt.f32.partialorder %v8052_v0, 0.0 }
 0x348   : > { %v4334_v14 = vsel %vm4270_vm4, %v4302_v61, %v4238_v7  ;;  %v3824_v47 = vadd.f32 -1.4531521, %v3792_v56  ;;  %v3086_v7 = vadd.f32 %v3054_v27, %v2821_v28  ;;  %v3541_v61 = vadd.f32 %v5154_v9, %v3540_v16 }
 0x349   : > { %v4366_v36 = vadd.f32 1.0, %v4334_v14  ;;  %v4047_v8 = vmul.f32 %v4015_v58, %v8100_v59  ;;  %v4159_v28 = vmul.f32 1.442695, %v4112_v15  ;;  %vm4273_vm5 = vcmp.lt.f32.partialorder %v8083_v60, 0.0 }
 0x34a   : > { %v3856_v43 = vmul.f32 %v3824_v47, %v8144_v19  ;;  %v8164_v40 = vadd.f32 %v7740_v54, %v3086_v7  ;;  %v3545_v59 = vsel %vm3544_vm14, %v5154_v9, %v3541_v61  ;;  %v8183_v47 = vld [vmem:[%s9393_s6] ss:$0 sm:$0xff] }
 0x34b   : > { %v4601_v30 = vpop.f32.mrf.mxu2  ;;  %v4398_v5 = vmul.f32 %v4366_v36, %v8027_v18  ;;  %v4207_v3 = vmul.f32 %v5152_v24, %v4047_v8  ;;  %v3549_v18 = vor.u32 1.1754944e-38, %v3548_v63  ;;  %5155 = vpow2.f32 %v4159_v28  ;;  %v5266_v28 = vld [vmem:[%s5506_s19 + $0x50] sm:$0xff] }
 0x34c   : > { %v4602_v55 = vadd.f32 %v7867_v52, %v4601_v30  ;;  %v3888_v53 = vadd.f32 1.4214138, %v3856_v43  ;;  %v8168_v30 = vmul.f32 0.70710677, %v8164_v40  ;;  %v3151_v36 = vmul.f32 0.5, %v7960_v46 }
 0x34d   : > { %v4430_v22 = vmul.f32 %v4398_v5, %v7788_v17  ;;  %v4239_v32 = vsub.f32 1.0, %v4207_v3  ;;  %v1513_v25 = vadd.f32 %v8183_v47, %v1512_v39 }
 0x34e   : > { %v4715_v10 = vadd.f32 %v4683_v2, %v4602_v55  ;;  %v3920_v17 = vmul.f32 %v3888_v53, %v8144_v19  ;;  %v3550_v2 = vsel %vm3547_vm9, %v3549_v18, %v3545_v59  ;;  %v8173_v24 = vand.u32 2147483647, %v8168_v30 }
 0x34f   : > { %4932 = vmatmul.msk.f32.gmra.mxu2 %vm1566_vm8, %v4430_v22  ;;  %v3793_v54 = vmul.f32 1.0614054, %v3550_v2  ;;  %v4303_v21 = vsub.f32 0.0, %v4239_v32  ;;  %v4113_v55 = vmul.f32 %v4081_v48, %v8091_v51  ;;  %v1515_v22 = vpop.f32.mrf.mxu1  ;;  %v4684_v59 = vmul.f32 %v5266_v28, %v8048_v31 }
 0x350   : > { %4747 = vst.msk [vmem:[%s7270_s28 + $0x48] sm:$0xff] %vm446_vm0, %v4715_v10  ;;  %v3952_v14 = vadd.f32 -0.28449672, %v3920_v17  ;;  %v3250_v9 = vmul.f32 0.3275911, %v8173_v24  ;;  %vm4274_vm3 = vcmp.lt.f32.partialorder %v8168_v30, 0.0 }
 0x351   : > { %v3825_v15 = vadd.f32 -1.4531521, %v3793_v54  ;;  %v4335_v42 = vsel %vm4271_vm6, %v4303_v21, %v4239_v32  ;;  %v4161_v51 = vmul.f32 1.442695, %v4113_v55  ;;  %v5156_v16 = vpop.eup %5155  ;;  %v3152_v21 = vmul.f32 0.5, %v8031_v45 }
 0x352   : > { %v3984_v56 = vmul.f32 %v3952_v14, %v8144_v19  ;;  %v4367_v33 = vadd.f32 1.0, %v4335_v42  ;;  %v3282_v27 = vadd.f32 1.0, %v3250_v9 }
 0x353   : > { %v3857_v50 = vmul.f32 %v3825_v15, %v3550_v2 }
 0x354   : > { %v4016_v58 = vadd.f32 0.2548296, %v3984_v56  ;;  %v4399_v10 = vmul.f32 %v4367_v33, %v3151_v36  ;;  %5157 = vrcp.f32 %v3282_v27  ;;  %v3563_v9 = vand.u32 2147483648, %v3282_v27 }
 0x355   : > { %v3889_v63 = vadd.f32 1.4214138, %v3857_v50  ;;  %5159 = vpow2.f32 %v4161_v51  ;;  %v3561_v31 = vand.u32 2147483647, %v3282_v27  ;;  %v1516_v36 = vadd.f32 %v8183_v47, %v1515_v22 }
 0x356   : > { %v4048_v5 = vmul.f32 %v4016_v58, %v8144_v19  ;;  %v4431_v46 = vmul.f32 %v4399_v10, %v1513_v25  ;;  %vm3557_vm13 = vweird.f32 %v3282_v27  ;;  %v2625_v25 = vmul.f32 %v6047_v41, %v8121_v20 }
 0x357   : > { %v3921_v7 = vmul.f32 %v3889_v63, %v3550_v2  ;;  %v1518_v10 = vpop.f32.mrf.mxu1  ;;  %vm3562_vm4 = vcmp.eq.f32.partialorder %v3561_v31, 8.507059e+37 }
 0x358   : > { %v4208_v8 = vmul.f32 %v5156_v16, %v4048_v5  ;;  %4933 = vmatmul.msk.f32.gmra.mxu2 %vm1566_vm8, %v4431_v46  ;;  %v4082_v46 = vsub.f32 0.0, %v8173_v24 }
 0x359   : > { %v3953_v43 = vadd.f32 -0.28449672, %v3921_v7  ;;  %v2660_v7 = vmul.f32 %v5934_v57, %v8123_v38 }
 0x35a   : > { %v4240_v61 = vsub.f32 1.0, %v4208_v8  ;;  %v5158_v3 = vpop.eup %5157 }
 0x35b   : > { %v3985_v53 = vmul.f32 %v3953_v43, %v3550_v2  ;;  %v3553_v32 = vmul.f32 %v5158_v3, %v3282_v27  ;;  %v5160_v42 = vpop.eup %5159  ;;  %vm3558_vm10 = vweird.f32 %v5158_v3  ;;  %v1412_v27 = vpop.f32.mrf.mxu0  ;;  %v8207_v43 = vld [vmem:[%s9391_s4] ss:$0 sm:$0xff]  ;;  %v2692_v28 = vadd.f32 %v2660_v7, %v2625_v25 }
 0x35c   : > { %v4304_v18 = vsub.f32 0.0, %v4240_v61  ;;  %vm3559_vm15 = vmor %vm3557_vm13, %vm3558_vm10  ;;  %v1413_v22 = vadd.f32 %v8207_v43, %v1412_v27 }
 0x35d   : > { %v4017_v19 = vadd.f32 0.2548296, %v3985_v53  ;;  %v3554_v39 = vsub.f32 1.0, %v3553_v32 }
 0x35e   : > { %v4336_v48 = vsel %vm4272_vm11, %v4304_v18, %v4240_v61  ;;  %v1430_v61 = vpop.f32.mrf.mxu3  ;;  %1594 = vst.msk [vmem:[#allocation2 + $0xc0] sm:$0xff] %vm1566_vm8, %v1413_v22 }
 0x35f   : > { %v4368_v14 = vadd.f32 1.0, %v4336_v48  ;;  %v4049_v15 = vmul.f32 %v4017_v19, %v3550_v2  ;;  %v3555_v55 = vmul.f32 %v5158_v3, %v3554_v39  ;;  %v3564_v2 = vor.u32 1.1754944e-38, %v3563_v9 }
 0x360   : > { %v1431_v53 = vadd.f32 %v8207_v43, %v1430_v61  ;;  %v1519_v39 = vadd.f32 %v8183_v47, %v1518_v10 }
 0x361   : > { %v4400_v0 = vmul.f32 %v4368_v14, %v3152_v21  ;;  %v4209_v33 = vmul.f32 %v5160_v42, %v4049_v15  ;;  %v3556_v50 = vadd.f32 %v5158_v3, %v3555_v55  ;;  %v8225_v14 = vld [vmem:[#allocation2 + $0xe8] sm:$0xff] }
 0x362   : > { %1600 = vst.msk [vmem:[#allocation2 + $0xf0] sm:$0xff] %vm1566_vm8, %v1431_v53  ;;  %v8227_v15 = vld [vmem:[#allocation2 + $0xe7] sm:$0xff] }
 0x363   : > { %v4432_v58 = vmul.f32 %v4400_v0, %v1516_v36  ;;  %v4241_v45 = vsub.f32 1.0, %v4209_v33  ;;  %v3560_v63 = vsel %vm3559_vm15, %v5158_v3, %v3556_v50  ;;  %v1415_v36 = vpop.f32.mrf.mxu0  ;;  %v9564_v0 = vmov 0  ;;  %v1521_v50 = vpop.f32.mrf.mxu1 }
 0x364   : > { %v4604_v17 = vpop.f32.mrf.mxu2  ;;  %v3565_v16 = vsel %vm3562_vm4, %v3564_v2, %v3560_v63  ;;  %v2310_v33 = vmul.f32 %v5905_v1, %v8225_v14  ;;  %v2238_v2 = vmul.f32 %v5900_v11, %v8121_v20 }
 0x365   : > { %v4605_v54 = vadd.f32 %v7867_v52, %v4604_v17  ;;  %v1625_v52 = vadd.s32 152, %v5872_v44  ;;  %4934 = vmatmul.msk.f32.gmra.mxu2 %vm1566_vm8, %v4432_v58  ;;  %v4305_v51 = vsub.f32 0.0, %v4241_v45  ;;  %v3794_v8 = vmul.f32 1.0614054, %v3565_v16 }
 0x366   : > { %v4114_v17 = vmul.f32 %v4082_v46, %v8173_v24  ;;  %v1627_v24 = vadd.s32 168, %v5872_v44  ;;  %v1416_v58 = vadd.f32 %v8207_v43, %v1415_v36  ;;  %v9568_v46 = vmov 0 }
 0x367   : > { %v4716_v56 = vadd.f32 %v4684_v59, %v4605_v54  ;;  %v1775_v5 = vand.u32 15, %v1625_v52  ;;  %v4337_v3 = vsel %vm4273_vm5, %v4305_v51, %v4241_v45  ;;  %v3153_v59 = vmul.f32 0.5, %v8068_v26 }
 0x368   : > { %v4369_v60 = vadd.f32 1.0, %v4337_v3  ;;  %v3826_v32 = vadd.f32 -1.4531521, %v3794_v8  ;;  %v1634_v54 = vadd.s32 224, %v5872_v44  ;;  %v4163_v31 = vmul.f32 1.442695, %v4114_v17 }
 0x369   : > { %4748 = vst.msk [vmem:[%s7270_s28 + $0x50] sm:$0xff] %vm446_vm0, %v4716_v56  ;;  %vm8211_vm1 = vcmp.eq.s32.totalorder %v1775_v5, 15  ;;  %v1789_v10 = vand.u32 15, %v1627_v24  ;;  %v2303_v5 = vmul.f32 %v5905_v1, %v8123_v38 }
 0x36a   : > { %v2726_v19 = vsel %vm8211_vm1, 0.0, %v8128_v23  ;;  %v4401_v21 = vmul.f32 %v4369_v60, %v3153_v59  ;;  %v3858_v26 = vmul.f32 %v3826_v32, %v3565_v16  ;;  %v1838_v42 = vand.u32 15, %v1634_v54  ;;  %1595 = vst.msk [vmem:[#allocation2 + $0xc8] sm:$0xff] %vm1566_vm8, %v1416_v58 }
 0x36b   : > { %v2759_v48 = vmul.f32 %v6057_v29, %v2726_v19  ;;  %5161 = vpow2.f32 %v4163_v31  ;;  %vm8251_vm2 = vcmp.eq.s32.totalorder %v1789_v10, 15  ;;  %v2335_v7 = vadd.f32 %v2303_v5, %v2238_v2  ;;  %v1418_v61 = vpop.f32.mrf.mxu0  ;;  %v8262_v59 = vpop.f32.mrf.mxu1 }
 0x36c   : > { %v4433_v56 = vmul.f32 %v4401_v21, %v1519_v39  ;;  %v3890_v55 = vadd.f32 1.4214138, %v3858_v26  ;;  %vm8232_vm7 = vcmp.eq.s32.totalorder %v1838_v42, 0  ;;  %v9569_v46 = vsel %vm8251_vm2, 4294967295, %v9568_v46 }
 0x36d   : > { %v8229_v9 = vadd.f32 %v2759_v48, %v2692_v28  ;;  %v9565_v0 = vsel %vm8232_vm7, 4294967295, %v9564_v0  ;;  %v2212_v45 = vsel %vm8232_vm7, 0.0, %v8227_v15  ;;  %9570 = vst [vmem:[#allocation9_spill] sm:$0xff] %v9569_v46  ;;  %v2463_v20 = vsel %vm8251_vm2, 0.0, %v8128_v23 }
 0x36e   : > { %9566 = vst [vmem:[#allocation20_spill] sm:$0xff] %v9565_v0  ;;  %4935 = vmatmul.msk.f32.gmra.mxu2 %vm1566_vm8, %v4433_v56  ;;  %v3922_v52 = vmul.f32 %v3890_v55, %v3565_v16  ;;  %v2245_v25 = vmul.f32 %v5900_v11, %v2212_v45  ;;  %v2496_v22 = vmul.f32 %v5939_v4, %v2463_v20  ;;  %v1630_v19 = vadd.s32 192, %v5872_v44 }
 0x36f   : > { %v1419_v38 = vadd.f32 %v8207_v43, %v1418_v61  ;;  %v3154_v54 = vmul.f32 0.5, %v8164_v40  ;;  %v1522_v26 = vadd.f32 %v8183_v47, %v1521_v50  ;;  %v1631_v5 = vadd.s32 200, %v5872_v44 }
 0x370   : > { %v3954_v63 = vadd.f32 -0.28449672, %v3922_v52  ;;  %v8249_v51 = vadd.f32 %v2310_v33, %v2245_v25  ;;  %v8260_v53 = vadd.f32 %v2496_v22, %v2335_v7  ;;  %v1810_v21 = vand.u32 15, %v1630_v19  ;;  %v8299_v25 = vld [vmem:[#allocation2 + $0xe9] sm:$0xff] }
 0x371   : > { %v5162_v28 = vpop.eup %5161  ;;  %1596 = vst.msk [vmem:[#allocation2 + $0xd0] sm:$0xff] %vm1566_vm8, %v1419_v38  ;;  %v8271_v56 = vld [vmem:[#allocation2 + $0xc7] sm:$0xff]  ;;  %v1624_v22 = vadd.s32 144, %v5872_v44  ;;  %v1628_v61 = vadd.s32 176, %v5872_v44  ;;  %v2758_v46 = vmul.f32 %v6057_v29, %v8009_v37 }
 0x372   : > { %9567 = vst [vmem:[#allocation15_spill] sm:$0xff] %v8249_v51  ;;  %v3986_v27 = vmul.f32 %v3954_v63, %v3565_v16  ;;  %vm8275_vm12 = vcmp.eq.s32.totalorder %v1810_v21, 0  ;;  %v8282_v31 = vld [vmem:[#allocation2 + $0xc8] sm:$0xff] }
 0x373   : > { %9571 = vst [vmem:[#allocation11_spill] sm:$0xff] %v8260_v53  ;;  %v1421_v23 = vpop.f32.mrf.mxu0  ;;  %v8273_v55 = vpop.f32.mrf.mxu1  ;;  %v2208_v40 = vsel %vm8275_vm12, 0.0, %v8271_v56  ;;  %v2862_v33 = vsel %vm8275_vm12, 0.0, %v8227_v15  ;;  %v2306_v45 = vmul.f32 %v5905_v1, %v8282_v31  ;;  %v9591_v53 = vld [vmem:[#allocation22_spill] sm:$0xff] }
 0x374   : > { %v4018_v8 = vadd.f32 0.2548296, %v3986_v27  ;;  %9574 = vst [vmem:[#allocation10_spill] sm:$0xff] %v8282_v31  ;;  %v2241_v52 = vmul.f32 %v5900_v11, %v2208_v40  ;;  %v2895_v20 = vmul.f32 %v6106_v35, %v2862_v33 }
 0x376   : > { %v4050_v3 = vmul.f32 %v4018_v8, %v3565_v16  ;;  %v1422_v16 = vadd.f32 %v8207_v43, %v1421_v23  ;;  %v2930_v8 = vmul.f32 %v6087_v62, %v8225_v14  ;;  %v1632_v23 = vadd.s32 208, %v5872_v44 }
 0x378   : > { %v4210_v60 = vmul.f32 %v5162_v28, %v4050_v3  ;;  %1597 = vst.msk [vmem:[#allocation2 + $0xd8] sm:$0xff] %vm1566_vm8, %v1422_v16  ;;  %v8285_v36 = vld [vmem:[#allocation2 + $0xc9] sm:$0xff]  ;;  %v2338_v3 = vadd.f32 %v2306_v45, %v2241_v52  ;;  %v8329_v16 = vld [vmem:[#allocation2 + $0xb8] sm:$0xff] }
 0x379   : > { %9575 = vst [vmem:[#allocation6_spill] sm:$0xff] %v8285_v36  ;;  %v2499_v27 = vmul.f32 %v5939_v4, %v8285_v36  ;;  %v2304_v52 = vmul.f32 %v5905_v1, %v8329_v16 }
 0x37a   : > { %v4242_v32 = vsub.f32 1.0, %v4210_v60  ;;  %v8320_v60 = vld [vmem:[%s9394_s7 + $0x8] ss:$0 sm:$0xff] }
 0x37b   : > { %v8324_v19 = vpop.f32.mrf.mxu1 }
 0x37c   : > { %v4306_v17 = vsub.f32 0.0, %v4242_v32  ;;  %9576 = vst [vmem:[#allocation13_spill] sm:$0xff] %v8324_v19 }
 0x37e   : > { %v4338_v48 = vsel %vm4274_vm3, %v4306_v17, %v4242_v32  ;;  %v3029_v32 = vmul.f32 %v8320_v60, %v8299_v25  ;;  %v1817_v17 = vand.u32 15, %v1631_v5 }
 0x37f   : > { %v4370_v39 = vadd.f32 1.0, %v4338_v48  ;;  %v8290_v50 = vld [vmem:[#allocation2 + $0xd7] sm:$0xff] }
 0x380   : > { %v8293_v58 = vld [vmem:[#allocation2 + $0xd8] sm:$0xff]  ;;  %v2597_v10 = vsel %vm8275_vm12, 0.0, %v8290_v50  ;;  %vm8340_vm9 = vcmp.eq.s32.totalorder %v1817_v17, 15  ;;  %v8374_v17 = vadd.f32 %v8183_v47, %v8262_v59  ;;  %v2667_v59 = vmul.f32 %v5934_v57, %v8225_v14 }
 0x381   : > { %v4402_v42 = vmul.f32 %v4370_v39, %v3154_v54  ;;  %v8297_v2 = vld [vmem:[#allocation2 + $0xd9] sm:$0xff]  ;;  %v2665_v63 = vmul.f32 %v5934_v57, %v8293_v58  ;;  %v2630_v7 = vmul.f32 %v6047_v41, %v2597_v10  ;;  %v1796_v54 = vand.u32 15, %v1628_v61  ;;  %v8344_v10 = vld [vmem:[#allocation2 + $0xe1] sm:$0xff] }
 0x382   : > { %v2764_v28 = vmul.f32 %v6057_v29, %v8297_v2  ;;  %v8327_v48 = vld [vmem:[#allocation2 + $0xb7] sm:$0xff]  ;;  %v2531_v39 = vadd.f32 %v2499_v27, %v2338_v3  ;;  %v8361_v61 = vld [vmem:[#allocation2 + $0xe0] sm:$0xff]  ;;  %v2732_v3 = vsel %vm8340_vm9, 0.0, %v8344_v10  ;;  %9588 = vst [vmem:[#allocation17_spill] sm:$0xff] %v8374_v17 }
 0x383   : > { %v4434_v24 = vmul.f32 %v4402_v42, %v1522_v26  ;;  %v2697_v38 = vadd.f32 %v2665_v63, %v2630_v7  ;;  %v2962_v26 = vadd.f32 %v2930_v8, %v2895_v20  ;;  %v1768_v42 = vand.u32 15, %v1624_v22  ;;  %v8356_v8 = vld [vmem:[%s9395_s8] ss:$0 sm:$0xff] }
 0x384   : > { %vm8331_vm14 = vcmp.eq.s32.totalorder %v1796_v54, 0  ;;  %v1824_v63 = vand.u32 15, %v1632_v23  ;;  %v1626_v7 = vadd.s32 160, %v5872_v44 }
 0x385   : > { %4936 = vmatmul.msk.f32.gmra.mxu2 %vm1566_vm8, %v4434_v24  ;;  %v2796_v21 = vadd.f32 %v2764_v28, %v2697_v38  ;;  %v9577_v24 = vmov 0  ;;  %v3061_v40 = vadd.f32 %v3029_v32, %v2962_v26  ;;  %v2206_v33 = vsel %vm8331_vm14, 0.0, %v8327_v48  ;;  %v8366_v38 = vpop.f32.mrf.mxu1  ;;  %v1433_v28 = vpop.f32.mrf.mxu3  ;;  %v9589_v26 = vld [vmem:[#allocation19_spill] sm:$0xff] }
 0x386   : > { %v9578_v24 = vsel %vm8331_vm14, 4294967295, %v9577_v24  ;;  %v2239_v5 = vmul.f32 %v5900_v11, %v2206_v33  ;;  %vm8347_vm6 = vcmp.eq.s32.totalorder %v1768_v42, 0  ;;  %9585 = vst [vmem:[#allocation16_spill] sm:$0xff] %v8366_v38  ;;  %vm8368_vm11 = vcmp.eq.s32.totalorder %v1824_v63, 0 }
 0x387   : > { %9579 = vst [vmem:[#allocation14_spill] sm:$0xff] %v9578_v24  ;;  %v2828_v30 = vadd.f32 %v2796_v21, %v2531_v39  ;;  %v1434_v54 = vadd.f32 %v8207_v43, %v1433_v28  ;;  %v2113_v39 = vld [vmem:[#allocation2 + $0xcf] sm:$0xff]  ;;  %v2202_v42 = vsel %vm8347_vm6, 0.0, %v9589_v26  ;;  %v2591_v33 = vsel %vm8347_vm6, 0.0, %v7964_v12  ;;  %v8401_v28 = vld [vmem:[#allocation2 + $0xdf] sm:$0xff] }
 0x388   : > { %v8351_v20 = vadd.f32 %v2304_v52, %v2239_v5  ;;  %v2274_v21 = vld [vmem:[#allocation2 + $0xd0] sm:$0xff]  ;;  %v2599_v63 = vsel %vm8368_vm11, 0.0, %v8227_v15  ;;  %v9590_v5 = vld [vmem:[#allocation21_spill] sm:$0xff]  ;;  %v2242_v14 = vmul.f32 %v5900_v11, %v2113_v39  ;;  %v2235_v38 = vmul.f32 %v5900_v11, %v2202_v42 }
 0x389   : > { %v3093_v27 = vadd.f32 %v3061_v40, %v2828_v30  ;;  %v2666_v30 = vmul.f32 %v5934_v57, %v8361_v61  ;;  %v2765_v40 = vmul.f32 %v6057_v29, %v2732_v3  ;;  %1601 = vst.msk [vmem:[#allocation2 + $0xf8] sm:$0xff] %vm1566_vm8, %v1434_v54  ;;  %v1633_v3 = vadd.s32 216, %v5872_v44  ;;  %v2371_v26 = vld [vmem:[#allocation2 + $0xd1] sm:$0xff] }
 0x38a   : > { %9584 = vst [vmem:[#allocation12_spill] sm:$0xff] %v8351_v20  ;;  %v2307_v12 = vmul.f32 %v5905_v1, %v2274_v21  ;;  %v2659_v54 = vmul.f32 %v5934_v57, %v7982_v34  ;;  %v8409_v15 = vld [vmem:[#allocation2 + $0xef] sm:$0xff]  ;;  %v2631_v39 = vmul.f32 %v6047_v41, %v8401_v28  ;;  %v2624_v21 = vmul.f32 %v6047_v41, %v2591_v33 }
 0x38b   : > { %v8359_v22 = vadd.f32 %v8356_v8, %v3093_v27  ;;  %v2300_v27 = vmul.f32 %v5905_v1, %v9590_v5  ;;  %v8411_v24 = vld [vmem:[#allocation2 + $0xf0] sm:$0xff]  ;;  %v2467_v5 = vsel %vm8340_vm9, 0.0, %v2371_v26  ;;  %v2632_v42 = vmul.f32 %v6047_v41, %v2599_v63 }
 0x38c   : > { %v2500_v19 = vmul.f32 %v5939_v4, %v2467_v5  ;;  %v2493_v34 = vmul.f32 %v5939_v4, %v9591_v53  ;;  %v2698_v51 = vadd.f32 %v2666_v30, %v2631_v39  ;;  %v2856_v26 = vsel %vm8347_vm6, 0.0, %v8327_v48 }
 0x38d   : > { %v8377_v23 = vmul.f32 0.70710677, %v8359_v22  ;;  %v1831_v36 = vand.u32 15, %v1633_v3  ;;  %v1436_v31 = vpop.f32.mrf.mxu3  ;;  %v2339_v33 = vadd.f32 %v2307_v12, %v2242_v14  ;;  %v2896_v5 = vmul.f32 %v6106_v35, %v8409_v15  ;;  %v8438_v30 = vpop.f32.mrf.mxu1 }
 0x38e   : > { %v2931_v63 = vmul.f32 %v6087_v62, %v8411_v24  ;;  %v2332_v53 = vadd.f32 %v2300_v27, %v2235_v38  ;;  %v2210_v37 = vsel %vm8368_vm11, 0.0, %v8290_v50  ;;  %9592 = vst [vmem:[#allocation18_spill] sm:$0xff] %v8438_v30  ;;  %v1437_v3 = vadd.f32 %v8207_v43, %v1436_v31  ;;  %v5271_v30 = vld [vmem:[#allocation2 + $0xa8] sm:$0xff] }
 0x38f   : > { %v8392_v52 = vand.u32 2147483647, %v8377_v23  ;;  %v2532_v12 = vadd.f32 %v2500_v19, %v2339_v33  ;;  %v2797_v39 = vadd.f32 %v2765_v40, %v2698_v51  ;;  %v2889_v0 = vmul.f32 %v6106_v35, %v2856_v26 }
 0x390   : > { %v8441_v14 = vld [vmem:[#allocation2 + $0xf1] sm:$0xff]  ;;  %v2924_v50 = vmul.f32 %v6087_v62, %v8329_v16  ;;  %vm8449_vm10 = vcmp.eq.s32.totalorder %v1831_v36, 15  ;;  %1602 = vst.msk [vmem:[#allocation2 + $0x100] sm:$0xff] %vm1566_vm8, %v1437_v3  ;;  %v2963_v31 = vadd.f32 %v2931_v63, %v2896_v5  ;;  %v2243_v51 = vmul.f32 %v5900_v11, %v2210_v37 }
 0x391   : > { %v3257_v20 = vmul.f32 0.3275911, %v8392_v52  ;;  %v2997_v38 = vsel %vm8340_vm9, 0.0, %v8441_v14  ;;  %v2308_v40 = vmul.f32 %v5905_v1, %v8293_v58  ;;  %v8458_v45 = vld [vmem:[#allocation2 + $0xf7] sm:$0xff]  ;;  %v2301_v36 = vmul.f32 %v5905_v1, %v7947_v13 }
 0x392   : > { %v3030_v19 = vmul.f32 %v8320_v60, %v2997_v38  ;;  %v1782_v26 = vand.u32 15, %v1626_v7  ;;  %v8466_v33 = vadd.f32 %v8183_v47, %v8273_v55  ;;  %v2829_v5 = vadd.f32 %v2797_v39, %v2532_v12  ;;  %v8475_v55 = vld [vmem:[#allocation2 + $0xf8] sm:$0xff] }
 0x393   : > { %v8424_v17 = vadd.f32 1.0, %v3257_v20  ;;  %v2691_v20 = vadd.f32 %v2659_v54, %v2624_v21  ;;  %v2236_v21 = vmul.f32 %v5900_v11, %v7941_v49  ;;  %v2461_v58 = vsel %vm8211_vm1, 0.0, %v7955_v6 }
 0x394   : > { %9595 = vst [vmem:[#allocation7_spill] sm:$0xff] %v8466_v33  ;;  %v3062_v63 = vadd.f32 %v3030_v19, %v2963_v31  ;;  %v2340_v12 = vadd.f32 %v2308_v40, %v2243_v51  ;;  %v2864_v39 = vsel %vm8368_vm11, 0.0, %v8458_v45  ;;  %vm8482_vm13 = vcmp.eq.s32.totalorder %v1782_v26, 0 }
 0x395   : > { %5163 = vrcp.f32 %v8424_v17  ;;  %v2790_v27 = vadd.f32 %v2758_v46, %v2691_v20  ;;  %v2525_v46 = vadd.f32 %v2493_v34, %v2332_v53  ;;  %v2699_v20 = vadd.f32 %v2667_v59, %v2632_v42  ;;  %v1439_v7 = vpop.f32.mrf.mxu3 }
 0x396   : > { %v2956_v53 = vadd.f32 %v2924_v50, %v2889_v0  ;;  %v3094_v3 = vadd.f32 %v3062_v63, %v2829_v5  ;;  %v1440_v6 = vadd.f32 %v8207_v43, %v1439_v7  ;;  %v2333_v59 = vadd.f32 %v2301_v36, %v2236_v21  ;;  %v5270_v63 = vld [vmem:[#allocation2 + $0xa7] sm:$0xff] }
 0x397   : > { %v2822_v34 = vadd.f32 %v2790_v27, %v2525_v46  ;;  %v2494_v0 = vmul.f32 %v5939_v4, %v2461_v58  ;;  %v2501_v50 = vmul.f32 %v5939_v4, %v8297_v2  ;;  %v2766_v32 = vmul.f32 %v6057_v29, %v8299_v25  ;;  %v8499_v46 = vpop.f32.mrf.mxu1  ;;  %v8504_v36 = vld [vmem:[#allocation2 + $0xf9] sm:$0xff] }
 0x398   : > { %v8487_v27 = vadd.f32 %v8356_v8, %v3094_v3  ;;  %v3666_v31 = vand.u32 2147483647, %v8424_v17  ;;  %v3668_v19 = vand.u32 2147483648, %v8424_v17  ;;  %1603 = vst.msk [vmem:[#allocation2 + $0x108] sm:$0xff] %vm1566_vm8, %v1440_v6  ;;  %v2897_v51 = vmul.f32 %v6106_v35, %v2864_v39 }
 0x399   : > { %v2932_v40 = vmul.f32 %v6087_v62, %v8475_v55  ;;  %9598 = vst [vmem:[#allocation8_spill] sm:$0xff] %v8499_v46  ;;  %v2533_v26 = vadd.f32 %v2501_v50, %v2340_v12  ;;  %vm3662_vm4 = vweird.f32 %v8424_v17  ;;  %v2526_v5 = vadd.f32 %v2494_v0, %v2333_v59 }
 0x39a   : > { %v8502_v2 = vmul.f32 0.70710677, %v8487_v27  ;;  %v2204_v58 = vsel %vm8482_vm13, 0.0, %v5270_v63  ;;  %v4089_v3 = vsub.f32 0.0, %v8392_v52  ;;  %v2798_v6 = vadd.f32 %v2766_v32, %v2699_v20 }
 0x39b   : > { %v5164_v37 = vpop.eup %5163  ;;  %v3669_v12 = vor.u32 1.1754944e-38, %v3668_v19  ;;  %v3031_v59 = vmul.f32 %v8320_v60, %v8504_v36  ;;  %vm3667_vm3 = vcmp.eq.f32.partialorder %v3666_v31, 8.507059e+37  ;;  %v2302_v33 = vmul.f32 %v5271_v30, %v5905_v1 }
 0x39c   : > { %v3658_v13 = vmul.f32 %v5164_v37, %v8424_v17  ;;  %vm3663_vm15 = vweird.f32 %v5164_v37  ;;  %v3226_v39 = vand.u32 2147483647, %v8502_v2  ;;  %v2964_v17 = vadd.f32 %v2932_v40, %v2897_v51 }
 0x39d   : > { %vm3664_vm5 = vmor %vm3662_vm4, %vm3663_vm15  ;;  %v2830_v63 = vadd.f32 %v2798_v6, %v2533_v26  ;;  %v2237_v40 = vmul.f32 %v5900_v11, %v2204_v58  ;;  %v2661_v30 = vmul.f32 %v5934_v57, %v8329_v16  ;;  %vm4281_vm9 = vcmp.lt.f32.partialorder %v8377_v23, 0.0 }
 0x39e   : > { %v3659_v38 = vsub.f32 1.0, %v3658_v13  ;;  %v2593_v13 = vsel %vm8482_vm13, 0.0, %v8327_v48  ;;  %v1442_v48 = vpop.f32.mrf.mxu3  ;;  %v3063_v32 = vadd.f32 %v3031_v59, %v2964_v17  ;;  %v4090_v59 = vsub.f32 0.0, %v3226_v39 }
 0x39f   : > { %v1443_v20 = vadd.f32 %v8207_v43, %v1442_v48  ;;  %v2626_v58 = vmul.f32 %v6047_v41, %v2593_v13  ;;  %v1542_v13 = vpop.f32.mrf.mxu1 }
 0x3a0   : > { %v3660_v21 = vmul.f32 %v5164_v37, %v3659_v38  ;;  %v8514_v38 = vld [vmem:[#allocation2 + $0xb9] sm:$0xff]  ;;  %v3095_v31 = vadd.f32 %v3063_v32, %v2830_v63  ;;  %v8568_v32 = vld [vmem:[#allocation2 + $0xc1] sm:$0xff] }
 0x3a1   : > { %v3023_v0 = vmul.f32 %v8320_v60, %v8514_v38  ;;  %1604 = vst.msk [vmem:[#allocation2 + $0x110] sm:$0xff] %vm1566_vm8, %v1443_v20 }
 0x3a2   : > { %v3661_v7 = vadd.f32 %v5164_v37, %v3660_v21  ;;  %v3258_v21 = vmul.f32 0.3275911, %v3226_v39  ;;  %9602 = vst [vmem:[#allocation22_spill] sm:$0xff] %v8568_v32 }
 0x3a3   : > { %v3055_v46 = vadd.f32 %v3023_v0, %v2956_v53  ;;  %v8532_v53 = vld [vmem:[#allocation2 + $0xbf] sm:$0xff]  ;;  %v2823_v0 = vadd.f32 %v8229_v9, %v2526_v5  ;;  %v2693_v9 = vadd.f32 %v2661_v30, %v2626_v58  ;;  %v8576_v5 = vmul.f32 0.5, %v8359_v22 }
 0x3a4   : > { %v3665_v50 = vsel %vm3664_vm5, %v5164_v37, %v3661_v7  ;;  %v8524_v51 = vadd.f32 1.0, %v3258_v21  ;;  %v4121_v37 = vmul.f32 %v4089_v3, %v8392_v52  ;;  %v5272_v7 = vld [vmem:[#allocation2 + $0xa9] sm:$0xff]  ;;  %9599 = vst [vmem:[#allocation19_spill] sm:$0xff] %v8532_v53  ;;  %v8540_v52 = vadd.f32 %v8356_v8, %v3095_v31 }
 0x3a5   : > { %v8520_v49 = vsel %vm3667_vm3, %v3669_v12, %v3665_v50  ;;  %v3087_v26 = vadd.f32 %v3055_v46, %v2822_v34  ;;  %v2495_v43 = vmul.f32 %v5272_v7, %v5939_v4  ;;  %v8534_v12 = vld [vmem:[#allocation2 + $0xc0] sm:$0xff]  ;;  %v8547_v46 = vmul.f32 %v5905_v1, %v8361_v61 }
 0x3a6   : > { %v3801_v19 = vmul.f32 1.0614054, %v8520_v49  ;;  %5165 = vrcp.f32 %v8524_v51  ;;  %9600 = vst [vmem:[#allocation21_spill] sm:$0xff] %v8534_v12  ;;  %v9601_v3 = vsel %vm8449_vm10, 0.0, %v8344_v10  ;;  %v2334_v50 = vadd.f32 %v2302_v33, %v2237_v40 }
 0x3a7   : > { %v8543_v34 = vadd.f32 %v8356_v8, %v3087_v26  ;;  %v8554_v17 = vmul.f32 %v5939_v4, %v9601_v3  ;;  %v4177_v48 = vmul.f32 1.442695, %v4121_v37  ;;  %v8559_v21 = vmul.f32 0.70710677, %v8540_v52 }
 0x3a8   : > { %v3833_v6 = vadd.f32 -1.4531521, %v3801_v19  ;;  %v2890_v61 = vmul.f32 %v6106_v35, %v8532_v53  ;;  %v2925_v10 = vmul.f32 %v6087_v62, %v8534_v12  ;;  %v8570_v19 = vadd.f32 %v2495_v43, %v2334_v50 }
 0x3a9   : > { %v8566_v20 = vmul.f32 0.70710677, %v8543_v34  ;;  %v8573_v33 = vadd.f32 %v8183_v47, %v1542_v13  ;;  %v3227_v40 = vand.u32 2147483647, %v8559_v21  ;;  %v2991_v37 = vsel %vm8211_vm1, 0.0, %v8568_v32 }
 0x3aa   : > { %v3865_v16 = vmul.f32 %v3833_v6, %v8520_v49  ;;  %v4122_v7 = vmul.f32 %v4090_v59, %v3226_v39  ;;  %v3024_v6 = vmul.f32 %v8320_v60, %v2991_v37  ;;  %v8586_v58 = vmul.f32 0.5, %v8487_v27 }
 0x3ab   : > { %v3219_v43 = vand.u32 2147483647, %v8566_v20  ;;  %v3259_v30 = vmul.f32 0.3275911, %v3227_v40  ;;  %v2957_v3 = vadd.f32 %v2925_v10, %v2890_v61  ;;  %5167 = vpow2.f32 %v4177_v48 }
 0x3ac   : > { %v3897_v63 = vadd.f32 1.4214138, %v3865_v16  ;;  %v5166_v31 = vpop.eup %5165  ;;  %v3681_v18 = vand.u32 2147483647, %v8524_v51  ;;  %v4091_v39 = vsub.f32 0.0, %v3227_v40  ;;  %v3683_v37 = vand.u32 2147483648, %v8524_v51 }
 0x3ad   : > { %v3673_v22 = vmul.f32 %v5166_v31, %v8524_v51  ;;  %v3251_v16 = vmul.f32 0.3275911, %v3219_v43  ;;  %v8590_v32 = vadd.f32 1.0, %v3259_v30  ;;  %v3056_v59 = vadd.f32 %v3024_v6, %v2957_v3 }
 0x3ae   : > { %v3929_v26 = vmul.f32 %v3897_v63, %v8520_v49  ;;  %v4179_v27 = vmul.f32 1.442695, %v4122_v7  ;;  %vm3678_vm1 = vweird.f32 %v5166_v31  ;;  %v2760_v48 = vmul.f32 %v6057_v29, %v8514_v38 }
 0x3af   : > { %v3674_v50 = vsub.f32 1.0, %v3673_v22  ;;  %v8594_v12 = vadd.f32 1.0, %v3251_v16  ;;  %5169 = vrcp.f32 %v8590_v32  ;;  %vm3677_vm12 = vweird.f32 %v8524_v51 }
 0x3b0   : > { %v3961_v13 = vadd.f32 -0.28449672, %v3929_v26  ;;  %v4083_v10 = vsub.f32 0.0, %v3219_v43  ;;  %vm3682_vm6 = vcmp.eq.f32.partialorder %v3681_v18, 8.507059e+37  ;;  %v4123_v7 = vmul.f32 %v4091_v39, %v3227_v40  ;;  %vm3679_vm11 = vmor %vm3677_vm12, %vm3678_vm1 }
 0x3b1   : > { %v3675_v53 = vmul.f32 %v5166_v31, %v3674_v50  ;;  %5171 = vrcp.f32 %v8594_v12  ;;  %v3088_v6 = vadd.f32 %v3056_v59, %v2823_v0  ;;  %v5168_v22 = vpop.eup %5167  ;;  %v3684_v3 = vor.u32 1.1754944e-38, %v3683_v37  ;;  %v8682_v37 = vld [vmem:[#allocation2 + $0x100] sm:$0xff] }
 0x3b2   : > { %v3993_v63 = vmul.f32 %v3961_v13, %v8520_v49  ;;  %5173 = vpow2.f32 %v4179_v27  ;;  %v3696_v38 = vand.u32 2147483647, %v8590_v32  ;;  %v8605_v51 = vmul.f32 0.5, %v8540_v52 }
 0x3b3   : > { %v3676_v26 = vadd.f32 %v5166_v31, %v3675_v53  ;;  %v3698_v16 = vand.u32 2147483648, %v8590_v32  ;;  %v8608_v50 = vadd.f32 %v2760_v48, %v2693_v9  ;;  %vm3692_vm15 = vweird.f32 %v8590_v32 }
 0x3b4   : > { %v4025_v61 = vadd.f32 0.2548296, %v3993_v63  ;;  %v4115_v0 = vmul.f32 %v4083_v10, %v3219_v43  ;;  %v8614_v39 = vmul.f32 1.442695, %v4123_v7  ;;  %v8618_v52 = vadd.f32 %v8356_v8, %v3088_v6 }
 0x3b5   : > { %v3680_v13 = vsel %vm3679_vm11, %v5166_v31, %v3676_v26  ;;  %v3576_v31 = vand.u32 2147483647, %v8594_v12  ;;  %vm8621_vm4 = vcmp.eq.f32.partialorder %v3696_v38, 8.507059e+37  ;;  %vm3572_vm5 = vweird.f32 %v8594_v12 }
 0x3b6   : > { %v4057_v30 = vmul.f32 %v4025_v61, %v8520_v49  ;;  %v8610_v18 = vsel %vm3682_vm6, %v3684_v3, %v3680_v13  ;;  %v5170_v49 = vpop.eup %5169  ;;  %9603 = vst [vmem:[#allocation23_spill] sm:$0xff] %v8618_v52  ;;  %v3699_v27 = vor.u32 1.1754944e-38, %v3698_v16  ;;  %v3578_v61 = vand.u32 2147483648, %v8594_v12 }
 0x3b7   : > { %v3802_v40 = vmul.f32 1.0614054, %v8610_v18  ;;  %v5172_v59 = vpop.eup %5171  ;;  %v3688_v9 = vmul.f32 %v5170_v49, %v8590_v32  ;;  %v8630_v6 = vmul.f32 1.442695, %v4115_v0  ;;  %vm8635_vm3 = vcmp.eq.f32.partialorder %v3576_v31, 8.507059e+37 }
 0x3b8   : > { %v4217_v53 = vmul.f32 %v5168_v22, %v4057_v30  ;;  %v3568_v48 = vmul.f32 %v5172_v59, %v8594_v12  ;;  %v8628_v10 = vpop.eup %5173  ;;  %v2244_v22 = vmul.f32 %v5900_v11, %v8401_v28  ;;  %v8640_v13 = vmul.f32 0.70710677, %v8618_v52  ;;  %v4607_v12 = vpop.f32.mrf.mxu2 }
 0x3b9   : > { %v3834_v43 = vadd.f32 -1.4531521, %v3802_v40  ;;  %v3689_v7 = vsub.f32 1.0, %v3688_v9  ;;  %vm3693_vm1 = vweird.f32 %v5170_v49  ;;  %v2633_v0 = vmul.f32 %v6047_v41, %v8409_v15 }
 0x3ba   : > { %v4249_v63 = vsub.f32 1.0, %v4217_v53  ;;  %v3569_v3 = vsub.f32 1.0, %v3568_v48  ;;  %vm3573_vm12 = vweird.f32 %v5172_v59  ;;  %v2341_v31 = vadd.f32 %v8547_v46, %v2244_v22 }
 0x3bb   : > { %v3866_v30 = vmul.f32 %v3834_v43, %v8610_v18  ;;  %v3690_v53 = vmul.f32 %v5170_v49, %v3689_v7  ;;  %v2668_v48 = vmul.f32 %v5934_v57, %v8411_v24  ;;  %v8650_v52 = vand.u32 2147483647, %v8640_v13  ;;  %vm3574_vm6 = vmor %vm3572_vm5, %vm3573_vm12 }
 0x3bc   : > { %v4313_v26 = vsub.f32 0.0, %v4249_v63  ;;  %v3570_v9 = vmul.f32 %v5172_v59, %v3569_v3  ;;  %v2734_v7 = vsel %vm8449_vm10, 0.0, %v8441_v14  ;;  %v3579_v22 = vor.u32 1.1754944e-38, %v3578_v61  ;;  %v5273_v61 = vld [vmem:[%s5506_s19 + $0x58] sm:$0xff] }
 0x3bd   : > { %v3898_v28 = vadd.f32 1.4214138, %v3866_v30  ;;  %v3691_v43 = vadd.f32 %v5170_v49, %v3690_v53  ;;  %v2767_v30 = vmul.f32 %v6057_v29, %v2734_v7  ;;  %v1545_v7 = vpop.f32.mrf.mxu3  ;;  %vm4282_vm11 = vcmp.lt.f32.partialorder %v8502_v2, 0.0 }
 0x3be   : > { %v4345_v16 = vsel %vm4281_vm9, %v4313_v26, %v4249_v63  ;;  %vm3694_vm9 = vmor %vm3692_vm15, %vm3693_vm1  ;;  %v3571_v26 = vadd.f32 %v5172_v59, %v3570_v9  ;;  %v8680_v9 = vld [vmem:[#allocation2 + $0xff] sm:$0xff]  ;;  %vm4275_vm15 = vcmp.lt.f32.partialorder %v8566_v20, 0.0 }
 0x3bf   : > { %v4377_v40 = vadd.f32 1.0, %v4345_v16  ;;  %v3930_v63 = vmul.f32 %v3898_v28, %v8610_v18  ;;  %v3695_v46 = vsel %vm3694_vm9, %v5170_v49, %v3691_v43  ;;  %v8677_v28 = vld [vmem:[%s9398_s11] ss:$0 sm:$0xff] }
 0x3c0   : > { %v8666_v32 = vsel %vm8621_vm4, %v3699_v27, %v3695_v46  ;;  %v3575_v53 = vsel %vm3574_vm6, %v5172_v59, %v3571_v26  ;;  %v8684_v59 = vld [vmem:[#allocation2 + $0x101] sm:$0xff]  ;;  %v2700_v27 = vadd.f32 %v2668_v48, %v2633_v0  ;;  %v2534_v26 = vadd.f32 %v8554_v17, %v2341_v31 }
 0x3c1   : > { %v4409_v23 = vmul.f32 %v4377_v40, %v8576_v5  ;;  %v3252_v5 = vmul.f32 0.3275911, %v8650_v52  ;;  %v3962_v16 = vadd.f32 -0.28449672, %v3930_v63  ;;  %v3803_v40 = vmul.f32 1.0614054, %v8666_v32 }
 0x3c2   : > { %v8671_v49 = vsel %vm8635_vm3, %v3579_v22, %v3575_v53  ;;  %v2799_v22 = vadd.f32 %v2767_v30, %v2700_v27  ;;  %v2898_v0 = vmul.f32 %v6106_v35, %v8680_v9  ;;  %v2933_v48 = vmul.f32 %v6087_v62, %v8682_v37 }
 0x3c3   : > { %v4441_v3 = vmul.f32 %v4409_v23, %v8573_v33  ;;  %v4685_v33 = vmul.f32 %v8677_v28, %v5273_v61  ;;  %v3994_v38 = vmul.f32 %v3962_v16, %v8610_v18  ;;  %v3795_v43 = vmul.f32 1.0614054, %v8671_v49  ;;  %v8691_v23 = vld [vmem:[%s9397_s10] ss:$0 sm:$0xff] }
 0x3c4   : > { %v4608_v63 = vadd.f32 %v8691_v23, %v4607_v12  ;;  %v3835_v46 = vadd.f32 -1.4531521, %v3803_v40  ;;  %v2999_v12 = vsel %vm8449_vm10, 0.0, %v8684_v59  ;;  %v2965_v31 = vadd.f32 %v2933_v48, %v2898_v0 }
 0x3c5   : > { %4943 = vmatmul.msk.f32.vlgmr.msra.gmra.mxu3 %vm1566_vm8, %v4441_v3  ;;  %v4026_v16 = vadd.f32 0.2548296, %v3994_v38  ;;  %v3827_v53 = vadd.f32 -1.4531521, %v3795_v43  ;;  %v3032_v30 = vmul.f32 %v8320_v60, %v2999_v12  ;;  %v8706_v3 = vadd.f32 1.0, %v3252_v5 }
 0x3c6   : > { %v4717_v61 = vadd.f32 %v4685_v33, %v4608_v63  ;;  %v3867_v17 = vmul.f32 %v3835_v46, %v8666_v32  ;;  %v1546_v40 = vadd.f32 %v8183_v47, %v1545_v7  ;;  %v8711_v38 = vmul.f32 0.5, %v8543_v34 }
 0x3c7   : > { %v4058_v27 = vmul.f32 %v4026_v16, %v8610_v18  ;;  %v3859_v33 = vmul.f32 %v3827_v53, %v8671_v49  ;;  %v2831_v43 = vadd.f32 %v2799_v22, %v2534_v26  ;;  %v3064_v63 = vadd.f32 %v3032_v30, %v2965_v31 }
 0x3c8   : > { %4749 = vst.msk [vmem:[%s7270_s28 + $0x58] sm:$0xff] %vm446_vm0, %v4717_v61  ;;  %v3899_v54 = vadd.f32 1.4214138, %v3867_v17  ;;  %5175 = vrcp.f32 %v8706_v3  ;;  %v2858_v47 = vsel %vm8482_vm13, 0.0, %v8271_v56  ;;  %v8726_v26 = vadd.f32 %v8608_v50, %v8570_v19 }
 0x3c9   : > { %v4218_v46 = vmul.f32 %v8628_v10, %v4058_v27  ;;  %5177 = vpow2.f32 %v8614_v39  ;;  %v3891_v5 = vadd.f32 1.4214138, %v3859_v33  ;;  %v3096_v18 = vadd.f32 %v3064_v63, %v2831_v43 }
 0x3ca   : > { %v3931_v34 = vmul.f32 %v3899_v54, %v8666_v32  ;;  %5179 = vpow2.f32 %v8630_v6  ;;  %v3593_v10 = vand.u32 2147483648, %v8706_v3  ;;  %v2601_v0 = vsel %vm8232_vm7, 0.0, %v8458_v45 }
 0x3cb   : > { %v4250_v7 = vsub.f32 1.0, %v4218_v46  ;;  %v3923_v22 = vmul.f32 %v3891_v5, %v8671_v49  ;;  %v8734_v56 = vadd.f32 %v8356_v8, %v3096_v18  ;;  %v2503_v6 = vmul.f32 %v5939_v4, %v8299_v25  ;;  %v9609_v18 = vld [vmem:[#allocation10_spill] sm:$0xff] }
 0x3cc   : > { %v3963_v42 = vadd.f32 -0.28449672, %v3931_v34  ;;  %v2891_v48 = vmul.f32 %v6106_v35, %v2858_v47  ;;  %v3591_v16 = vand.u32 2147483647, %v8706_v3  ;;  %v4084_v53 = vsub.f32 0.0, %v8650_v52  ;;  %v8756_v47 = vld [vmem:[#allocation2 + $0x107] sm:$0xff] }
 0x3cd   : > { %v4314_v19 = vsub.f32 0.0, %v4250_v7  ;;  %v3955_v50 = vadd.f32 -0.28449672, %v3923_v22  ;;  %v8743_v45 = vmul.f32 0.70710677, %v8734_v56  ;;  %v2634_v17 = vmul.f32 %v6047_v41, %v2601_v0 }
 0x3ce   : > { %v5176_v61 = vpop.eup %5175  ;;  %v3995_v12 = vmul.f32 %v3963_v42, %v8666_v32  ;;  %v2669_v31 = vmul.f32 %v5934_v57, %v8475_v55  ;;  %v3594_v54 = vor.u32 1.1754944e-38, %v3593_v10  ;;  %vm3587_vm10 = vweird.f32 %v8706_v3 }
 0x3cf   : > { %v5178_v25 = vpop.eup %5177  ;;  %v4346_v30 = vsel %vm4282_vm11, %v4314_v19, %v4250_v7  ;;  %v3987_v27 = vmul.f32 %v3955_v50, %v8671_v49  ;;  %v3583_v33 = vmul.f32 %v5176_v61, %v8706_v3  ;;  %v8753_v5 = vand.u32 2147483647, %v8743_v45 }
 0x3d0   : > { %v5180_v43 = vpop.eup %5179  ;;  %v4378_v63 = vadd.f32 1.0, %v4346_v30  ;;  %v4027_v46 = vadd.f32 0.2548296, %v3995_v12  ;;  %vm4283_vm13 = vcmp.lt.f32.partialorder %v8559_v21, 0.0  ;;  %v2768_v34 = vmul.f32 %v6057_v29, %v8504_v36  ;;  %v8768_v12 = vld [vmem:[#allocation2 + $0x108] sm:$0xff] }
 0x3d1   : > { %v4019_v55 = vadd.f32 0.2548296, %v3987_v27  ;;  %v3584_v2 = vsub.f32 1.0, %v3583_v33  ;;  %v2926_v7 = vmul.f32 %v6087_v62, %v9609_v18  ;;  %v3260_v0 = vmul.f32 0.3275911, %v8753_v5 }
 0x3d2   : > { %v4410_v22 = vmul.f32 %v4378_v63, %v8586_v58  ;;  %v4059_v10 = vmul.f32 %v4027_v46, %v8666_v32  ;;  %v2701_v42 = vadd.f32 %v2669_v31, %v2634_v17  ;;  %vm3588_vm4 = vweird.f32 %v5176_v61  ;;  %v9610_v32 = vld [vmem:[#allocation6_spill] sm:$0xff]  ;;  %v1548_v46 = vpop.f32.mrf.mxu3 }
 0x3d3   : > { %v4051_v19 = vmul.f32 %v4019_v55, %v8671_v49  ;;  %v3585_v50 = vmul.f32 %v5176_v61, %v3584_v2  ;;  %v2866_v30 = vsel %vm8232_vm7, 0.0, %v8756_v47  ;;  %v8773_v58 = vadd.f32 1.0, %v3260_v0  ;;  %vm3589_vm5 = vmor %vm3587_vm10, %vm3588_vm4 }
 0x3d4   : > { %v4442_v27 = vmul.f32 %v4410_v22, %v1546_v40  ;;  %v4219_v33 = vmul.f32 %v5178_v25, %v4059_v10  ;;  %v3025_v63 = vmul.f32 %v8320_v60, %v9610_v32  ;;  %v2800_v31 = vadd.f32 %v2768_v34, %v2701_v42  ;;  %v8793_v10 = vld [vmem:[#allocation2 + $0x109] sm:$0xff] }
 0x3d5   : > { %v4211_v18 = vmul.f32 %v5180_v43, %v4051_v19  ;;  %v3586_v17 = vadd.f32 %v5176_v61, %v3585_v50  ;;  %v2958_v49 = vadd.f32 %v2926_v7, %v2891_v48  ;;  %5181 = vrcp.f32 %v8773_v58  ;;  %v9611_v43 = vld [vmem:[#allocation15_spill] sm:$0xff]  ;;  %v8788_v48 = vld [vmem:[%s9393_s6] ss:$0 sm:$0xff] }
 0x3d6   : > { %v4251_v55 = vsub.f32 1.0, %v4219_v33  ;;  %v2899_v39 = vmul.f32 %v6106_v35, %v2866_v30  ;;  %v2934_v40 = vmul.f32 %v6087_v62, %v8768_v12  ;;  %4944 = vmatmul.msk.f32.gmra.mxu3 %vm1566_vm8, %v4442_v27  ;;  %vm3592_vm7 = vcmp.eq.f32.partialorder %v3591_v16, 8.507059e+37 }
 0x3d7   : > { %v4243_v25 = vsub.f32 1.0, %v4211_v18  ;;  %v3590_v2 = vsel %vm3589_vm5, %v5176_v61, %v3586_v17  ;;  %v2535_v22 = vadd.f32 %v2503_v6, %v9611_v43  ;;  %v1549_v3 = vadd.f32 %v8788_v48, %v1548_v46 }
 0x3d8   : > { %v4315_v34 = vsub.f32 0.0, %v4251_v55  ;;  %v8791_v7 = vsel %vm3592_vm7, %v3594_v54, %v3590_v2  ;;  %v3057_v0 = vadd.f32 %v3025_v63, %v2958_v49  ;;  %v4116_v16 = vmul.f32 %v4084_v53, %v8650_v52 }
 0x3d9   : > { %v4307_v42 = vsub.f32 0.0, %v4243_v25  ;;  %v3796_v19 = vmul.f32 1.0614054, %v8791_v7  ;;  %v2832_v61 = vadd.f32 %v2800_v31, %v2535_v22  ;;  %v2966_v50 = vadd.f32 %v2934_v40, %v2899_v39 }
 0x3da   : > { %v4347_v6 = vsel %vm4283_vm13, %v4315_v34, %v4251_v55  ;;  %v3033_v30 = vmul.f32 %v8320_v60, %v8793_v10  ;;  %v3089_v27 = vadd.f32 %v3057_v0, %v8726_v26  ;;  %v4092_v32 = vsub.f32 0.0, %v8753_v5 }
 0x3db   : > { %v4379_v54 = vadd.f32 1.0, %v4347_v6  ;;  %v4339_v33 = vsel %vm4275_vm15, %v4307_v42, %v4243_v25  ;;  %v3828_v63 = vadd.f32 -1.4531521, %v3796_v19  ;;  %v5182_v46 = vpop.eup %5181  ;;  %v1635_v21 = vadd.s32 232, %v5872_v44 }
 0x3dc   : > { %v4371_v18 = vadd.f32 1.0, %v4339_v33  ;;  %v3065_v52 = vadd.f32 %v3033_v30, %v2966_v50  ;;  %v8806_v53 = vadd.f32 %v8356_v8, %v3089_v27  ;;  %v3703_v60 = vmul.f32 %v5182_v46, %v8773_v58  ;;  %v4610_v30 = vpop.f32.mrf.mxu2  ;;  %v5277_v27 = vld [vmem:[%s5506_s19 + $0x60] sm:$0xff] }
 0x3dd   : > { %v4411_v17 = vmul.f32 %v4379_v54, %v8605_v51  ;;  %v3711_v26 = vand.u32 2147483647, %v8773_v58  ;;  %v4167_v31 = vmul.f32 1.442695, %v4116_v16  ;;  %v3713_v49 = vand.u32 2147483648, %v8773_v58  ;;  %v9612_v51 = vld [vmem:[#allocation17_spill] sm:$0xff] }
 0x3de   : > { %v4403_v20 = vmul.f32 %v4371_v18, %v8711_v38  ;;  %v3860_v55 = vmul.f32 %v3828_v63, %v8791_v7  ;;  %v3097_v39 = vadd.f32 %v3065_v52, %v2832_v61  ;;  %v3704_v25 = vsub.f32 1.0, %v3703_v60 }
 0x3df   : > { %v4443_v40 = vmul.f32 %v4411_v17, %v1549_v3  ;;  %v4124_v2 = vmul.f32 %v4092_v32, %v8753_v5  ;;  %v8817_v43 = vmul.f32 0.70710677, %v8806_v53  ;;  %v1845_v42 = vand.u32 15, %v1635_v21 }
 0x3e0   : > { %v4435_v22 = vmul.f32 %v4403_v20, %v9612_v51  ;;  %v3892_v34 = vadd.f32 1.4214138, %v3860_v55  ;;  %v8821_v0 = vadd.f32 %v8356_v8, %v3097_v39  ;;  %v3705_v38 = vmul.f32 %v5182_v46, %v3704_v25  ;;  %v9617_v55 = vld [vmem:[#allocation23_spill] sm:$0xff] }
 0x3e1   : > { %vm3708_vm3 = vweird.f32 %v5182_v46  ;;  %5183 = vpow2.f32 %v4167_v31  ;;  %v3221_v19 = vand.u32 2147483647, %v8817_v43  ;;  %4945 = vmatmul.msk.f32.gmra.mxu3 %vm1566_vm8, %v4443_v40  ;;  %vm3707_vm1 = vweird.f32 %v8773_v58 }
 0x3e2   : > { %4937 = vmatmul.msk.f32.gmra.mxu2 %vm1566_vm8, %v4435_v22  ;;  %vm8827_vm12 = vcmp.eq.f32.partialorder %v3711_v26, 8.507059e+37  ;;  %v3924_v8 = vmul.f32 %v3892_v34, %v8791_v7  ;;  %v8833_v3 = vmul.f32 0.70710677, %v8821_v0  ;;  %v3706_v16 = vadd.f32 %v5182_v46, %v3705_v38  ;;  %vm3709_vm9 = vmor %vm3707_vm1, %vm3708_vm3 }
 0x3e3   : > { %v3714_v61 = vor.u32 1.1754944e-38, %v3713_v49  ;;  %v4183_v6 = vmul.f32 1.442695, %v4124_v2  ;;  %v3253_v50 = vmul.f32 0.3275911, %v3221_v19  ;;  %v4686_v54 = vmul.f32 %v5277_v27, %v8677_v28 }
 0x3e4   : > { %v3956_v33 = vadd.f32 -0.28449672, %v3924_v8  ;;  %v8838_v58 = vand.u32 2147483647, %v8833_v3  ;;  %vm8840_vm6 = vcmp.eq.s32.totalorder %v1845_v42, 15  ;;  %v3710_v63 = vsel %vm3709_vm9, %v5182_v46, %v3706_v16 }
 0x3e5   : > { %v4611_v18 = vadd.f32 %v8691_v23, %v4610_v30  ;;  %v8845_v52 = vadd.f32 1.0, %v3253_v50  ;;  %v2246_v21 = vmul.f32 %v5900_v11, %v8409_v15  ;;  %v8851_v17 = vsel %vm8827_vm12, %v3714_v61, %v3710_v63 }
 0x3e6   : > { %v3988_v60 = vmul.f32 %v3956_v33, %v8791_v7  ;;  %v3261_v26 = vmul.f32 0.3275911, %v8838_v58  ;;  %v2311_v31 = vmul.f32 %v5905_v1, %v8411_v24  ;;  %v3804_v20 = vmul.f32 1.0614054, %v8851_v17 }
 0x3e7   : > { %v5184_v46 = vpop.eup %5183  ;;  %v4718_v49 = vadd.f32 %v4686_v54, %v4611_v18  ;;  %5185 = vrcp.f32 %v8845_v52  ;;  %v2471_v15 = vsel %vm8840_vm6, 0.0, %v8441_v14  ;;  %v8863_v39 = vmul.f32 0.5, %v9617_v55 }
 0x3e8   : > { %v4020_v40 = vadd.f32 0.2548296, %v3988_v60  ;;  %v8865_v25 = vadd.f32 1.0, %v3261_v26  ;;  %v4085_v2 = vsub.f32 0.0, %v3221_v19  ;;  %v8868_v51 = vmul.f32 0.5, %v8734_v56  ;;  %v8898_v26 = vld [vmem:[#allocation2 + $0x110] sm:$0xff] }
 0x3e9   : > { %v3836_v24 = vadd.f32 -1.4531521, %v3804_v20  ;;  %4750 = vst.msk [vmem:[%s7270_s28 + $0x60] sm:$0xff] %vm446_vm0, %v4718_v49  ;;  %vm4276_vm11 = vcmp.lt.f32.partialorder %v8640_v13, 0.0  ;;  %v3608_v22 = vand.u32 2147483648, %v8845_v52  ;;  %v2504_v42 = vmul.f32 %v5939_v4, %v2471_v15 }
 0x3ea   : > { %v4052_v34 = vmul.f32 %v4020_v40, %v8791_v7  ;;  %5187 = vrcp.f32 %v8865_v25  ;;  %v3606_v14 = vand.u32 2147483647, %v8845_v52  ;;  %v3728_v56 = vand.u32 2147483648, %v8865_v25  ;;  %v8884_v7 = vld [vmem:[#allocation2 + $0x10f] sm:$0xff]  ;;  %v8922_v13 = vld [vmem:[%s9394_s7 + $0x8] ss:$0 sm:$0xff] }
 0x3eb   : > { %v3868_v38 = vmul.f32 %v3836_v24, %v8851_v17  ;;  %5189 = vpow2.f32 %v4183_v6  ;;  %v2343_v5 = vadd.f32 %v2311_v31, %v2246_v21  ;;  %vm3602_vm10 = vweird.f32 %v8845_v52 }
 0x3ec   : > { %v4212_v8 = vmul.f32 %v5184_v46, %v4052_v34  ;;  %v8882_v61 = vmul.f32 %v4085_v2, %v3221_v19  ;;  %v3726_v27 = vand.u32 2147483647, %v8865_v25  ;;  %v8887_v54 = vor.u32 1.1754944e-38, %v3728_v56  ;;  %v8902_v46 = vld [vmem:[#allocation2 + $0x111] sm:$0xff] }
 0x3ed   : > { %v5186_v50 = vpop.eup %5185  ;;  %v3900_v30 = vadd.f32 1.4214138, %v3868_v38  ;;  %v3609_v33 = vor.u32 1.1754944e-38, %v3608_v22  ;;  %vm8890_vm15 = vcmp.eq.f32.partialorder %v3606_v14, 8.507059e+37  ;;  %v2536_v21 = vadd.f32 %v2504_v42, %v2343_v5 }
 0x3ee   : > { %v4244_v6 = vsub.f32 1.0, %v4212_v8  ;;  %v3598_v63 = vmul.f32 %v5186_v50, %v8845_v52  ;;  %vm3603_vm13 = vweird.f32 %v5186_v50  ;;  %vm3722_vm4 = vweird.f32 %v8865_v25 }
 0x3ef   : > { %v3932_v19 = vmul.f32 %v3900_v30, %v8851_v17  ;;  %v2635_v60 = vmul.f32 %v6047_v41, %v8680_v9  ;;  %v2670_v31 = vmul.f32 %v5934_v57, %v8682_v37  ;;  %v2736_v20 = vsel %vm8840_vm6, 0.0, %v8684_v59  ;;  %vm3604_vm7 = vmor %vm3602_vm10, %vm3603_vm13 }
 0x3f0   : > { %v5188_v49 = vpop.eup %5187  ;;  %v4308_v15 = vsub.f32 0.0, %v4244_v6  ;;  %v3599_v55 = vsub.f32 1.0, %v3598_v63  ;;  %v2769_v40 = vmul.f32 %v6057_v29, %v2736_v20  ;;  %v2900_v2 = vmul.f32 %v6106_v35, %v8884_v7  ;;  %v4613_v20 = vpop.f32.mrf.mxu2 }
 0x3f1   : > { %v5190_v24 = vpop.eup %5189  ;;  %v3964_v22 = vadd.f32 -0.28449672, %v3932_v19  ;;  %v3718_v34 = vmul.f32 %v5188_v49, %v8865_v25  ;;  %vm3723_vm5 = vweird.f32 %v5188_v49  ;;  %v2702_v14 = vadd.f32 %v2670_v31, %v2635_v60  ;;  %v9620_v31 = vld [vmem:[#allocation19_spill] sm:$0xff] }
 0x3f2   : > { %v4340_v42 = vsel %vm4276_vm11, %v4308_v15, %v4244_v6  ;;  %v3600_v38 = vmul.f32 %v5186_v50, %v3599_v55  ;;  %v2935_v56 = vmul.f32 %v6087_v62, %v8898_v26  ;;  %v3001_v5 = vsel %vm8840_vm6, 0.0, %v8902_v46  ;;  %vm3724_vm1 = vmor %vm3722_vm4, %vm3723_vm5 }
 0x3f3   : > { %v3996_v8 = vmul.f32 %v3964_v22, %v8851_v17  ;;  %v4372_v30 = vadd.f32 1.0, %v4340_v42  ;;  %v3719_v63 = vsub.f32 1.0, %v3718_v34  ;;  %v2801_v19 = vadd.f32 %v2769_v40, %v2702_v14  ;;  %v5279_v40 = vld [vmem:[%s5506_s19 + $0x68] sm:$0xff] }
 0x3f4   : > { %v3601_v16 = vadd.f32 %v5186_v50, %v3600_v38  ;;  %v2967_v60 = vadd.f32 %v2935_v56, %v2900_v2  ;;  %v3034_v6 = vmul.f32 %v8922_v13, %v3001_v5  ;;  %v2627_v32 = vmul.f32 %v6047_v41, %v9620_v31  ;;  %v9621_v5 = vld [vmem:[#allocation7_spill] sm:$0xff] }
 0x3f5   : > { %v4028_v15 = vadd.f32 0.2548296, %v3996_v8  ;;  %v4404_v55 = vmul.f32 %v4372_v30, %v8863_v39  ;;  %v3720_v22 = vmul.f32 %v5188_v49, %v3719_v63  ;;  %v4614_v34 = vadd.f32 %v8691_v23, %v4613_v20 }
 0x3f6   : > { %vm4284_vm3 = vcmp.lt.f32.partialorder %v8743_v45, 0.0  ;;  %v4687_v2 = vmul.f32 %v5279_v40, %v8677_v28  ;;  %v3605_v14 = vsel %vm3604_vm7, %v5186_v50, %v3601_v16  ;;  %v2833_v42 = vadd.f32 %v2801_v19, %v2536_v21  ;;  %v9622_v50 = vld [vmem:[#allocation21_spill] sm:$0xff] }
 0x3f7   : > { %v3066_v38 = vadd.f32 %v3034_v6, %v2967_v60  ;;  %v4060_v56 = vmul.f32 %v4028_v15, %v8851_v17  ;;  %v4436_v39 = vmul.f32 %v4404_v55, %v9621_v5  ;;  %v3721_v8 = vadd.f32 %v5188_v49, %v3720_v22  ;;  %v8968_v55 = vld [vmem:[#allocation2 + $0xcf] sm:$0xff]  ;;  %v1551_v22 = vpop.f32.mrf.mxu3 }
 0x3f8   : > { %v8939_v30 = vsel %vm8890_vm15, %v3609_v33, %v3605_v14  ;;  %v4719_v52 = vadd.f32 %v4687_v2, %v4614_v34  ;;  %v2662_v21 = vmul.f32 %v5934_v57, %v9622_v50  ;;  %vm3727_vm12 = vcmp.eq.f32.partialorder %v3726_v27, 8.507059e+37  ;;  %v9623_v33 = vld [vmem:[#allocation22_spill] sm:$0xff] }
 0x3f9   : > { %v3797_v63 = vmul.f32 1.0614054, %v8939_v30  ;;  %v3098_v16 = vadd.f32 %v3066_v38, %v2833_v42  ;;  %v4220_v19 = vmul.f32 %v5190_v24, %v4060_v56  ;;  %4938 = vmatmul.msk.f32.gmra.mxu2 %vm1566_vm8, %v4436_v39  ;;  %v3725_v17 = vsel %vm3724_vm1, %v5188_v49, %v3721_v8  ;;  %v8961_v24 = vld [vmem:[%s9395_s8] ss:$0 sm:$0xff]  ;;  %v8983_v39 = vld [vmem:[#allocation2 + $0xd1] sm:$0xff] }
 0x3fa   : > { %v2728_v20 = vsel %vm8251_vm2, 0.0, %v9623_v33  ;;  %v8954_v60 = vsel %vm3727_vm12, %v8887_v54, %v3725_v17  ;;  %4751 = vst.msk [vmem:[%s7270_s28 + $0x68] sm:$0xff] %vm446_vm0, %v4719_v52  ;;  %v2694_v25 = vadd.f32 %v2662_v21, %v2627_v32  ;;  %v2892_v54 = vmul.f32 %v8968_v55, %v6106_v35  ;;  %v8979_v32 = vld [vmem:[#allocation2 + $0xd0] sm:$0xff] }
 0x3fb   : > { %v3829_v6 = vadd.f32 -1.4531521, %v3797_v63  ;;  %v8964_v49 = vadd.f32 %v8961_v24, %v3098_v16  ;;  %v4252_v27 = vsub.f32 1.0, %v4220_v19  ;;  %v3805_v31 = vmul.f32 1.0614054, %v8954_v60 }
 0x3fc   : > { %v2761_v15 = vmul.f32 %v6057_v29, %v2728_v20  ;;  %v9625_v34 = vsub.f32 0.0, %v8838_v58  ;;  %v2927_v42 = vmul.f32 %v8979_v32, %v6087_v62  ;;  %v2993_v8 = vsel %vm8251_vm2, 0.0, %v8983_v39 }
 0x3fd   : > { %v3861_v2 = vmul.f32 %v3829_v6, %v8939_v30  ;;  %v8977_v14 = vmul.f32 0.70710677, %v8964_v49  ;;  %v4316_v38 = vsub.f32 0.0, %v4252_v27  ;;  %v3837_v56 = vadd.f32 -1.4531521, %v3805_v31 }
 0x3fe   : > { %v4125_v40 = vmul.f32 %v9625_v34, %v8838_v58  ;;  %v2793_v5 = vadd.f32 %v2761_v15, %v2694_v25  ;;  %v4169_v52 = vmul.f32 1.442695, %v8882_v61  ;;  %v2959_v21 = vadd.f32 %v2927_v42, %v2892_v54  ;;  %v9626_v25 = vld [vmem:[#allocation11_spill] sm:$0xff] }
 0x3ff   : > { %v3893_v58 = vadd.f32 1.4214138, %v3861_v2  ;;  %v3230_v63 = vand.u32 2147483647, %v8977_v14  ;;  %v4348_v16 = vsel %vm4284_vm3, %v4316_v38, %v4252_v27  ;;  %v3869_v50 = vmul.f32 %v3837_v56, %v8954_v60 }
 0x400   : > { %v3026_v19 = vmul.f32 %v8922_v13, %v2993_v8  ;;  %v4380_v17 = vadd.f32 1.0, %v4348_v16  ;;  %v4185_v33 = vmul.f32 1.442695, %v4125_v40  ;;  %v2825_v31 = vadd.f32 %v2793_v5, %v9626_v25  ;;  %v4616_v5 = vpop.f32.mrf.mxu2  ;;  %v1554_v8 = vpop.f32.mrf.mxu3 }
 0x401   : > { %v3925_v20 = vmul.f32 %v3893_v58, %v8939_v30  ;;  %v3262_v6 = vmul.f32 0.3275911, %v3230_v63  ;;  %v3901_v18 = vadd.f32 1.4214138, %v3869_v50  ;;  %v1636_v61 = vadd.s32 240, %v5872_v44 }
 0x402   : > { %v3058_v15 = vadd.f32 %v3026_v19, %v2959_v21  ;;  %v1552_v34 = vadd.f32 %v8788_v48, %v1551_v22  ;;  %v4412_v45 = vmul.f32 %v4380_v17, %v8868_v51  ;;  %5191 = vpow2.f32 %v4169_v52  ;;  %v5284_v21 = vld [vmem:[%s5506_s19 + $0x70] sm:$0xff]  ;;  %v9627_v19 = vld [vmem:[#allocation13_spill] sm:$0xff] }
 0x403   : > { %v3957_v27 = vadd.f32 -0.28449672, %v3925_v20  ;;  %v8999_v2 = vadd.f32 1.0, %v3262_v6  ;;  %v3933_v54 = vmul.f32 %v3901_v18, %v8954_v60  ;;  %v1852_v51 = vand.u32 15, %v1636_v61 }
 0x404   : > { %v3090_v40 = vadd.f32 %v3058_v15, %v2825_v31  ;;  %v4444_v42 = vmul.f32 %v4412_v45, %v1552_v34  ;;  %v4094_v16 = vsub.f32 0.0, %v3230_v63  ;;  %v4617_v50 = vadd.f32 %v8691_v23, %v4616_v5  ;;  %v5286_v5 = vld [vmem:[#allocation2 + $0xf7] sm:$0xff] }
 0x405   : > { %v3989_v38 = vmul.f32 %v3957_v27, %v8939_v30  ;;  %5193 = vrcp.f32 %v8999_v2  ;;  %v3965_v56 = vadd.f32 -0.28449672, %v3933_v54  ;;  %v4688_v52 = vmul.f32 %v5284_v21, %v8677_v28 }
 0x406   : > { %5195 = vpow2.f32 %v4185_v33  ;;  %v9005_v22 = vadd.f32 %v8961_v24, %v3090_v40  ;;  %4946 = vmatmul.msk.f32.gmra.mxu3 %vm1566_vm8, %v4444_v42  ;;  %v9013_v17 = vadd.f32 %v8788_v48, %v9627_v19  ;;  %v3157_v20 = vmul.f32 0.5, %v8806_v53  ;;  %v5285_v40 = vld [vmem:[#allocation2 + $0xf8] sm:$0xff] }
 0x407   : > { %v4021_v58 = vadd.f32 0.2548296, %v3989_v38  ;;  %v3997_v33 = vmul.f32 %v3965_v56, %v8954_v60  ;;  %vm4277_vm2 = vcmp.lt.f32.partialorder %v8817_v43, 0.0  ;;  %v4720_v18 = vadd.f32 %v4688_v52, %v4617_v50 }
 0x408   : > { %v9020_v25 = vmul.f32 0.70710677, %v9005_v22  ;;  %v5192_v31 = vpop.eup %5191  ;;  %v9023_v15 = vadd.f32 %v8788_v48, %v1554_v8  ;;  %v9026_v61 = vmul.f32 0.5, %v8821_v0  ;;  %vm9028_vm9 = vcmp.eq.s32.totalorder %v1852_v51, 0 }
 0x409   : > { %v4053_v6 = vmul.f32 %v4021_v58, %v8939_v30  ;;  %v4029_v34 = vadd.f32 0.2548296, %v3997_v33  ;;  %vm4285_vm6 = vcmp.lt.f32.partialorder %v8833_v3, 0.0  ;;  %v4126_v27 = vmul.f32 %v4094_v16, %v3230_v63  ;;  %4752 = vst.msk [vmem:[%s7270_s28 + $0x70] sm:$0xff] %vm446_vm0, %v4720_v18 }
 0x40a   : > { %v9036_v54 = vand.u32 2147483647, %v9020_v25  ;;  %v2312_v42 = vmul.f32 %v5285_v40, %v5905_v1  ;;  %v2214_v51 = vsel %vm9028_vm9, 0.0, %v5286_v5  ;;  %v2505_v63 = vmul.f32 %v5939_v4, %v8504_v36 }
 0x40b   : > { %v5194_v53 = vpop.eup %5193  ;;  %v4213_v30 = vmul.f32 %v5192_v31, %v4053_v6  ;;  %v4061_v38 = vmul.f32 %v4029_v34, %v8954_v60  ;;  %v3741_v58 = vand.u32 2147483647, %v8999_v2  ;;  %v2603_v50 = vsel %vm9028_vm9, 0.0, %v8756_v47 }
 0x40c   : > { %v5196_v0 = vpop.eup %5195  ;;  %v3733_v56 = vmul.f32 %v5194_v53, %v8999_v2  ;;  %v3254_v16 = vmul.f32 0.3275911, %v9036_v54  ;;  %v2636_v52 = vmul.f32 %v6047_v41, %v2603_v50  ;;  %v2671_v19 = vmul.f32 %v5934_v57, %v8768_v12  ;;  %v2903_v50 = vld [vmem:[#allocation2 + $0x118] sm:$0xff] }
 0x40d   : > { %v4245_v8 = vsub.f32 1.0, %v4213_v30  ;;  %v4221_v21 = vmul.f32 %v5196_v0, %v4061_v38  ;;  %v3743_v6 = vand.u32 2147483648, %v8999_v2  ;;  %v2247_v18 = vmul.f32 %v5900_v11, %v2214_v51  ;;  %v2836_v30 = vld [vmem:[#allocation2 + $0x117] sm:$0xff] }
 0x40e   : > { %v3734_v60 = vsub.f32 1.0, %v3733_v56  ;;  %v9054_v36 = vadd.f32 1.0, %v3254_v16  ;;  %vm3738_vm11 = vweird.f32 %v5194_v53  ;;  %v2770_v47 = vmul.f32 %v6057_v29, %v8793_v10 }
 0x40f   : > { %v4309_v33 = vsub.f32 0.0, %v4245_v8  ;;  %v4253_v31 = vsub.f32 1.0, %v4221_v21  ;;  %vm3737_vm10 = vweird.f32 %v8999_v2  ;;  %v9062_v12 = vmul.f32 1.442695, %v4126_v27  ;;  %v2970_v21 = vld [vmem:[#allocation2 + $0x119] sm:$0xff] }
 0x410   : > { %v3735_v34 = vmul.f32 %v5194_v53, %v3734_v60  ;;  %5197 = vrcp.f32 %v9054_v36  ;;  %v2703_v5 = vadd.f32 %v2671_v19, %v2636_v52  ;;  %vm3739_vm13 = vmor %vm3737_vm10, %vm3738_vm11  ;;  %vm3742_vm15 = vcmp.eq.f32.partialorder %v3741_v58, 8.507059e+37  ;;  %v5287_v52 = vld [vmem:[#allocation2 + $0xb9] sm:$0xff] }
 0x411   : > { %v4341_v40 = vsel %vm4277_vm2, %v4309_v33, %v4245_v8  ;;  %v4317_v0 = vsub.f32 0.0, %v4253_v31  ;;  %v3744_v51 = vor.u32 1.1754944e-38, %v3743_v6  ;;  %v2344_v16 = vadd.f32 %v2312_v42, %v2247_v18 }
 0x412   : > { %v4373_v38 = vadd.f32 1.0, %v4341_v40  ;;  %v3736_v56 = vadd.f32 %v5194_v53, %v3735_v34  ;;  %v2868_v10 = vsel %vm9028_vm9, 0.0, %v2836_v30  ;;  %v2802_v8 = vadd.f32 %v2770_v47, %v2703_v5 }
 0x413   : > { %v4349_v43 = vsel %vm4285_vm6, %v4317_v0, %v4253_v31  ;;  %v2537_v34 = vadd.f32 %v2505_v63, %v2344_v16  ;;  %v2497_v58 = vmul.f32 %v5287_v52, %v5939_v4  ;;  %v2901_v19 = vmul.f32 %v6106_v35, %v2868_v10  ;;  %v5288_v31 = vld [vmem:[#allocation2 + $0xc7] sm:$0xff] }
 0x414   : > { %v4405_v2 = vmul.f32 %v4373_v38, %v3157_v20  ;;  %v3740_v27 = vsel %vm3739_vm13, %v5194_v53, %v3736_v56  ;;  %v4381_v60 = vadd.f32 1.0, %v4349_v43  ;;  %v2936_v3 = vmul.f32 %v6087_v62, %v2903_v50 }
 0x415   : > { %v9069_v33 = vsel %vm3742_vm15, %v3744_v51, %v3740_v27  ;;  %v3621_v53 = vand.u32 2147483647, %v9054_v36  ;;  %v3035_v18 = vmul.f32 %v8922_v13, %v2970_v21  ;;  %v2595_v47 = vsel %vm8331_vm14, 0.0, %v5288_v31  ;;  %v5290_v51 = vld [vmem:[#allocation2 + $0xc9] sm:$0xff]  ;;  %v5293_v31 = vld [vmem:[#allocation2 + $0xd9] sm:$0xff] }
 0x416   : > { %v4437_v42 = vmul.f32 %v4405_v2, %v9013_v17  ;;  %v3806_v45 = vmul.f32 1.0614054, %v9069_v33  ;;  %v5198_v6 = vpop.eup %5197  ;;  %v4413_v20 = vmul.f32 %v4381_v60, %v9026_v61  ;;  %v2834_v40 = vadd.f32 %v2802_v8, %v2537_v34  ;;  %v5289_v61 = vld [vmem:[#allocation2 + $0xc8] sm:$0xff]  ;;  %v5291_v2 = vld [vmem:[#allocation2 + $0xd7] sm:$0xff] }
 0x417   : > { %v3613_v30 = vmul.f32 %v5198_v6, %v9054_v36  ;;  %v2968_v0 = vadd.f32 %v2936_v3, %v2901_v19  ;;  %v2628_v56 = vmul.f32 %v6047_v41, %v2595_v47  ;;  %v2663_v5 = vmul.f32 %v5289_v61, %v5934_v57  ;;  %v5292_v60 = vld [vmem:[#allocation2 + $0xd8] sm:$0xff]  ;;  %v9631_v19 = vld [vmem:[#allocation12_spill] sm:$0xff] }
 0x418   : > { %4939 = vmatmul.msk.f32.gmra.mxu2 %vm1566_vm8, %v4437_v42  ;;  %v3838_v17 = vadd.f32 -1.4531521, %v3806_v45  ;;  %v4445_v38 = vmul.f32 %v4413_v20, %v9023_v15  ;;  %v2762_v16 = vmul.f32 %v5290_v51, %v6057_v29  ;;  %v2860_v27 = vsel %vm8331_vm14, 0.0, %v5291_v2 }
 0x419   : > { %v3614_v50 = vsub.f32 1.0, %v3613_v30  ;;  %v3067_v43 = vadd.f32 %v3035_v18, %v2968_v0  ;;  %v3623_v8 = vand.u32 2147483648, %v9054_v36  ;;  %v2695_v21 = vadd.f32 %v2663_v5, %v2628_v56 }
 0x41a   : > { %v3870_v10 = vmul.f32 %v3838_v17, %v9069_v33  ;;  %v2893_v15 = vmul.f32 %v6106_v35, %v2860_v27  ;;  %v2928_v34 = vmul.f32 %v5292_v60, %v6087_v62  ;;  %4947 = vmatmul.msk.f32.gmra.mxu3 %vm1566_vm8, %v4445_v38  ;;  %vm3618_vm4 = vweird.f32 %v5198_v6 }
 0x41b   : > { %v3615_v42 = vmul.f32 %v5198_v6, %v3614_v50  ;;  %v3099_v45 = vadd.f32 %v3067_v43, %v2834_v40  ;;  %v2529_v3 = vadd.f32 %v2497_v58, %v9631_v19  ;;  %v2794_v20 = vadd.f32 %v2762_v16, %v2695_v21  ;;  %v1557_v19 = vpop.f32.mrf.mxu3 }
 0x41c   : > { %v3902_v52 = vadd.f32 1.4214138, %v3870_v10  ;;  %v2960_v18 = vadd.f32 %v2928_v34, %v2893_v15  ;;  %v3027_v63 = vmul.f32 %v5293_v31, %v8922_v13  ;;  %vm3617_vm14 = vweird.f32 %v9054_v36 }
 0x41d   : > { %v3616_v17 = vadd.f32 %v5198_v6, %v3615_v42  ;;  %v9099_v30 = vadd.f32 %v8961_v24, %v3099_v45  ;;  %vm3619_vm5 = vmor %vm3617_vm14, %vm3618_vm4  ;;  %v3624_v0 = vor.u32 1.1754944e-38, %v3623_v8  ;;  %v2826_v38 = vadd.f32 %v2794_v20, %v2529_v3 }
 0x41e   : > { %v3934_v47 = vmul.f32 %v3902_v52, %v9069_v33  ;;  %v3059_v56 = vadd.f32 %v3027_v63, %v2960_v18  ;;  %v1637_v40 = vadd.s32 248, %v5872_v44  ;;  %vm3622_vm7 = vcmp.eq.f32.partialorder %v3621_v53, 8.507059e+37 }
 0x41f   : > { %v3620_v61 = vsel %vm3619_vm5, %v5198_v6, %v3616_v17  ;;  %v9103_v5 = vmul.f32 0.70710677, %v9099_v30  ;;  %5199 = vpow2.f32 %v9062_v12  ;;  %v4086_v36 = vsub.f32 0.0, %v9036_v54 }
 0x420   : > { %v3966_v58 = vadd.f32 -0.28449672, %v3934_v47  ;;  %v3625_v51 = vsel %vm3622_vm7, %v3624_v0, %v3620_v61  ;;  %v3091_v16 = vadd.f32 %v3059_v56, %v2826_v38  ;;  %v1859_v6 = vand.u32 15, %v1637_v40 }
 0x421   : > { %v3798_v50 = vmul.f32 1.0614054, %v3625_v51  ;;  %v9109_v43 = vand.u32 2147483647, %v9103_v5  ;;  %v4118_v12 = vmul.f32 %v4086_v36, %v9036_v54  ;;  %v1558_v47 = vadd.f32 %v8788_v48, %v1557_v19  ;;  %v2837_v36 = vld [vmem:[#allocation2 + $0x11f] sm:$0xff] }
 0x422   : > { %v3998_v10 = vmul.f32 %v3966_v58, %v9069_v33  ;;  %v9112_v2 = vadd.f32 %v8961_v24, %v3091_v16  ;;  %vm9125_vm3 = vcmp.eq.s32.totalorder %v1859_v6, 15  ;;  %v3166_v17 = vmul.f32 0.5, %v8964_v49 }
 0x423   : > { %v3830_v27 = vadd.f32 -1.4531521, %v3798_v50  ;;  %v3263_v8 = vmul.f32 0.3275911, %v9109_v43  ;;  %v4171_v54 = vmul.f32 1.442695, %v4118_v12  ;;  %v2248_v0 = vmul.f32 %v5900_v11, %v8680_v9 }
 0x424   : > { %v4030_v53 = vadd.f32 0.2548296, %v3998_v10  ;;  %v9117_v21 = vmul.f32 0.70710677, %v9112_v2  ;;  %v2473_v63 = vsel %vm9125_vm3, 0.0, %v8684_v59  ;;  %v2313_v38 = vmul.f32 %v5905_v1, %v8682_v37 }
 0x425   : > { %v3862_v60 = vmul.f32 %v3830_v27, %v3625_v51  ;;  %v9120_v34 = vadd.f32 1.0, %v3263_v8  ;;  %v5200_v52 = vpop.eup %5199  ;;  %v2637_v61 = vmul.f32 %v6047_v41, %v8884_v7  ;;  %vm4286_vm1 = vcmp.lt.f32.partialorder %v8977_v14, 0.0  ;;  %v2971_v27 = vld [vmem:[#allocation2 + $0x121] sm:$0xff] }
 0x426   : > { %v4062_v15 = vmul.f32 %v4030_v53, %v9069_v33  ;;  %v9123_v42 = vand.u32 2147483647, %v9117_v21  ;;  %v2506_v59 = vmul.f32 %v5939_v4, %v2473_v63  ;;  %v2672_v49 = vmul.f32 %v5934_v57, %v8898_v26  ;;  %v2904_v53 = vld [vmem:[#allocation2 + $0x120] sm:$0xff] }
 0x427   : > { %v3894_v20 = vadd.f32 1.4214138, %v3862_v60  ;;  %5201 = vrcp.f32 %v9120_v34  ;;  %v2738_v37 = vsel %vm9125_vm3, 0.0, %v8902_v46  ;;  %v3756_v14 = vand.u32 2147483647, %v9120_v34 }
 0x428   : > { %v4222_v3 = vmul.f32 %v5200_v52, %v4062_v15  ;;  %v3255_v33 = vmul.f32 0.3275911, %v9123_v42  ;;  %5203 = vpow2.f32 %v4171_v54  ;;  %v2345_v6 = vadd.f32 %v2313_v38, %v2248_v0 }
 0x429   : > { %v3926_v31 = vmul.f32 %v3894_v20, %v3625_v51  ;;  %v3758_v26 = vand.u32 2147483648, %v9120_v34  ;;  %v2704_v12 = vadd.f32 %v2672_v49, %v2637_v61  ;;  %v2902_v15 = vmul.f32 %v6106_v35, %v2837_v36  ;;  %v4619_v36 = vpop.f32.mrf.mxu2 }
 0x42a   : > { %v4254_v18 = vsub.f32 1.0, %v4222_v3  ;;  %v9140_v58 = vadd.f32 1.0, %v3255_v33  ;;  %vm4278_vm12 = vcmp.lt.f32.partialorder %v9020_v25, 0.0  ;;  %v2538_v19 = vadd.f32 %v2506_v59, %v2345_v6 }
 0x42b   : > { %v3958_v40 = vadd.f32 -0.28449672, %v3926_v31  ;;  %v2771_v46 = vmul.f32 %v6057_v29, %v2738_v37  ;;  %v2937_v20 = vmul.f32 %v6087_v62, %v2904_v53  ;;  %v3003_v54 = vsel %vm9125_vm3, 0.0, %v2971_v27 }
 0x42c   : > { %v4318_v56 = vsub.f32 0.0, %v4254_v18  ;;  %5205 = vrcp.f32 %v9140_v58  ;;  %vm3752_vm9 = vweird.f32 %v9120_v34  ;;  %vm9164_vm6 = vcmp.eq.f32.partialorder %v3756_v14, 8.507059e+37 }
 0x42d   : > { %v5202_v9 = vpop.eup %5201  ;;  %v3990_v10 = vmul.f32 %v3958_v40, %v3625_v51  ;;  %v2803_v63 = vadd.f32 %v2771_v46, %v2704_v12  ;;  %v3759_v49 = vor.u32 1.1754944e-38, %v3758_v26  ;;  %v3636_v14 = vand.u32 2147483647, %v9140_v58 }
 0x42e   : > { %v4350_v16 = vsel %vm4286_vm1, %v4318_v56, %v4254_v18  ;;  %v3748_v7 = vmul.f32 %v5202_v9, %v9120_v34  ;;  %vm3753_vm2 = vweird.f32 %v5202_v9  ;;  %v5204_v18 = vpop.eup %5203  ;;  %v4095_v56 = vsub.f32 0.0, %v9109_v43 }
 0x42f   : > { %v4382_v50 = vadd.f32 1.0, %v4350_v16  ;;  %v4022_v8 = vadd.f32 0.2548296, %v3990_v10  ;;  %vm3754_vm11 = vmor %vm3752_vm9, %vm3753_vm2  ;;  %v5294_v16 = vld [vmem:[%s5506_s19 + $0x78] sm:$0xff]  ;;  %v3638_v27 = vand.u32 2147483648, %v9140_v58  ;;  %vm3632_vm13 = vweird.f32 %v9140_v58 }
 0x430   : > { %v3749_v52 = vsub.f32 1.0, %v3748_v7  ;;  %v4689_v34 = vmul.f32 %v5294_v16, %v8677_v28  ;;  %v3158_v28 = vmul.f32 0.5, %v9005_v22  ;;  %vm3637_vm4 = vcmp.eq.f32.partialorder %v3636_v14, 8.507059e+37 }
 0x431   : > { %v4414_v60 = vmul.f32 %v4382_v50, %v3166_v17  ;;  %v4054_v3 = vmul.f32 %v4022_v8, %v3625_v51  ;;  %v3036_v17 = vmul.f32 %v8922_v13, %v3003_v54  ;;  %v2969_v51 = vadd.f32 %v2937_v20, %v2902_v15 }
 0x432   : > { %v3750_v33 = vmul.f32 %v5202_v9, %v3749_v52  ;;  %v5206_v0 = vpop.eup %5205  ;;  %v4620_v50 = vadd.f32 %v8691_v23, %v4619_v36  ;;  %v3639_v22 = vor.u32 1.1754944e-38, %v3638_v27  ;;  %vm4287_vm5 = vcmp.lt.f32.partialorder %v9103_v5, 0.0 }
 0x433   : > { %v4446_v31 = vmul.f32 %v4414_v60, %v1558_v47  ;;  %v4214_v38 = vmul.f32 %v5204_v18, %v4054_v3  ;;  %v3628_v45 = vmul.f32 %v5206_v0, %v9140_v58  ;;  %v2835_v47 = vadd.f32 %v2803_v63, %v2538_v19  ;;  %v9636_v3 = vld [vmem:[#allocation16_spill] sm:$0xff] }
 0x434   : > { %v3751_v40 = vadd.f32 %v5202_v9, %v3750_v33  ;;  %v3068_v10 = vadd.f32 %v3036_v17, %v2969_v51  ;;  %v4721_v12 = vadd.f32 %v4689_v34, %v4620_v50  ;;  %vm3633_vm10 = vweird.f32 %v5206_v0 }
 0x435   : > { %4948 = vmatmul.msk.f32.gmra.mxu3 %vm1566_vm8, %v4446_v31  ;;  %v4246_v59 = vsub.f32 1.0, %v4214_v38  ;;  %v3629_v7 = vsub.f32 1.0, %v3628_v45  ;;  %v1534_v20 = vadd.f32 %v8788_v48, %v9636_v3  ;;  %vm3634_vm15 = vmor %vm3632_vm13, %vm3633_vm10  ;;  %v4087_v33 = vsub.f32 0.0, %v9123_v42 }
 0x436   : > { %v3755_v37 = vsel %vm3754_vm11, %v5202_v9, %v3751_v40  ;;  %v3100_v8 = vadd.f32 %v3068_v10, %v2835_v47  ;;  %v4127_v9 = vmul.f32 %v4095_v56, %v9109_v43  ;;  %4753 = vst.msk [vmem:[%s7270_s28 + $0x78] sm:$0xff] %vm446_vm0, %v4721_v12  ;;  %v1629_v40 = vadd.s32 184, %v5872_v44 }
 0x437   : > { %v4310_v6 = vsub.f32 0.0, %v4246_v59  ;;  %v3760_v53 = vsel %vm9164_vm6, %v3759_v49, %v3755_v37  ;;  %v3630_v15 = vmul.f32 %v5206_v0, %v3629_v7  ;;  %vm4279_vm7 = vcmp.lt.f32.partialorder %v9117_v21, 0.0 }
 0x438   : > { %v3807_v26 = vmul.f32 1.0614054, %v3760_v53  ;;  %v9183_v60 = vadd.f32 %v8961_v24, %v3100_v8  ;;  %v4189_v38 = vmul.f32 1.442695, %v4127_v9  ;;  %v1803_v36 = vand.u32 15, %v1629_v40  ;;  %v5298_v40 = vld [vmem:[#allocation2 + $0xc0] sm:$0xff] }
 0x439   : > { %v4342_v23 = vsel %vm4278_vm12, %v4310_v6, %v4246_v59  ;;  %v3631_v46 = vadd.f32 %v5206_v0, %v3630_v15  ;;  %v5295_v15 = vld [vmem:[#allocation2 + $0xe1] sm:$0xff] }
 0x43a   : > { %v4374_v52 = vadd.f32 1.0, %v4342_v23  ;;  %v3839_v19 = vadd.f32 -1.4531521, %v3807_v26  ;;  %v9191_v25 = vmul.f32 0.70710677, %v9183_v60  ;;  %5207 = vpow2.f32 %v4189_v38 }
 0x43b   : > { %v3635_v18 = vsel %vm3634_vm15, %v5206_v0, %v3631_v46  ;;  %v4119_v0 = vmul.f32 %v4087_v33, %v9123_v42  ;;  %vm9201_vm14 = vcmp.eq.s32.totalorder %v1803_v36, 15  ;;  %v1560_v42 = vpop.f32.mrf.mxu3  ;;  %v3167_v23 = vmul.f32 0.5, %v9099_v30 }
 0x43c   : > { %v4406_v54 = vmul.f32 %v4374_v52, %v3158_v28  ;;  %v3871_v43 = vmul.f32 %v3839_v19, %v3760_v53  ;;  %v3640_v31 = vsel %vm3637_vm4, %v3639_v22, %v3635_v18  ;;  %v9195_v63 = vand.u32 2147483647, %v9191_v25  ;;  %v5296_v19 = vld [vmem:[#allocation2 + $0xe0] sm:$0xff] }
 0x43d   : > { %v3799_v56 = vmul.f32 1.0614054, %v3640_v31  ;;  %v4173_v10 = vmul.f32 1.442695, %v4119_v0  ;;  %v2995_v28 = vsel %vm9201_vm14, 0.0, %v5295_v15  ;;  %v2929_v46 = vmul.f32 %v5296_v19, %v6087_v62 }
 0x43e   : > { %v4438_v17 = vmul.f32 %v4406_v54, %v1534_v20  ;;  %v3903_v58 = vadd.f32 1.4214138, %v3871_v43  ;;  %v3264_v51 = vmul.f32 0.3275911, %v9195_v63  ;;  %v4096_v54 = vsub.f32 0.0, %v9195_v63 }
 0x43f   : > { %v3831_v45 = vadd.f32 -1.4531521, %v3799_v56  ;;  %v3028_v43 = vmul.f32 %v8922_v13, %v2995_v28  ;;  %v2305_v13 = vmul.f32 %v5298_v40, %v5905_v1  ;;  %v9224_v0 = vld [vmem:[%s9398_s11] ss:$0 sm:$0xff]  ;;  %v3159_v15 = vmul.f32 0.5, %v9112_v2  ;;  %v9641_v2 = vld [vmem:[#allocation18_spill] sm:$0xff] }
 0x440   : > { %4940 = vmatmul.msk.f32.gmra.mxu2 %vm1566_vm8, %v4438_v17  ;;  %v3935_v61 = vmul.f32 %v3903_v58, %v3760_v53  ;;  %v3296_v47 = vadd.f32 1.0, %v3264_v51  ;;  %v5208_v44 = vpop.eup %5207  ;;  %v5297_v58 = vld [vmem:[#allocation2 + $0xbf] sm:$0xff]  ;;  %v4128_v7 = vmul.f32 %v4096_v54, %v9195_v63  ;;  %vm4288_vm9 = vcmp.lt.f32.partialorder %v9191_v25, 0.0 }
 0x441   : > { %v3863_v49 = vmul.f32 %v3831_v45, %v3640_v31  ;;  %v2240_v5 = vmul.f32 %v5297_v58, %v5900_v11  ;;  %v5299_v45 = vld [vmem:[%s5506_s19 + $0x80] sm:$0xff] }
 0x442   : > { %v3967_v59 = vadd.f32 -0.28449672, %v3935_v61  ;;  %5209 = vrcp.f32 %v3296_v47  ;;  %v3771_v9 = vand.u32 2147483647, %v3296_v47  ;;  %v3773_v52 = vand.u32 2147483648, %v3296_v47  ;;  %v4622_v61 = vpop.f32.mrf.mxu2 }
 0x443   : > { %v3895_v34 = vadd.f32 1.4214138, %v3863_v49  ;;  %5211 = vpow2.f32 %v4173_v10  ;;  %vm3767_vm1 = vweird.f32 %v3296_v47  ;;  %v2629_v49 = vmul.f32 %v8968_v55, %v6047_v41 }
 0x444   : > { %v3999_v16 = vmul.f32 %v3967_v59, %v3760_v53  ;;  %vm9214_vm12 = vcmp.eq.f32.partialorder %v3771_v9, 8.507059e+37  ;;  %v5301_v59 = vld [vmem:[#allocation2 + $0xc1] sm:$0xff]  ;;  %v2730_v41 = vsel %vm9201_vm14, 0.0, %v8983_v39 }
 0x445   : > { %v3927_v50 = vmul.f32 %v3895_v34, %v3640_v31  ;;  %v2465_v11 = vsel %vm9201_vm14, 0.0, %v5301_v59 }
 0x446   : > { %v4031_v37 = vadd.f32 0.2548296, %v3999_v16  ;;  %v9234_v16 = vld [vmem:[%s9397_s10] ss:$0 sm:$0xff]  ;;  %v2498_v10 = vmul.f32 %v5939_v4, %v2465_v11  ;;  %v2763_v4 = vmul.f32 %v6057_v29, %v2730_v41  ;;  %v5305_v41 = vld [vmem:[%s5506_s19 + $0x88] sm:$0xff] }
 0x447   : > { %v3959_v6 = vadd.f32 -0.28449672, %v3927_v50  ;;  %v4623_v34 = vadd.f32 %v9234_v16, %v4622_v61 }
 0x448   : > { %v4063_v14 = vmul.f32 %v4031_v37, %v3760_v53  ;;  %v5210_v27 = vpop.eup %5209  ;;  %v1561_v53 = vadd.f32 %v8788_v48, %v1560_v42  ;;  %v3774_v48 = vor.u32 1.1754944e-38, %v3773_v52 }
 0x449   : > { %v3991_v26 = vmul.f32 %v3959_v6, %v3640_v31  ;;  %v3763_v12 = vmul.f32 %v5210_v27, %v3296_v47  ;;  %vm3768_vm3 = vweird.f32 %v5210_v27  ;;  %v5212_v17 = vpop.eup %5211  ;;  %v4690_v47 = vmul.f32 %v9224_v0, %v5299_v45 }
 0x44a   : > { %v4223_v8 = vmul.f32 %v5208_v44, %v4063_v14  ;;  %vm3769_vm2 = vmor %vm3767_vm1, %vm3768_vm3  ;;  %v2664_v44 = vmul.f32 %v8979_v32, %v5934_v57 }
 0x44b   : > { %v4023_v20 = vadd.f32 0.2548296, %v3991_v26  ;;  %v3764_v22 = vsub.f32 1.0, %v3763_v12  ;;  %v4722_v6 = vadd.f32 %v4690_v47, %v4623_v34  ;;  %v5303_v26 = vld [vmem:[#allocation2 + $0xdf] sm:$0xff] }
 0x44c   : > { %v4255_v3 = vsub.f32 1.0, %v4223_v8  ;;  %v2696_v8 = vadd.f32 %v2664_v44, %v2629_v49  ;;  %v2894_v12 = vmul.f32 %v5303_v26, %v6106_v35  ;;  %v9257_v35 = vld [vmem:[%s9393_s6] ss:$0 sm:$0xff]  ;;  %v4625_v44 = vpop.f32.mrf.mxu2 }
 0x44d   : > { %v4055_v30 = vmul.f32 %v4023_v20, %v3640_v31  ;;  %v3765_v33 = vmul.f32 %v5210_v27, %v3764_v22  ;;  %4754 = vst.msk [vmem:[%s7270_s28 + $0x80] sm:$0xff] %vm446_vm0, %v4722_v6  ;;  %v1537_v21 = vadd.f32 %v9257_v35, %v9641_v2  ;;  %v4191_v20 = vmul.f32 1.442695, %v4128_v7  ;;  %v5307_v2 = vld [vmem:[%s5506_s19 + $0x98] sm:$0xff] }
 0x44e   : > { %v4319_v18 = vsub.f32 0.0, %v4255_v3  ;;  %v2961_v9 = vadd.f32 %v2929_v46, %v2894_v12  ;;  %v4626_v6 = vadd.f32 %v9234_v16, %v4625_v44  ;;  %v5306_v12 = vld [vmem:[%s5506_s19 + $0x90] sm:$0xff] }
 0x44f   : > { %v4215_v56 = vmul.f32 %v5212_v17, %v4055_v30  ;;  %v3766_v51 = vadd.f32 %v5210_v27, %v3765_v33  ;;  %5213 = vpow2.f32 %v4191_v20 }
 0x450   : > { %v4351_v38 = vsel %vm4287_vm5, %v4319_v18, %v4255_v3  ;;  %v3060_v63 = vadd.f32 %v3028_v43, %v2961_v9 }
 0x451   : > { %v4383_v31 = vadd.f32 1.0, %v4351_v38  ;;  %v4247_v36 = vsub.f32 1.0, %v4215_v56  ;;  %v3770_v1 = vsel %vm3769_vm2, %v5210_v27, %v3766_v51  ;;  %v2337_v27 = vadd.f32 %v2305_v13, %v2240_v5 }
 0x452   : > { %v3775_v50 = vsel %vm9214_vm12, %v3774_v48, %v3770_v1 }
 0x453   : > { %v4415_v37 = vmul.f32 %v4383_v31, %v3167_v23  ;;  %v4311_v55 = vsub.f32 0.0, %v4247_v36  ;;  %v3808_v14 = vmul.f32 1.0614054, %v3775_v50  ;;  %v2530_v28 = vadd.f32 %v2498_v10, %v2337_v27 }
 0x454   : > { %v2795_v23 = vadd.f32 %v2763_v4, %v2696_v8  ;;  %v3168_v31 = vmul.f32 0.5, %v9183_v60 }
 0x455   : > { %v4447_v42 = vmul.f32 %v4415_v37, %v1561_v53  ;;  %v4343_v57 = vsel %vm4279_vm7, %v4311_v55, %v4247_v36  ;;  %v3840_v32 = vadd.f32 -1.4531521, %v3808_v14  ;;  %v5214_v58 = vpop.eup %5213  ;;  %v4691_v55 = vmul.f32 %v5305_v41, %v9224_v0  ;;  %v5313_v41 = vld [vmem:[%s5506_s19 + $0xd0] sm:$0xff] }
 0x456   : > { %v4375_v39 = vadd.f32 1.0, %v4343_v57  ;;  %v2827_v19 = vadd.f32 %v2795_v23, %v2530_v28 }
 0x457   : > { %4949 = vmatmul.msk.f32.gmra.mxu3 %vm1566_vm8, %v4447_v42  ;;  %v3872_v29 = vmul.f32 %v3840_v32, %v3775_v50  ;;  %v4723_v42 = vadd.f32 %v4691_v55, %v4626_v6  ;;  %v4700_v55 = vmul.f32 %v5313_v41, %v9224_v0 }
 0x458   : > { %v4407_v52 = vmul.f32 %v4375_v39, %v3159_v15  ;;  %v3092_v22 = vadd.f32 %v3060_v63, %v2827_v19  ;;  %v4692_v15 = vmul.f32 %v5306_v12, %v9224_v0  ;;  %v5315_v12 = vld [vmem:[%s5506_s19 + $0xe0] sm:$0xff] }
 0x459   : > { %v3904_v53 = vadd.f32 1.4214138, %v3872_v29  ;;  %4755 = vst.msk [vmem:[%s7270_s28 + $0x88] sm:$0xff] %vm446_vm0, %v4723_v42 }
 0x45a   : > { %v4439_v3 = vmul.f32 %v4407_v52, %v1537_v21  ;;  %v9263_v46 = vadd.f32 %v8961_v24, %v3092_v22  ;;  %v1563_v24 = vpop.f32.mrf.mxu3  ;;  %v4693_v21 = vmul.f32 %v5307_v2, %v9224_v0 }
 0x45b   : > { %v3936_v54 = vmul.f32 %v3904_v53, %v3775_v50  ;;  %v1564_v47 = vadd.f32 %v9257_v35, %v1563_v24  ;;  %v5309_v24 = vld [vmem:[%s5506_s19 + $0xc0] sm:$0xff] }
 0x45c   : > { %4941 = vmatmul.msk.f32.gmra.mxu2 %vm1566_vm8, %v4439_v3  ;;  %v9266_v30 = vmul.f32 0.70710677, %v9263_v46 }
 0x45d   : > { %v3968_v18 = vadd.f32 -0.28449672, %v3936_v54 }
 0x45e   : > { %v3224_v17 = vand.u32 2147483647, %v9266_v30  ;;  %vm4280_vm15 = vcmp.lt.f32.partialorder %v9266_v30, 0.0 }
 0x45f   : > { %v4000_v33 = vmul.f32 %v3968_v18, %v3775_v50 }
 0x460   : > { %v3256_v43 = vmul.f32 0.3275911, %v3224_v17 }
 0x461   : > { %v4032_v62 = vadd.f32 0.2548296, %v4000_v33  ;;  %v3160_v33 = vmul.f32 0.5, %v9263_v46 }
 0x462   : > { %v3288_v5 = vadd.f32 1.0, %v3256_v43  ;;  %v4646_v46 = vpop.f32.mrf.mxu3 }
 0x463   : > { %v4064_v48 = vmul.f32 %v4032_v62, %v3775_v50  ;;  %v4088_v50 = vsub.f32 0.0, %v3224_v17  ;;  %v9642_v62 = vld [vmem:[#allocation8_spill] sm:$0xff] }
 0x464   : > { %5215 = vrcp.f32 %v3288_v5  ;;  %v3653_v36 = vand.u32 2147483648, %v3288_v5  ;;  %v3651_v34 = vand.u32 2147483647, %v3288_v5  ;;  %vm3647_vm11 = vweird.f32 %v3288_v5 }
 0x465   : > { %v4224_v38 = vmul.f32 %v5214_v58, %v4064_v48  ;;  %v4120_v8 = vmul.f32 %v4088_v50, %v3224_v17  ;;  %v4628_v32 = vpop.f32.mrf.mxu2  ;;  %v1540_v43 = vadd.f32 %v9257_v35, %v9642_v62  ;;  %v4698_v35 = vmul.f32 %v5309_v24, %v9224_v0 }
 0x466   : > { %v3654_v10 = vor.u32 1.1754944e-38, %v3653_v36  ;;  %vm3652_vm13 = vcmp.eq.f32.partialorder %v3651_v34, 8.507059e+37  ;;  %v4629_v39 = vadd.f32 %v9234_v16, %v4628_v32 }
 0x467   : > { %v4256_v56 = vsub.f32 1.0, %v4224_v38  ;;  %v4175_v57 = vmul.f32 1.442695, %v4120_v8 }
 0x468   : > { %v4724_v23 = vadd.f32 %v4692_v15, %v4629_v39  ;;  %v4702_v15 = vmul.f32 %v5315_v12, %v9224_v0  ;;  %v5316_v39 = vld [vmem:[%s5506_s19 + $0xe8] sm:$0xff] }
 0x469   : > { %v4320_v51 = vsub.f32 0.0, %v4256_v56  ;;  %5217 = vpow2.f32 %v4175_v57 }
 0x46a   : > { %v5216_v13 = vpop.eup %5215  ;;  %4756 = vst.msk [vmem:[%s7270_s28 + $0x90] sm:$0xff] %vm446_vm0, %v4724_v23 }
 0x46b   : > { %v4352_v40 = vsel %vm4288_vm9, %v4320_v51, %v4256_v56  ;;  %v3643_v45 = vmul.f32 %v5216_v13, %v3288_v5  ;;  %vm3648_vm6 = vweird.f32 %v5216_v13  ;;  %v5308_v5 = vld [vmem:[%s5506_s19 + $0xa0] sm:$0xff] }
 0x46c   : > { %v4384_v61 = vadd.f32 1.0, %v4352_v40  ;;  %vm3649_vm10 = vmor %vm3647_vm11, %vm3648_vm6  ;;  %v4694_v38 = vmul.f32 %v5308_v5, %v9224_v0  ;;  %v4647_v40 = vadd.f32 %v9234_v16, %v4646_v46 }
 0x46d   : > { %v3644_v11 = vsub.f32 1.0, %v3643_v45 }
 0x46e   : > { %v4416_v59 = vmul.f32 %v4384_v61, %v3168_v31  ;;  %v5310_v31 = vld [vmem:[%s5506_s19 + $0xa8] sm:$0xff] }
 0x46f   : > { %v3645_v1 = vmul.f32 %v5216_v13, %v3644_v11  ;;  %v5218_v53 = vpop.eup %5217  ;;  %v4695_v61 = vmul.f32 %v5310_v31, %v9224_v0  ;;  %v5311_v11 = vld [vmem:[%s5506_s19 + $0xc8] sm:$0xff] }
 0x470   : > { %v4448_v49 = vmul.f32 %v4416_v59, %v1564_v47  ;;  %v4649_v59 = vpop.f32.mrf.mxu3 }
 0x471   : > { %v3646_v25 = vadd.f32 %v5216_v13, %v3645_v1  ;;  %v4650_v1 = vadd.f32 %v9234_v16, %v4649_v59 }
 0x472   : > { %4950 = vmatmul.msk.f32.gmra.mxu3 %vm1566_vm8, %v4448_v49  ;;  %v4699_v49 = vmul.f32 %v5311_v11, %v9224_v0 }
 0x473   : > { %v3650_v60 = vsel %vm3649_vm10, %v5216_v13, %v3646_v25  ;;  %v4730_v13 = vadd.f32 %v4698_v35, %v4647_v40  ;;  %v5312_v25 = vld [vmem:[%s5506_s19 + $0xb0] sm:$0xff] }
 0x474   : > { %v3655_v37 = vsel %vm3652_vm13, %v3654_v10, %v3650_v60  ;;  %v4731_v34 = vadd.f32 %v4699_v49, %v4650_v1  ;;  %v4696_v10 = vmul.f32 %v5312_v25, %v9224_v0 }
 0x475   : > { %v3800_v14 = vmul.f32 1.0614054, %v3655_v37  ;;  %4762 = vst.msk [vmem:[%s7270_s28 + $0xc0] sm:$0xff] %vm446_vm0, %v4730_v13 }
 0x476   : > { %4763 = vst.msk [vmem:[%s7270_s28 + $0xc8] sm:$0xff] %vm446_vm0, %v4731_v34 }
 0x477   : > { %v3832_v27 = vadd.f32 -1.4531521, %v3800_v14 }
 0x478   : > { %v4652_v44 = vpop.f32.mrf.mxu3 }
 0x479   : > { %v3864_v4 = vmul.f32 %v3832_v27, %v3655_v37  ;;  %v4653_v14 = vadd.f32 %v9234_v16, %v4652_v44  ;;  %v5314_v27 = vld [vmem:[%s5506_s19 + $0xd8] sm:$0xff] }
 0x47a   : > { %v4701_v42 = vmul.f32 %v5314_v27, %v9224_v0 }
 0x47b   : > { %v3896_v26 = vadd.f32 1.4214138, %v3864_v4  ;;  %v4732_v6 = vadd.f32 %v4700_v55, %v4653_v14 }
 0x47c   : > { %v4631_v52 = vpop.f32.mrf.mxu2 }
 0x47d   : > { %v3928_v7 = vmul.f32 %v3896_v26, %v3655_v37  ;;  %v4632_v63 = vadd.f32 %v9234_v16, %v4631_v52  ;;  %4764 = vst.msk [vmem:[%s7270_s28 + $0xd0] sm:$0xff] %vm446_vm0, %v4732_v6 }
 0x47f   : > { %v3960_v28 = vadd.f32 -0.28449672, %v3928_v7  ;;  %v4725_v20 = vadd.f32 %v4693_v21, %v4632_v63 }
 0x481   : > { %v3992_v9 = vmul.f32 %v3960_v28, %v3655_v37  ;;  %4757 = vst.msk [vmem:[%s7270_s28 + $0x98] sm:$0xff] %vm446_vm0, %v4725_v20  ;;  %v4703_v28 = vmul.f32 %v5316_v39, %v9224_v0 }
 0x483   : > { %v4024_v29 = vadd.f32 0.2548296, %v3992_v9 }
 0x485   : > { %v4056_v19 = vmul.f32 %v4024_v29, %v3655_v37  ;;  %v5317_v29 = vld [vmem:[%s5506_s19 + $0xb8] sm:$0xff] }
 0x486   : > { %v4697_v2 = vmul.f32 %v5317_v29, %v9224_v0 }
 0x487   : > { %v4216_v3 = vmul.f32 %v5218_v53, %v4056_v19  ;;  %v5318_v53 = vld [vmem:[%s5506_s19 + $0xf0] sm:$0xff] }
 0x489   : > { %v4248_v22 = vsub.f32 1.0, %v4216_v3  ;;  %v4655_v8 = vpop.f32.mrf.mxu3  ;;  %v4704_v3 = vmul.f32 %v5318_v53, %v9224_v0 }
 0x48a   : > { %v4656_v4 = vadd.f32 %v9234_v16, %v4655_v8 }
 0x48b   : > { %v4312_v54 = vsub.f32 0.0, %v4248_v22 }
 0x48c   : > { %v4733_v26 = vadd.f32 %v4701_v42, %v4656_v4 }
 0x48d   : > { %v4344_v18 = vsel %vm4280_vm15, %v4312_v54, %v4248_v22 }
 0x48e   : > { %v4376_v17 = vadd.f32 1.0, %v4344_v18  ;;  %4765 = vst.msk [vmem:[%s7270_s28 + $0xd8] sm:$0xff] %vm446_vm0, %v4733_v26  ;;  %v5319_v18 = vld [vmem:[%s5506_s19 + $0xf8] sm:$0xff] }
 0x490   : > { %v4408_v48 = vmul.f32 %v4376_v17, %v3160_v33  ;;  %v4705_v33 = vmul.f32 %v5319_v18, %v9224_v0 }
 0x492   : > { %v4440_v58 = vmul.f32 %v4408_v48, %v1540_v43 }
 0x494   : > { %4942 = vmatmul.msk.f32.gmra.mxu2 %vm1566_vm8, %v4440_v58 }
 0x49b   : > { %v4634_v56 = vpop.f32.mrf.mxu2 }
 0x49c   : > { %v4635_v30 = vadd.f32 %v9234_v16, %v4634_v56 }
 0x49d   : > { %v4658_v57 = vpop.f32.mrf.mxu3 }
 0x49e   : > { %v4726_v51 = vadd.f32 %v4694_v38, %v4635_v30  ;;  %v4659_v32 = vadd.f32 %v9234_v16, %v4658_v57 }
 0x4a0   : > { %4758 = vst.msk [vmem:[%s7270_s28 + $0xa0] sm:$0xff] %vm446_vm0, %v4726_v51  ;;  %v4734_v7 = vadd.f32 %v4702_v15, %v4659_v32 }
 0x4a2   : > { %4766 = vst.msk [vmem:[%s7270_s28 + $0xe0] sm:$0xff] %vm446_vm0, %v4734_v7 }
 0x4b8   : > { %v4661_v23 = vpop.f32.mrf.mxu3 }
 0x4b9   : > { %v4662_v9 = vadd.f32 %v9234_v16, %v4661_v23 }
 0x4bb   : > { %v4735_v52 = vadd.f32 %v4703_v28, %v4662_v9 }
 0x4bd   : > { %4767 = vst.msk [vmem:[%s7270_s28 + $0xe8] sm:$0xff] %vm446_vm0, %v4735_v52 }
 0x4c3   : > { %v4637_v45 = vpop.f32.mrf.mxu2 }
 0x4c4   : > { %v4638_v47 = vadd.f32 %v9234_v16, %v4637_v45 }
 0x4c6   : > { %v4727_v36 = vadd.f32 %v4695_v61, %v4638_v47 }
 0x4c8   : > { %4759 = vst.msk [vmem:[%s7270_s28 + $0xa8] sm:$0xff] %vm446_vm0, %v4727_v36 }
 0x4da   : > { %v4664_v20 = vpop.f32.mrf.mxu3 }
 0x4db   : > { %v4665_v22 = vadd.f32 %v9234_v16, %v4664_v20 }
 0x4dd   : > { %v4736_v54 = vadd.f32 %v4704_v3, %v4665_v22 }
 0x4df   : > { %v4640_v60 = vpop.f32.mrf.mxu2  ;;  %4768 = vst.msk [vmem:[%s7270_s28 + $0xf0] sm:$0xff] %vm446_vm0, %v4736_v54 }
 0x4e0   : > { %v4641_v37 = vadd.f32 %v9234_v16, %v4640_v60 }
 0x4e2   : > { %v4728_v50 = vadd.f32 %v4696_v10, %v4641_v37 }
 0x4e4   : > { %4760 = vst.msk [vmem:[%s7270_s28 + $0xb0] sm:$0xff] %vm446_vm0, %v4728_v50 }
 0x4f5   : > { %v4667_v17 = vpop.f32.mrf.mxu3 }
 0x4f6   : > { %v4668_v62 = vadd.f32 %v9234_v16, %v4667_v17 }
 0x4f8   : > { %v4737_v43 = vadd.f32 %v4705_v33, %v4668_v62 }
 0x4fa   : > { %4769 = vst.msk [vmem:[%s7270_s28 + $0xf8] sm:$0xff] %vm446_vm0, %v4737_v43 }
 0x517   : > { %v4643_v21 = vpop.f32.mrf.mxu2 }
 0x518   : > { %v4644_v19 = vadd.f32 %v9234_v16, %v4643_v21 }
 0x51a   : > { %v4729_v63 = vadd.f32 %v4697_v2, %v4644_v19 }
 0x51c   : > { %4761 = vst.msk [vmem:[%s7270_s28 + $0xb8] sm:$0xff] %vm446_vm0, %v4729_v63 }
 0x51d   : > { %5347 = shalt.err (!%p5344_p3)
}
 0x51e   : > { %s5386_s17 = smov 128   ;;  %s5387_s28 = smov 8  }
 0x51f   : > { %4974 = dma.vmem_to_hbm [thread:$0]  (%p5491_p5), %s4784_s20, 4096, %s4786_s26, %s4771_s25, %s5386_s17, %s5386_s17, %s5387_s28  }
 0x520 PF: > { %p4980_p4 = scmp.ge.s32.totalorder %s5382_s24, 2  ;;  %s4800_s19 = sand.u32 1, %s5370_s21  }
 0x521   : > { %s4801_s0 = scalar_lea.sflag [#allocation4], %s4800_s19 }
 0x522   : > { %p4977_p7 = pnand %p4980_p4, %p5495_p6 }
 0x524   : > { %p4978_p8 = pneg %p4977_p7 }
 0x526   : > { %5365 = dma.done.wait (%p4978_p8), %s4801_s0, 4096  }
 0x527   : > { %5367 = vsyncadd (%p4978_p8), %s4801_s0, 4294963200  ;;  %p22_p9 = scmp.ge.s32.totalorder %s5478_s27, 4   ;;  %s9643_s21 = smov %s5374_s22 }
 0x528   : > { %s9644_s22 = smov %s5378_s23  ;;  %s9645_s23 = smov %s5489_s30 }
 0x529   : > { %s9646_s24 = smov %s5478_s27  ;;  %24 = sbr.rel (!%p22_p9) target bundleno = 6 (0x6), region = 103 }
 0x52e   :  { %4807 = vsyncpa [#allocation4], 1 }
 0x52f   :  { %4809 = vsyncpa [#allocation4 + $0x1], 1 }

</bundles_post_ra>
